<compile_context>
chip_gen: v7x
topology: tpu7x:2x2x1
jax: 0.10.0
libtpu: 0.0.40
codegen_flags: <defaults>
</compile_context>

<pallas_src>
import functools

import jax
import jax.numpy as jnp
from jax import lax
from jax.experimental import pallas as pl
from jax.experimental.pallas import tpu as pltpu

# ---------------------------------------------------------------------------
# Static geometry (28x28 input; latent_dim = 48*10*10 = 4800 as in the module).
#
# All conv activations live on an "overextended" 16x16 per-image position grid
# (256 lanes per image, so every per-image lane base is 256-aligned):
#   conv1 output (valid 13x13)  -> lane oh1*16 + ow1
#   conv2 output (valid 10x10)  -> lane oh2*16 + ow2
# conv2 taps become lane shifts of i*16 + j (<= 51).  Positions outside the
# valid windows are still computed (finite garbage) but they only multiply
# against all-zero rows of the pre-permuted linear1 weight.
#
# INVARIANTS (do not change one without the others):
#   * _H1PAD >= 3*_G + 3 = 51  (largest conv2 lane shift stays inside h1)
#   * valid conv2 outputs only read conv1 lanes with oh1, ow1 <= 12, which are
#     always computed from genuine image pixels (never from padding / the
#     neighbouring image's block);
#   * wl1k rows for overextended positions (ow2 >= 10) are exactly zero.
_G = 16                 # side of the overextended per-image position grid
_GRID = _G * _G         # 256 lanes per image
_SPAN = 160             # per-channel K-span fed to linear1 (10*16)
_H1PAD = 64             # extra conv1 lanes so conv2 shifts (<= 51) stay valid
_K_LIN1 = 48 * _SPAN    # 7680 = contraction length of the fused linear1 matmul

assert _H1PAD >= 3 * _G + 3, "conv2 lane shifts would run off conv1's padding"
assert _SPAN >= 9 * _G + 10, "linear1 span must cover all valid conv2 outputs"
assert _SPAN % 8 == 0 and _K_LIN1 % 128 == 0


def _fused_kernel(x1_ref, w1_ref, b1_ref, w2_ref, b2_ref, wl1_hbm,
                  bl1_ref, wl2_ref, bl2_ref, o_ref,
                  x2_ref, h2_ref, lin_ref, wl1_vmem, wl1_sem, *, n_batch):
    """Whole forward pass; conv activations are (channels, batch*256) tiles."""
    width = n_batch * _GRID                     # conv2 output lane width

    # Kick off the dominant HBM transfer (linear1 weights, ~3 MB) immediately
    # so it overlaps with all of the conv compute + relayout below.
    wl1_copy = pltpu.make_async_copy(wl1_hbm, wl1_vmem, wl1_sem)
    wl1_copy.start()

    # ---- conv1 (4x4, stride 2) + ReLU: ONE (16,16) x (16, width+pad) matmul.
    h1 = jnp.dot(w1_ref[...], x1_ref[...], preferred_element_type=jnp.float32)
    h1 = jnp.maximum(h1 + b1_ref[...], 0.0)     # (16, width + _H1PAD)

    # ---- conv2 (4x4, stride 1) + ReLU: in-VMEM im2col (16 shifted copies of
    #      h1 into a (256, width) scratch) then ONE (48,256)x(256,width) matmul
    #      (K = 256 exactly fills the MXU depth).
    for i in range(4):
        for j in range(4):
            sh = i * 4 + j
            off = i * _G + j
            x2_ref[sh * 16:(sh + 1) * 16, :] = h1[:, off:off + width]
    h2 = jnp.dot(w2_ref[...], x2_ref[...], preferred_element_type=jnp.float32)
    h2_ref[...] = jnp.maximum(h2 + b2_ref[...], 0.0)        # (48, width)

    # ---- latent relayout: one contiguous (n, 48*_SPAN) row per image so that
    #      linear1 becomes a single long-K matmul.  Each copy is a single
    #      sublane row whose source base (n*256) is lane-aligned.
    for n in range(n_batch):
        for c in range(48):
            lin_ref[n:n + 1, c * _SPAN:(c + 1) * _SPAN] = (
                h2_ref[c:c + 1, n * _GRID:n * _GRID + _SPAN])

    # ---- linear1 + ReLU + linear2, whole batch in one shot.
    wl1_copy.wait()                              # weights are now in VMEM
    y1 = jnp.dot(lin_ref[...], wl1_vmem[...],
                 preferred_element_type=jnp.float32)          # (n, 100)
    y1 = jnp.maximum(y1 + bl1_ref[...], 0.0)
    logits = jnp.sum(y1 * wl2_ref[...], axis=1, keepdims=True) + bl2_ref[...]
    o_ref[...] = logits.astype(o_ref.dtype)


def _im2col_conv1(x):
    """x (N,1,28,28) f32 -> (16, N*256 + _H1PAD) conv1 im2col on the 16x16 grid.

    Row t = ki*4+kj holds x[n, 0, 2*oh1+ki, 2*ow1+kj] at lane n*256+oh1*16+ow1
    (zeros where the 4x4 window would leave the image).  ~16x expansion of a
    3 KB/image input; done once per call in plain JAX, negligible.
    """
    n = x.shape[0]
    xp = jnp.pad(x[:, 0], ((0, 0), (0, 6), (0, 6)))          # (N, 34, 34)
    taps = [xp[:, ki:ki + 31:2, kj:kj + 31:2]                # (N, 16, 16) each
            for ki in range(4) for kj in range(4)]
    x1 = jnp.stack(taps, axis=0).reshape(16, n * _GRID)
    return jnp.pad(x1, ((0, 0), (0, _H1PAD)))


def prepare_params(params):
    """One-time weight layout prep (hoisted out of the per-call path)."""
    # conv1 as a dense (cout, ki*4+kj) matrix.
    w1c = params["w1"].reshape(16, 16)
    # conv2 as a dense (cout, (i*4+j)*16 + cin) matrix -> K = 256.
    w2c = params["w2"].transpose(0, 2, 3, 1).reshape(48, 256)
    # linear1: rows permuted to index [c*_SPAN + oh2*16 + ow2]; zero rows for
    # the overextended positions (ow2 >= 10).  PyTorch's NCHW flatten order is
    # absorbed into this permutation, so no gather is needed in-kernel.
    wl1t = params["wl1"].T.reshape(48, 10, 10, 100)          # [c, oh2, ow2, f]
    wl1k = jnp.pad(wl1t, ((0, 0), (0, 0), (0, _G - 10), (0, 0)))
    wl1k = wl1k.reshape(_K_LIN1, 100)
    return {
        "w1c": w1c.astype(jnp.float32),
        "b1": params["b1"].reshape(16, 1).astype(jnp.float32),
        "w2c": w2c.astype(jnp.float32),
        "b2": params["b2"].reshape(48, 1).astype(jnp.float32),
        "wl1k": wl1k.astype(jnp.float32),
        "bl1": params["bl1"].reshape(1, 100).astype(jnp.float32),
        "wl2": params["wl2"].reshape(1, 100).astype(jnp.float32),
        "bl2": params["bl2"].reshape(1, 1).astype(jnp.float32),
    }


def forward(prep, x):
    """ConvNetPneumoniaMnist.forward: x (N,1,28,28) -> logits (N,1)."""
    n = x.shape[0]
    x1 = _im2col_conv1(x)                        # (16, n*256 + _H1PAD), ~80 KB
    kernel = functools.partial(_fused_kernel, n_batch=n)
    return pl.pallas_call(
        kernel,
        out_shape=jax.ShapeDtypeStruct((n, 1), jnp.float32),
        grid=(1,),
        in_specs=[
            pl.BlockSpec(x1.shape, lambda i: (0, 0)),
            pl.BlockSpec((16, 16), lambda i: (0, 0)),
            pl.BlockSpec((16, 1), lambda i: (0, 0)),
            pl.BlockSpec((48, 256), lambda i: (0, 0)),
            pl.BlockSpec((48, 1), lambda i: (0, 0)),
            pl.BlockSpec(memory_space=pl.ANY),   # wl1k: manual overlapped DMA
            pl.BlockSpec((1, 100), lambda i: (0, 0)),
            pl.BlockSpec((1, 100), lambda i: (0, 0)),
            pl.BlockSpec((1, 1), lambda i: (0, 0)),
        ],
        out_specs=pl.BlockSpec((n, 1), lambda i: (0, 0)),
        scratch_shapes=[
            pltpu.VMEM((256, n * _GRID), jnp.float32),   # conv2 im2col
            pltpu.VMEM((48, n * _GRID), jnp.float32),    # conv2 output
            pltpu.VMEM((n, _K_LIN1), jnp.float32),       # linear1 lhs rows
            pltpu.VMEM((_K_LIN1, 100), jnp.float32),     # linear1 weights
            pltpu.SemaphoreType.DMA,
        ],
        compiler_params=pltpu.CompilerParams(
            dimension_semantics=("arbitrary",),
            vmem_limit_bytes=32 * 1024 * 1024),
    )(x1, prep["w1c"], prep["b1"], prep["w2c"], prep["b2"],
      prep["wl1k"], prep["bl1"], prep["wl2"], prep["bl2"])


def reference_forward(params, x):
    """Pure-JAX (non-Pallas) reference for the correctness check."""
    dn = ("NCHW", "OIHW", "NCHW")
    hp = lax.Precision.HIGHEST
    y = lax.conv_general_dilated(x, params["w1"], (2, 2), "VALID",
                                 dimension_numbers=dn, precision=hp)
    y = jax.nn.relu(y + params["b1"][None, :, None, None])
    y = lax.conv_general_dilated(y, params["w2"], (1, 1), "VALID",
                                 dimension_numbers=dn, precision=hp)
    y = jax.nn.relu(y + params["b2"][None, :, None, None])
    y = y.reshape(y.shape[0], -1)                        # NCHW flatten
    y = jax.nn.relu(jnp.dot(y, params["wl1"].T, precision=hp) + params["bl1"])
    return jnp.dot(y, params["wl2"].T, precision=hp) + params["bl2"]


def init_params(key):
    """Deterministic PyTorch-style uniform(-1/sqrt(fan_in), 1/sqrt(fan_in)) init."""
    ks = jax.random.split(key, 8)

    def u(k, shape, fan_in):
        bound = 1.0 / (fan_in ** 0.5)
        return jax.random.uniform(k, shape, jnp.float32, -bound, bound)

    return {
        "w1": u(ks[0], (16, 1, 4, 4), 1 * 4 * 4),
        "b1": u(ks[1], (16,), 1 * 4 * 4),
        "w2": u(ks[2], (48, 16, 4, 4), 16 * 4 * 4),
        "b2": u(ks[3], (48,), 16 * 4 * 4),
        "wl1": u(ks[4], (100, 4800), 4800),              # PyTorch Linear: (out, in)
        "bl1": u(ks[5], (100,), 4800),
        "wl2": u(ks[6], (1, 100), 100),
        "bl2": u(ks[7], (1,), 100),
    }


if __name__ == "__main__":
    key = jax.random.PRNGKey(0)
    k_param, k_x = jax.random.split(key)
    params = init_params(k_param)
    prep = prepare_params(params)        # one-time layout prep (not per forward)
    # 28x28 input is required by the architecture (latent_dim = 48*10*10 = 4800).
    x = jax.random.uniform(k_x, (2, 1, 28, 28), jnp.float32)

    fwd = jax.jit(forward)
    out = jax.block_until_ready(fwd(prep, x))
    ref = jax.block_until_ready(reference_forward(params, x))

    assert out.shape == (2, 1), out.shape
    assert jnp.allclose(out, ref, rtol=1e-3, atol=1e-3), (out, ref)
    print("KERNEL_OK")
</pallas_src>

<mosaic_0001>
module attributes {stable_mosaic.version = 11 : i64} {
  func.func @_fused_kernel(%arg0: i32, %arg1: memref<16x576xf32, #tpu.memory_space<vmem>>, %arg2: memref<16x16xf32, #tpu.memory_space<vmem>>, %arg3: memref<16x1xf32, #tpu.memory_space<vmem>>, %arg4: memref<48x256xf32, #tpu.memory_space<vmem>>, %arg5: memref<48x1xf32, #tpu.memory_space<vmem>>, %arg6: memref<7680x100xf32, #tpu.memory_space<any>>, %arg7: memref<1x100xf32, #tpu.memory_space<vmem>>, %arg8: memref<1x100xf32, #tpu.memory_space<vmem>>, %arg9: memref<1x1xf32, #tpu.memory_space<vmem>>, %arg10: memref<2x1xf32, #tpu.memory_space<vmem>>, %arg11: memref<256x512xf32, #tpu.memory_space<vmem>>, %arg12: memref<48x512xf32, #tpu.memory_space<vmem>>, %arg13: memref<2x7680xf32, #tpu.memory_space<vmem>>, %arg14: memref<7680x100xf32, #tpu.memory_space<vmem>>, %arg15: memref<!tpu.dma_semaphore, #tpu.memory_space<semaphore_mem>>) attributes {dimension_semantics = [#tpu.dimension_semantics<arbitrary>], iteration_bounds = array<i64: 1>, scalar_prefetch = 0 : i64, scratch_operands = 5 : i64, tpu.core_type = #tpu.core_type<tc>, window_params = [{pipeline_mode = #tpu.pipeline_mode<synchronous>, transform_indices = @transform_0, window_bounds = array<i64: 16, 576>}, {pipeline_mode = #tpu.pipeline_mode<synchronous>, transform_indices = @transform_1, window_bounds = array<i64: 16, 16>}, {pipeline_mode = #tpu.pipeline_mode<synchronous>, transform_indices = @transform_2, window_bounds = array<i64: 16, 1>}, {pipeline_mode = #tpu.pipeline_mode<synchronous>, transform_indices = @transform_3, window_bounds = array<i64: 48, 256>}, {pipeline_mode = #tpu.pipeline_mode<synchronous>, transform_indices = @transform_4, window_bounds = array<i64: 48, 1>}, {}, {pipeline_mode = #tpu.pipeline_mode<synchronous>, transform_indices = @transform_6, window_bounds = array<i64: 1, 100>}, {pipeline_mode = #tpu.pipeline_mode<synchronous>, transform_indices = @transform_7, window_bounds = array<i64: 1, 100>}, {pipeline_mode = #tpu.pipeline_mode<synchronous>, transform_indices = @transform_8, window_bounds = array<i64: 1, 1>}, {pipeline_mode = #tpu.pipeline_mode<synchronous>, transform_indices = @transform_9, window_bounds = array<i64: 2, 1>}]} {
    tpu.enqueue_dma source(%arg6 : memref<7680x100xf32, #tpu.memory_space<any>>) target(%arg14 : memref<7680x100xf32, #tpu.memory_space<vmem>>) target_semaphore(%arg15 : memref<!tpu.dma_semaphore, #tpu.memory_space<semaphore_mem>>)
    %c0 = arith.constant 0 : index
    %c0_0 = arith.constant 0 : index
    %0 = vector.load %arg2[%c0, %c0_0] : memref<16x16xf32, #tpu.memory_space<vmem>>, vector<16x16xf32>
    %c0_1 = arith.constant 0 : index
    %c0_2 = arith.constant 0 : index
    %1 = vector.load %arg1[%c0_1, %c0_2] : memref<16x576xf32, #tpu.memory_space<vmem>>, vector<16x576xf32>
    %cst = arith.constant dense<0.000000e+00> : vector<16x576xf32>
    %2 = tpu.matmul %0, %1, %cst {dimension_numbers = #tpu.dot_dimension_numbers<[1], [0], [0], [1], [0, 0, 1, 1], [], []>} : vector<16x16xf32>, vector<16x576xf32>, vector<16x576xf32> -> vector<16x576xf32>
    %c0_3 = arith.constant 0 : index
    %c0_4 = arith.constant 0 : index
    %3 = vector.load %arg3[%c0_3, %c0_4] : memref<16x1xf32, #tpu.memory_space<vmem>>, vector<16x1xf32>
    %4 = vector.broadcast %3 : vector<16x1xf32> to vector<16x576xf32>
    %5 = arith.addf %2, %4 : vector<16x576xf32>
    %cst_5 = arith.constant 0.000000e+00 : f32
    %6 = vector.broadcast %cst_5 : f32 to vector<16x576xf32>
    %7 = arith.maximumf %5, %6 : vector<16x576xf32>
    %8 = vector.extract_strided_slice %7 {offsets = [0, 0], sizes = [16, 512], strides = [1, 1]} : vector<16x576xf32> to vector<16x512xf32>
    %c0_6 = arith.constant 0 : index
    %c0_7 = arith.constant 0 : index
    %9 = vector.load %arg11[%c0_6, %c0_7] : memref<256x512xf32, #tpu.memory_space<vmem>>, vector<16x512xf32>
    tpu.vector_store %arg11[%c0_6, %c0_7], %8 {strides = array<i32>} : memref<256x512xf32, #tpu.memory_space<vmem>>, vector<16x512xf32>,
    %10 = vector.extract_strided_slice %7 {offsets = [0, 1], sizes = [16, 512], strides = [1, 1]} : vector<16x576xf32> to vector<16x512xf32>
    %c16 = arith.constant 16 : index
    %c0_8 = arith.constant 0 : index
    %11 = vector.load %arg11[%c16, %c0_8] : memref<256x512xf32, #tpu.memory_space<vmem>>, vector<16x512xf32>
    tpu.vector_store %arg11[%c16, %c0_8], %10 {strides = array<i32>} : memref<256x512xf32, #tpu.memory_space<vmem>>, vector<16x512xf32>,
    %12 = vector.extract_strided_slice %7 {offsets = [0, 2], sizes = [16, 512], strides = [1, 1]} : vector<16x576xf32> to vector<16x512xf32>
    %c32 = arith.constant 32 : index
    %c0_9 = arith.constant 0 : index
    %13 = vector.load %arg11[%c32, %c0_9] : memref<256x512xf32, #tpu.memory_space<vmem>>, vector<16x512xf32>
    tpu.vector_store %arg11[%c32, %c0_9], %12 {strides = array<i32>} : memref<256x512xf32, #tpu.memory_space<vmem>>, vector<16x512xf32>,
    %14 = vector.extract_strided_slice %7 {offsets = [0, 3], sizes = [16, 512], strides = [1, 1]} : vector<16x576xf32> to vector<16x512xf32>
    %c48 = arith.constant 48 : index
    %c0_10 = arith.constant 0 : index
    %15 = vector.load %arg11[%c48, %c0_10] : memref<256x512xf32, #tpu.memory_space<vmem>>, vector<16x512xf32>
    tpu.vector_store %arg11[%c48, %c0_10], %14 {strides = array<i32>} : memref<256x512xf32, #tpu.memory_space<vmem>>, vector<16x512xf32>,
    %16 = vector.extract_strided_slice %7 {offsets = [0, 16], sizes = [16, 512], strides = [1, 1]} : vector<16x576xf32> to vector<16x512xf32>
    %c64 = arith.constant 64 : index
    %c0_11 = arith.constant 0 : index
    %17 = vector.load %arg11[%c64, %c0_11] : memref<256x512xf32, #tpu.memory_space<vmem>>, vector<16x512xf32>
    tpu.vector_store %arg11[%c64, %c0_11], %16 {strides = array<i32>} : memref<256x512xf32, #tpu.memory_space<vmem>>, vector<16x512xf32>,
    %18 = vector.extract_strided_slice %7 {offsets = [0, 17], sizes = [16, 512], strides = [1, 1]} : vector<16x576xf32> to vector<16x512xf32>
    %c80 = arith.constant 80 : index
    %c0_12 = arith.constant 0 : index
    %19 = vector.load %arg11[%c80, %c0_12] : memref<256x512xf32, #tpu.memory_space<vmem>>, vector<16x512xf32>
    tpu.vector_store %arg11[%c80, %c0_12], %18 {strides = array<i32>} : memref<256x512xf32, #tpu.memory_space<vmem>>, vector<16x512xf32>,
    %20 = vector.extract_strided_slice %7 {offsets = [0, 18], sizes = [16, 512], strides = [1, 1]} : vector<16x576xf32> to vector<16x512xf32>
    %c96 = arith.constant 96 : index
    %c0_13 = arith.constant 0 : index
    %21 = vector.load %arg11[%c96, %c0_13] : memref<256x512xf32, #tpu.memory_space<vmem>>, vector<16x512xf32>
    tpu.vector_store %arg11[%c96, %c0_13], %20 {strides = array<i32>} : memref<256x512xf32, #tpu.memory_space<vmem>>, vector<16x512xf32>,
    %22 = vector.extract_strided_slice %7 {offsets = [0, 19], sizes = [16, 512], strides = [1, 1]} : vector<16x576xf32> to vector<16x512xf32>
    %c112 = arith.constant 112 : index
    %c0_14 = arith.constant 0 : index
    %23 = vector.load %arg11[%c112, %c0_14] : memref<256x512xf32, #tpu.memory_space<vmem>>, vector<16x512xf32>
    tpu.vector_store %arg11[%c112, %c0_14], %22 {strides = array<i32>} : memref<256x512xf32, #tpu.memory_space<vmem>>, vector<16x512xf32>,
    %24 = vector.extract_strided_slice %7 {offsets = [0, 32], sizes = [16, 512], strides = [1, 1]} : vector<16x576xf32> to vector<16x512xf32>
    %c128 = arith.constant 128 : index
    %c0_15 = arith.constant 0 : index
    %25 = vector.load %arg11[%c128, %c0_15] : memref<256x512xf32, #tpu.memory_space<vmem>>, vector<16x512xf32>
    tpu.vector_store %arg11[%c128, %c0_15], %24 {strides = array<i32>} : memref<256x512xf32, #tpu.memory_space<vmem>>, vector<16x512xf32>,
    %26 = vector.extract_strided_slice %7 {offsets = [0, 33], sizes = [16, 512], strides = [1, 1]} : vector<16x576xf32> to vector<16x512xf32>
    %c144 = arith.constant 144 : index
    %c0_16 = arith.constant 0 : index
    %27 = vector.load %arg11[%c144, %c0_16] : memref<256x512xf32, #tpu.memory_space<vmem>>, vector<16x512xf32>
    tpu.vector_store %arg11[%c144, %c0_16], %26 {strides = array<i32>} : memref<256x512xf32, #tpu.memory_space<vmem>>, vector<16x512xf32>,
    %28 = vector.extract_strided_slice %7 {offsets = [0, 34], sizes = [16, 512], strides = [1, 1]} : vector<16x576xf32> to vector<16x512xf32>
    %c160 = arith.constant 160 : index
    %c0_17 = arith.constant 0 : index
    %29 = vector.load %arg11[%c160, %c0_17] : memref<256x512xf32, #tpu.memory_space<vmem>>, vector<16x512xf32>
    tpu.vector_store %arg11[%c160, %c0_17], %28 {strides = array<i32>} : memref<256x512xf32, #tpu.memory_space<vmem>>, vector<16x512xf32>,
    %30 = vector.extract_strided_slice %7 {offsets = [0, 35], sizes = [16, 512], strides = [1, 1]} : vector<16x576xf32> to vector<16x512xf32>
    %c176 = arith.constant 176 : index
    %c0_18 = arith.constant 0 : index
    %31 = vector.load %arg11[%c176, %c0_18] : memref<256x512xf32, #tpu.memory_space<vmem>>, vector<16x512xf32>
    tpu.vector_store %arg11[%c176, %c0_18], %30 {strides = array<i32>} : memref<256x512xf32, #tpu.memory_space<vmem>>, vector<16x512xf32>,
    %32 = vector.extract_strided_slice %7 {offsets = [0, 48], sizes = [16, 512], strides = [1, 1]} : vector<16x576xf32> to vector<16x512xf32>
    %c192 = arith.constant 192 : index
    %c0_19 = arith.constant 0 : index
    %33 = vector.load %arg11[%c192, %c0_19] : memref<256x512xf32, #tpu.memory_space<vmem>>, vector<16x512xf32>
    tpu.vector_store %arg11[%c192, %c0_19], %32 {strides = array<i32>} : memref<256x512xf32, #tpu.memory_space<vmem>>, vector<16x512xf32>,
    %34 = vector.extract_strided_slice %7 {offsets = [0, 49], sizes = [16, 512], strides = [1, 1]} : vector<16x576xf32> to vector<16x512xf32>
    %c208 = arith.constant 208 : index
    %c0_20 = arith.constant 0 : index
    %35 = vector.load %arg11[%c208, %c0_20] : memref<256x512xf32, #tpu.memory_space<vmem>>, vector<16x512xf32>
    tpu.vector_store %arg11[%c208, %c0_20], %34 {strides = array<i32>} : memref<256x512xf32, #tpu.memory_space<vmem>>, vector<16x512xf32>,
    %36 = vector.extract_strided_slice %7 {offsets = [0, 50], sizes = [16, 512], strides = [1, 1]} : vector<16x576xf32> to vector<16x512xf32>
    %c224 = arith.constant 224 : index
    %c0_21 = arith.constant 0 : index
    %37 = vector.load %arg11[%c224, %c0_21] : memref<256x512xf32, #tpu.memory_space<vmem>>, vector<16x512xf32>
    tpu.vector_store %arg11[%c224, %c0_21], %36 {strides = array<i32>} : memref<256x512xf32, #tpu.memory_space<vmem>>, vector<16x512xf32>,
    %38 = vector.extract_strided_slice %7 {offsets = [0, 51], sizes = [16, 512], strides = [1, 1]} : vector<16x576xf32> to vector<16x512xf32>
    %c240 = arith.constant 240 : index
    %c0_22 = arith.constant 0 : index
    %39 = vector.load %arg11[%c240, %c0_22] : memref<256x512xf32, #tpu.memory_space<vmem>>, vector<16x512xf32>
    tpu.vector_store %arg11[%c240, %c0_22], %38 {strides = array<i32>} : memref<256x512xf32, #tpu.memory_space<vmem>>, vector<16x512xf32>,
    %c0_23 = arith.constant 0 : index
    %c0_24 = arith.constant 0 : index
    %40 = vector.load %arg4[%c0_23, %c0_24] : memref<48x256xf32, #tpu.memory_space<vmem>>, vector<48x256xf32>
    %c0_25 = arith.constant 0 : index
    %c0_26 = arith.constant 0 : index
    %41 = vector.load %arg11[%c0_25, %c0_26] : memref<256x512xf32, #tpu.memory_space<vmem>>, vector<256x512xf32>
    %cst_27 = arith.constant dense<0.000000e+00> : vector<48x512xf32>
    %42 = tpu.matmul %40, %41, %cst_27 {dimension_numbers = #tpu.dot_dimension_numbers<[1], [0], [0], [1], [0, 0, 1, 1], [], []>} : vector<48x256xf32>, vector<256x512xf32>, vector<48x512xf32> -> vector<48x512xf32>
    %c0_28 = arith.constant 0 : index
    %c0_29 = arith.constant 0 : index
    %43 = vector.load %arg5[%c0_28, %c0_29] : memref<48x1xf32, #tpu.memory_space<vmem>>, vector<48x1xf32>
    %44 = vector.broadcast %43 : vector<48x1xf32> to vector<48x512xf32>
    %45 = arith.addf %42, %44 : vector<48x512xf32>
    %cst_30 = arith.constant 0.000000e+00 : f32
    %46 = vector.broadcast %cst_30 : f32 to vector<48x512xf32>
    %47 = arith.maximumf %45, %46 : vector<48x512xf32>
    %c0_31 = arith.constant 0 : index
    %c0_32 = arith.constant 0 : index
    %48 = vector.load %arg12[%c0_31, %c0_32] : memref<48x512xf32, #tpu.memory_space<vmem>>, vector<48x512xf32>
    tpu.vector_store %arg12[%c0_31, %c0_32], %47 {strides = array<i32>} : memref<48x512xf32, #tpu.memory_space<vmem>>, vector<48x512xf32>,
    %c0_33 = arith.constant 0 : index
    %c0_34 = arith.constant 0 : index
    %49 = vector.load %arg12[%c0_33, %c0_34] : memref<48x512xf32, #tpu.memory_space<vmem>>, vector<1x160xf32>
    %c0_35 = arith.constant 0 : index
    %c0_36 = arith.constant 0 : index
    %50 = vector.load %arg13[%c0_35, %c0_36] : memref<2x7680xf32, #tpu.memory_space<vmem>>, vector<1x160xf32>
    tpu.vector_store %arg13[%c0_35, %c0_36], %49 {strides = array<i32>} : memref<2x7680xf32, #tpu.memory_space<vmem>>, vector<1x160xf32>,
    %c1 = arith.constant 1 : index
    %c0_37 = arith.constant 0 : index
    %51 = vector.load %arg12[%c1, %c0_37] : memref<48x512xf32, #tpu.memory_space<vmem>>, vector<1x160xf32>
    %c0_38 = arith.constant 0 : index
    %c160_39 = arith.constant 160 : index
    %52 = vector.load %arg13[%c0_38, %c160_39] : memref<2x7680xf32, #tpu.memory_space<vmem>>, vector<1x160xf32>
    tpu.vector_store %arg13[%c0_38, %c160_39], %51 {strides = array<i32>} : memref<2x7680xf32, #tpu.memory_space<vmem>>, vector<1x160xf32>,
    %c2 = arith.constant 2 : index
    %c0_40 = arith.constant 0 : index
    %53 = vector.load %arg12[%c2, %c0_40] : memref<48x512xf32, #tpu.memory_space<vmem>>, vector<1x160xf32>
    %c0_41 = arith.constant 0 : index
    %c320 = arith.constant 320 : index
    %54 = vector.load %arg13[%c0_41, %c320] : memref<2x7680xf32, #tpu.memory_space<vmem>>, vector<1x160xf32>
    tpu.vector_store %arg13[%c0_41, %c320], %53 {strides = array<i32>} : memref<2x7680xf32, #tpu.memory_space<vmem>>, vector<1x160xf32>,
    %c3 = arith.constant 3 : index
    %c0_42 = arith.constant 0 : index
    %55 = vector.load %arg12[%c3, %c0_42] : memref<48x512xf32, #tpu.memory_space<vmem>>, vector<1x160xf32>
    %c0_43 = arith.constant 0 : index
    %c480 = arith.constant 480 : index
    %56 = vector.load %arg13[%c0_43, %c480] : memref<2x7680xf32, #tpu.memory_space<vmem>>, vector<1x160xf32>
    tpu.vector_store %arg13[%c0_43, %c480], %55 {strides = array<i32>} : memref<2x7680xf32, #tpu.memory_space<vmem>>, vector<1x160xf32>,
    %c4 = arith.constant 4 : index
    %c0_44 = arith.constant 0 : index
    %57 = vector.load %arg12[%c4, %c0_44] : memref<48x512xf32, #tpu.memory_space<vmem>>, vector<1x160xf32>
    %c0_45 = arith.constant 0 : index
    %c640 = arith.constant 640 : index
    %58 = vector.load %arg13[%c0_45, %c640] : memref<2x7680xf32, #tpu.memory_space<vmem>>, vector<1x160xf32>
    tpu.vector_store %arg13[%c0_45, %c640], %57 {strides = array<i32>} : memref<2x7680xf32, #tpu.memory_space<vmem>>, vector<1x160xf32>,
    %c5 = arith.constant 5 : index
    %c0_46 = arith.constant 0 : index
    %59 = vector.load %arg12[%c5, %c0_46] : memref<48x512xf32, #tpu.memory_space<vmem>>, vector<1x160xf32>
    %c0_47 = arith.constant 0 : index
    %c800 = arith.constant 800 : index
    %60 = vector.load %arg13[%c0_47, %c800] : memref<2x7680xf32, #tpu.memory_space<vmem>>, vector<1x160xf32>
    tpu.vector_store %arg13[%c0_47, %c800], %59 {strides = array<i32>} : memref<2x7680xf32, #tpu.memory_space<vmem>>, vector<1x160xf32>,
    %c6 = arith.constant 6 : index
    %c0_48 = arith.constant 0 : index
    %61 = vector.load %arg12[%c6, %c0_48] : memref<48x512xf32, #tpu.memory_space<vmem>>, vector<1x160xf32>
    %c0_49 = arith.constant 0 : index
    %c960 = arith.constant 960 : index
    %62 = vector.load %arg13[%c0_49, %c960] : memref<2x7680xf32, #tpu.memory_space<vmem>>, vector<1x160xf32>
    tpu.vector_store %arg13[%c0_49, %c960], %61 {strides = array<i32>} : memref<2x7680xf32, #tpu.memory_space<vmem>>, vector<1x160xf32>,
    %c7 = arith.constant 7 : index
    %c0_50 = arith.constant 0 : index
    %63 = vector.load %arg12[%c7, %c0_50] : memref<48x512xf32, #tpu.memory_space<vmem>>, vector<1x160xf32>
    %c0_51 = arith.constant 0 : index
    %c1120 = arith.constant 1120 : index
    %64 = vector.load %arg13[%c0_51, %c1120] : memref<2x7680xf32, #tpu.memory_space<vmem>>, vector<1x160xf32>
    tpu.vector_store %arg13[%c0_51, %c1120], %63 {strides = array<i32>} : memref<2x7680xf32, #tpu.memory_space<vmem>>, vector<1x160xf32>,
    %c8 = arith.constant 8 : index
    %c0_52 = arith.constant 0 : index
    %65 = vector.load %arg12[%c8, %c0_52] : memref<48x512xf32, #tpu.memory_space<vmem>>, vector<1x160xf32>
    %c0_53 = arith.constant 0 : index
    %c1280 = arith.constant 1280 : index
    %66 = vector.load %arg13[%c0_53, %c1280] : memref<2x7680xf32, #tpu.memory_space<vmem>>, vector<1x160xf32>
    tpu.vector_store %arg13[%c0_53, %c1280], %65 {strides = array<i32>} : memref<2x7680xf32, #tpu.memory_space<vmem>>, vector<1x160xf32>,
    %c9 = arith.constant 9 : index
    %c0_54 = arith.constant 0 : index
    %67 = vector.load %arg12[%c9, %c0_54] : memref<48x512xf32, #tpu.memory_space<vmem>>, vector<1x160xf32>
    %c0_55 = arith.constant 0 : index
    %c1440 = arith.constant 1440 : index
    %68 = vector.load %arg13[%c0_55, %c1440] : memref<2x7680xf32, #tpu.memory_space<vmem>>, vector<1x160xf32>
    tpu.vector_store %arg13[%c0_55, %c1440], %67 {strides = array<i32>} : memref<2x7680xf32, #tpu.memory_space<vmem>>, vector<1x160xf32>,
    %c10 = arith.constant 10 : index
    %c0_56 = arith.constant 0 : index
    %69 = vector.load %arg12[%c10, %c0_56] : memref<48x512xf32, #tpu.memory_space<vmem>>, vector<1x160xf32>
    %c0_57 = arith.constant 0 : index
    %c1600 = arith.constant 1600 : index
    %70 = vector.load %arg13[%c0_57, %c1600] : memref<2x7680xf32, #tpu.memory_space<vmem>>, vector<1x160xf32>
    tpu.vector_store %arg13[%c0_57, %c1600], %69 {strides = array<i32>} : memref<2x7680xf32, #tpu.memory_space<vmem>>, vector<1x160xf32>,
    %c11 = arith.constant 11 : index
    %c0_58 = arith.constant 0 : index
    %71 = vector.load %arg12[%c11, %c0_58] : memref<48x512xf32, #tpu.memory_space<vmem>>, vector<1x160xf32>
    %c0_59 = arith.constant 0 : index
    %c1760 = arith.constant 1760 : index
    %72 = vector.load %arg13[%c0_59, %c1760] : memref<2x7680xf32, #tpu.memory_space<vmem>>, vector<1x160xf32>
    tpu.vector_store %arg13[%c0_59, %c1760], %71 {strides = array<i32>} : memref<2x7680xf32, #tpu.memory_space<vmem>>, vector<1x160xf32>,
    %c12 = arith.constant 12 : index
    %c0_60 = arith.constant 0 : index
    %73 = vector.load %arg12[%c12, %c0_60] : memref<48x512xf32, #tpu.memory_space<vmem>>, vector<1x160xf32>
    %c0_61 = arith.constant 0 : index
    %c1920 = arith.constant 1920 : index
    %74 = vector.load %arg13[%c0_61, %c1920] : memref<2x7680xf32, #tpu.memory_space<vmem>>, vector<1x160xf32>
    tpu.vector_store %arg13[%c0_61, %c1920], %73 {strides = array<i32>} : memref<2x7680xf32, #tpu.memory_space<vmem>>, vector<1x160xf32>,
    %c13 = arith.constant 13 : index
    %c0_62 = arith.constant 0 : index
    %75 = vector.load %arg12[%c13, %c0_62] : memref<48x512xf32, #tpu.memory_space<vmem>>, vector<1x160xf32>
    %c0_63 = arith.constant 0 : index
    %c2080 = arith.constant 2080 : index
    %76 = vector.load %arg13[%c0_63, %c2080] : memref<2x7680xf32, #tpu.memory_space<vmem>>, vector<1x160xf32>
    tpu.vector_store %arg13[%c0_63, %c2080], %75 {strides = array<i32>} : memref<2x7680xf32, #tpu.memory_space<vmem>>, vector<1x160xf32>,
    %c14 = arith.constant 14 : index
    %c0_64 = arith.constant 0 : index
    %77 = vector.load %arg12[%c14, %c0_64] : memref<48x512xf32, #tpu.memory_space<vmem>>, vector<1x160xf32>
    %c0_65 = arith.constant 0 : index
    %c2240 = arith.constant 2240 : index
    %78 = vector.load %arg13[%c0_65, %c2240] : memref<2x7680xf32, #tpu.memory_space<vmem>>, vector<1x160xf32>
    tpu.vector_store %arg13[%c0_65, %c2240], %77 {strides = array<i32>} : memref<2x7680xf32, #tpu.memory_space<vmem>>, vector<1x160xf32>,
    %c15 = arith.constant 15 : index
    %c0_66 = arith.constant 0 : index
    %79 = vector.load %arg12[%c15, %c0_66] : memref<48x512xf32, #tpu.memory_space<vmem>>, vector<1x160xf32>
    %c0_67 = arith.constant 0 : index
    %c2400 = arith.constant 2400 : index
    %80 = vector.load %arg13[%c0_67, %c2400] : memref<2x7680xf32, #tpu.memory_space<vmem>>, vector<1x160xf32>
    tpu.vector_store %arg13[%c0_67, %c2400], %79 {strides = array<i32>} : memref<2x7680xf32, #tpu.memory_space<vmem>>, vector<1x160xf32>,
    %c16_68 = arith.constant 16 : index
    %c0_69 = arith.constant 0 : index
    %81 = vector.load %arg12[%c16_68, %c0_69] : memref<48x512xf32, #tpu.memory_space<vmem>>, vector<1x160xf32>
    %c0_70 = arith.constant 0 : index
    %c2560 = arith.constant 2560 : index
    %82 = vector.load %arg13[%c0_70, %c2560] : memref<2x7680xf32, #tpu.memory_space<vmem>>, vector<1x160xf32>
    tpu.vector_store %arg13[%c0_70, %c2560], %81 {strides = array<i32>} : memref<2x7680xf32, #tpu.memory_space<vmem>>, vector<1x160xf32>,
    %c17 = arith.constant 17 : index
    %c0_71 = arith.constant 0 : index
    %83 = vector.load %arg12[%c17, %c0_71] : memref<48x512xf32, #tpu.memory_space<vmem>>, vector<1x160xf32>
    %c0_72 = arith.constant 0 : index
    %c2720 = arith.constant 2720 : index
    %84 = vector.load %arg13[%c0_72, %c2720] : memref<2x7680xf32, #tpu.memory_space<vmem>>, vector<1x160xf32>
    tpu.vector_store %arg13[%c0_72, %c2720], %83 {strides = array<i32>} : memref<2x7680xf32, #tpu.memory_space<vmem>>, vector<1x160xf32>,
    %c18 = arith.constant 18 : index
    %c0_73 = arith.constant 0 : index
    %85 = vector.load %arg12[%c18, %c0_73] : memref<48x512xf32, #tpu.memory_space<vmem>>, vector<1x160xf32>
    %c0_74 = arith.constant 0 : index
    %c2880 = arith.constant 2880 : index
    %86 = vector.load %arg13[%c0_74, %c2880] : memref<2x7680xf32, #tpu.memory_space<vmem>>, vector<1x160xf32>
    tpu.vector_store %arg13[%c0_74, %c2880], %85 {strides = array<i32>} : memref<2x7680xf32, #tpu.memory_space<vmem>>, vector<1x160xf32>,
    %c19 = arith.constant 19 : index
    %c0_75 = arith.constant 0 : index
    %87 = vector.load %arg12[%c19, %c0_75] : memref<48x512xf32, #tpu.memory_space<vmem>>, vector<1x160xf32>
    %c0_76 = arith.constant 0 : index
    %c3040 = arith.constant 3040 : index
    %88 = vector.load %arg13[%c0_76, %c3040] : memref<2x7680xf32, #tpu.memory_space<vmem>>, vector<1x160xf32>
    tpu.vector_store %arg13[%c0_76, %c3040], %87 {strides = array<i32>} : memref<2x7680xf32, #tpu.memory_space<vmem>>, vector<1x160xf32>,
    %c20 = arith.constant 20 : index
    %c0_77 = arith.constant 0 : index
    %89 = vector.load %arg12[%c20, %c0_77] : memref<48x512xf32, #tpu.memory_space<vmem>>, vector<1x160xf32>
    %c0_78 = arith.constant 0 : index
    %c3200 = arith.constant 3200 : index
    %90 = vector.load %arg13[%c0_78, %c3200] : memref<2x7680xf32, #tpu.memory_space<vmem>>, vector<1x160xf32>
    tpu.vector_store %arg13[%c0_78, %c3200], %89 {strides = array<i32>} : memref<2x7680xf32, #tpu.memory_space<vmem>>, vector<1x160xf32>,
    %c21 = arith.constant 21 : index
    %c0_79 = arith.constant 0 : index
    %91 = vector.load %arg12[%c21, %c0_79] : memref<48x512xf32, #tpu.memory_space<vmem>>, vector<1x160xf32>
    %c0_80 = arith.constant 0 : index
    %c3360 = arith.constant 3360 : index
    %92 = vector.load %arg13[%c0_80, %c3360] : memref<2x7680xf32, #tpu.memory_space<vmem>>, vector<1x160xf32>
    tpu.vector_store %arg13[%c0_80, %c3360], %91 {strides = array<i32>} : memref<2x7680xf32, #tpu.memory_space<vmem>>, vector<1x160xf32>,
    %c22 = arith.constant 22 : index
    %c0_81 = arith.constant 0 : index
    %93 = vector.load %arg12[%c22, %c0_81] : memref<48x512xf32, #tpu.memory_space<vmem>>, vector<1x160xf32>
    %c0_82 = arith.constant 0 : index
    %c3520 = arith.constant 3520 : index
    %94 = vector.load %arg13[%c0_82, %c3520] : memref<2x7680xf32, #tpu.memory_space<vmem>>, vector<1x160xf32>
    tpu.vector_store %arg13[%c0_82, %c3520], %93 {strides = array<i32>} : memref<2x7680xf32, #tpu.memory_space<vmem>>, vector<1x160xf32>,
    %c23 = arith.constant 23 : index
    %c0_83 = arith.constant 0 : index
    %95 = vector.load %arg12[%c23, %c0_83] : memref<48x512xf32, #tpu.memory_space<vmem>>, vector<1x160xf32>
    %c0_84 = arith.constant 0 : index
    %c3680 = arith.constant 3680 : index
    %96 = vector.load %arg13[%c0_84, %c3680] : memref<2x7680xf32, #tpu.memory_space<vmem>>, vector<1x160xf32>
    tpu.vector_store %arg13[%c0_84, %c3680], %95 {strides = array<i32>} : memref<2x7680xf32, #tpu.memory_space<vmem>>, vector<1x160xf32>,
    %c24 = arith.constant 24 : index
    %c0_85 = arith.constant 0 : index
    %97 = vector.load %arg12[%c24, %c0_85] : memref<48x512xf32, #tpu.memory_space<vmem>>, vector<1x160xf32>
    %c0_86 = arith.constant 0 : index
    %c3840 = arith.constant 3840 : index
    %98 = vector.load %arg13[%c0_86, %c3840] : memref<2x7680xf32, #tpu.memory_space<vmem>>, vector<1x160xf32>
    tpu.vector_store %arg13[%c0_86, %c3840], %97 {strides = array<i32>} : memref<2x7680xf32, #tpu.memory_space<vmem>>, vector<1x160xf32>,
    %c25 = arith.constant 25 : index
    %c0_87 = arith.constant 0 : index
    %99 = vector.load %arg12[%c25, %c0_87] : memref<48x512xf32, #tpu.memory_space<vmem>>, vector<1x160xf32>
    %c0_88 = arith.constant 0 : index
    %c4000 = arith.constant 4000 : index
    %100 = vector.load %arg13[%c0_88, %c4000] : memref<2x7680xf32, #tpu.memory_space<vmem>>, vector<1x160xf32>
    tpu.vector_store %arg13[%c0_88, %c4000], %99 {strides = array<i32>} : memref<2x7680xf32, #tpu.memory_space<vmem>>, vector<1x160xf32>,
    %c26 = arith.constant 26 : index
    %c0_89 = arith.constant 0 : index
    %101 = vector.load %arg12[%c26, %c0_89] : memref<48x512xf32, #tpu.memory_space<vmem>>, vector<1x160xf32>
    %c0_90 = arith.constant 0 : index
    %c4160 = arith.constant 4160 : index
    %102 = vector.load %arg13[%c0_90, %c4160] : memref<2x7680xf32, #tpu.memory_space<vmem>>, vector<1x160xf32>
    tpu.vector_store %arg13[%c0_90, %c4160], %101 {strides = array<i32>} : memref<2x7680xf32, #tpu.memory_space<vmem>>, vector<1x160xf32>,
    %c27 = arith.constant 27 : index
    %c0_91 = arith.constant 0 : index
    %103 = vector.load %arg12[%c27, %c0_91] : memref<48x512xf32, #tpu.memory_space<vmem>>, vector<1x160xf32>
    %c0_92 = arith.constant 0 : index
    %c4320 = arith.constant 4320 : index
    %104 = vector.load %arg13[%c0_92, %c4320] : memref<2x7680xf32, #tpu.memory_space<vmem>>, vector<1x160xf32>
    tpu.vector_store %arg13[%c0_92, %c4320], %103 {strides = array<i32>} : memref<2x7680xf32, #tpu.memory_space<vmem>>, vector<1x160xf32>,
    %c28 = arith.constant 28 : index
    %c0_93 = arith.constant 0 : index
    %105 = vector.load %arg12[%c28, %c0_93] : memref<48x512xf32, #tpu.memory_space<vmem>>, vector<1x160xf32>
    %c0_94 = arith.constant 0 : index
    %c4480 = arith.constant 4480 : index
    %106 = vector.load %arg13[%c0_94, %c4480] : memref<2x7680xf32, #tpu.memory_space<vmem>>, vector<1x160xf32>
    tpu.vector_store %arg13[%c0_94, %c4480], %105 {strides = array<i32>} : memref<2x7680xf32, #tpu.memory_space<vmem>>, vector<1x160xf32>,
    %c29 = arith.constant 29 : index
    %c0_95 = arith.constant 0 : index
    %107 = vector.load %arg12[%c29, %c0_95] : memref<48x512xf32, #tpu.memory_space<vmem>>, vector<1x160xf32>
    %c0_96 = arith.constant 0 : index
    %c4640 = arith.constant 4640 : index
    %108 = vector.load %arg13[%c0_96, %c4640] : memref<2x7680xf32, #tpu.memory_space<vmem>>, vector<1x160xf32>
    tpu.vector_store %arg13[%c0_96, %c4640], %107 {strides = array<i32>} : memref<2x7680xf32, #tpu.memory_space<vmem>>, vector<1x160xf32>,
    %c30 = arith.constant 30 : index
    %c0_97 = arith.constant 0 : index
    %109 = vector.load %arg12[%c30, %c0_97] : memref<48x512xf32, #tpu.memory_space<vmem>>, vector<1x160xf32>
    %c0_98 = arith.constant 0 : index
    %c4800 = arith.constant 4800 : index
    %110 = vector.load %arg13[%c0_98, %c4800] : memref<2x7680xf32, #tpu.memory_space<vmem>>, vector<1x160xf32>
    tpu.vector_store %arg13[%c0_98, %c4800], %109 {strides = array<i32>} : memref<2x7680xf32, #tpu.memory_space<vmem>>, vector<1x160xf32>,
    %c31 = arith.constant 31 : index
    %c0_99 = arith.constant 0 : index
    %111 = vector.load %arg12[%c31, %c0_99] : memref<48x512xf32, #tpu.memory_space<vmem>>, vector<1x160xf32>
    %c0_100 = arith.constant 0 : index
    %c4960 = arith.constant 4960 : index
    %112 = vector.load %arg13[%c0_100, %c4960] : memref<2x7680xf32, #tpu.memory_space<vmem>>, vector<1x160xf32>
    tpu.vector_store %arg13[%c0_100, %c4960], %111 {strides = array<i32>} : memref<2x7680xf32, #tpu.memory_space<vmem>>, vector<1x160xf32>,
    %c32_101 = arith.constant 32 : index
    %c0_102 = arith.constant 0 : index
    %113 = vector.load %arg12[%c32_101, %c0_102] : memref<48x512xf32, #tpu.memory_space<vmem>>, vector<1x160xf32>
    %c0_103 = arith.constant 0 : index
    %c5120 = arith.constant 5120 : index
    %114 = vector.load %arg13[%c0_103, %c5120] : memref<2x7680xf32, #tpu.memory_space<vmem>>, vector<1x160xf32>
    tpu.vector_store %arg13[%c0_103, %c5120], %113 {strides = array<i32>} : memref<2x7680xf32, #tpu.memory_space<vmem>>, vector<1x160xf32>,
    %c33 = arith.constant 33 : index
    %c0_104 = arith.constant 0 : index
    %115 = vector.load %arg12[%c33, %c0_104] : memref<48x512xf32, #tpu.memory_space<vmem>>, vector<1x160xf32>
    %c0_105 = arith.constant 0 : index
    %c5280 = arith.constant 5280 : index
    %116 = vector.load %arg13[%c0_105, %c5280] : memref<2x7680xf32, #tpu.memory_space<vmem>>, vector<1x160xf32>
    tpu.vector_store %arg13[%c0_105, %c5280], %115 {strides = array<i32>} : memref<2x7680xf32, #tpu.memory_space<vmem>>, vector<1x160xf32>,
    %c34 = arith.constant 34 : index
    %c0_106 = arith.constant 0 : index
    %117 = vector.load %arg12[%c34, %c0_106] : memref<48x512xf32, #tpu.memory_space<vmem>>, vector<1x160xf32>
    %c0_107 = arith.constant 0 : index
    %c5440 = arith.constant 5440 : index
    %118 = vector.load %arg13[%c0_107, %c5440] : memref<2x7680xf32, #tpu.memory_space<vmem>>, vector<1x160xf32>
    tpu.vector_store %arg13[%c0_107, %c5440], %117 {strides = array<i32>} : memref<2x7680xf32, #tpu.memory_space<vmem>>, vector<1x160xf32>,
    %c35 = arith.constant 35 : index
    %c0_108 = arith.constant 0 : index
    %119 = vector.load %arg12[%c35, %c0_108] : memref<48x512xf32, #tpu.memory_space<vmem>>, vector<1x160xf32>
    %c0_109 = arith.constant 0 : index
    %c5600 = arith.constant 5600 : index
    %120 = vector.load %arg13[%c0_109, %c5600] : memref<2x7680xf32, #tpu.memory_space<vmem>>, vector<1x160xf32>
    tpu.vector_store %arg13[%c0_109, %c5600], %119 {strides = array<i32>} : memref<2x7680xf32, #tpu.memory_space<vmem>>, vector<1x160xf32>,
    %c36 = arith.constant 36 : index
    %c0_110 = arith.constant 0 : index
    %121 = vector.load %arg12[%c36, %c0_110] : memref<48x512xf32, #tpu.memory_space<vmem>>, vector<1x160xf32>
    %c0_111 = arith.constant 0 : index
    %c5760 = arith.constant 5760 : index
    %122 = vector.load %arg13[%c0_111, %c5760] : memref<2x7680xf32, #tpu.memory_space<vmem>>, vector<1x160xf32>
    tpu.vector_store %arg13[%c0_111, %c5760], %121 {strides = array<i32>} : memref<2x7680xf32, #tpu.memory_space<vmem>>, vector<1x160xf32>,
    %c37 = arith.constant 37 : index
    %c0_112 = arith.constant 0 : index
    %123 = vector.load %arg12[%c37, %c0_112] : memref<48x512xf32, #tpu.memory_space<vmem>>, vector<1x160xf32>
    %c0_113 = arith.constant 0 : index
    %c5920 = arith.constant 5920 : index
    %124 = vector.load %arg13[%c0_113, %c5920] : memref<2x7680xf32, #tpu.memory_space<vmem>>, vector<1x160xf32>
    tpu.vector_store %arg13[%c0_113, %c5920], %123 {strides = array<i32>} : memref<2x7680xf32, #tpu.memory_space<vmem>>, vector<1x160xf32>,
    %c38 = arith.constant 38 : index
    %c0_114 = arith.constant 0 : index
    %125 = vector.load %arg12[%c38, %c0_114] : memref<48x512xf32, #tpu.memory_space<vmem>>, vector<1x160xf32>
    %c0_115 = arith.constant 0 : index
    %c6080 = arith.constant 6080 : index
    %126 = vector.load %arg13[%c0_115, %c6080] : memref<2x7680xf32, #tpu.memory_space<vmem>>, vector<1x160xf32>
    tpu.vector_store %arg13[%c0_115, %c6080], %125 {strides = array<i32>} : memref<2x7680xf32, #tpu.memory_space<vmem>>, vector<1x160xf32>,
    %c39 = arith.constant 39 : index
    %c0_116 = arith.constant 0 : index
    %127 = vector.load %arg12[%c39, %c0_116] : memref<48x512xf32, #tpu.memory_space<vmem>>, vector<1x160xf32>
    %c0_117 = arith.constant 0 : index
    %c6240 = arith.constant 6240 : index
    %128 = vector.load %arg13[%c0_117, %c6240] : memref<2x7680xf32, #tpu.memory_space<vmem>>, vector<1x160xf32>
    tpu.vector_store %arg13[%c0_117, %c6240], %127 {strides = array<i32>} : memref<2x7680xf32, #tpu.memory_space<vmem>>, vector<1x160xf32>,
    %c40 = arith.constant 40 : index
    %c0_118 = arith.constant 0 : index
    %129 = vector.load %arg12[%c40, %c0_118] : memref<48x512xf32, #tpu.memory_space<vmem>>, vector<1x160xf32>
    %c0_119 = arith.constant 0 : index
    %c6400 = arith.constant 6400 : index
    %130 = vector.load %arg13[%c0_119, %c6400] : memref<2x7680xf32, #tpu.memory_space<vmem>>, vector<1x160xf32>
    tpu.vector_store %arg13[%c0_119, %c6400], %129 {strides = array<i32>} : memref<2x7680xf32, #tpu.memory_space<vmem>>, vector<1x160xf32>,
    %c41 = arith.constant 41 : index
    %c0_120 = arith.constant 0 : index
    %131 = vector.load %arg12[%c41, %c0_120] : memref<48x512xf32, #tpu.memory_space<vmem>>, vector<1x160xf32>
    %c0_121 = arith.constant 0 : index
    %c6560 = arith.constant 6560 : index
    %132 = vector.load %arg13[%c0_121, %c6560] : memref<2x7680xf32, #tpu.memory_space<vmem>>, vector<1x160xf32>
    tpu.vector_store %arg13[%c0_121, %c6560], %131 {strides = array<i32>} : memref<2x7680xf32, #tpu.memory_space<vmem>>, vector<1x160xf32>,
    %c42 = arith.constant 42 : index
    %c0_122 = arith.constant 0 : index
    %133 = vector.load %arg12[%c42, %c0_122] : memref<48x512xf32, #tpu.memory_space<vmem>>, vector<1x160xf32>
    %c0_123 = arith.constant 0 : index
    %c6720 = arith.constant 6720 : index
    %134 = vector.load %arg13[%c0_123, %c6720] : memref<2x7680xf32, #tpu.memory_space<vmem>>, vector<1x160xf32>
    tpu.vector_store %arg13[%c0_123, %c6720], %133 {strides = array<i32>} : memref<2x7680xf32, #tpu.memory_space<vmem>>, vector<1x160xf32>,
    %c43 = arith.constant 43 : index
    %c0_124 = arith.constant 0 : index
    %135 = vector.load %arg12[%c43, %c0_124] : memref<48x512xf32, #tpu.memory_space<vmem>>, vector<1x160xf32>
    %c0_125 = arith.constant 0 : index
    %c6880 = arith.constant 6880 : index
    %136 = vector.load %arg13[%c0_125, %c6880] : memref<2x7680xf32, #tpu.memory_space<vmem>>, vector<1x160xf32>
    tpu.vector_store %arg13[%c0_125, %c6880], %135 {strides = array<i32>} : memref<2x7680xf32, #tpu.memory_space<vmem>>, vector<1x160xf32>,
    %c44 = arith.constant 44 : index
    %c0_126 = arith.constant 0 : index
    %137 = vector.load %arg12[%c44, %c0_126] : memref<48x512xf32, #tpu.memory_space<vmem>>, vector<1x160xf32>
    %c0_127 = arith.constant 0 : index
    %c7040 = arith.constant 7040 : index
    %138 = vector.load %arg13[%c0_127, %c7040] : memref<2x7680xf32, #tpu.memory_space<vmem>>, vector<1x160xf32>
    tpu.vector_store %arg13[%c0_127, %c7040], %137 {strides = array<i32>} : memref<2x7680xf32, #tpu.memory_space<vmem>>, vector<1x160xf32>,
    %c45 = arith.constant 45 : index
    %c0_128 = arith.constant 0 : index
    %139 = vector.load %arg12[%c45, %c0_128] : memref<48x512xf32, #tpu.memory_space<vmem>>, vector<1x160xf32>
    %c0_129 = arith.constant 0 : index
    %c7200 = arith.constant 7200 : index
    %140 = vector.load %arg13[%c0_129, %c7200] : memref<2x7680xf32, #tpu.memory_space<vmem>>, vector<1x160xf32>
    tpu.vector_store %arg13[%c0_129, %c7200], %139 {strides = array<i32>} : memref<2x7680xf32, #tpu.memory_space<vmem>>, vector<1x160xf32>,
    %c46 = arith.constant 46 : index
    %c0_130 = arith.constant 0 : index
    %141 = vector.load %arg12[%c46, %c0_130] : memref<48x512xf32, #tpu.memory_space<vmem>>, vector<1x160xf32>
    %c0_131 = arith.constant 0 : index
    %c7360 = arith.constant 7360 : index
    %142 = vector.load %arg13[%c0_131, %c7360] : memref<2x7680xf32, #tpu.memory_space<vmem>>, vector<1x160xf32>
    tpu.vector_store %arg13[%c0_131, %c7360], %141 {strides = array<i32>} : memref<2x7680xf32, #tpu.memory_space<vmem>>, vector<1x160xf32>,
    %c47 = arith.constant 47 : index
    %c0_132 = arith.constant 0 : index
    %143 = vector.load %arg12[%c47, %c0_132] : memref<48x512xf32, #tpu.memory_space<vmem>>, vector<1x160xf32>
    %c0_133 = arith.constant 0 : index
    %c7520 = arith.constant 7520 : index
    %144 = vector.load %arg13[%c0_133, %c7520] : memref<2x7680xf32, #tpu.memory_space<vmem>>, vector<1x160xf32>
    tpu.vector_store %arg13[%c0_133, %c7520], %143 {strides = array<i32>} : memref<2x7680xf32, #tpu.memory_space<vmem>>, vector<1x160xf32>,
    %c0_134 = arith.constant 0 : index
    %c256 = arith.constant 256 : index
    %145 = vector.load %arg12[%c0_134, %c256] : memref<48x512xf32, #tpu.memory_space<vmem>>, vector<1x160xf32>
    %c1_135 = arith.constant 1 : index
    %c0_136 = arith.constant 0 : index
    %146 = vector.load %arg13[%c1_135, %c0_136] : memref<2x7680xf32, #tpu.memory_space<vmem>>, vector<1x160xf32>
    tpu.vector_store %arg13[%c1_135, %c0_136], %145 {strides = array<i32>} : memref<2x7680xf32, #tpu.memory_space<vmem>>, vector<1x160xf32>,
    %c1_137 = arith.constant 1 : index
    %c256_138 = arith.constant 256 : index
    %147 = vector.load %arg12[%c1_137, %c256_138] : memref<48x512xf32, #tpu.memory_space<vmem>>, vector<1x160xf32>
    %c1_139 = arith.constant 1 : index
    %c160_140 = arith.constant 160 : index
    %148 = vector.load %arg13[%c1_139, %c160_140] : memref<2x7680xf32, #tpu.memory_space<vmem>>, vector<1x160xf32>
    tpu.vector_store %arg13[%c1_139, %c160_140], %147 {strides = array<i32>} : memref<2x7680xf32, #tpu.memory_space<vmem>>, vector<1x160xf32>,
    %c2_141 = arith.constant 2 : index
    %c256_142 = arith.constant 256 : index
    %149 = vector.load %arg12[%c2_141, %c256_142] : memref<48x512xf32, #tpu.memory_space<vmem>>, vector<1x160xf32>
    %c1_143 = arith.constant 1 : index
    %c320_144 = arith.constant 320 : index
    %150 = vector.load %arg13[%c1_143, %c320_144] : memref<2x7680xf32, #tpu.memory_space<vmem>>, vector<1x160xf32>
    tpu.vector_store %arg13[%c1_143, %c320_144], %149 {strides = array<i32>} : memref<2x7680xf32, #tpu.memory_space<vmem>>, vector<1x160xf32>,
    %c3_145 = arith.constant 3 : index
    %c256_146 = arith.constant 256 : index
    %151 = vector.load %arg12[%c3_145, %c256_146] : memref<48x512xf32, #tpu.memory_space<vmem>>, vector<1x160xf32>
    %c1_147 = arith.constant 1 : index
    %c480_148 = arith.constant 480 : index
    %152 = vector.load %arg13[%c1_147, %c480_148] : memref<2x7680xf32, #tpu.memory_space<vmem>>, vector<1x160xf32>
    tpu.vector_store %arg13[%c1_147, %c480_148], %151 {strides = array<i32>} : memref<2x7680xf32, #tpu.memory_space<vmem>>, vector<1x160xf32>,
    %c4_149 = arith.constant 4 : index
    %c256_150 = arith.constant 256 : index
    %153 = vector.load %arg12[%c4_149, %c256_150] : memref<48x512xf32, #tpu.memory_space<vmem>>, vector<1x160xf32>
    %c1_151 = arith.constant 1 : index
    %c640_152 = arith.constant 640 : index
    %154 = vector.load %arg13[%c1_151, %c640_152] : memref<2x7680xf32, #tpu.memory_space<vmem>>, vector<1x160xf32>
    tpu.vector_store %arg13[%c1_151, %c640_152], %153 {strides = array<i32>} : memref<2x7680xf32, #tpu.memory_space<vmem>>, vector<1x160xf32>,
    %c5_153 = arith.constant 5 : index
    %c256_154 = arith.constant 256 : index
    %155 = vector.load %arg12[%c5_153, %c256_154] : memref<48x512xf32, #tpu.memory_space<vmem>>, vector<1x160xf32>
    %c1_155 = arith.constant 1 : index
    %c800_156 = arith.constant 800 : index
    %156 = vector.load %arg13[%c1_155, %c800_156] : memref<2x7680xf32, #tpu.memory_space<vmem>>, vector<1x160xf32>
    tpu.vector_store %arg13[%c1_155, %c800_156], %155 {strides = array<i32>} : memref<2x7680xf32, #tpu.memory_space<vmem>>, vector<1x160xf32>,
    %c6_157 = arith.constant 6 : index
    %c256_158 = arith.constant 256 : index
    %157 = vector.load %arg12[%c6_157, %c256_158] : memref<48x512xf32, #tpu.memory_space<vmem>>, vector<1x160xf32>
    %c1_159 = arith.constant 1 : index
    %c960_160 = arith.constant 960 : index
    %158 = vector.load %arg13[%c1_159, %c960_160] : memref<2x7680xf32, #tpu.memory_space<vmem>>, vector<1x160xf32>
    tpu.vector_store %arg13[%c1_159, %c960_160], %157 {strides = array<i32>} : memref<2x7680xf32, #tpu.memory_space<vmem>>, vector<1x160xf32>,
    %c7_161 = arith.constant 7 : index
    %c256_162 = arith.constant 256 : index
    %159 = vector.load %arg12[%c7_161, %c256_162] : memref<48x512xf32, #tpu.memory_space<vmem>>, vector<1x160xf32>
    %c1_163 = arith.constant 1 : index
    %c1120_164 = arith.constant 1120 : index
    %160 = vector.load %arg13[%c1_163, %c1120_164] : memref<2x7680xf32, #tpu.memory_space<vmem>>, vector<1x160xf32>
    tpu.vector_store %arg13[%c1_163, %c1120_164], %159 {strides = array<i32>} : memref<2x7680xf32, #tpu.memory_space<vmem>>, vector<1x160xf32>,
    %c8_165 = arith.constant 8 : index
    %c256_166 = arith.constant 256 : index
    %161 = vector.load %arg12[%c8_165, %c256_166] : memref<48x512xf32, #tpu.memory_space<vmem>>, vector<1x160xf32>
    %c1_167 = arith.constant 1 : index
    %c1280_168 = arith.constant 1280 : index
    %162 = vector.load %arg13[%c1_167, %c1280_168] : memref<2x7680xf32, #tpu.memory_space<vmem>>, vector<1x160xf32>
    tpu.vector_store %arg13[%c1_167, %c1280_168], %161 {strides = array<i32>} : memref<2x7680xf32, #tpu.memory_space<vmem>>, vector<1x160xf32>,
    %c9_169 = arith.constant 9 : index
    %c256_170 = arith.constant 256 : index
    %163 = vector.load %arg12[%c9_169, %c256_170] : memref<48x512xf32, #tpu.memory_space<vmem>>, vector<1x160xf32>
    %c1_171 = arith.constant 1 : index
    %c1440_172 = arith.constant 1440 : index
    %164 = vector.load %arg13[%c1_171, %c1440_172] : memref<2x7680xf32, #tpu.memory_space<vmem>>, vector<1x160xf32>
    tpu.vector_store %arg13[%c1_171, %c1440_172], %163 {strides = array<i32>} : memref<2x7680xf32, #tpu.memory_space<vmem>>, vector<1x160xf32>,
    %c10_173 = arith.constant 10 : index
    %c256_174 = arith.constant 256 : index
    %165 = vector.load %arg12[%c10_173, %c256_174] : memref<48x512xf32, #tpu.memory_space<vmem>>, vector<1x160xf32>
    %c1_175 = arith.constant 1 : index
    %c1600_176 = arith.constant 1600 : index
    %166 = vector.load %arg13[%c1_175, %c1600_176] : memref<2x7680xf32, #tpu.memory_space<vmem>>, vector<1x160xf32>
    tpu.vector_store %arg13[%c1_175, %c1600_176], %165 {strides = array<i32>} : memref<2x7680xf32, #tpu.memory_space<vmem>>, vector<1x160xf32>,
    %c11_177 = arith.constant 11 : index
    %c256_178 = arith.constant 256 : index
    %167 = vector.load %arg12[%c11_177, %c256_178] : memref<48x512xf32, #tpu.memory_space<vmem>>, vector<1x160xf32>
    %c1_179 = arith.constant 1 : index
    %c1760_180 = arith.constant 1760 : index
    %168 = vector.load %arg13[%c1_179, %c1760_180] : memref<2x7680xf32, #tpu.memory_space<vmem>>, vector<1x160xf32>
    tpu.vector_store %arg13[%c1_179, %c1760_180], %167 {strides = array<i32>} : memref<2x7680xf32, #tpu.memory_space<vmem>>, vector<1x160xf32>,
    %c12_181 = arith.constant 12 : index
    %c256_182 = arith.constant 256 : index
    %169 = vector.load %arg12[%c12_181, %c256_182] : memref<48x512xf32, #tpu.memory_space<vmem>>, vector<1x160xf32>
    %c1_183 = arith.constant 1 : index
    %c1920_184 = arith.constant 1920 : index
    %170 = vector.load %arg13[%c1_183, %c1920_184] : memref<2x7680xf32, #tpu.memory_space<vmem>>, vector<1x160xf32>
    tpu.vector_store %arg13[%c1_183, %c1920_184], %169 {strides = array<i32>} : memref<2x7680xf32, #tpu.memory_space<vmem>>, vector<1x160xf32>,
    %c13_185 = arith.constant 13 : index
    %c256_186 = arith.constant 256 : index
    %171 = vector.load %arg12[%c13_185, %c256_186] : memref<48x512xf32, #tpu.memory_space<vmem>>, vector<1x160xf32>
    %c1_187 = arith.constant 1 : index
    %c2080_188 = arith.constant 2080 : index
    %172 = vector.load %arg13[%c1_187, %c2080_188] : memref<2x7680xf32, #tpu.memory_space<vmem>>, vector<1x160xf32>
    tpu.vector_store %arg13[%c1_187, %c2080_188], %171 {strides = array<i32>} : memref<2x7680xf32, #tpu.memory_space<vmem>>, vector<1x160xf32>,
    %c14_189 = arith.constant 14 : index
    %c256_190 = arith.constant 256 : index
    %173 = vector.load %arg12[%c14_189, %c256_190] : memref<48x512xf32, #tpu.memory_space<vmem>>, vector<1x160xf32>
    %c1_191 = arith.constant 1 : index
    %c2240_192 = arith.constant 2240 : index
    %174 = vector.load %arg13[%c1_191, %c2240_192] : memref<2x7680xf32, #tpu.memory_space<vmem>>, vector<1x160xf32>
    tpu.vector_store %arg13[%c1_191, %c2240_192], %173 {strides = array<i32>} : memref<2x7680xf32, #tpu.memory_space<vmem>>, vector<1x160xf32>,
    %c15_193 = arith.constant 15 : index
    %c256_194 = arith.constant 256 : index
    %175 = vector.load %arg12[%c15_193, %c256_194] : memref<48x512xf32, #tpu.memory_space<vmem>>, vector<1x160xf32>
    %c1_195 = arith.constant 1 : index
    %c2400_196 = arith.constant 2400 : index
    %176 = vector.load %arg13[%c1_195, %c2400_196] : memref<2x7680xf32, #tpu.memory_space<vmem>>, vector<1x160xf32>
    tpu.vector_store %arg13[%c1_195, %c2400_196], %175 {strides = array<i32>} : memref<2x7680xf32, #tpu.memory_space<vmem>>, vector<1x160xf32>,
    %c16_197 = arith.constant 16 : index
    %c256_198 = arith.constant 256 : index
    %177 = vector.load %arg12[%c16_197, %c256_198] : memref<48x512xf32, #tpu.memory_space<vmem>>, vector<1x160xf32>
    %c1_199 = arith.constant 1 : index
    %c2560_200 = arith.constant 2560 : index
    %178 = vector.load %arg13[%c1_199, %c2560_200] : memref<2x7680xf32, #tpu.memory_space<vmem>>, vector<1x160xf32>
    tpu.vector_store %arg13[%c1_199, %c2560_200], %177 {strides = array<i32>} : memref<2x7680xf32, #tpu.memory_space<vmem>>, vector<1x160xf32>,
    %c17_201 = arith.constant 17 : index
    %c256_202 = arith.constant 256 : index
    %179 = vector.load %arg12[%c17_201, %c256_202] : memref<48x512xf32, #tpu.memory_space<vmem>>, vector<1x160xf32>
    %c1_203 = arith.constant 1 : index
    %c2720_204 = arith.constant 2720 : index
    %180 = vector.load %arg13[%c1_203, %c2720_204] : memref<2x7680xf32, #tpu.memory_space<vmem>>, vector<1x160xf32>
    tpu.vector_store %arg13[%c1_203, %c2720_204], %179 {strides = array<i32>} : memref<2x7680xf32, #tpu.memory_space<vmem>>, vector<1x160xf32>,
    %c18_205 = arith.constant 18 : index
    %c256_206 = arith.constant 256 : index
    %181 = vector.load %arg12[%c18_205, %c256_206] : memref<48x512xf32, #tpu.memory_space<vmem>>, vector<1x160xf32>
    %c1_207 = arith.constant 1 : index
    %c2880_208 = arith.constant 2880 : index
    %182 = vector.load %arg13[%c1_207, %c2880_208] : memref<2x7680xf32, #tpu.memory_space<vmem>>, vector<1x160xf32>
    tpu.vector_store %arg13[%c1_207, %c2880_208], %181 {strides = array<i32>} : memref<2x7680xf32, #tpu.memory_space<vmem>>, vector<1x160xf32>,
    %c19_209 = arith.constant 19 : index
    %c256_210 = arith.constant 256 : index
    %183 = vector.load %arg12[%c19_209, %c256_210] : memref<48x512xf32, #tpu.memory_space<vmem>>, vector<1x160xf32>
    %c1_211 = arith.constant 1 : index
    %c3040_212 = arith.constant 3040 : index
    %184 = vector.load %arg13[%c1_211, %c3040_212] : memref<2x7680xf32, #tpu.memory_space<vmem>>, vector<1x160xf32>
    tpu.vector_store %arg13[%c1_211, %c3040_212], %183 {strides = array<i32>} : memref<2x7680xf32, #tpu.memory_space<vmem>>, vector<1x160xf32>,
    %c20_213 = arith.constant 20 : index
    %c256_214 = arith.constant 256 : index
    %185 = vector.load %arg12[%c20_213, %c256_214] : memref<48x512xf32, #tpu.memory_space<vmem>>, vector<1x160xf32>
    %c1_215 = arith.constant 1 : index
    %c3200_216 = arith.constant 3200 : index
    %186 = vector.load %arg13[%c1_215, %c3200_216] : memref<2x7680xf32, #tpu.memory_space<vmem>>, vector<1x160xf32>
    tpu.vector_store %arg13[%c1_215, %c3200_216], %185 {strides = array<i32>} : memref<2x7680xf32, #tpu.memory_space<vmem>>, vector<1x160xf32>,
    %c21_217 = arith.constant 21 : index
    %c256_218 = arith.constant 256 : index
    %187 = vector.load %arg12[%c21_217, %c256_218] : memref<48x512xf32, #tpu.memory_space<vmem>>, vector<1x160xf32>
    %c1_219 = arith.constant 1 : index
    %c3360_220 = arith.constant 3360 : index
    %188 = vector.load %arg13[%c1_219, %c3360_220] : memref<2x7680xf32, #tpu.memory_space<vmem>>, vector<1x160xf32>
    tpu.vector_store %arg13[%c1_219, %c3360_220], %187 {strides = array<i32>} : memref<2x7680xf32, #tpu.memory_space<vmem>>, vector<1x160xf32>,
    %c22_221 = arith.constant 22 : index
    %c256_222 = arith.constant 256 : index
    %189 = vector.load %arg12[%c22_221, %c256_222] : memref<48x512xf32, #tpu.memory_space<vmem>>, vector<1x160xf32>
    %c1_223 = arith.constant 1 : index
    %c3520_224 = arith.constant 3520 : index
    %190 = vector.load %arg13[%c1_223, %c3520_224] : memref<2x7680xf32, #tpu.memory_space<vmem>>, vector<1x160xf32>
    tpu.vector_store %arg13[%c1_223, %c3520_224], %189 {strides = array<i32>} : memref<2x7680xf32, #tpu.memory_space<vmem>>, vector<1x160xf32>,
    %c23_225 = arith.constant 23 : index
    %c256_226 = arith.constant 256 : index
    %191 = vector.load %arg12[%c23_225, %c256_226] : memref<48x512xf32, #tpu.memory_space<vmem>>, vector<1x160xf32>
    %c1_227 = arith.constant 1 : index
    %c3680_228 = arith.constant 3680 : index
    %192 = vector.load %arg13[%c1_227, %c3680_228] : memref<2x7680xf32, #tpu.memory_space<vmem>>, vector<1x160xf32>
    tpu.vector_store %arg13[%c1_227, %c3680_228], %191 {strides = array<i32>} : memref<2x7680xf32, #tpu.memory_space<vmem>>, vector<1x160xf32>,
    %c24_229 = arith.constant 24 : index
    %c256_230 = arith.constant 256 : index
    %193 = vector.load %arg12[%c24_229, %c256_230] : memref<48x512xf32, #tpu.memory_space<vmem>>, vector<1x160xf32>
    %c1_231 = arith.constant 1 : index
    %c3840_232 = arith.constant 3840 : index
    %194 = vector.load %arg13[%c1_231, %c3840_232] : memref<2x7680xf32, #tpu.memory_space<vmem>>, vector<1x160xf32>
    tpu.vector_store %arg13[%c1_231, %c3840_232], %193 {strides = array<i32>} : memref<2x7680xf32, #tpu.memory_space<vmem>>, vector<1x160xf32>,
    %c25_233 = arith.constant 25 : index
    %c256_234 = arith.constant 256 : index
    %195 = vector.load %arg12[%c25_233, %c256_234] : memref<48x512xf32, #tpu.memory_space<vmem>>, vector<1x160xf32>
    %c1_235 = arith.constant 1 : index
    %c4000_236 = arith.constant 4000 : index
    %196 = vector.load %arg13[%c1_235, %c4000_236] : memref<2x7680xf32, #tpu.memory_space<vmem>>, vector<1x160xf32>
    tpu.vector_store %arg13[%c1_235, %c4000_236], %195 {strides = array<i32>} : memref<2x7680xf32, #tpu.memory_space<vmem>>, vector<1x160xf32>,
    %c26_237 = arith.constant 26 : index
    %c256_238 = arith.constant 256 : index
    %197 = vector.load %arg12[%c26_237, %c256_238] : memref<48x512xf32, #tpu.memory_space<vmem>>, vector<1x160xf32>
    %c1_239 = arith.constant 1 : index
    %c4160_240 = arith.constant 4160 : index
    %198 = vector.load %arg13[%c1_239, %c4160_240] : memref<2x7680xf32, #tpu.memory_space<vmem>>, vector<1x160xf32>
    tpu.vector_store %arg13[%c1_239, %c4160_240], %197 {strides = array<i32>} : memref<2x7680xf32, #tpu.memory_space<vmem>>, vector<1x160xf32>,
    %c27_241 = arith.constant 27 : index
    %c256_242 = arith.constant 256 : index
    %199 = vector.load %arg12[%c27_241, %c256_242] : memref<48x512xf32, #tpu.memory_space<vmem>>, vector<1x160xf32>
    %c1_243 = arith.constant 1 : index
    %c4320_244 = arith.constant 4320 : index
    %200 = vector.load %arg13[%c1_243, %c4320_244] : memref<2x7680xf32, #tpu.memory_space<vmem>>, vector<1x160xf32>
    tpu.vector_store %arg13[%c1_243, %c4320_244], %199 {strides = array<i32>} : memref<2x7680xf32, #tpu.memory_space<vmem>>, vector<1x160xf32>,
    %c28_245 = arith.constant 28 : index
    %c256_246 = arith.constant 256 : index
    %201 = vector.load %arg12[%c28_245, %c256_246] : memref<48x512xf32, #tpu.memory_space<vmem>>, vector<1x160xf32>
    %c1_247 = arith.constant 1 : index
    %c4480_248 = arith.constant 4480 : index
    %202 = vector.load %arg13[%c1_247, %c4480_248] : memref<2x7680xf32, #tpu.memory_space<vmem>>, vector<1x160xf32>
    tpu.vector_store %arg13[%c1_247, %c4480_248], %201 {strides = array<i32>} : memref<2x7680xf32, #tpu.memory_space<vmem>>, vector<1x160xf32>,
    %c29_249 = arith.constant 29 : index
    %c256_250 = arith.constant 256 : index
    %203 = vector.load %arg12[%c29_249, %c256_250] : memref<48x512xf32, #tpu.memory_space<vmem>>, vector<1x160xf32>
    %c1_251 = arith.constant 1 : index
    %c4640_252 = arith.constant 4640 : index
    %204 = vector.load %arg13[%c1_251, %c4640_252] : memref<2x7680xf32, #tpu.memory_space<vmem>>, vector<1x160xf32>
    tpu.vector_store %arg13[%c1_251, %c4640_252], %203 {strides = array<i32>} : memref<2x7680xf32, #tpu.memory_space<vmem>>, vector<1x160xf32>,
    %c30_253 = arith.constant 30 : index
    %c256_254 = arith.constant 256 : index
    %205 = vector.load %arg12[%c30_253, %c256_254] : memref<48x512xf32, #tpu.memory_space<vmem>>, vector<1x160xf32>
    %c1_255 = arith.constant 1 : index
    %c4800_256 = arith.constant 4800 : index
    %206 = vector.load %arg13[%c1_255, %c4800_256] : memref<2x7680xf32, #tpu.memory_space<vmem>>, vector<1x160xf32>
    tpu.vector_store %arg13[%c1_255, %c4800_256], %205 {strides = array<i32>} : memref<2x7680xf32, #tpu.memory_space<vmem>>, vector<1x160xf32>,
    %c31_257 = arith.constant 31 : index
    %c256_258 = arith.constant 256 : index
    %207 = vector.load %arg12[%c31_257, %c256_258] : memref<48x512xf32, #tpu.memory_space<vmem>>, vector<1x160xf32>
    %c1_259 = arith.constant 1 : index
    %c4960_260 = arith.constant 4960 : index
    %208 = vector.load %arg13[%c1_259, %c4960_260] : memref<2x7680xf32, #tpu.memory_space<vmem>>, vector<1x160xf32>
    tpu.vector_store %arg13[%c1_259, %c4960_260], %207 {strides = array<i32>} : memref<2x7680xf32, #tpu.memory_space<vmem>>, vector<1x160xf32>,
    %c32_261 = arith.constant 32 : index
    %c256_262 = arith.constant 256 : index
    %209 = vector.load %arg12[%c32_261, %c256_262] : memref<48x512xf32, #tpu.memory_space<vmem>>, vector<1x160xf32>
    %c1_263 = arith.constant 1 : index
    %c5120_264 = arith.constant 5120 : index
    %210 = vector.load %arg13[%c1_263, %c5120_264] : memref<2x7680xf32, #tpu.memory_space<vmem>>, vector<1x160xf32>
    tpu.vector_store %arg13[%c1_263, %c5120_264], %209 {strides = array<i32>} : memref<2x7680xf32, #tpu.memory_space<vmem>>, vector<1x160xf32>,
    %c33_265 = arith.constant 33 : index
    %c256_266 = arith.constant 256 : index
    %211 = vector.load %arg12[%c33_265, %c256_266] : memref<48x512xf32, #tpu.memory_space<vmem>>, vector<1x160xf32>
    %c1_267 = arith.constant 1 : index
    %c5280_268 = arith.constant 5280 : index
    %212 = vector.load %arg13[%c1_267, %c5280_268] : memref<2x7680xf32, #tpu.memory_space<vmem>>, vector<1x160xf32>
    tpu.vector_store %arg13[%c1_267, %c5280_268], %211 {strides = array<i32>} : memref<2x7680xf32, #tpu.memory_space<vmem>>, vector<1x160xf32>,
    %c34_269 = arith.constant 34 : index
    %c256_270 = arith.constant 256 : index
    %213 = vector.load %arg12[%c34_269, %c256_270] : memref<48x512xf32, #tpu.memory_space<vmem>>, vector<1x160xf32>
    %c1_271 = arith.constant 1 : index
    %c5440_272 = arith.constant 5440 : index
    %214 = vector.load %arg13[%c1_271, %c5440_272] : memref<2x7680xf32, #tpu.memory_space<vmem>>, vector<1x160xf32>
    tpu.vector_store %arg13[%c1_271, %c5440_272], %213 {strides = array<i32>} : memref<2x7680xf32, #tpu.memory_space<vmem>>, vector<1x160xf32>,
    %c35_273 = arith.constant 35 : index
    %c256_274 = arith.constant 256 : index
    %215 = vector.load %arg12[%c35_273, %c256_274] : memref<48x512xf32, #tpu.memory_space<vmem>>, vector<1x160xf32>
    %c1_275 = arith.constant 1 : index
    %c5600_276 = arith.constant 5600 : index
    %216 = vector.load %arg13[%c1_275, %c5600_276] : memref<2x7680xf32, #tpu.memory_space<vmem>>, vector<1x160xf32>
    tpu.vector_store %arg13[%c1_275, %c5600_276], %215 {strides = array<i32>} : memref<2x7680xf32, #tpu.memory_space<vmem>>, vector<1x160xf32>,
    %c36_277 = arith.constant 36 : index
    %c256_278 = arith.constant 256 : index
    %217 = vector.load %arg12[%c36_277, %c256_278] : memref<48x512xf32, #tpu.memory_space<vmem>>, vector<1x160xf32>
    %c1_279 = arith.constant 1 : index
    %c5760_280 = arith.constant 5760 : index
    %218 = vector.load %arg13[%c1_279, %c5760_280] : memref<2x7680xf32, #tpu.memory_space<vmem>>, vector<1x160xf32>
    tpu.vector_store %arg13[%c1_279, %c5760_280], %217 {strides = array<i32>} : memref<2x7680xf32, #tpu.memory_space<vmem>>, vector<1x160xf32>,
    %c37_281 = arith.constant 37 : index
    %c256_282 = arith.constant 256 : index
    %219 = vector.load %arg12[%c37_281, %c256_282] : memref<48x512xf32, #tpu.memory_space<vmem>>, vector<1x160xf32>
    %c1_283 = arith.constant 1 : index
    %c5920_284 = arith.constant 5920 : index
    %220 = vector.load %arg13[%c1_283, %c5920_284] : memref<2x7680xf32, #tpu.memory_space<vmem>>, vector<1x160xf32>
    tpu.vector_store %arg13[%c1_283, %c5920_284], %219 {strides = array<i32>} : memref<2x7680xf32, #tpu.memory_space<vmem>>, vector<1x160xf32>,
    %c38_285 = arith.constant 38 : index
    %c256_286 = arith.constant 256 : index
    %221 = vector.load %arg12[%c38_285, %c256_286] : memref<48x512xf32, #tpu.memory_space<vmem>>, vector<1x160xf32>
    %c1_287 = arith.constant 1 : index
    %c6080_288 = arith.constant 6080 : index
    %222 = vector.load %arg13[%c1_287, %c6080_288] : memref<2x7680xf32, #tpu.memory_space<vmem>>, vector<1x160xf32>
    tpu.vector_store %arg13[%c1_287, %c6080_288], %221 {strides = array<i32>} : memref<2x7680xf32, #tpu.memory_space<vmem>>, vector<1x160xf32>,
    %c39_289 = arith.constant 39 : index
    %c256_290 = arith.constant 256 : index
    %223 = vector.load %arg12[%c39_289, %c256_290] : memref<48x512xf32, #tpu.memory_space<vmem>>, vector<1x160xf32>
    %c1_291 = arith.constant 1 : index
    %c6240_292 = arith.constant 6240 : index
    %224 = vector.load %arg13[%c1_291, %c6240_292] : memref<2x7680xf32, #tpu.memory_space<vmem>>, vector<1x160xf32>
    tpu.vector_store %arg13[%c1_291, %c6240_292], %223 {strides = array<i32>} : memref<2x7680xf32, #tpu.memory_space<vmem>>, vector<1x160xf32>,
    %c40_293 = arith.constant 40 : index
    %c256_294 = arith.constant 256 : index
    %225 = vector.load %arg12[%c40_293, %c256_294] : memref<48x512xf32, #tpu.memory_space<vmem>>, vector<1x160xf32>
    %c1_295 = arith.constant 1 : index
    %c6400_296 = arith.constant 6400 : index
    %226 = vector.load %arg13[%c1_295, %c6400_296] : memref<2x7680xf32, #tpu.memory_space<vmem>>, vector<1x160xf32>
    tpu.vector_store %arg13[%c1_295, %c6400_296], %225 {strides = array<i32>} : memref<2x7680xf32, #tpu.memory_space<vmem>>, vector<1x160xf32>,
    %c41_297 = arith.constant 41 : index
    %c256_298 = arith.constant 256 : index
    %227 = vector.load %arg12[%c41_297, %c256_298] : memref<48x512xf32, #tpu.memory_space<vmem>>, vector<1x160xf32>
    %c1_299 = arith.constant 1 : index
    %c6560_300 = arith.constant 6560 : index
    %228 = vector.load %arg13[%c1_299, %c6560_300] : memref<2x7680xf32, #tpu.memory_space<vmem>>, vector<1x160xf32>
    tpu.vector_store %arg13[%c1_299, %c6560_300], %227 {strides = array<i32>} : memref<2x7680xf32, #tpu.memory_space<vmem>>, vector<1x160xf32>,
    %c42_301 = arith.constant 42 : index
    %c256_302 = arith.constant 256 : index
    %229 = vector.load %arg12[%c42_301, %c256_302] : memref<48x512xf32, #tpu.memory_space<vmem>>, vector<1x160xf32>
    %c1_303 = arith.constant 1 : index
    %c6720_304 = arith.constant 6720 : index
    %230 = vector.load %arg13[%c1_303, %c6720_304] : memref<2x7680xf32, #tpu.memory_space<vmem>>, vector<1x160xf32>
    tpu.vector_store %arg13[%c1_303, %c6720_304], %229 {strides = array<i32>} : memref<2x7680xf32, #tpu.memory_space<vmem>>, vector<1x160xf32>,
    %c43_305 = arith.constant 43 : index
    %c256_306 = arith.constant 256 : index
    %231 = vector.load %arg12[%c43_305, %c256_306] : memref<48x512xf32, #tpu.memory_space<vmem>>, vector<1x160xf32>
    %c1_307 = arith.constant 1 : index
    %c6880_308 = arith.constant 6880 : index
    %232 = vector.load %arg13[%c1_307, %c6880_308] : memref<2x7680xf32, #tpu.memory_space<vmem>>, vector<1x160xf32>
    tpu.vector_store %arg13[%c1_307, %c6880_308], %231 {strides = array<i32>} : memref<2x7680xf32, #tpu.memory_space<vmem>>, vector<1x160xf32>,
    %c44_309 = arith.constant 44 : index
    %c256_310 = arith.constant 256 : index
    %233 = vector.load %arg12[%c44_309, %c256_310] : memref<48x512xf32, #tpu.memory_space<vmem>>, vector<1x160xf32>
    %c1_311 = arith.constant 1 : index
    %c7040_312 = arith.constant 7040 : index
    %234 = vector.load %arg13[%c1_311, %c7040_312] : memref<2x7680xf32, #tpu.memory_space<vmem>>, vector<1x160xf32>
    tpu.vector_store %arg13[%c1_311, %c7040_312], %233 {strides = array<i32>} : memref<2x7680xf32, #tpu.memory_space<vmem>>, vector<1x160xf32>,
    %c45_313 = arith.constant 45 : index
    %c256_314 = arith.constant 256 : index
    %235 = vector.load %arg12[%c45_313, %c256_314] : memref<48x512xf32, #tpu.memory_space<vmem>>, vector<1x160xf32>
    %c1_315 = arith.constant 1 : index
    %c7200_316 = arith.constant 7200 : index
    %236 = vector.load %arg13[%c1_315, %c7200_316] : memref<2x7680xf32, #tpu.memory_space<vmem>>, vector<1x160xf32>
    tpu.vector_store %arg13[%c1_315, %c7200_316], %235 {strides = array<i32>} : memref<2x7680xf32, #tpu.memory_space<vmem>>, vector<1x160xf32>,
    %c46_317 = arith.constant 46 : index
    %c256_318 = arith.constant 256 : index
    %237 = vector.load %arg12[%c46_317, %c256_318] : memref<48x512xf32, #tpu.memory_space<vmem>>, vector<1x160xf32>
    %c1_319 = arith.constant 1 : index
    %c7360_320 = arith.constant 7360 : index
    %238 = vector.load %arg13[%c1_319, %c7360_320] : memref<2x7680xf32, #tpu.memory_space<vmem>>, vector<1x160xf32>
    tpu.vector_store %arg13[%c1_319, %c7360_320], %237 {strides = array<i32>} : memref<2x7680xf32, #tpu.memory_space<vmem>>, vector<1x160xf32>,
    %c47_321 = arith.constant 47 : index
    %c256_322 = arith.constant 256 : index
    %239 = vector.load %arg12[%c47_321, %c256_322] : memref<48x512xf32, #tpu.memory_space<vmem>>, vector<1x160xf32>
    %c1_323 = arith.constant 1 : index
    %c7520_324 = arith.constant 7520 : index
    %240 = vector.load %arg13[%c1_323, %c7520_324] : memref<2x7680xf32, #tpu.memory_space<vmem>>, vector<1x160xf32>
    tpu.vector_store %arg13[%c1_323, %c7520_324], %239 {strides = array<i32>} : memref<2x7680xf32, #tpu.memory_space<vmem>>, vector<1x160xf32>,
    tpu.wait_dma2 semaphore(%arg15 : memref<!tpu.dma_semaphore, #tpu.memory_space<semaphore_mem>>) src(%arg6 : memref<7680x100xf32, #tpu.memory_space<any>>) dst(%arg14 : memref<7680x100xf32, #tpu.memory_space<vmem>>)
    %c0_325 = arith.constant 0 : index
    %c0_326 = arith.constant 0 : index
    %241 = vector.load %arg13[%c0_325, %c0_326] : memref<2x7680xf32, #tpu.memory_space<vmem>>, vector<2x7680xf32>
    %c0_327 = arith.constant 0 : index
    %c0_328 = arith.constant 0 : index
    %242 = vector.load %arg14[%c0_327, %c0_328] : memref<7680x100xf32, #tpu.memory_space<vmem>>, vector<7680x100xf32>
    %cst_329 = arith.constant dense<0.000000e+00> : vector<2x100xf32>
    %243 = tpu.matmul %241, %242, %cst_329 {dimension_numbers = #tpu.dot_dimension_numbers<[1], [0], [0], [1], [0, 0, 1, 1], [], []>} : vector<2x7680xf32>, vector<7680x100xf32>, vector<2x100xf32> -> vector<2x100xf32>
    %c0_330 = arith.constant 0 : index
    %c0_331 = arith.constant 0 : index
    %244 = vector.load %arg7[%c0_330, %c0_331] : memref<1x100xf32, #tpu.memory_space<vmem>>, vector<1x100xf32>
    %245 = vector.broadcast %244 : vector<1x100xf32> to vector<2x100xf32>
    %246 = arith.addf %243, %245 : vector<2x100xf32>
    %cst_332 = arith.constant 0.000000e+00 : f32
    %247 = vector.broadcast %cst_332 : f32 to vector<2x100xf32>
    %248 = arith.maximumf %246, %247 : vector<2x100xf32>
    %c0_333 = arith.constant 0 : index
    %c0_334 = arith.constant 0 : index
    %249 = vector.load %arg8[%c0_333, %c0_334] : memref<1x100xf32, #tpu.memory_space<vmem>>, vector<1x100xf32>
    %250 = vector.broadcast %249 : vector<1x100xf32> to vector<2x100xf32>
    %251 = arith.mulf %248, %250 : vector<2x100xf32>
    %cst_335 = arith.constant dense<0.000000e+00> : vector<2xf32>
    %252 = vector.multi_reduction <add>, %251, %cst_335 [1] : vector<2x100xf32> to vector<2xf32>
    %253 = vector.shape_cast %252 : vector<2xf32> to vector<2x1xf32>
    %c0_336 = arith.constant 0 : index
    %c0_337 = arith.constant 0 : index
    %254 = vector.load %arg9[%c0_336, %c0_337] : memref<1x1xf32, #tpu.memory_space<vmem>>, vector<1x1xf32>
    %255 = vector.broadcast %254 : vector<1x1xf32> to vector<2x1xf32>
    %256 = arith.addf %253, %255 : vector<2x1xf32>
    %c0_338 = arith.constant 0 : index
    %c0_339 = arith.constant 0 : index
    %257 = vector.load %arg10[%c0_338, %c0_339] : memref<2x1xf32, #tpu.memory_space<vmem>>, vector<2x1xf32>
    tpu.vector_store %arg10[%c0_338, %c0_339], %256 {strides = array<i32>} : memref<2x1xf32, #tpu.memory_space<vmem>>, vector<2x1xf32>,
    return
  }
  func.func @transform_0(%arg0: i32) -> (i32, i32) {
    %c0_i32 = arith.constant 0 : i32
    %c0_i32_0 = arith.constant 0 : i32
    %c0_i32_1 = arith.constant 0 : i32
    return %c0_i32, %c0_i32_0 : i32, i32
  }
  func.func @transform_1(%arg0: i32) -> (i32, i32) {
    %c0_i32 = arith.constant 0 : i32
    %c0_i32_0 = arith.constant 0 : i32
    %c0_i32_1 = arith.constant 0 : i32
    return %c0_i32, %c0_i32_0 : i32, i32
  }
  func.func @transform_2(%arg0: i32) -> (i32, i32) {
    %c0_i32 = arith.constant 0 : i32
    %c0_i32_0 = arith.constant 0 : i32
    %c0_i32_1 = arith.constant 0 : i32
    return %c0_i32, %c0_i32_0 : i32, i32
  }
  func.func @transform_3(%arg0: i32) -> (i32, i32) {
    %c0_i32 = arith.constant 0 : i32
    %c0_i32_0 = arith.constant 0 : i32
    %c0_i32_1 = arith.constant 0 : i32
    return %c0_i32, %c0_i32_0 : i32, i32
  }
  func.func @transform_4(%arg0: i32) -> (i32, i32) {
    %c0_i32 = arith.constant 0 : i32
    %c0_i32_0 = arith.constant 0 : i32
    %c0_i32_1 = arith.constant 0 : i32
    return %c0_i32, %c0_i32_0 : i32, i32
  }
  func.func @transform_6(%arg0: i32) -> (i32, i32) {
    %c0_i32 = arith.constant 0 : i32
    %c0_i32_0 = arith.constant 0 : i32
    %c0_i32_1 = arith.constant 0 : i32
    return %c0_i32, %c0_i32_0 : i32, i32
  }
  func.func @transform_7(%arg0: i32) -> (i32, i32) {
    %c0_i32 = arith.constant 0 : i32
    %c0_i32_0 = arith.constant 0 : i32
    %c0_i32_1 = arith.constant 0 : i32
    return %c0_i32, %c0_i32_0 : i32, i32
  }
  func.func @transform_8(%arg0: i32) -> (i32, i32) {
    %c0_i32 = arith.constant 0 : i32
    %c0_i32_0 = arith.constant 0 : i32
    %c0_i32_1 = arith.constant 0 : i32
    return %c0_i32, %c0_i32_0 : i32, i32
  }
  func.func @transform_9(%arg0: i32) -> (i32, i32) {
    %c0_i32 = arith.constant 0 : i32
    %c0_i32_0 = arith.constant 0 : i32
    %c0_i32_1 = arith.constant 0 : i32
    return %c0_i32, %c0_i32_0 : i32, i32
  }
}

</mosaic_0001>

<bundles_post_ra>
// kernel: forward.1
= control target key start
LH: loop header
LB: loop body
LE: loop exit
PB: predicated region body
PF: predicated region fallthrough
CT: control target
= control target key end

     0   :  { %s17498_s0 = inlined_call_operand.vmem [shape: f32[16,576], index: 0, kind: input, shape index: {}]   ;;  %s17499_s1 = inlined_call_operand.vmem [shape: f32[16,16], index: 1, kind: input, shape index: {}]   ;;  %s17500_s2 = inlined_call_operand.vmem [shape: f32[16,1], index: 2, kind: input, shape index: {}]   ;;  %s17501_s3 = inlined_call_operand.vmem [shape: f32[48,256], index: 3, kind: input, shape index: {}]   ;;  %s17502_s4 = inlined_call_operand.vmem [shape: f32[48,1], index: 4, kind: input, shape index: {}]   ;;  %s17503_s5 = inlined_call_operand.vmem [shape: f32[7680,100], index: 5, kind: input, shape index: {}]   ;;  %s17504_s6 = inlined_call_operand.vmem [shape: f32[1,100], index: 6, kind: input, shape index: {}]   ;;  %s17505_s7 = inlined_call_operand.vmem [shape: f32[1,100], index: 7, kind: input, shape index: {}]   ;;  %s17506_s8 = inlined_call_operand.<no memory space> [shape: f32[1,1], index: 8, kind: input, shape index: {}]   ;;  %s17507_s9 = inlined_call_operand.vmem [shape: f32[2,1], index: 9, kind: output, shape index: {}]  }
   0x1   :  { %v14_v0 = vstv %s17506_s8  ;;  %v10329_v1 = vld [vmem:[%s17503_s5] sm:$0xff]  ;;  %v10334_v2 = vld [vmem:[%s17503_s5 + $0x8] sm:$0xff]  ;;  %v10339_v3 = vld [vmem:[%s17503_s5 + $0x10] sm:$0xff] }
   0x2   :  { %17519 = vst [vmem:[#allocation10_spill] sm:$0xff] %v10329_v1  ;;  %17520 = vst [vmem:[#allocation11_spill] sm:$0xff] %v10334_v2  ;;  %v10344_v4 = vld [vmem:[%s17503_s5 + $0x18] sm:$0xff]  ;;  %v10349_v5 = vld [vmem:[%s17503_s5 + $0x20] sm:$0xff] }
   0x3   :  { %17521 = vst [vmem:[#allocation12_spill] sm:$0xff] %v10339_v3  ;;  %15 = vst [vmem:[#allocation7] sm:$0x1] %v14_v0  ;;  %v10354_v6 = vld [vmem:[%s17503_s5 + $0x28] sm:$0xff]  ;;  %v10359_v7 = vld [vmem:[%s17503_s5 + $0x30] sm:$0xff] }
   0x4   :  { %17522 = vst [vmem:[#allocation13_spill] sm:$0xff] %v10344_v4  ;;  %17523 = vst [vmem:[#allocation14_spill] sm:$0xff] %v10349_v5  ;;  %v10364_v8 = vld [vmem:[%s17503_s5 + $0x38] sm:$0xff]  ;;  %v10369_v9 = vld [vmem:[%s17503_s5 + $0x40] sm:$0xff] }
   0x5   :  { %17524 = vst [vmem:[#allocation15_spill] sm:$0xff] %v10354_v6  ;;  %17525 = vst [vmem:[#allocation16_spill] sm:$0xff] %v10359_v7  ;;  %v10374_v10 = vld [vmem:[%s17503_s5 + $0x48] sm:$0xff]  ;;  %v10379_v11 = vld [vmem:[%s17503_s5 + $0x50] sm:$0xff] }
   0x6   :  { %17526 = vst [vmem:[#allocation17_spill] sm:$0xff] %v10364_v8  ;;  %17527 = vst [vmem:[#allocation18_spill] sm:$0xff] %v10369_v9  ;;  %v10384_v12 = vld [vmem:[%s17503_s5 + $0x58] sm:$0xff]  ;;  %v10389_v13 = vld [vmem:[%s17503_s5 + $0x60] sm:$0xff] }
   0x7   :  { %17528 = vst [vmem:[#allocation19_spill] sm:$0xff] %v10374_v10  ;;  %17529 = vst [vmem:[#allocation20_spill] sm:$0xff] %v10379_v11  ;;  %v10394_v14 = vld [vmem:[%s17503_s5 + $0x68] sm:$0xff]  ;;  %v10399_v15 = vld [vmem:[%s17503_s5 + $0x70] sm:$0xff] }
   0x8   :  { %17530 = vst [vmem:[#allocation21_spill] sm:$0xff] %v10384_v12  ;;  %17531 = vst [vmem:[#allocation22_spill] sm:$0xff] %v10389_v13  ;;  %v10404_v16 = vld [vmem:[%s17503_s5 + $0x78] sm:$0xff]  ;;  %v10409_v17 = vld [vmem:[%s17503_s5 + $0x80] sm:$0xff] }
   0x9   :  { %17532 = vst [vmem:[#allocation23_spill] sm:$0xff] %v10394_v14  ;;  %17533 = vst [vmem:[#allocation24_spill] sm:$0xff] %v10399_v15  ;;  %v10414_v18 = vld [vmem:[%s17503_s5 + $0x88] sm:$0xff]  ;;  %v10419_v19 = vld [vmem:[%s17503_s5 + $0x90] sm:$0xff] }
   0xa   :  { %17534 = vst [vmem:[#allocation25_spill] sm:$0xff] %v10404_v16  ;;  %17535 = vst [vmem:[#allocation26_spill] sm:$0xff] %v10409_v17  ;;  %v10424_v20 = vld [vmem:[%s17503_s5 + $0x98] sm:$0xff]  ;;  %v10429_v21 = vld [vmem:[%s17503_s5 + $0xa0] sm:$0xff] }
   0xb   :  { %17536 = vst [vmem:[#allocation27_spill] sm:$0xff] %v10414_v18  ;;  %17537 = vst [vmem:[#allocation28_spill] sm:$0xff] %v10419_v19  ;;  %v10434_v22 = vld [vmem:[%s17503_s5 + $0xa8] sm:$0xff]  ;;  %v10439_v23 = vld [vmem:[%s17503_s5 + $0xb0] sm:$0xff] }
   0xc   :  { %17538 = vst [vmem:[#allocation29_spill] sm:$0xff] %v10424_v20  ;;  %17539 = vst [vmem:[#allocation30_spill] sm:$0xff] %v10429_v21  ;;  %v10444_v24 = vld [vmem:[%s17503_s5 + $0xb8] sm:$0xff]  ;;  %v10449_v25 = vld [vmem:[%s17503_s5 + $0xc0] sm:$0xff] }
   0xd   :  { %17540 = vst [vmem:[#allocation31_spill] sm:$0xff] %v10434_v22  ;;  %17541 = vst [vmem:[#allocation32_spill] sm:$0xff] %v10439_v23  ;;  %v10454_v26 = vld [vmem:[%s17503_s5 + $0xc8] sm:$0xff]  ;;  %v10459_v27 = vld [vmem:[%s17503_s5 + $0xd0] sm:$0xff] }
   0xe   :  { %17542 = vst [vmem:[#allocation33_spill] sm:$0xff] %v10444_v24  ;;  %17543 = vst [vmem:[#allocation34_spill] sm:$0xff] %v10449_v25  ;;  %v10464_v28 = vld [vmem:[%s17503_s5 + $0xd8] sm:$0xff]  ;;  %v10469_v29 = vld [vmem:[%s17503_s5 + $0xe0] sm:$0xff] }
   0xf   :  { %17544 = vst [vmem:[#allocation35_spill] sm:$0xff] %v10454_v26  ;;  %17545 = vst [vmem:[#allocation36_spill] sm:$0xff] %v10459_v27  ;;  %v10474_v30 = vld [vmem:[%s17503_s5 + $0xe8] sm:$0xff]  ;;  %v10479_v31 = vld [vmem:[%s17503_s5 + $0xf0] sm:$0xff] }
  0x10   :  { %17546 = vst [vmem:[#allocation37_spill] sm:$0xff] %v10464_v28  ;;  %17547 = vst [vmem:[#allocation38_spill] sm:$0xff] %v10469_v29  ;;  %v10484_v32 = vld [vmem:[%s17503_s5 + $0xf8] sm:$0xff]  ;;  %v10489_v33 = vld [vmem:[%s17503_s5 + $0x100] sm:$0xff] }
  0x11   :  { %17548 = vst [vmem:[#allocation39_spill] sm:$0xff] %v10474_v30  ;;  %17549 = vst [vmem:[#allocation40_spill] sm:$0xff] %v10479_v31  ;;  %v10494_v34 = vld [vmem:[%s17503_s5 + $0x108] sm:$0xff]  ;;  %v10499_v35 = vld [vmem:[%s17503_s5 + $0x110] sm:$0xff] }
  0x12   :  { %17550 = vst [vmem:[#allocation41_spill] sm:$0xff] %v10484_v32  ;;  %17551 = vst [vmem:[#allocation42_spill] sm:$0xff] %v10489_v33  ;;  %v10504_v36 = vld [vmem:[%s17503_s5 + $0x118] sm:$0xff]  ;;  %v10509_v37 = vld [vmem:[%s17503_s5 + $0x120] sm:$0xff] }
  0x13   :  { %17552 = vst [vmem:[#allocation43_spill] sm:$0xff] %v10494_v34  ;;  %17553 = vst [vmem:[#allocation44_spill] sm:$0xff] %v10499_v35  ;;  %v10514_v38 = vld [vmem:[%s17503_s5 + $0x128] sm:$0xff]  ;;  %v10519_v39 = vld [vmem:[%s17503_s5 + $0x130] sm:$0xff] }
  0x14   :  { %17554 = vst [vmem:[#allocation45_spill] sm:$0xff] %v10504_v36  ;;  %17555 = vst [vmem:[#allocation46_spill] sm:$0xff] %v10509_v37  ;;  %v10524_v40 = vld [vmem:[%s17503_s5 + $0x138] sm:$0xff]  ;;  %v10529_v41 = vld [vmem:[%s17503_s5 + $0x140] sm:$0xff] }
  0x15   :  { %17556 = vst [vmem:[#allocation47_spill] sm:$0xff] %v10514_v38  ;;  %17557 = vst [vmem:[#allocation48_spill] sm:$0xff] %v10519_v39  ;;  %v10534_v42 = vld [vmem:[%s17503_s5 + $0x148] sm:$0xff]  ;;  %v10539_v43 = vld [vmem:[%s17503_s5 + $0x150] sm:$0xff] }
  0x16   :  { %17558 = vst [vmem:[#allocation49_spill] sm:$0xff] %v10524_v40  ;;  %17559 = vst [vmem:[#allocation50_spill] sm:$0xff] %v10529_v41  ;;  %v10544_v44 = vld [vmem:[%s17503_s5 + $0x158] sm:$0xff]  ;;  %v10549_v45 = vld [vmem:[%s17503_s5 + $0x160] sm:$0xff] }
  0x17   :  { %17560 = vst [vmem:[#allocation51_spill] sm:$0xff] %v10534_v42  ;;  %17561 = vst [vmem:[#allocation52_spill] sm:$0xff] %v10539_v43  ;;  %v10554_v46 = vld [vmem:[%s17503_s5 + $0x168] sm:$0xff]  ;;  %v10559_v47 = vld [vmem:[%s17503_s5 + $0x170] sm:$0xff] }
  0x18   :  { %17562 = vst [vmem:[#allocation53_spill] sm:$0xff] %v10544_v44  ;;  %17563 = vst [vmem:[#allocation54_spill] sm:$0xff] %v10549_v45  ;;  %v10564_v48 = vld [vmem:[%s17503_s5 + $0x178] sm:$0xff]  ;;  %v10569_v49 = vld [vmem:[%s17503_s5 + $0x180] sm:$0xff] }
  0x19   :  { %17564 = vst [vmem:[#allocation55_spill] sm:$0xff] %v10554_v46  ;;  %17565 = vst [vmem:[#allocation56_spill] sm:$0xff] %v10559_v47  ;;  %v10574_v50 = vld [vmem:[%s17503_s5 + $0x188] sm:$0xff]  ;;  %v10579_v51 = vld [vmem:[%s17503_s5 + $0x190] sm:$0xff] }
  0x1a   :  { %17566 = vst [vmem:[#allocation57_spill] sm:$0xff] %v10564_v48  ;;  %17567 = vst [vmem:[#allocation58_spill] sm:$0xff] %v10569_v49  ;;  %v10584_v52 = vld [vmem:[%s17503_s5 + $0x198] sm:$0xff]  ;;  %v10589_v53 = vld [vmem:[%s17503_s5 + $0x1a0] sm:$0xff] }
  0x1b   :  { %17568 = vst [vmem:[#allocation59_spill] sm:$0xff] %v10574_v50  ;;  %17569 = vst [vmem:[#allocation60_spill] sm:$0xff] %v10579_v51  ;;  %v10594_v54 = vld [vmem:[%s17503_s5 + $0x1a8] sm:$0xff]  ;;  %v10599_v55 = vld [vmem:[%s17503_s5 + $0x1b0] sm:$0xff] }
  0x1c   :  { %17570 = vst [vmem:[#allocation61_spill] sm:$0xff] %v10584_v52  ;;  %17571 = vst [vmem:[#allocation62_spill] sm:$0xff] %v10589_v53  ;;  %v10604_v56 = vld [vmem:[%s17503_s5 + $0x1b8] sm:$0xff]  ;;  %v10609_v57 = vld [vmem:[%s17503_s5 + $0x1c0] sm:$0xff] }
  0x1d   :  { %17572 = vst [vmem:[#allocation63_spill] sm:$0xff] %v10594_v54  ;;  %17573 = vst [vmem:[#allocation64_spill] sm:$0xff] %v10599_v55  ;;  %v10614_v58 = vld [vmem:[%s17503_s5 + $0x1c8] sm:$0xff]  ;;  %v10619_v59 = vld [vmem:[%s17503_s5 + $0x1d0] sm:$0xff] }
  0x1e   :  { %17574 = vst [vmem:[#allocation65_spill] sm:$0xff] %v10604_v56  ;;  %17575 = vst [vmem:[#allocation66_spill] sm:$0xff] %v10609_v57  ;;  %v10624_v60 = vld [vmem:[%s17503_s5 + $0x1d8] sm:$0xff]  ;;  %v10629_v61 = vld [vmem:[%s17503_s5 + $0x1e0] sm:$0xff] }
  0x1f   :  { %17576 = vst [vmem:[#allocation67_spill] sm:$0xff] %v10614_v58  ;;  %17577 = vst [vmem:[#allocation68_spill] sm:$0xff] %v10619_v59  ;;  %v10634_v62 = vld [vmem:[%s17503_s5 + $0x1e8] sm:$0xff]  ;;  %v10639_v63 = vld [vmem:[%s17503_s5 + $0x1f0] sm:$0xff] }
  0x20   :  { %17578 = vst [vmem:[#allocation69_spill] sm:$0xff] %v10624_v60  ;;  %17579 = vst [vmem:[#allocation70_spill] sm:$0xff] %v10629_v61  ;;  %v10644_v0 = vld [vmem:[%s17503_s5 + $0x1f8] sm:$0xff]  ;;  %v10649_v48 = vld [vmem:[%s17503_s5 + $0x200] sm:$0xff] }
  0x21   :  { %17580 = vst [vmem:[#allocation71_spill] sm:$0xff] %v10634_v62  ;;  %17581 = vst [vmem:[#allocation72_spill] sm:$0xff] %v10639_v63  ;;  %v10654_v47 = vld [vmem:[%s17503_s5 + $0x208] sm:$0xff]  ;;  %v10659_v16 = vld [vmem:[%s17503_s5 + $0x210] sm:$0xff] }
  0x22   :  { %17582 = vst [vmem:[#allocation73_spill] sm:$0xff] %v10644_v0  ;;  %17583 = vst [vmem:[#allocation74_spill] sm:$0xff] %v10649_v48  ;;  %v10664_v15 = vld [vmem:[%s17503_s5 + $0x218] sm:$0xff]  ;;  %v10669_v0 = vld [vmem:[%s17503_s5 + $0x220] sm:$0xff] }
  0x23   :  { %17584 = vst [vmem:[#allocation75_spill] sm:$0xff] %v10654_v47  ;;  %17585 = vst [vmem:[#allocation76_spill] sm:$0xff] %v10659_v16  ;;  %v10674_v48 = vld [vmem:[%s17503_s5 + $0x228] sm:$0xff]  ;;  %v10679_v47 = vld [vmem:[%s17503_s5 + $0x230] sm:$0xff] }
  0x24   :  { %17586 = vst [vmem:[#allocation77_spill] sm:$0xff] %v10664_v15  ;;  %17587 = vst [vmem:[#allocation78_spill] sm:$0xff] %v10669_v0  ;;  %v10684_v16 = vld [vmem:[%s17503_s5 + $0x238] sm:$0xff]  ;;  %v10689_v15 = vld [vmem:[%s17503_s5 + $0x240] sm:$0xff] }
  0x25   :  { %17588 = vst [vmem:[#allocation79_spill] sm:$0xff] %v10674_v48  ;;  %17589 = vst [vmem:[#allocation80_spill] sm:$0xff] %v10679_v47  ;;  %v10694_v0 = vld [vmem:[%s17503_s5 + $0x248] sm:$0xff]  ;;  %v10699_v48 = vld [vmem:[%s17503_s5 + $0x250] sm:$0xff] }
  0x26   :  { %17590 = vst [vmem:[#allocation81_spill] sm:$0xff] %v10684_v16  ;;  %17591 = vst [vmem:[#allocation82_spill] sm:$0xff] %v10689_v15  ;;  %v10704_v47 = vld [vmem:[%s17503_s5 + $0x258] sm:$0xff]  ;;  %v10709_v16 = vld [vmem:[%s17503_s5 + $0x260] sm:$0xff] }
  0x27   :  { %17592 = vst [vmem:[#allocation83_spill] sm:$0xff] %v10694_v0  ;;  %17593 = vst [vmem:[#allocation84_spill] sm:$0xff] %v10699_v48  ;;  %v10714_v15 = vld [vmem:[%s17503_s5 + $0x268] sm:$0xff]  ;;  %v10719_v0 = vld [vmem:[%s17503_s5 + $0x270] sm:$0xff] }
  0x28   :  { %17594 = vst [vmem:[#allocation85_spill] sm:$0xff] %v10704_v47  ;;  %17595 = vst [vmem:[#allocation86_spill] sm:$0xff] %v10709_v16  ;;  %v10724_v48 = vld [vmem:[%s17503_s5 + $0x278] sm:$0xff]  ;;  %v10729_v47 = vld [vmem:[%s17503_s5 + $0x280] sm:$0xff] }
  0x29   :  { %17596 = vst [vmem:[#allocation87_spill] sm:$0xff] %v10714_v15  ;;  %17597 = vst [vmem:[#allocation88_spill] sm:$0xff] %v10719_v0  ;;  %v10734_v16 = vld [vmem:[%s17503_s5 + $0x288] sm:$0xff]  ;;  %v10739_v15 = vld [vmem:[%s17503_s5 + $0x290] sm:$0xff] }
  0x2a   :  { %17598 = vst [vmem:[#allocation89_spill] sm:$0xff] %v10724_v48  ;;  %17599 = vst [vmem:[#allocation90_spill] sm:$0xff] %v10729_v47  ;;  %v10744_v0 = vld [vmem:[%s17503_s5 + $0x298] sm:$0xff]  ;;  %v10749_v48 = vld [vmem:[%s17503_s5 + $0x2a0] sm:$0xff] }
  0x2b   :  { %17600 = vst [vmem:[#allocation91_spill] sm:$0xff] %v10734_v16  ;;  %17601 = vst [vmem:[#allocation92_spill] sm:$0xff] %v10739_v15  ;;  %v10754_v47 = vld [vmem:[%s17503_s5 + $0x2a8] sm:$0xff]  ;;  %v10759_v16 = vld [vmem:[%s17503_s5 + $0x2b0] sm:$0xff] }
  0x2c   :  { %17602 = vst [vmem:[#allocation93_spill] sm:$0xff] %v10744_v0  ;;  %17603 = vst [vmem:[#allocation94_spill] sm:$0xff] %v10749_v48  ;;  %v10764_v15 = vld [vmem:[%s17503_s5 + $0x2b8] sm:$0xff]  ;;  %v10769_v0 = vld [vmem:[%s17503_s5 + $0x2c0] sm:$0xff] }
  0x2d   :  { %17604 = vst [vmem:[#allocation95_spill] sm:$0xff] %v10754_v47  ;;  %17605 = vst [vmem:[#allocation96_spill] sm:$0xff] %v10759_v16  ;;  %v10774_v48 = vld [vmem:[%s17503_s5 + $0x2c8] sm:$0xff]  ;;  %v10779_v47 = vld [vmem:[%s17503_s5 + $0x2d0] sm:$0xff] }
  0x2e   :  { %17606 = vst [vmem:[#allocation97_spill] sm:$0xff] %v10764_v15  ;;  %17607 = vst [vmem:[#allocation98_spill] sm:$0xff] %v10769_v0  ;;  %v10784_v16 = vld [vmem:[%s17503_s5 + $0x2d8] sm:$0xff]  ;;  %v10789_v15 = vld [vmem:[%s17503_s5 + $0x2e0] sm:$0xff] }
  0x2f   :  { %17608 = vst [vmem:[#allocation99_spill] sm:$0xff] %v10774_v48  ;;  %17609 = vst [vmem:[#allocation100_spill] sm:$0xff] %v10779_v47  ;;  %v10794_v0 = vld [vmem:[%s17503_s5 + $0x2e8] sm:$0xff]  ;;  %v10799_v48 = vld [vmem:[%s17503_s5 + $0x2f0] sm:$0xff] }
  0x30   :  { %17610 = vst [vmem:[#allocation101_spill] sm:$0xff] %v10784_v16  ;;  %17611 = vst [vmem:[#allocation102_spill] sm:$0xff] %v10789_v15  ;;  %v10804_v47 = vld [vmem:[%s17503_s5 + $0x2f8] sm:$0xff]  ;;  %v10809_v16 = vld [vmem:[%s17503_s5 + $0x300] sm:$0xff] }
  0x31   :  { %17612 = vst [vmem:[#allocation103_spill] sm:$0xff] %v10794_v0  ;;  %17613 = vst [vmem:[#allocation104_spill] sm:$0xff] %v10799_v48  ;;  %v10814_v15 = vld [vmem:[%s17503_s5 + $0x308] sm:$0xff]  ;;  %v10819_v0 = vld [vmem:[%s17503_s5 + $0x310] sm:$0xff] }
  0x32   :  { %17614 = vst [vmem:[#allocation105_spill] sm:$0xff] %v10804_v47  ;;  %17615 = vst [vmem:[#allocation106_spill] sm:$0xff] %v10809_v16  ;;  %v10824_v48 = vld [vmem:[%s17503_s5 + $0x318] sm:$0xff]  ;;  %v10829_v47 = vld [vmem:[%s17503_s5 + $0x320] sm:$0xff] }
  0x33   :  { %17616 = vst [vmem:[#allocation107_spill] sm:$0xff] %v10814_v15  ;;  %17617 = vst [vmem:[#allocation108_spill] sm:$0xff] %v10819_v0  ;;  %v10834_v16 = vld [vmem:[%s17503_s5 + $0x328] sm:$0xff]  ;;  %v10839_v15 = vld [vmem:[%s17503_s5 + $0x330] sm:$0xff] }
  0x34   :  { %17618 = vst [vmem:[#allocation109_spill] sm:$0xff] %v10824_v48  ;;  %17619 = vst [vmem:[#allocation110_spill] sm:$0xff] %v10829_v47  ;;  %v10844_v0 = vld [vmem:[%s17503_s5 + $0x338] sm:$0xff]  ;;  %v10849_v48 = vld [vmem:[%s17503_s5 + $0x340] sm:$0xff] }
  0x35   :  { %17620 = vst [vmem:[#allocation111_spill] sm:$0xff] %v10834_v16  ;;  %17621 = vst [vmem:[#allocation112_spill] sm:$0xff] %v10839_v15  ;;  %v10854_v47 = vld [vmem:[%s17503_s5 + $0x348] sm:$0xff]  ;;  %v10859_v16 = vld [vmem:[%s17503_s5 + $0x350] sm:$0xff] }
  0x36   :  { %17622 = vst [vmem:[#allocation113_spill] sm:$0xff] %v10844_v0  ;;  %17623 = vst [vmem:[#allocation114_spill] sm:$0xff] %v10849_v48  ;;  %v10864_v15 = vld [vmem:[%s17503_s5 + $0x358] sm:$0xff]  ;;  %v10869_v0 = vld [vmem:[%s17503_s5 + $0x360] sm:$0xff] }
  0x37   :  { %17624 = vst [vmem:[#allocation115_spill] sm:$0xff] %v10854_v47  ;;  %17625 = vst [vmem:[#allocation116_spill] sm:$0xff] %v10859_v16  ;;  %v10874_v48 = vld [vmem:[%s17503_s5 + $0x368] sm:$0xff]  ;;  %v10879_v47 = vld [vmem:[%s17503_s5 + $0x370] sm:$0xff] }
  0x38   :  { %17626 = vst [vmem:[#allocation117_spill] sm:$0xff] %v10864_v15  ;;  %17627 = vst [vmem:[#allocation118_spill] sm:$0xff] %v10869_v0  ;;  %v10884_v16 = vld [vmem:[%s17503_s5 + $0x378] sm:$0xff]  ;;  %v10889_v15 = vld [vmem:[%s17503_s5 + $0x380] sm:$0xff] }
  0x39   :  { %17628 = vst [vmem:[#allocation119_spill] sm:$0xff] %v10874_v48  ;;  %17629 = vst [vmem:[#allocation120_spill] sm:$0xff] %v10879_v47  ;;  %v10894_v0 = vld [vmem:[%s17503_s5 + $0x388] sm:$0xff]  ;;  %v10899_v48 = vld [vmem:[%s17503_s5 + $0x390] sm:$0xff] }
  0x3a   :  { %17630 = vst [vmem:[#allocation121_spill] sm:$0xff] %v10884_v16  ;;  %17631 = vst [vmem:[#allocation122_spill] sm:$0xff] %v10889_v15  ;;  %v10904_v47 = vld [vmem:[%s17503_s5 + $0x398] sm:$0xff]  ;;  %v10909_v16 = vld [vmem:[%s17503_s5 + $0x3a0] sm:$0xff] }
  0x3b   :  { %17632 = vst [vmem:[#allocation123_spill] sm:$0xff] %v10894_v0  ;;  %17633 = vst [vmem:[#allocation124_spill] sm:$0xff] %v10899_v48  ;;  %v10914_v15 = vld [vmem:[%s17503_s5 + $0x3a8] sm:$0xff]  ;;  %v10919_v0 = vld [vmem:[%s17503_s5 + $0x3b0] sm:$0xff] }
  0x3c   :  { %17634 = vst [vmem:[#allocation125_spill] sm:$0xff] %v10904_v47  ;;  %17635 = vst [vmem:[#allocation126_spill] sm:$0xff] %v10909_v16  ;;  %v10924_v48 = vld [vmem:[%s17503_s5 + $0x3b8] sm:$0xff]  ;;  %v10929_v47 = vld [vmem:[%s17503_s5 + $0x3c0] sm:$0xff] }
  0x3d   :  { %17636 = vst [vmem:[#allocation127_spill] sm:$0xff] %v10914_v15  ;;  %17637 = vst [vmem:[#allocation128_spill] sm:$0xff] %v10919_v0  ;;  %v10934_v16 = vld [vmem:[%s17503_s5 + $0x3c8] sm:$0xff]  ;;  %v10939_v15 = vld [vmem:[%s17503_s5 + $0x3d0] sm:$0xff] }
  0x3e   :  { %17638 = vst [vmem:[#allocation129_spill] sm:$0xff] %v10924_v48  ;;  %17639 = vst [vmem:[#allocation130_spill] sm:$0xff] %v10929_v47  ;;  %v10944_v0 = vld [vmem:[%s17503_s5 + $0x3d8] sm:$0xff]  ;;  %v10949_v48 = vld [vmem:[%s17503_s5 + $0x3e0] sm:$0xff] }
  0x3f   :  { %17640 = vst [vmem:[#allocation131_spill] sm:$0xff] %v10934_v16  ;;  %17641 = vst [vmem:[#allocation132_spill] sm:$0xff] %v10939_v15  ;;  %v10954_v47 = vld [vmem:[%s17503_s5 + $0x3e8] sm:$0xff]  ;;  %v10959_v16 = vld [vmem:[%s17503_s5 + $0x3f0] sm:$0xff] }
  0x40   :  { %17642 = vst [vmem:[#allocation133_spill] sm:$0xff] %v10944_v0  ;;  %17643 = vst [vmem:[#allocation134_spill] sm:$0xff] %v10949_v48  ;;  %v10964_v15 = vld [vmem:[%s17503_s5 + $0x3f8] sm:$0xff]  ;;  %v10969_v0 = vld [vmem:[%s17503_s5 + $0x400] sm:$0xff] }
  0x41   :  { %17644 = vst [vmem:[#allocation135_spill] sm:$0xff] %v10954_v47  ;;  %17645 = vst [vmem:[#allocation136_spill] sm:$0xff] %v10959_v16  ;;  %v10974_v48 = vld [vmem:[%s17503_s5 + $0x408] sm:$0xff]  ;;  %v10979_v47 = vld [vmem:[%s17503_s5 + $0x410] sm:$0xff] }
  0x42   :  { %17646 = vst [vmem:[#allocation137_spill] sm:$0xff] %v10964_v15  ;;  %17647 = vst [vmem:[#allocation138_spill] sm:$0xff] %v10969_v0  ;;  %v10984_v16 = vld [vmem:[%s17503_s5 + $0x418] sm:$0xff]  ;;  %v10989_v15 = vld [vmem:[%s17503_s5 + $0x420] sm:$0xff] }
  0x43   :  { %17648 = vst [vmem:[#allocation139_spill] sm:$0xff] %v10974_v48  ;;  %17649 = vst [vmem:[#allocation140_spill] sm:$0xff] %v10979_v47  ;;  %v10994_v0 = vld [vmem:[%s17503_s5 + $0x428] sm:$0xff]  ;;  %v10999_v48 = vld [vmem:[%s17503_s5 + $0x430] sm:$0xff] }
  0x44   :  { %17650 = vst [vmem:[#allocation141_spill] sm:$0xff] %v10984_v16  ;;  %17651 = vst [vmem:[#allocation142_spill] sm:$0xff] %v10989_v15  ;;  %v11004_v47 = vld [vmem:[%s17503_s5 + $0x438] sm:$0xff]  ;;  %v11009_v16 = vld [vmem:[%s17503_s5 + $0x440] sm:$0xff] }
  0x45   :  { %17652 = vst [vmem:[#allocation143_spill] sm:$0xff] %v10994_v0  ;;  %17653 = vst [vmem:[#allocation144_spill] sm:$0xff] %v10999_v48  ;;  %v11014_v15 = vld [vmem:[%s17503_s5 + $0x448] sm:$0xff]  ;;  %v11019_v0 = vld [vmem:[%s17503_s5 + $0x450] sm:$0xff] }
  0x46   :  { %17654 = vst [vmem:[#allocation145_spill] sm:$0xff] %v11004_v47  ;;  %17655 = vst [vmem:[#allocation146_spill] sm:$0xff] %v11009_v16  ;;  %v11024_v48 = vld [vmem:[%s17503_s5 + $0x458] sm:$0xff]  ;;  %v11029_v47 = vld [vmem:[%s17503_s5 + $0x460] sm:$0xff] }
  0x47   :  { %17656 = vst [vmem:[#allocation147_spill] sm:$0xff] %v11014_v15  ;;  %17657 = vst [vmem:[#allocation148_spill] sm:$0xff] %v11019_v0  ;;  %v11034_v16 = vld [vmem:[%s17503_s5 + $0x468] sm:$0xff]  ;;  %v11039_v15 = vld [vmem:[%s17503_s5 + $0x470] sm:$0xff] }
  0x48   :  { %17658 = vst [vmem:[#allocation149_spill] sm:$0xff] %v11024_v48  ;;  %17659 = vst [vmem:[#allocation150_spill] sm:$0xff] %v11029_v47  ;;  %v11044_v0 = vld [vmem:[%s17503_s5 + $0x478] sm:$0xff]  ;;  %v11049_v48 = vld [vmem:[%s17503_s5 + $0x480] sm:$0xff] }
  0x49   :  { %17660 = vst [vmem:[#allocation151_spill] sm:$0xff] %v11034_v16  ;;  %17661 = vst [vmem:[#allocation152_spill] sm:$0xff] %v11039_v15  ;;  %v11054_v47 = vld [vmem:[%s17503_s5 + $0x488] sm:$0xff]  ;;  %v11059_v16 = vld [vmem:[%s17503_s5 + $0x490] sm:$0xff] }
  0x4a   :  { %17662 = vst [vmem:[#allocation153_spill] sm:$0xff] %v11044_v0  ;;  %17663 = vst [vmem:[#allocation154_spill] sm:$0xff] %v11049_v48  ;;  %v11064_v15 = vld [vmem:[%s17503_s5 + $0x498] sm:$0xff]  ;;  %v11069_v0 = vld [vmem:[%s17503_s5 + $0x4a0] sm:$0xff] }
  0x4b   :  { %17664 = vst [vmem:[#allocation155_spill] sm:$0xff] %v11054_v47  ;;  %17665 = vst [vmem:[#allocation156_spill] sm:$0xff] %v11059_v16  ;;  %v11074_v48 = vld [vmem:[%s17503_s5 + $0x4a8] sm:$0xff]  ;;  %v11079_v47 = vld [vmem:[%s17503_s5 + $0x4b0] sm:$0xff] }
  0x4c   :  { %17666 = vst [vmem:[#allocation157_spill] sm:$0xff] %v11064_v15  ;;  %17667 = vst [vmem:[#allocation158_spill] sm:$0xff] %v11069_v0  ;;  %v11084_v16 = vld [vmem:[%s17503_s5 + $0x4b8] sm:$0xff]  ;;  %v11089_v15 = vld [vmem:[%s17503_s5 + $0x4c0] sm:$0xff] }
  0x4d   :  { %17668 = vst [vmem:[#allocation159_spill] sm:$0xff] %v11074_v48  ;;  %17669 = vst [vmem:[#allocation160_spill] sm:$0xff] %v11079_v47  ;;  %v11094_v0 = vld [vmem:[%s17503_s5 + $0x4c8] sm:$0xff]  ;;  %v11099_v48 = vld [vmem:[%s17503_s5 + $0x4d0] sm:$0xff] }
  0x4e   :  { %17670 = vst [vmem:[#allocation161_spill] sm:$0xff] %v11084_v16  ;;  %17671 = vst [vmem:[#allocation162_spill] sm:$0xff] %v11089_v15  ;;  %v11104_v47 = vld [vmem:[%s17503_s5 + $0x4d8] sm:$0xff]  ;;  %v11109_v16 = vld [vmem:[%s17503_s5 + $0x4e0] sm:$0xff] }
  0x4f   :  { %17672 = vst [vmem:[#allocation163_spill] sm:$0xff] %v11094_v0  ;;  %17673 = vst [vmem:[#allocation164_spill] sm:$0xff] %v11099_v48  ;;  %v11114_v15 = vld [vmem:[%s17503_s5 + $0x4e8] sm:$0xff]  ;;  %v11119_v0 = vld [vmem:[%s17503_s5 + $0x4f0] sm:$0xff] }
  0x50   :  { %17674 = vst [vmem:[#allocation165_spill] sm:$0xff] %v11104_v47  ;;  %17675 = vst [vmem:[#allocation166_spill] sm:$0xff] %v11109_v16  ;;  %v11124_v48 = vld [vmem:[%s17503_s5 + $0x4f8] sm:$0xff]  ;;  %v11129_v47 = vld [vmem:[%s17503_s5 + $0x500] sm:$0xff] }
  0x51   :  { %17676 = vst [vmem:[#allocation167_spill] sm:$0xff] %v11114_v15  ;;  %17677 = vst [vmem:[#allocation168_spill] sm:$0xff] %v11119_v0  ;;  %v11134_v16 = vld [vmem:[%s17503_s5 + $0x508] sm:$0xff]  ;;  %v11139_v15 = vld [vmem:[%s17503_s5 + $0x510] sm:$0xff] }
  0x52   :  { %17678 = vst [vmem:[#allocation169_spill] sm:$0xff] %v11124_v48  ;;  %17679 = vst [vmem:[#allocation170_spill] sm:$0xff] %v11129_v47  ;;  %v11144_v0 = vld [vmem:[%s17503_s5 + $0x518] sm:$0xff]  ;;  %v11149_v48 = vld [vmem:[%s17503_s5 + $0x520] sm:$0xff] }
  0x53   :  { %17680 = vst [vmem:[#allocation171_spill] sm:$0xff] %v11134_v16  ;;  %17681 = vst [vmem:[#allocation172_spill] sm:$0xff] %v11139_v15  ;;  %v11154_v47 = vld [vmem:[%s17503_s5 + $0x528] sm:$0xff]  ;;  %v11159_v16 = vld [vmem:[%s17503_s5 + $0x530] sm:$0xff] }
  0x54   :  { %17682 = vst [vmem:[#allocation173_spill] sm:$0xff] %v11144_v0  ;;  %17683 = vst [vmem:[#allocation174_spill] sm:$0xff] %v11149_v48  ;;  %v11164_v15 = vld [vmem:[%s17503_s5 + $0x538] sm:$0xff]  ;;  %v11169_v0 = vld [vmem:[%s17503_s5 + $0x540] sm:$0xff] }
  0x55   :  { %17684 = vst [vmem:[#allocation175_spill] sm:$0xff] %v11154_v47  ;;  %17685 = vst [vmem:[#allocation176_spill] sm:$0xff] %v11159_v16  ;;  %v11174_v48 = vld [vmem:[%s17503_s5 + $0x548] sm:$0xff]  ;;  %v11179_v47 = vld [vmem:[%s17503_s5 + $0x550] sm:$0xff] }
  0x56   :  { %17686 = vst [vmem:[#allocation177_spill] sm:$0xff] %v11164_v15  ;;  %17687 = vst [vmem:[#allocation178_spill] sm:$0xff] %v11169_v0  ;;  %v11184_v16 = vld [vmem:[%s17503_s5 + $0x558] sm:$0xff]  ;;  %v11189_v15 = vld [vmem:[%s17503_s5 + $0x560] sm:$0xff] }
  0x57   :  { %17688 = vst [vmem:[#allocation179_spill] sm:$0xff] %v11174_v48  ;;  %17689 = vst [vmem:[#allocation180_spill] sm:$0xff] %v11179_v47  ;;  %v11194_v0 = vld [vmem:[%s17503_s5 + $0x568] sm:$0xff]  ;;  %v11199_v48 = vld [vmem:[%s17503_s5 + $0x570] sm:$0xff] }
  0x58   :  { %17690 = vst [vmem:[#allocation181_spill] sm:$0xff] %v11184_v16  ;;  %17691 = vst [vmem:[#allocation182_spill] sm:$0xff] %v11189_v15  ;;  %v11204_v47 = vld [vmem:[%s17503_s5 + $0x578] sm:$0xff]  ;;  %v11209_v16 = vld [vmem:[%s17503_s5 + $0x580] sm:$0xff] }
  0x59   :  { %17692 = vst [vmem:[#allocation183_spill] sm:$0xff] %v11194_v0  ;;  %17693 = vst [vmem:[#allocation184_spill] sm:$0xff] %v11199_v48  ;;  %v11214_v15 = vld [vmem:[%s17503_s5 + $0x588] sm:$0xff]  ;;  %v11219_v0 = vld [vmem:[%s17503_s5 + $0x590] sm:$0xff] }
  0x5a   :  { %17694 = vst [vmem:[#allocation185_spill] sm:$0xff] %v11204_v47  ;;  %17695 = vst [vmem:[#allocation186_spill] sm:$0xff] %v11209_v16  ;;  %v11224_v48 = vld [vmem:[%s17503_s5 + $0x598] sm:$0xff]  ;;  %v11229_v47 = vld [vmem:[%s17503_s5 + $0x5a0] sm:$0xff] }
  0x5b   :  { %17696 = vst [vmem:[#allocation187_spill] sm:$0xff] %v11214_v15  ;;  %17697 = vst [vmem:[#allocation188_spill] sm:$0xff] %v11219_v0  ;;  %v11234_v16 = vld [vmem:[%s17503_s5 + $0x5a8] sm:$0xff]  ;;  %v11239_v15 = vld [vmem:[%s17503_s5 + $0x5b0] sm:$0xff] }
  0x5c   :  { %17698 = vst [vmem:[#allocation189_spill] sm:$0xff] %v11224_v48  ;;  %17699 = vst [vmem:[#allocation190_spill] sm:$0xff] %v11229_v47  ;;  %v11244_v0 = vld [vmem:[%s17503_s5 + $0x5b8] sm:$0xff]  ;;  %v11249_v48 = vld [vmem:[%s17503_s5 + $0x5c0] sm:$0xff] }
  0x5d   :  { %17700 = vst [vmem:[#allocation191_spill] sm:$0xff] %v11234_v16  ;;  %17701 = vst [vmem:[#allocation192_spill] sm:$0xff] %v11239_v15  ;;  %v11254_v47 = vld [vmem:[%s17503_s5 + $0x5c8] sm:$0xff]  ;;  %v11259_v16 = vld [vmem:[%s17503_s5 + $0x5d0] sm:$0xff] }
  0x5e   :  { %17702 = vst [vmem:[#allocation193_spill] sm:$0xff] %v11244_v0  ;;  %17703 = vst [vmem:[#allocation194_spill] sm:$0xff] %v11249_v48  ;;  %v11264_v15 = vld [vmem:[%s17503_s5 + $0x5d8] sm:$0xff]  ;;  %v11269_v0 = vld [vmem:[%s17503_s5 + $0x5e0] sm:$0xff] }
  0x5f   :  { %17704 = vst [vmem:[#allocation195_spill] sm:$0xff] %v11254_v47  ;;  %17705 = vst [vmem:[#allocation196_spill] sm:$0xff] %v11259_v16  ;;  %v11274_v48 = vld [vmem:[%s17503_s5 + $0x5e8] sm:$0xff]  ;;  %v11279_v47 = vld [vmem:[%s17503_s5 + $0x5f0] sm:$0xff] }
  0x60   :  { %17706 = vst [vmem:[#allocation197_spill] sm:$0xff] %v11264_v15  ;;  %17707 = vst [vmem:[#allocation198_spill] sm:$0xff] %v11269_v0  ;;  %v11284_v16 = vld [vmem:[%s17503_s5 + $0x5f8] sm:$0xff]  ;;  %v11289_v15 = vld [vmem:[%s17503_s5 + $0x600] sm:$0xff] }
  0x61   :  { %17708 = vst [vmem:[#allocation199_spill] sm:$0xff] %v11274_v48  ;;  %17709 = vst [vmem:[#allocation200_spill] sm:$0xff] %v11279_v47  ;;  %v11294_v0 = vld [vmem:[%s17503_s5 + $0x608] sm:$0xff]  ;;  %v11299_v48 = vld [vmem:[%s17503_s5 + $0x610] sm:$0xff] }
  0x62   :  { %17710 = vst [vmem:[#allocation201_spill] sm:$0xff] %v11284_v16  ;;  %17711 = vst [vmem:[#allocation202_spill] sm:$0xff] %v11289_v15  ;;  %v11304_v47 = vld [vmem:[%s17503_s5 + $0x618] sm:$0xff]  ;;  %v11309_v16 = vld [vmem:[%s17503_s5 + $0x620] sm:$0xff] }
  0x63   :  { %17712 = vst [vmem:[#allocation203_spill] sm:$0xff] %v11294_v0  ;;  %17713 = vst [vmem:[#allocation204_spill] sm:$0xff] %v11299_v48  ;;  %v11314_v15 = vld [vmem:[%s17503_s5 + $0x628] sm:$0xff]  ;;  %v11319_v0 = vld [vmem:[%s17503_s5 + $0x630] sm:$0xff] }
  0x64   :  { %17714 = vst [vmem:[#allocation205_spill] sm:$0xff] %v11304_v47  ;;  %17715 = vst [vmem:[#allocation206_spill] sm:$0xff] %v11309_v16  ;;  %v11324_v48 = vld [vmem:[%s17503_s5 + $0x638] sm:$0xff]  ;;  %v11329_v47 = vld [vmem:[%s17503_s5 + $0x640] sm:$0xff] }
  0x65   :  { %17716 = vst [vmem:[#allocation207_spill] sm:$0xff] %v11314_v15  ;;  %17717 = vst [vmem:[#allocation208_spill] sm:$0xff] %v11319_v0  ;;  %v11334_v16 = vld [vmem:[%s17503_s5 + $0x648] sm:$0xff]  ;;  %v11339_v15 = vld [vmem:[%s17503_s5 + $0x650] sm:$0xff] }
  0x66   :  { %17718 = vst [vmem:[#allocation209_spill] sm:$0xff] %v11324_v48  ;;  %17719 = vst [vmem:[#allocation210_spill] sm:$0xff] %v11329_v47  ;;  %v11344_v0 = vld [vmem:[%s17503_s5 + $0x658] sm:$0xff]  ;;  %v11349_v48 = vld [vmem:[%s17503_s5 + $0x660] sm:$0xff] }
  0x67   :  { %17720 = vst [vmem:[#allocation211_spill] sm:$0xff] %v11334_v16  ;;  %17721 = vst [vmem:[#allocation212_spill] sm:$0xff] %v11339_v15  ;;  %v11354_v47 = vld [vmem:[%s17503_s5 + $0x668] sm:$0xff]  ;;  %v11359_v16 = vld [vmem:[%s17503_s5 + $0x670] sm:$0xff] }
  0x68   :  { %17722 = vst [vmem:[#allocation213_spill] sm:$0xff] %v11344_v0  ;;  %17723 = vst [vmem:[#allocation214_spill] sm:$0xff] %v11349_v48  ;;  %v11364_v15 = vld [vmem:[%s17503_s5 + $0x678] sm:$0xff]  ;;  %v11369_v0 = vld [vmem:[%s17503_s5 + $0x680] sm:$0xff] }
  0x69   :  { %17724 = vst [vmem:[#allocation215_spill] sm:$0xff] %v11354_v47  ;;  %17725 = vst [vmem:[#allocation216_spill] sm:$0xff] %v11359_v16  ;;  %v11374_v48 = vld [vmem:[%s17503_s5 + $0x688] sm:$0xff]  ;;  %v11379_v47 = vld [vmem:[%s17503_s5 + $0x690] sm:$0xff] }
  0x6a   :  { %17726 = vst [vmem:[#allocation217_spill] sm:$0xff] %v11364_v15  ;;  %17727 = vst [vmem:[#allocation218_spill] sm:$0xff] %v11369_v0  ;;  %v11384_v16 = vld [vmem:[%s17503_s5 + $0x698] sm:$0xff]  ;;  %v11389_v15 = vld [vmem:[%s17503_s5 + $0x6a0] sm:$0xff] }
  0x6b   :  { %17728 = vst [vmem:[#allocation219_spill] sm:$0xff] %v11374_v48  ;;  %17729 = vst [vmem:[#allocation220_spill] sm:$0xff] %v11379_v47  ;;  %v11394_v0 = vld [vmem:[%s17503_s5 + $0x6a8] sm:$0xff]  ;;  %v11399_v48 = vld [vmem:[%s17503_s5 + $0x6b0] sm:$0xff] }
  0x6c   :  { %17730 = vst [vmem:[#allocation221_spill] sm:$0xff] %v11384_v16  ;;  %17731 = vst [vmem:[#allocation222_spill] sm:$0xff] %v11389_v15  ;;  %v11404_v47 = vld [vmem:[%s17503_s5 + $0x6b8] sm:$0xff]  ;;  %v11409_v16 = vld [vmem:[%s17503_s5 + $0x6c0] sm:$0xff] }
  0x6d   :  { %17732 = vst [vmem:[#allocation223_spill] sm:$0xff] %v11394_v0  ;;  %17733 = vst [vmem:[#allocation224_spill] sm:$0xff] %v11399_v48  ;;  %v11414_v15 = vld [vmem:[%s17503_s5 + $0x6c8] sm:$0xff]  ;;  %v11419_v0 = vld [vmem:[%s17503_s5 + $0x6d0] sm:$0xff] }
  0x6e   :  { %17734 = vst [vmem:[#allocation225_spill] sm:$0xff] %v11404_v47  ;;  %17735 = vst [vmem:[#allocation226_spill] sm:$0xff] %v11409_v16  ;;  %v11424_v48 = vld [vmem:[%s17503_s5 + $0x6d8] sm:$0xff]  ;;  %v11429_v47 = vld [vmem:[%s17503_s5 + $0x6e0] sm:$0xff] }
  0x6f   :  { %17736 = vst [vmem:[#allocation227_spill] sm:$0xff] %v11414_v15  ;;  %17737 = vst [vmem:[#allocation228_spill] sm:$0xff] %v11419_v0  ;;  %v11434_v16 = vld [vmem:[%s17503_s5 + $0x6e8] sm:$0xff]  ;;  %v11439_v15 = vld [vmem:[%s17503_s5 + $0x6f0] sm:$0xff] }
  0x70   :  { %17738 = vst [vmem:[#allocation229_spill] sm:$0xff] %v11424_v48  ;;  %17739 = vst [vmem:[#allocation230_spill] sm:$0xff] %v11429_v47  ;;  %v11444_v0 = vld [vmem:[%s17503_s5 + $0x6f8] sm:$0xff]  ;;  %v11449_v48 = vld [vmem:[%s17503_s5 + $0x700] sm:$0xff] }
  0x71   :  { %17740 = vst [vmem:[#allocation231_spill] sm:$0xff] %v11434_v16  ;;  %17741 = vst [vmem:[#allocation232_spill] sm:$0xff] %v11439_v15  ;;  %v11454_v47 = vld [vmem:[%s17503_s5 + $0x708] sm:$0xff]  ;;  %v11459_v16 = vld [vmem:[%s17503_s5 + $0x710] sm:$0xff] }
  0x72   :  { %17742 = vst [vmem:[#allocation233_spill] sm:$0xff] %v11444_v0  ;;  %17743 = vst [vmem:[#allocation234_spill] sm:$0xff] %v11449_v48  ;;  %v11464_v15 = vld [vmem:[%s17503_s5 + $0x718] sm:$0xff]  ;;  %v11469_v0 = vld [vmem:[%s17503_s5 + $0x720] sm:$0xff] }
  0x73   :  { %17744 = vst [vmem:[#allocation235_spill] sm:$0xff] %v11454_v47  ;;  %17745 = vst [vmem:[#allocation236_spill] sm:$0xff] %v11459_v16  ;;  %v11474_v48 = vld [vmem:[%s17503_s5 + $0x728] sm:$0xff]  ;;  %v11479_v47 = vld [vmem:[%s17503_s5 + $0x730] sm:$0xff] }
  0x74   :  { %17746 = vst [vmem:[#allocation237_spill] sm:$0xff] %v11464_v15  ;;  %17747 = vst [vmem:[#allocation238_spill] sm:$0xff] %v11469_v0  ;;  %v11484_v16 = vld [vmem:[%s17503_s5 + $0x738] sm:$0xff]  ;;  %v11489_v15 = vld [vmem:[%s17503_s5 + $0x740] sm:$0xff] }
  0x75   :  { %17748 = vst [vmem:[#allocation239_spill] sm:$0xff] %v11474_v48  ;;  %17749 = vst [vmem:[#allocation240_spill] sm:$0xff] %v11479_v47  ;;  %v11494_v0 = vld [vmem:[%s17503_s5 + $0x748] sm:$0xff]  ;;  %v11499_v48 = vld [vmem:[%s17503_s5 + $0x750] sm:$0xff] }
  0x76   :  { %17750 = vst [vmem:[#allocation241_spill] sm:$0xff] %v11484_v16  ;;  %17751 = vst [vmem:[#allocation242_spill] sm:$0xff] %v11489_v15  ;;  %v11504_v47 = vld [vmem:[%s17503_s5 + $0x758] sm:$0xff]  ;;  %v11509_v16 = vld [vmem:[%s17503_s5 + $0x760] sm:$0xff] }
  0x77   :  { %17752 = vst [vmem:[#allocation243_spill] sm:$0xff] %v11494_v0  ;;  %17753 = vst [vmem:[#allocation244_spill] sm:$0xff] %v11499_v48  ;;  %v11514_v15 = vld [vmem:[%s17503_s5 + $0x768] sm:$0xff]  ;;  %v11519_v0 = vld [vmem:[%s17503_s5 + $0x770] sm:$0xff] }
  0x78   :  { %17754 = vst [vmem:[#allocation245_spill] sm:$0xff] %v11504_v47  ;;  %17755 = vst [vmem:[#allocation246_spill] sm:$0xff] %v11509_v16  ;;  %v11524_v48 = vld [vmem:[%s17503_s5 + $0x778] sm:$0xff]  ;;  %v11529_v47 = vld [vmem:[%s17503_s5 + $0x780] sm:$0xff] }
  0x79   :  { %17756 = vst [vmem:[#allocation247_spill] sm:$0xff] %v11514_v15  ;;  %17757 = vst [vmem:[#allocation248_spill] sm:$0xff] %v11519_v0  ;;  %v11534_v16 = vld [vmem:[%s17503_s5 + $0x788] sm:$0xff]  ;;  %v11539_v15 = vld [vmem:[%s17503_s5 + $0x790] sm:$0xff] }
  0x7a   :  { %17758 = vst [vmem:[#allocation249_spill] sm:$0xff] %v11524_v48  ;;  %17759 = vst [vmem:[#allocation250_spill] sm:$0xff] %v11529_v47  ;;  %v11544_v0 = vld [vmem:[%s17503_s5 + $0x798] sm:$0xff]  ;;  %v11549_v48 = vld [vmem:[%s17503_s5 + $0x7a0] sm:$0xff] }
  0x7b   :  { %17760 = vst [vmem:[#allocation251_spill] sm:$0xff] %v11534_v16  ;;  %17761 = vst [vmem:[#allocation252_spill] sm:$0xff] %v11539_v15  ;;  %v11554_v47 = vld [vmem:[%s17503_s5 + $0x7a8] sm:$0xff]  ;;  %v11559_v16 = vld [vmem:[%s17503_s5 + $0x7b0] sm:$0xff] }
  0x7c   :  { %17762 = vst [vmem:[#allocation253_spill] sm:$0xff] %v11544_v0  ;;  %17763 = vst [vmem:[#allocation254_spill] sm:$0xff] %v11549_v48  ;;  %v11564_v15 = vld [vmem:[%s17503_s5 + $0x7b8] sm:$0xff]  ;;  %v11569_v0 = vld [vmem:[%s17503_s5 + $0x7c0] sm:$0xff] }
  0x7d   :  { %17764 = vst [vmem:[#allocation255_spill] sm:$0xff] %v11554_v47  ;;  %17765 = vst [vmem:[#allocation256_spill] sm:$0xff] %v11559_v16  ;;  %v11574_v48 = vld [vmem:[%s17503_s5 + $0x7c8] sm:$0xff]  ;;  %v11579_v47 = vld [vmem:[%s17503_s5 + $0x7d0] sm:$0xff] }
  0x7e   :  { %17766 = vst [vmem:[#allocation257_spill] sm:$0xff] %v11564_v15  ;;  %17767 = vst [vmem:[#allocation258_spill] sm:$0xff] %v11569_v0  ;;  %v11584_v16 = vld [vmem:[%s17503_s5 + $0x7d8] sm:$0xff]  ;;  %v11589_v15 = vld [vmem:[%s17503_s5 + $0x7e0] sm:$0xff] }
  0x7f   :  { %17768 = vst [vmem:[#allocation259_spill] sm:$0xff] %v11574_v48  ;;  %17769 = vst [vmem:[#allocation260_spill] sm:$0xff] %v11579_v47  ;;  %v11594_v0 = vld [vmem:[%s17503_s5 + $0x7e8] sm:$0xff]  ;;  %v11599_v48 = vld [vmem:[%s17503_s5 + $0x7f0] sm:$0xff] }
  0x80   :  { %17770 = vst [vmem:[#allocation261_spill] sm:$0xff] %v11584_v16  ;;  %17771 = vst [vmem:[#allocation262_spill] sm:$0xff] %v11589_v15  ;;  %v11604_v47 = vld [vmem:[%s17503_s5 + $0x7f8] sm:$0xff]  ;;  %v11609_v16 = vld [vmem:[%s17503_s5 + $0x800] sm:$0xff] }
  0x81   :  { %17772 = vst [vmem:[#allocation263_spill] sm:$0xff] %v11594_v0  ;;  %17773 = vst [vmem:[#allocation264_spill] sm:$0xff] %v11599_v48  ;;  %v11614_v15 = vld [vmem:[%s17503_s5 + $0x808] sm:$0xff]  ;;  %v11619_v0 = vld [vmem:[%s17503_s5 + $0x810] sm:$0xff] }
  0x82   :  { %17774 = vst [vmem:[#allocation265_spill] sm:$0xff] %v11604_v47  ;;  %17775 = vst [vmem:[#allocation266_spill] sm:$0xff] %v11609_v16  ;;  %v11624_v48 = vld [vmem:[%s17503_s5 + $0x818] sm:$0xff]  ;;  %v11629_v47 = vld [vmem:[%s17503_s5 + $0x820] sm:$0xff] }
  0x83   :  { %17776 = vst [vmem:[#allocation267_spill] sm:$0xff] %v11614_v15  ;;  %17777 = vst [vmem:[#allocation268_spill] sm:$0xff] %v11619_v0  ;;  %v11634_v16 = vld [vmem:[%s17503_s5 + $0x828] sm:$0xff]  ;;  %v11639_v15 = vld [vmem:[%s17503_s5 + $0x830] sm:$0xff] }
  0x84   :  { %17778 = vst [vmem:[#allocation269_spill] sm:$0xff] %v11624_v48  ;;  %17779 = vst [vmem:[#allocation270_spill] sm:$0xff] %v11629_v47  ;;  %v11644_v0 = vld [vmem:[%s17503_s5 + $0x838] sm:$0xff]  ;;  %v11649_v48 = vld [vmem:[%s17503_s5 + $0x840] sm:$0xff] }
  0x85   :  { %17780 = vst [vmem:[#allocation271_spill] sm:$0xff] %v11634_v16  ;;  %17781 = vst [vmem:[#allocation272_spill] sm:$0xff] %v11639_v15  ;;  %v11654_v47 = vld [vmem:[%s17503_s5 + $0x848] sm:$0xff]  ;;  %v11659_v16 = vld [vmem:[%s17503_s5 + $0x850] sm:$0xff] }
  0x86   :  { %17782 = vst [vmem:[#allocation273_spill] sm:$0xff] %v11644_v0  ;;  %17783 = vst [vmem:[#allocation274_spill] sm:$0xff] %v11649_v48  ;;  %v11664_v15 = vld [vmem:[%s17503_s5 + $0x858] sm:$0xff]  ;;  %v11669_v0 = vld [vmem:[%s17503_s5 + $0x860] sm:$0xff] }
  0x87   :  { %17784 = vst [vmem:[#allocation275_spill] sm:$0xff] %v11654_v47  ;;  %17785 = vst [vmem:[#allocation276_spill] sm:$0xff] %v11659_v16  ;;  %v11674_v48 = vld [vmem:[%s17503_s5 + $0x868] sm:$0xff]  ;;  %v11679_v47 = vld [vmem:[%s17503_s5 + $0x870] sm:$0xff] }
  0x88   :  { %17786 = vst [vmem:[#allocation277_spill] sm:$0xff] %v11664_v15  ;;  %17787 = vst [vmem:[#allocation278_spill] sm:$0xff] %v11669_v0  ;;  %v11684_v16 = vld [vmem:[%s17503_s5 + $0x878] sm:$0xff]  ;;  %v11689_v15 = vld [vmem:[%s17503_s5 + $0x880] sm:$0xff] }
  0x89   :  { %17788 = vst [vmem:[#allocation279_spill] sm:$0xff] %v11674_v48  ;;  %17789 = vst [vmem:[#allocation280_spill] sm:$0xff] %v11679_v47  ;;  %v11694_v0 = vld [vmem:[%s17503_s5 + $0x888] sm:$0xff]  ;;  %v11699_v48 = vld [vmem:[%s17503_s5 + $0x890] sm:$0xff] }
  0x8a   :  { %17790 = vst [vmem:[#allocation281_spill] sm:$0xff] %v11684_v16  ;;  %17791 = vst [vmem:[#allocation282_spill] sm:$0xff] %v11689_v15  ;;  %v11704_v47 = vld [vmem:[%s17503_s5 + $0x898] sm:$0xff]  ;;  %v11709_v16 = vld [vmem:[%s17503_s5 + $0x8a0] sm:$0xff] }
  0x8b   :  { %17792 = vst [vmem:[#allocation283_spill] sm:$0xff] %v11694_v0  ;;  %17793 = vst [vmem:[#allocation284_spill] sm:$0xff] %v11699_v48  ;;  %v11714_v15 = vld [vmem:[%s17503_s5 + $0x8a8] sm:$0xff]  ;;  %v11719_v0 = vld [vmem:[%s17503_s5 + $0x8b0] sm:$0xff] }
  0x8c   :  { %17794 = vst [vmem:[#allocation285_spill] sm:$0xff] %v11704_v47  ;;  %17795 = vst [vmem:[#allocation286_spill] sm:$0xff] %v11709_v16  ;;  %v11724_v48 = vld [vmem:[%s17503_s5 + $0x8b8] sm:$0xff]  ;;  %v11729_v47 = vld [vmem:[%s17503_s5 + $0x8c0] sm:$0xff] }
  0x8d   :  { %17796 = vst [vmem:[#allocation287_spill] sm:$0xff] %v11714_v15  ;;  %17797 = vst [vmem:[#allocation288_spill] sm:$0xff] %v11719_v0  ;;  %v11734_v16 = vld [vmem:[%s17503_s5 + $0x8c8] sm:$0xff]  ;;  %v11739_v15 = vld [vmem:[%s17503_s5 + $0x8d0] sm:$0xff] }
  0x8e   :  { %17798 = vst [vmem:[#allocation289_spill] sm:$0xff] %v11724_v48  ;;  %17799 = vst [vmem:[#allocation290_spill] sm:$0xff] %v11729_v47  ;;  %v11744_v0 = vld [vmem:[%s17503_s5 + $0x8d8] sm:$0xff]  ;;  %v11749_v48 = vld [vmem:[%s17503_s5 + $0x8e0] sm:$0xff] }
  0x8f   :  { %17800 = vst [vmem:[#allocation291_spill] sm:$0xff] %v11734_v16  ;;  %17801 = vst [vmem:[#allocation292_spill] sm:$0xff] %v11739_v15  ;;  %v11754_v47 = vld [vmem:[%s17503_s5 + $0x8e8] sm:$0xff]  ;;  %v11759_v16 = vld [vmem:[%s17503_s5 + $0x8f0] sm:$0xff] }
  0x90   :  { %17802 = vst [vmem:[#allocation293_spill] sm:$0xff] %v11744_v0  ;;  %17803 = vst [vmem:[#allocation294_spill] sm:$0xff] %v11749_v48  ;;  %v11764_v15 = vld [vmem:[%s17503_s5 + $0x8f8] sm:$0xff]  ;;  %v11769_v0 = vld [vmem:[%s17503_s5 + $0x900] sm:$0xff] }
  0x91   :  { %17804 = vst [vmem:[#allocation295_spill] sm:$0xff] %v11754_v47  ;;  %17805 = vst [vmem:[#allocation296_spill] sm:$0xff] %v11759_v16  ;;  %v11774_v48 = vld [vmem:[%s17503_s5 + $0x908] sm:$0xff]  ;;  %v11779_v47 = vld [vmem:[%s17503_s5 + $0x910] sm:$0xff] }
  0x92   :  { %17806 = vst [vmem:[#allocation297_spill] sm:$0xff] %v11764_v15  ;;  %17807 = vst [vmem:[#allocation298_spill] sm:$0xff] %v11769_v0  ;;  %v11784_v16 = vld [vmem:[%s17503_s5 + $0x918] sm:$0xff]  ;;  %v11789_v15 = vld [vmem:[%s17503_s5 + $0x920] sm:$0xff] }
  0x93   :  { %17808 = vst [vmem:[#allocation299_spill] sm:$0xff] %v11774_v48  ;;  %17809 = vst [vmem:[#allocation300_spill] sm:$0xff] %v11779_v47  ;;  %v11794_v0 = vld [vmem:[%s17503_s5 + $0x928] sm:$0xff]  ;;  %v11799_v48 = vld [vmem:[%s17503_s5 + $0x930] sm:$0xff] }
  0x94   :  { %17810 = vst [vmem:[#allocation301_spill] sm:$0xff] %v11784_v16  ;;  %17811 = vst [vmem:[#allocation302_spill] sm:$0xff] %v11789_v15  ;;  %v11804_v47 = vld [vmem:[%s17503_s5 + $0x938] sm:$0xff]  ;;  %v11809_v16 = vld [vmem:[%s17503_s5 + $0x940] sm:$0xff] }
  0x95   :  { %17812 = vst [vmem:[#allocation303_spill] sm:$0xff] %v11794_v0  ;;  %17813 = vst [vmem:[#allocation304_spill] sm:$0xff] %v11799_v48  ;;  %v11814_v15 = vld [vmem:[%s17503_s5 + $0x948] sm:$0xff]  ;;  %v11819_v0 = vld [vmem:[%s17503_s5 + $0x950] sm:$0xff] }
  0x96   :  { %17814 = vst [vmem:[#allocation305_spill] sm:$0xff] %v11804_v47  ;;  %17815 = vst [vmem:[#allocation306_spill] sm:$0xff] %v11809_v16  ;;  %v11824_v48 = vld [vmem:[%s17503_s5 + $0x958] sm:$0xff]  ;;  %v11829_v47 = vld [vmem:[%s17503_s5 + $0x960] sm:$0xff] }
  0x97   :  { %17816 = vst [vmem:[#allocation307_spill] sm:$0xff] %v11814_v15  ;;  %17817 = vst [vmem:[#allocation308_spill] sm:$0xff] %v11819_v0  ;;  %v11834_v16 = vld [vmem:[%s17503_s5 + $0x968] sm:$0xff]  ;;  %v11839_v15 = vld [vmem:[%s17503_s5 + $0x970] sm:$0xff] }
  0x98   :  { %17818 = vst [vmem:[#allocation309_spill] sm:$0xff] %v11824_v48  ;;  %17819 = vst [vmem:[#allocation310_spill] sm:$0xff] %v11829_v47  ;;  %v11844_v0 = vld [vmem:[%s17503_s5 + $0x978] sm:$0xff]  ;;  %v11849_v48 = vld [vmem:[%s17503_s5 + $0x980] sm:$0xff] }
  0x99   :  { %17820 = vst [vmem:[#allocation311_spill] sm:$0xff] %v11834_v16  ;;  %17821 = vst [vmem:[#allocation312_spill] sm:$0xff] %v11839_v15  ;;  %v11854_v47 = vld [vmem:[%s17503_s5 + $0x988] sm:$0xff]  ;;  %v11859_v16 = vld [vmem:[%s17503_s5 + $0x990] sm:$0xff] }
  0x9a   :  { %17822 = vst [vmem:[#allocation313_spill] sm:$0xff] %v11844_v0  ;;  %17823 = vst [vmem:[#allocation314_spill] sm:$0xff] %v11849_v48  ;;  %v11864_v15 = vld [vmem:[%s17503_s5 + $0x998] sm:$0xff]  ;;  %v11869_v0 = vld [vmem:[%s17503_s5 + $0x9a0] sm:$0xff] }
  0x9b   :  { %17824 = vst [vmem:[#allocation315_spill] sm:$0xff] %v11854_v47  ;;  %17825 = vst [vmem:[#allocation316_spill] sm:$0xff] %v11859_v16  ;;  %v11874_v48 = vld [vmem:[%s17503_s5 + $0x9a8] sm:$0xff]  ;;  %v11879_v47 = vld [vmem:[%s17503_s5 + $0x9b0] sm:$0xff] }
  0x9c   :  { %17826 = vst [vmem:[#allocation317_spill] sm:$0xff] %v11864_v15  ;;  %17827 = vst [vmem:[#allocation318_spill] sm:$0xff] %v11869_v0  ;;  %v11884_v16 = vld [vmem:[%s17503_s5 + $0x9b8] sm:$0xff]  ;;  %v11889_v15 = vld [vmem:[%s17503_s5 + $0x9c0] sm:$0xff] }
  0x9d   :  { %17828 = vst [vmem:[#allocation319_spill] sm:$0xff] %v11874_v48  ;;  %17829 = vst [vmem:[#allocation320_spill] sm:$0xff] %v11879_v47  ;;  %v11894_v0 = vld [vmem:[%s17503_s5 + $0x9c8] sm:$0xff]  ;;  %v11899_v48 = vld [vmem:[%s17503_s5 + $0x9d0] sm:$0xff] }
  0x9e   :  { %17830 = vst [vmem:[#allocation321_spill] sm:$0xff] %v11884_v16  ;;  %17831 = vst [vmem:[#allocation322_spill] sm:$0xff] %v11889_v15  ;;  %v11904_v47 = vld [vmem:[%s17503_s5 + $0x9d8] sm:$0xff]  ;;  %v11909_v16 = vld [vmem:[%s17503_s5 + $0x9e0] sm:$0xff] }
  0x9f   :  { %17832 = vst [vmem:[#allocation323_spill] sm:$0xff] %v11894_v0  ;;  %17833 = vst [vmem:[#allocation324_spill] sm:$0xff] %v11899_v48  ;;  %v11914_v15 = vld [vmem:[%s17503_s5 + $0x9e8] sm:$0xff]  ;;  %v11919_v0 = vld [vmem:[%s17503_s5 + $0x9f0] sm:$0xff] }
  0xa0   :  { %17834 = vst [vmem:[#allocation325_spill] sm:$0xff] %v11904_v47  ;;  %17835 = vst [vmem:[#allocation326_spill] sm:$0xff] %v11909_v16  ;;  %v11924_v48 = vld [vmem:[%s17503_s5 + $0x9f8] sm:$0xff]  ;;  %v11929_v47 = vld [vmem:[%s17503_s5 + $0xa00] sm:$0xff] }
  0xa1   :  { %17836 = vst [vmem:[#allocation327_spill] sm:$0xff] %v11914_v15  ;;  %17837 = vst [vmem:[#allocation328_spill] sm:$0xff] %v11919_v0  ;;  %v11934_v16 = vld [vmem:[%s17503_s5 + $0xa08] sm:$0xff]  ;;  %v11939_v15 = vld [vmem:[%s17503_s5 + $0xa10] sm:$0xff] }
  0xa2   :  { %17838 = vst [vmem:[#allocation329_spill] sm:$0xff] %v11924_v48  ;;  %17839 = vst [vmem:[#allocation330_spill] sm:$0xff] %v11929_v47  ;;  %v11944_v0 = vld [vmem:[%s17503_s5 + $0xa18] sm:$0xff]  ;;  %v11949_v48 = vld [vmem:[%s17503_s5 + $0xa20] sm:$0xff] }
  0xa3   :  { %17840 = vst [vmem:[#allocation331_spill] sm:$0xff] %v11934_v16  ;;  %17841 = vst [vmem:[#allocation332_spill] sm:$0xff] %v11939_v15  ;;  %v11954_v47 = vld [vmem:[%s17503_s5 + $0xa28] sm:$0xff]  ;;  %v11959_v16 = vld [vmem:[%s17503_s5 + $0xa30] sm:$0xff] }
  0xa4   :  { %17842 = vst [vmem:[#allocation333_spill] sm:$0xff] %v11944_v0  ;;  %17843 = vst [vmem:[#allocation334_spill] sm:$0xff] %v11949_v48  ;;  %v11964_v15 = vld [vmem:[%s17503_s5 + $0xa38] sm:$0xff]  ;;  %v11969_v0 = vld [vmem:[%s17503_s5 + $0xa40] sm:$0xff] }
  0xa5   :  { %17844 = vst [vmem:[#allocation335_spill] sm:$0xff] %v11954_v47  ;;  %17845 = vst [vmem:[#allocation336_spill] sm:$0xff] %v11959_v16  ;;  %v11974_v48 = vld [vmem:[%s17503_s5 + $0xa48] sm:$0xff]  ;;  %v11979_v47 = vld [vmem:[%s17503_s5 + $0xa50] sm:$0xff] }
  0xa6   :  { %17846 = vst [vmem:[#allocation337_spill] sm:$0xff] %v11964_v15  ;;  %17847 = vst [vmem:[#allocation338_spill] sm:$0xff] %v11969_v0  ;;  %v11984_v16 = vld [vmem:[%s17503_s5 + $0xa58] sm:$0xff]  ;;  %v11989_v15 = vld [vmem:[%s17503_s5 + $0xa60] sm:$0xff] }
  0xa7   :  { %17848 = vst [vmem:[#allocation339_spill] sm:$0xff] %v11974_v48  ;;  %17849 = vst [vmem:[#allocation340_spill] sm:$0xff] %v11979_v47  ;;  %v11994_v0 = vld [vmem:[%s17503_s5 + $0xa68] sm:$0xff]  ;;  %v11999_v48 = vld [vmem:[%s17503_s5 + $0xa70] sm:$0xff] }
  0xa8   :  { %17850 = vst [vmem:[#allocation341_spill] sm:$0xff] %v11984_v16  ;;  %17851 = vst [vmem:[#allocation342_spill] sm:$0xff] %v11989_v15  ;;  %v12004_v47 = vld [vmem:[%s17503_s5 + $0xa78] sm:$0xff]  ;;  %v12009_v16 = vld [vmem:[%s17503_s5 + $0xa80] sm:$0xff] }
  0xa9   :  { %17852 = vst [vmem:[#allocation343_spill] sm:$0xff] %v11994_v0  ;;  %17853 = vst [vmem:[#allocation344_spill] sm:$0xff] %v11999_v48  ;;  %v12014_v15 = vld [vmem:[%s17503_s5 + $0xa88] sm:$0xff]  ;;  %v12019_v0 = vld [vmem:[%s17503_s5 + $0xa90] sm:$0xff] }
  0xaa   :  { %17854 = vst [vmem:[#allocation345_spill] sm:$0xff] %v12004_v47  ;;  %17855 = vst [vmem:[#allocation346_spill] sm:$0xff] %v12009_v16  ;;  %v12024_v48 = vld [vmem:[%s17503_s5 + $0xa98] sm:$0xff]  ;;  %v12029_v47 = vld [vmem:[%s17503_s5 + $0xaa0] sm:$0xff] }
  0xab   :  { %17856 = vst [vmem:[#allocation347_spill] sm:$0xff] %v12014_v15  ;;  %17857 = vst [vmem:[#allocation348_spill] sm:$0xff] %v12019_v0  ;;  %v12034_v16 = vld [vmem:[%s17503_s5 + $0xaa8] sm:$0xff]  ;;  %v12039_v15 = vld [vmem:[%s17503_s5 + $0xab0] sm:$0xff] }
  0xac   :  { %17858 = vst [vmem:[#allocation349_spill] sm:$0xff] %v12024_v48  ;;  %17859 = vst [vmem:[#allocation350_spill] sm:$0xff] %v12029_v47  ;;  %v12044_v0 = vld [vmem:[%s17503_s5 + $0xab8] sm:$0xff]  ;;  %v12049_v48 = vld [vmem:[%s17503_s5 + $0xac0] sm:$0xff] }
  0xad   :  { %17860 = vst [vmem:[#allocation351_spill] sm:$0xff] %v12034_v16  ;;  %17861 = vst [vmem:[#allocation352_spill] sm:$0xff] %v12039_v15  ;;  %v12054_v47 = vld [vmem:[%s17503_s5 + $0xac8] sm:$0xff]  ;;  %v12059_v16 = vld [vmem:[%s17503_s5 + $0xad0] sm:$0xff] }
  0xae   :  { %17862 = vst [vmem:[#allocation353_spill] sm:$0xff] %v12044_v0  ;;  %17863 = vst [vmem:[#allocation354_spill] sm:$0xff] %v12049_v48  ;;  %v12064_v15 = vld [vmem:[%s17503_s5 + $0xad8] sm:$0xff]  ;;  %v12069_v0 = vld [vmem:[%s17503_s5 + $0xae0] sm:$0xff] }
  0xaf   :  { %17864 = vst [vmem:[#allocation355_spill] sm:$0xff] %v12054_v47  ;;  %17865 = vst [vmem:[#allocation356_spill] sm:$0xff] %v12059_v16  ;;  %v12074_v48 = vld [vmem:[%s17503_s5 + $0xae8] sm:$0xff]  ;;  %v12079_v47 = vld [vmem:[%s17503_s5 + $0xaf0] sm:$0xff] }
  0xb0   :  { %17866 = vst [vmem:[#allocation357_spill] sm:$0xff] %v12064_v15  ;;  %17867 = vst [vmem:[#allocation358_spill] sm:$0xff] %v12069_v0  ;;  %v12084_v16 = vld [vmem:[%s17503_s5 + $0xaf8] sm:$0xff]  ;;  %v12089_v15 = vld [vmem:[%s17503_s5 + $0xb00] sm:$0xff] }
  0xb1   :  { %17868 = vst [vmem:[#allocation359_spill] sm:$0xff] %v12074_v48  ;;  %17869 = vst [vmem:[#allocation360_spill] sm:$0xff] %v12079_v47  ;;  %v12094_v0 = vld [vmem:[%s17503_s5 + $0xb08] sm:$0xff]  ;;  %v12099_v48 = vld [vmem:[%s17503_s5 + $0xb10] sm:$0xff] }
  0xb2   :  { %17870 = vst [vmem:[#allocation361_spill] sm:$0xff] %v12084_v16  ;;  %17871 = vst [vmem:[#allocation362_spill] sm:$0xff] %v12089_v15  ;;  %v12104_v47 = vld [vmem:[%s17503_s5 + $0xb18] sm:$0xff]  ;;  %v12109_v16 = vld [vmem:[%s17503_s5 + $0xb20] sm:$0xff] }
  0xb3   :  { %17872 = vst [vmem:[#allocation363_spill] sm:$0xff] %v12094_v0  ;;  %17873 = vst [vmem:[#allocation364_spill] sm:$0xff] %v12099_v48  ;;  %v12114_v15 = vld [vmem:[%s17503_s5 + $0xb28] sm:$0xff]  ;;  %v12119_v0 = vld [vmem:[%s17503_s5 + $0xb30] sm:$0xff] }
  0xb4   :  { %17874 = vst [vmem:[#allocation365_spill] sm:$0xff] %v12104_v47  ;;  %17875 = vst [vmem:[#allocation366_spill] sm:$0xff] %v12109_v16  ;;  %v12124_v48 = vld [vmem:[%s17503_s5 + $0xb38] sm:$0xff]  ;;  %v12129_v47 = vld [vmem:[%s17503_s5 + $0xb40] sm:$0xff] }
  0xb5   :  { %17876 = vst [vmem:[#allocation367_spill] sm:$0xff] %v12114_v15  ;;  %17877 = vst [vmem:[#allocation368_spill] sm:$0xff] %v12119_v0  ;;  %v12134_v16 = vld [vmem:[%s17503_s5 + $0xb48] sm:$0xff]  ;;  %v12139_v15 = vld [vmem:[%s17503_s5 + $0xb50] sm:$0xff] }
  0xb6   :  { %17878 = vst [vmem:[#allocation369_spill] sm:$0xff] %v12124_v48  ;;  %17879 = vst [vmem:[#allocation370_spill] sm:$0xff] %v12129_v47  ;;  %v12144_v0 = vld [vmem:[%s17503_s5 + $0xb58] sm:$0xff]  ;;  %v12149_v48 = vld [vmem:[%s17503_s5 + $0xb60] sm:$0xff] }
  0xb7   :  { %17880 = vst [vmem:[#allocation371_spill] sm:$0xff] %v12134_v16  ;;  %17881 = vst [vmem:[#allocation372_spill] sm:$0xff] %v12139_v15  ;;  %v12154_v47 = vld [vmem:[%s17503_s5 + $0xb68] sm:$0xff]  ;;  %v12159_v16 = vld [vmem:[%s17503_s5 + $0xb70] sm:$0xff] }
  0xb8   :  { %17882 = vst [vmem:[#allocation373_spill] sm:$0xff] %v12144_v0  ;;  %17883 = vst [vmem:[#allocation374_spill] sm:$0xff] %v12149_v48  ;;  %v12164_v15 = vld [vmem:[%s17503_s5 + $0xb78] sm:$0xff]  ;;  %v12169_v0 = vld [vmem:[%s17503_s5 + $0xb80] sm:$0xff] }
  0xb9   :  { %17884 = vst [vmem:[#allocation375_spill] sm:$0xff] %v12154_v47  ;;  %17885 = vst [vmem:[#allocation376_spill] sm:$0xff] %v12159_v16  ;;  %v12174_v48 = vld [vmem:[%s17503_s5 + $0xb88] sm:$0xff]  ;;  %v12179_v47 = vld [vmem:[%s17503_s5 + $0xb90] sm:$0xff] }
  0xba   :  { %17886 = vst [vmem:[#allocation377_spill] sm:$0xff] %v12164_v15  ;;  %17887 = vst [vmem:[#allocation378_spill] sm:$0xff] %v12169_v0  ;;  %v12184_v16 = vld [vmem:[%s17503_s5 + $0xb98] sm:$0xff]  ;;  %v12189_v15 = vld [vmem:[%s17503_s5 + $0xba0] sm:$0xff] }
  0xbb   :  { %17888 = vst [vmem:[#allocation379_spill] sm:$0xff] %v12174_v48  ;;  %17889 = vst [vmem:[#allocation380_spill] sm:$0xff] %v12179_v47  ;;  %v12194_v0 = vld [vmem:[%s17503_s5 + $0xba8] sm:$0xff]  ;;  %v12199_v48 = vld [vmem:[%s17503_s5 + $0xbb0] sm:$0xff] }
  0xbc   :  { %17890 = vst [vmem:[#allocation381_spill] sm:$0xff] %v12184_v16  ;;  %17891 = vst [vmem:[#allocation382_spill] sm:$0xff] %v12189_v15  ;;  %v12204_v47 = vld [vmem:[%s17503_s5 + $0xbb8] sm:$0xff]  ;;  %v12209_v16 = vld [vmem:[%s17503_s5 + $0xbc0] sm:$0xff] }
  0xbd   :  { %17892 = vst [vmem:[#allocation383_spill] sm:$0xff] %v12194_v0  ;;  %17893 = vst [vmem:[#allocation384_spill] sm:$0xff] %v12199_v48  ;;  %v12214_v15 = vld [vmem:[%s17503_s5 + $0xbc8] sm:$0xff]  ;;  %v12219_v0 = vld [vmem:[%s17503_s5 + $0xbd0] sm:$0xff] }
  0xbe   :  { %17894 = vst [vmem:[#allocation385_spill] sm:$0xff] %v12204_v47  ;;  %17895 = vst [vmem:[#allocation386_spill] sm:$0xff] %v12209_v16  ;;  %v12224_v48 = vld [vmem:[%s17503_s5 + $0xbd8] sm:$0xff]  ;;  %v12229_v47 = vld [vmem:[%s17503_s5 + $0xbe0] sm:$0xff] }
  0xbf   :  { %17896 = vst [vmem:[#allocation387_spill] sm:$0xff] %v12214_v15  ;;  %17897 = vst [vmem:[#allocation388_spill] sm:$0xff] %v12219_v0  ;;  %v12234_v16 = vld [vmem:[%s17503_s5 + $0xbe8] sm:$0xff]  ;;  %v12239_v15 = vld [vmem:[%s17503_s5 + $0xbf0] sm:$0xff] }
  0xc0   :  { %17898 = vst [vmem:[#allocation389_spill] sm:$0xff] %v12224_v48  ;;  %17899 = vst [vmem:[#allocation390_spill] sm:$0xff] %v12229_v47  ;;  %v12244_v0 = vld [vmem:[%s17503_s5 + $0xbf8] sm:$0xff]  ;;  %v12249_v48 = vld [vmem:[%s17503_s5 + $0xc00] sm:$0xff] }
  0xc1   :  { %17900 = vst [vmem:[#allocation391_spill] sm:$0xff] %v12234_v16  ;;  %17901 = vst [vmem:[#allocation392_spill] sm:$0xff] %v12239_v15  ;;  %v12254_v47 = vld [vmem:[%s17503_s5 + $0xc08] sm:$0xff]  ;;  %v12259_v16 = vld [vmem:[%s17503_s5 + $0xc10] sm:$0xff] }
  0xc2   :  { %17902 = vst [vmem:[#allocation393_spill] sm:$0xff] %v12244_v0  ;;  %17903 = vst [vmem:[#allocation394_spill] sm:$0xff] %v12249_v48  ;;  %v12264_v15 = vld [vmem:[%s17503_s5 + $0xc18] sm:$0xff]  ;;  %v12269_v0 = vld [vmem:[%s17503_s5 + $0xc20] sm:$0xff] }
  0xc3   :  { %17904 = vst [vmem:[#allocation395_spill] sm:$0xff] %v12254_v47  ;;  %17905 = vst [vmem:[#allocation396_spill] sm:$0xff] %v12259_v16  ;;  %v12274_v48 = vld [vmem:[%s17503_s5 + $0xc28] sm:$0xff]  ;;  %v12279_v47 = vld [vmem:[%s17503_s5 + $0xc30] sm:$0xff] }
  0xc4   :  { %17906 = vst [vmem:[#allocation397_spill] sm:$0xff] %v12264_v15  ;;  %17907 = vst [vmem:[#allocation398_spill] sm:$0xff] %v12269_v0  ;;  %v12284_v16 = vld [vmem:[%s17503_s5 + $0xc38] sm:$0xff]  ;;  %v12289_v15 = vld [vmem:[%s17503_s5 + $0xc40] sm:$0xff] }
  0xc5   :  { %17908 = vst [vmem:[#allocation399_spill] sm:$0xff] %v12274_v48  ;;  %17909 = vst [vmem:[#allocation400_spill] sm:$0xff] %v12279_v47  ;;  %v12294_v0 = vld [vmem:[%s17503_s5 + $0xc48] sm:$0xff]  ;;  %v12299_v48 = vld [vmem:[%s17503_s5 + $0xc50] sm:$0xff] }
  0xc6   :  { %17910 = vst [vmem:[#allocation401_spill] sm:$0xff] %v12284_v16  ;;  %17911 = vst [vmem:[#allocation402_spill] sm:$0xff] %v12289_v15  ;;  %v12304_v47 = vld [vmem:[%s17503_s5 + $0xc58] sm:$0xff]  ;;  %v12309_v16 = vld [vmem:[%s17503_s5 + $0xc60] sm:$0xff] }
  0xc7   :  { %17912 = vst [vmem:[#allocation403_spill] sm:$0xff] %v12294_v0  ;;  %17913 = vst [vmem:[#allocation404_spill] sm:$0xff] %v12299_v48  ;;  %v12314_v15 = vld [vmem:[%s17503_s5 + $0xc68] sm:$0xff]  ;;  %v12319_v0 = vld [vmem:[%s17503_s5 + $0xc70] sm:$0xff] }
  0xc8   :  { %17914 = vst [vmem:[#allocation405_spill] sm:$0xff] %v12304_v47  ;;  %17915 = vst [vmem:[#allocation406_spill] sm:$0xff] %v12309_v16  ;;  %v12324_v48 = vld [vmem:[%s17503_s5 + $0xc78] sm:$0xff]  ;;  %v12329_v47 = vld [vmem:[%s17503_s5 + $0xc80] sm:$0xff] }
  0xc9   :  { %17916 = vst [vmem:[#allocation407_spill] sm:$0xff] %v12314_v15  ;;  %17917 = vst [vmem:[#allocation408_spill] sm:$0xff] %v12319_v0  ;;  %v12334_v16 = vld [vmem:[%s17503_s5 + $0xc88] sm:$0xff]  ;;  %v12339_v15 = vld [vmem:[%s17503_s5 + $0xc90] sm:$0xff] }
  0xca   :  { %17918 = vst [vmem:[#allocation409_spill] sm:$0xff] %v12324_v48  ;;  %17919 = vst [vmem:[#allocation410_spill] sm:$0xff] %v12329_v47  ;;  %v12344_v0 = vld [vmem:[%s17503_s5 + $0xc98] sm:$0xff]  ;;  %v12349_v48 = vld [vmem:[%s17503_s5 + $0xca0] sm:$0xff] }
  0xcb   :  { %17920 = vst [vmem:[#allocation411_spill] sm:$0xff] %v12334_v16  ;;  %17921 = vst [vmem:[#allocation412_spill] sm:$0xff] %v12339_v15  ;;  %v12354_v47 = vld [vmem:[%s17503_s5 + $0xca8] sm:$0xff]  ;;  %v12359_v16 = vld [vmem:[%s17503_s5 + $0xcb0] sm:$0xff] }
  0xcc   :  { %17922 = vst [vmem:[#allocation413_spill] sm:$0xff] %v12344_v0  ;;  %17923 = vst [vmem:[#allocation414_spill] sm:$0xff] %v12349_v48  ;;  %v12364_v15 = vld [vmem:[%s17503_s5 + $0xcb8] sm:$0xff]  ;;  %v12369_v0 = vld [vmem:[%s17503_s5 + $0xcc0] sm:$0xff] }
  0xcd   :  { %17924 = vst [vmem:[#allocation415_spill] sm:$0xff] %v12354_v47  ;;  %17925 = vst [vmem:[#allocation416_spill] sm:$0xff] %v12359_v16  ;;  %v12374_v48 = vld [vmem:[%s17503_s5 + $0xcc8] sm:$0xff]  ;;  %v12379_v47 = vld [vmem:[%s17503_s5 + $0xcd0] sm:$0xff] }
  0xce   :  { %17926 = vst [vmem:[#allocation417_spill] sm:$0xff] %v12364_v15  ;;  %17927 = vst [vmem:[#allocation418_spill] sm:$0xff] %v12369_v0  ;;  %v12384_v16 = vld [vmem:[%s17503_s5 + $0xcd8] sm:$0xff]  ;;  %v12389_v15 = vld [vmem:[%s17503_s5 + $0xce0] sm:$0xff] }
  0xcf   :  { %17928 = vst [vmem:[#allocation419_spill] sm:$0xff] %v12374_v48  ;;  %17929 = vst [vmem:[#allocation420_spill] sm:$0xff] %v12379_v47  ;;  %v12394_v0 = vld [vmem:[%s17503_s5 + $0xce8] sm:$0xff]  ;;  %v12399_v48 = vld [vmem:[%s17503_s5 + $0xcf0] sm:$0xff] }
  0xd0   :  { %17930 = vst [vmem:[#allocation421_spill] sm:$0xff] %v12384_v16  ;;  %17931 = vst [vmem:[#allocation422_spill] sm:$0xff] %v12389_v15  ;;  %v12404_v47 = vld [vmem:[%s17503_s5 + $0xcf8] sm:$0xff]  ;;  %v12409_v16 = vld [vmem:[%s17503_s5 + $0xd00] sm:$0xff] }
  0xd1   :  { %17932 = vst [vmem:[#allocation423_spill] sm:$0xff] %v12394_v0  ;;  %17933 = vst [vmem:[#allocation424_spill] sm:$0xff] %v12399_v48  ;;  %v12414_v15 = vld [vmem:[%s17503_s5 + $0xd08] sm:$0xff]  ;;  %v12419_v0 = vld [vmem:[%s17503_s5 + $0xd10] sm:$0xff] }
  0xd2   :  { %17934 = vst [vmem:[#allocation425_spill] sm:$0xff] %v12404_v47  ;;  %17935 = vst [vmem:[#allocation426_spill] sm:$0xff] %v12409_v16  ;;  %v12424_v48 = vld [vmem:[%s17503_s5 + $0xd18] sm:$0xff]  ;;  %v12429_v47 = vld [vmem:[%s17503_s5 + $0xd20] sm:$0xff] }
  0xd3   :  { %17936 = vst [vmem:[#allocation427_spill] sm:$0xff] %v12414_v15  ;;  %17937 = vst [vmem:[#allocation428_spill] sm:$0xff] %v12419_v0  ;;  %v12434_v16 = vld [vmem:[%s17503_s5 + $0xd28] sm:$0xff]  ;;  %v12439_v15 = vld [vmem:[%s17503_s5 + $0xd30] sm:$0xff] }
  0xd4   :  { %17938 = vst [vmem:[#allocation429_spill] sm:$0xff] %v12424_v48  ;;  %17939 = vst [vmem:[#allocation430_spill] sm:$0xff] %v12429_v47  ;;  %v12444_v0 = vld [vmem:[%s17503_s5 + $0xd38] sm:$0xff]  ;;  %v12449_v48 = vld [vmem:[%s17503_s5 + $0xd40] sm:$0xff] }
  0xd5   :  { %17940 = vst [vmem:[#allocation431_spill] sm:$0xff] %v12434_v16  ;;  %17941 = vst [vmem:[#allocation432_spill] sm:$0xff] %v12439_v15  ;;  %v12454_v47 = vld [vmem:[%s17503_s5 + $0xd48] sm:$0xff]  ;;  %v12459_v16 = vld [vmem:[%s17503_s5 + $0xd50] sm:$0xff] }
  0xd6   :  { %17942 = vst [vmem:[#allocation433_spill] sm:$0xff] %v12444_v0  ;;  %17943 = vst [vmem:[#allocation434_spill] sm:$0xff] %v12449_v48  ;;  %v12464_v15 = vld [vmem:[%s17503_s5 + $0xd58] sm:$0xff]  ;;  %v12469_v0 = vld [vmem:[%s17503_s5 + $0xd60] sm:$0xff] }
  0xd7   :  { %17944 = vst [vmem:[#allocation435_spill] sm:$0xff] %v12454_v47  ;;  %17945 = vst [vmem:[#allocation436_spill] sm:$0xff] %v12459_v16  ;;  %v12474_v48 = vld [vmem:[%s17503_s5 + $0xd68] sm:$0xff]  ;;  %v12479_v47 = vld [vmem:[%s17503_s5 + $0xd70] sm:$0xff] }
  0xd8   :  { %17946 = vst [vmem:[#allocation437_spill] sm:$0xff] %v12464_v15  ;;  %17947 = vst [vmem:[#allocation438_spill] sm:$0xff] %v12469_v0  ;;  %v12484_v16 = vld [vmem:[%s17503_s5 + $0xd78] sm:$0xff]  ;;  %v12489_v15 = vld [vmem:[%s17503_s5 + $0xd80] sm:$0xff] }
  0xd9   :  { %17948 = vst [vmem:[#allocation439_spill] sm:$0xff] %v12474_v48  ;;  %17949 = vst [vmem:[#allocation440_spill] sm:$0xff] %v12479_v47  ;;  %v12494_v0 = vld [vmem:[%s17503_s5 + $0xd88] sm:$0xff]  ;;  %v12499_v48 = vld [vmem:[%s17503_s5 + $0xd90] sm:$0xff] }
  0xda   :  { %17950 = vst [vmem:[#allocation441_spill] sm:$0xff] %v12484_v16  ;;  %17951 = vst [vmem:[#allocation442_spill] sm:$0xff] %v12489_v15  ;;  %v12504_v47 = vld [vmem:[%s17503_s5 + $0xd98] sm:$0xff]  ;;  %v12509_v16 = vld [vmem:[%s17503_s5 + $0xda0] sm:$0xff] }
  0xdb   :  { %17952 = vst [vmem:[#allocation443_spill] sm:$0xff] %v12494_v0  ;;  %17953 = vst [vmem:[#allocation444_spill] sm:$0xff] %v12499_v48  ;;  %v12514_v15 = vld [vmem:[%s17503_s5 + $0xda8] sm:$0xff]  ;;  %v12519_v0 = vld [vmem:[%s17503_s5 + $0xdb0] sm:$0xff] }
  0xdc   :  { %17954 = vst [vmem:[#allocation445_spill] sm:$0xff] %v12504_v47  ;;  %17955 = vst [vmem:[#allocation446_spill] sm:$0xff] %v12509_v16  ;;  %v12524_v48 = vld [vmem:[%s17503_s5 + $0xdb8] sm:$0xff]  ;;  %v12529_v47 = vld [vmem:[%s17503_s5 + $0xdc0] sm:$0xff] }
  0xdd   :  { %17956 = vst [vmem:[#allocation447_spill] sm:$0xff] %v12514_v15  ;;  %17957 = vst [vmem:[#allocation448_spill] sm:$0xff] %v12519_v0  ;;  %v12534_v16 = vld [vmem:[%s17503_s5 + $0xdc8] sm:$0xff]  ;;  %v12539_v15 = vld [vmem:[%s17503_s5 + $0xdd0] sm:$0xff] }
  0xde   :  { %17958 = vst [vmem:[#allocation449_spill] sm:$0xff] %v12524_v48  ;;  %17959 = vst [vmem:[#allocation450_spill] sm:$0xff] %v12529_v47  ;;  %v12544_v0 = vld [vmem:[%s17503_s5 + $0xdd8] sm:$0xff]  ;;  %v12549_v48 = vld [vmem:[%s17503_s5 + $0xde0] sm:$0xff] }
  0xdf   :  { %17960 = vst [vmem:[#allocation451_spill] sm:$0xff] %v12534_v16  ;;  %17961 = vst [vmem:[#allocation452_spill] sm:$0xff] %v12539_v15  ;;  %v12554_v47 = vld [vmem:[%s17503_s5 + $0xde8] sm:$0xff]  ;;  %v12559_v16 = vld [vmem:[%s17503_s5 + $0xdf0] sm:$0xff] }
  0xe0   :  { %17962 = vst [vmem:[#allocation453_spill] sm:$0xff] %v12544_v0  ;;  %17963 = vst [vmem:[#allocation454_spill] sm:$0xff] %v12549_v48  ;;  %v12564_v15 = vld [vmem:[%s17503_s5 + $0xdf8] sm:$0xff]  ;;  %v12569_v0 = vld [vmem:[%s17503_s5 + $0xe00] sm:$0xff] }
  0xe1   :  { %17964 = vst [vmem:[#allocation455_spill] sm:$0xff] %v12554_v47  ;;  %17965 = vst [vmem:[#allocation456_spill] sm:$0xff] %v12559_v16  ;;  %v12574_v48 = vld [vmem:[%s17503_s5 + $0xe08] sm:$0xff]  ;;  %v12579_v47 = vld [vmem:[%s17503_s5 + $0xe10] sm:$0xff] }
  0xe2   :  { %17966 = vst [vmem:[#allocation457_spill] sm:$0xff] %v12564_v15  ;;  %17967 = vst [vmem:[#allocation458_spill] sm:$0xff] %v12569_v0  ;;  %v12584_v16 = vld [vmem:[%s17503_s5 + $0xe18] sm:$0xff]  ;;  %v12589_v15 = vld [vmem:[%s17503_s5 + $0xe20] sm:$0xff] }
  0xe3   :  { %17968 = vst [vmem:[#allocation459_spill] sm:$0xff] %v12574_v48  ;;  %17969 = vst [vmem:[#allocation460_spill] sm:$0xff] %v12579_v47  ;;  %v12594_v0 = vld [vmem:[%s17503_s5 + $0xe28] sm:$0xff]  ;;  %v12599_v48 = vld [vmem:[%s17503_s5 + $0xe30] sm:$0xff] }
  0xe4   :  { %17970 = vst [vmem:[#allocation461_spill] sm:$0xff] %v12584_v16  ;;  %17971 = vst [vmem:[#allocation462_spill] sm:$0xff] %v12589_v15  ;;  %v12604_v47 = vld [vmem:[%s17503_s5 + $0xe38] sm:$0xff]  ;;  %v12609_v16 = vld [vmem:[%s17503_s5 + $0xe40] sm:$0xff] }
  0xe5   :  { %17972 = vst [vmem:[#allocation463_spill] sm:$0xff] %v12594_v0  ;;  %17973 = vst [vmem:[#allocation464_spill] sm:$0xff] %v12599_v48  ;;  %v12614_v15 = vld [vmem:[%s17503_s5 + $0xe48] sm:$0xff]  ;;  %v12619_v0 = vld [vmem:[%s17503_s5 + $0xe50] sm:$0xff] }
  0xe6   :  { %17974 = vst [vmem:[#allocation465_spill] sm:$0xff] %v12604_v47  ;;  %17975 = vst [vmem:[#allocation466_spill] sm:$0xff] %v12609_v16  ;;  %v12624_v48 = vld [vmem:[%s17503_s5 + $0xe58] sm:$0xff]  ;;  %v12629_v47 = vld [vmem:[%s17503_s5 + $0xe60] sm:$0xff] }
  0xe7   :  { %17976 = vst [vmem:[#allocation467_spill] sm:$0xff] %v12614_v15  ;;  %17977 = vst [vmem:[#allocation468_spill] sm:$0xff] %v12619_v0  ;;  %v12634_v16 = vld [vmem:[%s17503_s5 + $0xe68] sm:$0xff]  ;;  %v12639_v15 = vld [vmem:[%s17503_s5 + $0xe70] sm:$0xff] }
  0xe8   :  { %17978 = vst [vmem:[#allocation469_spill] sm:$0xff] %v12624_v48  ;;  %17979 = vst [vmem:[#allocation470_spill] sm:$0xff] %v12629_v47  ;;  %v12644_v0 = vld [vmem:[%s17503_s5 + $0xe78] sm:$0xff]  ;;  %v12649_v48 = vld [vmem:[%s17503_s5 + $0xe80] sm:$0xff] }
  0xe9   :  { %17980 = vst [vmem:[#allocation471_spill] sm:$0xff] %v12634_v16  ;;  %17981 = vst [vmem:[#allocation472_spill] sm:$0xff] %v12639_v15  ;;  %v12654_v47 = vld [vmem:[%s17503_s5 + $0xe88] sm:$0xff]  ;;  %v12659_v16 = vld [vmem:[%s17503_s5 + $0xe90] sm:$0xff] }
  0xea   :  { %17982 = vst [vmem:[#allocation473_spill] sm:$0xff] %v12644_v0  ;;  %17983 = vst [vmem:[#allocation474_spill] sm:$0xff] %v12649_v48  ;;  %v12664_v15 = vld [vmem:[%s17503_s5 + $0xe98] sm:$0xff]  ;;  %v12669_v0 = vld [vmem:[%s17503_s5 + $0xea0] sm:$0xff] }
  0xeb   :  { %17984 = vst [vmem:[#allocation475_spill] sm:$0xff] %v12654_v47  ;;  %17985 = vst [vmem:[#allocation476_spill] sm:$0xff] %v12659_v16  ;;  %v12674_v48 = vld [vmem:[%s17503_s5 + $0xea8] sm:$0xff]  ;;  %v12679_v47 = vld [vmem:[%s17503_s5 + $0xeb0] sm:$0xff] }
  0xec   :  { %17986 = vst [vmem:[#allocation477_spill] sm:$0xff] %v12664_v15  ;;  %17987 = vst [vmem:[#allocation478_spill] sm:$0xff] %v12669_v0  ;;  %v12684_v16 = vld [vmem:[%s17503_s5 + $0xeb8] sm:$0xff]  ;;  %v12689_v15 = vld [vmem:[%s17503_s5 + $0xec0] sm:$0xff] }
  0xed   :  { %17988 = vst [vmem:[#allocation479_spill] sm:$0xff] %v12674_v48  ;;  %17989 = vst [vmem:[#allocation480_spill] sm:$0xff] %v12679_v47  ;;  %v12694_v0 = vld [vmem:[%s17503_s5 + $0xec8] sm:$0xff]  ;;  %v12699_v48 = vld [vmem:[%s17503_s5 + $0xed0] sm:$0xff] }
  0xee   :  { %17990 = vst [vmem:[#allocation481_spill] sm:$0xff] %v12684_v16  ;;  %17991 = vst [vmem:[#allocation482_spill] sm:$0xff] %v12689_v15  ;;  %v12704_v47 = vld [vmem:[%s17503_s5 + $0xed8] sm:$0xff]  ;;  %v12709_v16 = vld [vmem:[%s17503_s5 + $0xee0] sm:$0xff] }
  0xef   :  { %17992 = vst [vmem:[#allocation483_spill] sm:$0xff] %v12694_v0  ;;  %17993 = vst [vmem:[#allocation484_spill] sm:$0xff] %v12699_v48  ;;  %v12714_v15 = vld [vmem:[%s17503_s5 + $0xee8] sm:$0xff]  ;;  %v12719_v0 = vld [vmem:[%s17503_s5 + $0xef0] sm:$0xff] }
  0xf0   :  { %17994 = vst [vmem:[#allocation485_spill] sm:$0xff] %v12704_v47  ;;  %17995 = vst [vmem:[#allocation486_spill] sm:$0xff] %v12709_v16  ;;  %v12724_v48 = vld [vmem:[%s17503_s5 + $0xef8] sm:$0xff]  ;;  %v12729_v47 = vld [vmem:[%s17503_s5 + $0xf00] sm:$0xff] }
  0xf1   :  { %17996 = vst [vmem:[#allocation487_spill] sm:$0xff] %v12714_v15  ;;  %17997 = vst [vmem:[#allocation488_spill] sm:$0xff] %v12719_v0  ;;  %v12734_v16 = vld [vmem:[%s17503_s5 + $0xf08] sm:$0xff]  ;;  %v12739_v15 = vld [vmem:[%s17503_s5 + $0xf10] sm:$0xff] }
  0xf2   :  { %17998 = vst [vmem:[#allocation489_spill] sm:$0xff] %v12724_v48  ;;  %17999 = vst [vmem:[#allocation490_spill] sm:$0xff] %v12729_v47  ;;  %v12744_v0 = vld [vmem:[%s17503_s5 + $0xf18] sm:$0xff]  ;;  %v12749_v48 = vld [vmem:[%s17503_s5 + $0xf20] sm:$0xff] }
  0xf3   :  { %18000 = vst [vmem:[#allocation491_spill] sm:$0xff] %v12734_v16  ;;  %18001 = vst [vmem:[#allocation492_spill] sm:$0xff] %v12739_v15  ;;  %v12754_v47 = vld [vmem:[%s17503_s5 + $0xf28] sm:$0xff]  ;;  %v12759_v16 = vld [vmem:[%s17503_s5 + $0xf30] sm:$0xff] }
  0xf4   :  { %18002 = vst [vmem:[#allocation493_spill] sm:$0xff] %v12744_v0  ;;  %18003 = vst [vmem:[#allocation494_spill] sm:$0xff] %v12749_v48  ;;  %v12764_v15 = vld [vmem:[%s17503_s5 + $0xf38] sm:$0xff]  ;;  %v12769_v0 = vld [vmem:[%s17503_s5 + $0xf40] sm:$0xff] }
  0xf5   :  { %18004 = vst [vmem:[#allocation495_spill] sm:$0xff] %v12754_v47  ;;  %18005 = vst [vmem:[#allocation496_spill] sm:$0xff] %v12759_v16  ;;  %v12774_v48 = vld [vmem:[%s17503_s5 + $0xf48] sm:$0xff]  ;;  %v12779_v47 = vld [vmem:[%s17503_s5 + $0xf50] sm:$0xff] }
  0xf6   :  { %18006 = vst [vmem:[#allocation497_spill] sm:$0xff] %v12764_v15  ;;  %18007 = vst [vmem:[#allocation498_spill] sm:$0xff] %v12769_v0  ;;  %v12784_v16 = vld [vmem:[%s17503_s5 + $0xf58] sm:$0xff]  ;;  %v12789_v15 = vld [vmem:[%s17503_s5 + $0xf60] sm:$0xff] }
  0xf7   :  { %18008 = vst [vmem:[#allocation499_spill] sm:$0xff] %v12774_v48  ;;  %18009 = vst [vmem:[#allocation500_spill] sm:$0xff] %v12779_v47  ;;  %v12794_v0 = vld [vmem:[%s17503_s5 + $0xf68] sm:$0xff]  ;;  %v12799_v48 = vld [vmem:[%s17503_s5 + $0xf70] sm:$0xff] }
  0xf8   :  { %18010 = vst [vmem:[#allocation501_spill] sm:$0xff] %v12784_v16  ;;  %18011 = vst [vmem:[#allocation502_spill] sm:$0xff] %v12789_v15  ;;  %v12804_v47 = vld [vmem:[%s17503_s5 + $0xf78] sm:$0xff]  ;;  %v12809_v16 = vld [vmem:[%s17503_s5 + $0xf80] sm:$0xff] }
  0xf9   :  { %18012 = vst [vmem:[#allocation503_spill] sm:$0xff] %v12794_v0  ;;  %18013 = vst [vmem:[#allocation504_spill] sm:$0xff] %v12799_v48  ;;  %v12814_v15 = vld [vmem:[%s17503_s5 + $0xf88] sm:$0xff]  ;;  %v12819_v0 = vld [vmem:[%s17503_s5 + $0xf90] sm:$0xff] }
  0xfa   :  { %18014 = vst [vmem:[#allocation505_spill] sm:$0xff] %v12804_v47  ;;  %18015 = vst [vmem:[#allocation506_spill] sm:$0xff] %v12809_v16  ;;  %v12824_v48 = vld [vmem:[%s17503_s5 + $0xf98] sm:$0xff]  ;;  %v12829_v47 = vld [vmem:[%s17503_s5 + $0xfa0] sm:$0xff] }
  0xfb   :  { %18016 = vst [vmem:[#allocation507_spill] sm:$0xff] %v12814_v15  ;;  %18017 = vst [vmem:[#allocation508_spill] sm:$0xff] %v12819_v0  ;;  %v12834_v16 = vld [vmem:[%s17503_s5 + $0xfa8] sm:$0xff]  ;;  %v12839_v15 = vld [vmem:[%s17503_s5 + $0xfb0] sm:$0xff] }
  0xfc   :  { %18018 = vst [vmem:[#allocation509_spill] sm:$0xff] %v12824_v48  ;;  %18019 = vst [vmem:[#allocation510_spill] sm:$0xff] %v12829_v47  ;;  %v12844_v0 = vld [vmem:[%s17503_s5 + $0xfb8] sm:$0xff]  ;;  %v12849_v48 = vld [vmem:[%s17503_s5 + $0xfc0] sm:$0xff] }
  0xfd   :  { %18020 = vst [vmem:[#allocation511_spill] sm:$0xff] %v12834_v16  ;;  %18021 = vst [vmem:[#allocation512_spill] sm:$0xff] %v12839_v15  ;;  %v12854_v47 = vld [vmem:[%s17503_s5 + $0xfc8] sm:$0xff]  ;;  %v12859_v16 = vld [vmem:[%s17503_s5 + $0xfd0] sm:$0xff] }
  0xfe   :  { %18022 = vst [vmem:[#allocation513_spill] sm:$0xff] %v12844_v0  ;;  %18023 = vst [vmem:[#allocation514_spill] sm:$0xff] %v12849_v48  ;;  %v12864_v15 = vld [vmem:[%s17503_s5 + $0xfd8] sm:$0xff]  ;;  %v12869_v0 = vld [vmem:[%s17503_s5 + $0xfe0] sm:$0xff] }
  0xff   :  { %18024 = vst [vmem:[#allocation515_spill] sm:$0xff] %v12854_v47  ;;  %18025 = vst [vmem:[#allocation516_spill] sm:$0xff] %v12859_v16  ;;  %v12874_v48 = vld [vmem:[%s17503_s5 + $0xfe8] sm:$0xff]  ;;  %v12879_v47 = vld [vmem:[%s17503_s5 + $0xff0] sm:$0xff] }
 0x100   :  { %18026 = vst [vmem:[#allocation517_spill] sm:$0xff] %v12864_v15  ;;  %18027 = vst [vmem:[#allocation518_spill] sm:$0xff] %v12869_v0  ;;  %v12884_v16 = vld [vmem:[%s17503_s5 + $0xff8] sm:$0xff]  ;;  %v12889_v15 = vld [vmem:[%s17503_s5 + $0x1000] sm:$0xff] }
 0x101   :  { %18028 = vst [vmem:[#allocation519_spill] sm:$0xff] %v12874_v48  ;;  %18029 = vst [vmem:[#allocation520_spill] sm:$0xff] %v12879_v47  ;;  %v12894_v0 = vld [vmem:[%s17503_s5 + $0x1008] sm:$0xff]  ;;  %v12899_v48 = vld [vmem:[%s17503_s5 + $0x1010] sm:$0xff] }
 0x102   :  { %18030 = vst [vmem:[#allocation521_spill] sm:$0xff] %v12884_v16  ;;  %18031 = vst [vmem:[#allocation522_spill] sm:$0xff] %v12889_v15  ;;  %v12904_v47 = vld [vmem:[%s17503_s5 + $0x1018] sm:$0xff]  ;;  %v12909_v16 = vld [vmem:[%s17503_s5 + $0x1020] sm:$0xff] }
 0x103   :  { %18032 = vst [vmem:[#allocation523_spill] sm:$0xff] %v12894_v0  ;;  %18033 = vst [vmem:[#allocation524_spill] sm:$0xff] %v12899_v48  ;;  %v12914_v15 = vld [vmem:[%s17503_s5 + $0x1028] sm:$0xff]  ;;  %v12919_v0 = vld [vmem:[%s17503_s5 + $0x1030] sm:$0xff] }
 0x104   :  { %18034 = vst [vmem:[#allocation525_spill] sm:$0xff] %v12904_v47  ;;  %18035 = vst [vmem:[#allocation526_spill] sm:$0xff] %v12909_v16  ;;  %v12924_v48 = vld [vmem:[%s17503_s5 + $0x1038] sm:$0xff]  ;;  %v12929_v47 = vld [vmem:[%s17503_s5 + $0x1040] sm:$0xff] }
 0x105   :  { %18036 = vst [vmem:[#allocation527_spill] sm:$0xff] %v12914_v15  ;;  %18037 = vst [vmem:[#allocation528_spill] sm:$0xff] %v12919_v0  ;;  %v12934_v16 = vld [vmem:[%s17503_s5 + $0x1048] sm:$0xff]  ;;  %v12939_v15 = vld [vmem:[%s17503_s5 + $0x1050] sm:$0xff] }
 0x106   :  { %18038 = vst [vmem:[#allocation529_spill] sm:$0xff] %v12924_v48  ;;  %18039 = vst [vmem:[#allocation530_spill] sm:$0xff] %v12929_v47  ;;  %v12944_v0 = vld [vmem:[%s17503_s5 + $0x1058] sm:$0xff]  ;;  %v12949_v48 = vld [vmem:[%s17503_s5 + $0x1060] sm:$0xff] }
 0x107   :  { %18040 = vst [vmem:[#allocation531_spill] sm:$0xff] %v12934_v16  ;;  %18041 = vst [vmem:[#allocation532_spill] sm:$0xff] %v12939_v15  ;;  %v12954_v47 = vld [vmem:[%s17503_s5 + $0x1068] sm:$0xff]  ;;  %v12959_v16 = vld [vmem:[%s17503_s5 + $0x1070] sm:$0xff] }
 0x108   :  { %18042 = vst [vmem:[#allocation533_spill] sm:$0xff] %v12944_v0  ;;  %18043 = vst [vmem:[#allocation534_spill] sm:$0xff] %v12949_v48  ;;  %v12964_v15 = vld [vmem:[%s17503_s5 + $0x1078] sm:$0xff]  ;;  %v12969_v0 = vld [vmem:[%s17503_s5 + $0x1080] sm:$0xff] }
 0x109   :  { %18044 = vst [vmem:[#allocation535_spill] sm:$0xff] %v12954_v47  ;;  %18045 = vst [vmem:[#allocation536_spill] sm:$0xff] %v12959_v16  ;;  %v12974_v48 = vld [vmem:[%s17503_s5 + $0x1088] sm:$0xff]  ;;  %v12979_v47 = vld [vmem:[%s17503_s5 + $0x1090] sm:$0xff] }
 0x10a   :  { %18046 = vst [vmem:[#allocation537_spill] sm:$0xff] %v12964_v15  ;;  %18047 = vst [vmem:[#allocation538_spill] sm:$0xff] %v12969_v0  ;;  %v12984_v16 = vld [vmem:[%s17503_s5 + $0x1098] sm:$0xff]  ;;  %v12989_v15 = vld [vmem:[%s17503_s5 + $0x10a0] sm:$0xff] }
 0x10b   :  { %18048 = vst [vmem:[#allocation539_spill] sm:$0xff] %v12974_v48  ;;  %18049 = vst [vmem:[#allocation540_spill] sm:$0xff] %v12979_v47  ;;  %v12994_v0 = vld [vmem:[%s17503_s5 + $0x10a8] sm:$0xff]  ;;  %v12999_v48 = vld [vmem:[%s17503_s5 + $0x10b0] sm:$0xff] }
 0x10c   :  { %18050 = vst [vmem:[#allocation541_spill] sm:$0xff] %v12984_v16  ;;  %18051 = vst [vmem:[#allocation542_spill] sm:$0xff] %v12989_v15  ;;  %v13004_v47 = vld [vmem:[%s17503_s5 + $0x10b8] sm:$0xff]  ;;  %v13009_v16 = vld [vmem:[%s17503_s5 + $0x10c0] sm:$0xff] }
 0x10d   :  { %18052 = vst [vmem:[#allocation543_spill] sm:$0xff] %v12994_v0  ;;  %18053 = vst [vmem:[#allocation544_spill] sm:$0xff] %v12999_v48  ;;  %v13014_v15 = vld [vmem:[%s17503_s5 + $0x10c8] sm:$0xff]  ;;  %v13019_v0 = vld [vmem:[%s17503_s5 + $0x10d0] sm:$0xff] }
 0x10e   :  { %18054 = vst [vmem:[#allocation545_spill] sm:$0xff] %v13004_v47  ;;  %18055 = vst [vmem:[#allocation546_spill] sm:$0xff] %v13009_v16  ;;  %v13024_v48 = vld [vmem:[%s17503_s5 + $0x10d8] sm:$0xff]  ;;  %v13029_v47 = vld [vmem:[%s17503_s5 + $0x10e0] sm:$0xff] }
 0x10f   :  { %18056 = vst [vmem:[#allocation547_spill] sm:$0xff] %v13014_v15  ;;  %18057 = vst [vmem:[#allocation548_spill] sm:$0xff] %v13019_v0  ;;  %v13034_v16 = vld [vmem:[%s17503_s5 + $0x10e8] sm:$0xff]  ;;  %v13039_v15 = vld [vmem:[%s17503_s5 + $0x10f0] sm:$0xff] }
 0x110   :  { %18058 = vst [vmem:[#allocation549_spill] sm:$0xff] %v13024_v48  ;;  %18059 = vst [vmem:[#allocation550_spill] sm:$0xff] %v13029_v47  ;;  %v13044_v0 = vld [vmem:[%s17503_s5 + $0x10f8] sm:$0xff]  ;;  %v13049_v48 = vld [vmem:[%s17503_s5 + $0x1100] sm:$0xff] }
 0x111   :  { %18060 = vst [vmem:[#allocation551_spill] sm:$0xff] %v13034_v16  ;;  %18061 = vst [vmem:[#allocation552_spill] sm:$0xff] %v13039_v15  ;;  %v13054_v47 = vld [vmem:[%s17503_s5 + $0x1108] sm:$0xff]  ;;  %v13059_v16 = vld [vmem:[%s17503_s5 + $0x1110] sm:$0xff] }
 0x112   :  { %18062 = vst [vmem:[#allocation553_spill] sm:$0xff] %v13044_v0  ;;  %18063 = vst [vmem:[#allocation554_spill] sm:$0xff] %v13049_v48  ;;  %v13064_v15 = vld [vmem:[%s17503_s5 + $0x1118] sm:$0xff]  ;;  %v13069_v0 = vld [vmem:[%s17503_s5 + $0x1120] sm:$0xff] }
 0x113   :  { %18064 = vst [vmem:[#allocation555_spill] sm:$0xff] %v13054_v47  ;;  %18065 = vst [vmem:[#allocation556_spill] sm:$0xff] %v13059_v16  ;;  %v13074_v48 = vld [vmem:[%s17503_s5 + $0x1128] sm:$0xff]  ;;  %v13079_v47 = vld [vmem:[%s17503_s5 + $0x1130] sm:$0xff] }
 0x114   :  { %18066 = vst [vmem:[#allocation557_spill] sm:$0xff] %v13064_v15  ;;  %18067 = vst [vmem:[#allocation558_spill] sm:$0xff] %v13069_v0  ;;  %v13084_v16 = vld [vmem:[%s17503_s5 + $0x1138] sm:$0xff]  ;;  %v13089_v15 = vld [vmem:[%s17503_s5 + $0x1140] sm:$0xff] }
 0x115   :  { %18068 = vst [vmem:[#allocation559_spill] sm:$0xff] %v13074_v48  ;;  %18069 = vst [vmem:[#allocation560_spill] sm:$0xff] %v13079_v47  ;;  %v13094_v0 = vld [vmem:[%s17503_s5 + $0x1148] sm:$0xff]  ;;  %v13099_v48 = vld [vmem:[%s17503_s5 + $0x1150] sm:$0xff] }
 0x116   :  { %18070 = vst [vmem:[#allocation561_spill] sm:$0xff] %v13084_v16  ;;  %18071 = vst [vmem:[#allocation562_spill] sm:$0xff] %v13089_v15  ;;  %v13104_v47 = vld [vmem:[%s17503_s5 + $0x1158] sm:$0xff]  ;;  %v13109_v16 = vld [vmem:[%s17503_s5 + $0x1160] sm:$0xff] }
 0x117   :  { %18072 = vst [vmem:[#allocation563_spill] sm:$0xff] %v13094_v0  ;;  %18073 = vst [vmem:[#allocation564_spill] sm:$0xff] %v13099_v48  ;;  %v13114_v15 = vld [vmem:[%s17503_s5 + $0x1168] sm:$0xff]  ;;  %v13119_v0 = vld [vmem:[%s17503_s5 + $0x1170] sm:$0xff] }
 0x118   :  { %18074 = vst [vmem:[#allocation565_spill] sm:$0xff] %v13104_v47  ;;  %18075 = vst [vmem:[#allocation566_spill] sm:$0xff] %v13109_v16  ;;  %v13124_v48 = vld [vmem:[%s17503_s5 + $0x1178] sm:$0xff]  ;;  %v13129_v47 = vld [vmem:[%s17503_s5 + $0x1180] sm:$0xff] }
 0x119   :  { %18076 = vst [vmem:[#allocation567_spill] sm:$0xff] %v13114_v15  ;;  %18077 = vst [vmem:[#allocation568_spill] sm:$0xff] %v13119_v0  ;;  %v13134_v16 = vld [vmem:[%s17503_s5 + $0x1188] sm:$0xff]  ;;  %v13139_v15 = vld [vmem:[%s17503_s5 + $0x1190] sm:$0xff] }
 0x11a   :  { %18078 = vst [vmem:[#allocation569_spill] sm:$0xff] %v13124_v48  ;;  %18079 = vst [vmem:[#allocation570_spill] sm:$0xff] %v13129_v47  ;;  %v13144_v0 = vld [vmem:[%s17503_s5 + $0x1198] sm:$0xff]  ;;  %v13149_v48 = vld [vmem:[%s17503_s5 + $0x11a0] sm:$0xff] }
 0x11b   :  { %18080 = vst [vmem:[#allocation571_spill] sm:$0xff] %v13134_v16  ;;  %18081 = vst [vmem:[#allocation572_spill] sm:$0xff] %v13139_v15  ;;  %v13154_v47 = vld [vmem:[%s17503_s5 + $0x11a8] sm:$0xff]  ;;  %v13159_v16 = vld [vmem:[%s17503_s5 + $0x11b0] sm:$0xff] }
 0x11c   :  { %18082 = vst [vmem:[#allocation573_spill] sm:$0xff] %v13144_v0  ;;  %18083 = vst [vmem:[#allocation574_spill] sm:$0xff] %v13149_v48  ;;  %v13164_v15 = vld [vmem:[%s17503_s5 + $0x11b8] sm:$0xff]  ;;  %v13169_v0 = vld [vmem:[%s17503_s5 + $0x11c0] sm:$0xff] }
 0x11d   :  { %18084 = vst [vmem:[#allocation575_spill] sm:$0xff] %v13154_v47  ;;  %18085 = vst [vmem:[#allocation576_spill] sm:$0xff] %v13159_v16  ;;  %v13174_v48 = vld [vmem:[%s17503_s5 + $0x11c8] sm:$0xff]  ;;  %v13179_v47 = vld [vmem:[%s17503_s5 + $0x11d0] sm:$0xff] }
 0x11e   :  { %18086 = vst [vmem:[#allocation577_spill] sm:$0xff] %v13164_v15  ;;  %18087 = vst [vmem:[#allocation578_spill] sm:$0xff] %v13169_v0  ;;  %v13184_v16 = vld [vmem:[%s17503_s5 + $0x11d8] sm:$0xff]  ;;  %v13189_v15 = vld [vmem:[%s17503_s5 + $0x11e0] sm:$0xff] }
 0x11f   :  { %18088 = vst [vmem:[#allocation579_spill] sm:$0xff] %v13174_v48  ;;  %18089 = vst [vmem:[#allocation580_spill] sm:$0xff] %v13179_v47  ;;  %v13194_v0 = vld [vmem:[%s17503_s5 + $0x11e8] sm:$0xff]  ;;  %v13199_v48 = vld [vmem:[%s17503_s5 + $0x11f0] sm:$0xff] }
 0x120   :  { %18090 = vst [vmem:[#allocation581_spill] sm:$0xff] %v13184_v16  ;;  %18091 = vst [vmem:[#allocation582_spill] sm:$0xff] %v13189_v15  ;;  %v13204_v47 = vld [vmem:[%s17503_s5 + $0x11f8] sm:$0xff]  ;;  %v13209_v16 = vld [vmem:[%s17503_s5 + $0x1200] sm:$0xff] }
 0x121   :  { %18092 = vst [vmem:[#allocation583_spill] sm:$0xff] %v13194_v0  ;;  %18093 = vst [vmem:[#allocation584_spill] sm:$0xff] %v13199_v48  ;;  %v13214_v15 = vld [vmem:[%s17503_s5 + $0x1208] sm:$0xff]  ;;  %v13219_v0 = vld [vmem:[%s17503_s5 + $0x1210] sm:$0xff] }
 0x122   :  { %18094 = vst [vmem:[#allocation585_spill] sm:$0xff] %v13204_v47  ;;  %18095 = vst [vmem:[#allocation586_spill] sm:$0xff] %v13209_v16  ;;  %v13224_v48 = vld [vmem:[%s17503_s5 + $0x1218] sm:$0xff]  ;;  %v13229_v47 = vld [vmem:[%s17503_s5 + $0x1220] sm:$0xff] }
 0x123   :  { %18096 = vst [vmem:[#allocation587_spill] sm:$0xff] %v13214_v15  ;;  %18097 = vst [vmem:[#allocation588_spill] sm:$0xff] %v13219_v0  ;;  %v13234_v16 = vld [vmem:[%s17503_s5 + $0x1228] sm:$0xff]  ;;  %v13239_v15 = vld [vmem:[%s17503_s5 + $0x1230] sm:$0xff] }
 0x124   :  { %18098 = vst [vmem:[#allocation589_spill] sm:$0xff] %v13224_v48  ;;  %18099 = vst [vmem:[#allocation590_spill] sm:$0xff] %v13229_v47  ;;  %v13244_v0 = vld [vmem:[%s17503_s5 + $0x1238] sm:$0xff]  ;;  %v13249_v48 = vld [vmem:[%s17503_s5 + $0x1240] sm:$0xff] }
 0x125   :  { %18100 = vst [vmem:[#allocation591_spill] sm:$0xff] %v13234_v16  ;;  %18101 = vst [vmem:[#allocation592_spill] sm:$0xff] %v13239_v15  ;;  %v13254_v47 = vld [vmem:[%s17503_s5 + $0x1248] sm:$0xff]  ;;  %v13259_v16 = vld [vmem:[%s17503_s5 + $0x1250] sm:$0xff] }
 0x126   :  { %18102 = vst [vmem:[#allocation593_spill] sm:$0xff] %v13244_v0  ;;  %18103 = vst [vmem:[#allocation594_spill] sm:$0xff] %v13249_v48  ;;  %v13264_v15 = vld [vmem:[%s17503_s5 + $0x1258] sm:$0xff]  ;;  %v13269_v0 = vld [vmem:[%s17503_s5 + $0x1260] sm:$0xff] }
 0x127   :  { %18104 = vst [vmem:[#allocation595_spill] sm:$0xff] %v13254_v47  ;;  %18105 = vst [vmem:[#allocation596_spill] sm:$0xff] %v13259_v16  ;;  %v13274_v48 = vld [vmem:[%s17503_s5 + $0x1268] sm:$0xff]  ;;  %v13279_v47 = vld [vmem:[%s17503_s5 + $0x1270] sm:$0xff] }
 0x128   :  { %18106 = vst [vmem:[#allocation597_spill] sm:$0xff] %v13264_v15  ;;  %18107 = vst [vmem:[#allocation598_spill] sm:$0xff] %v13269_v0  ;;  %v13284_v16 = vld [vmem:[%s17503_s5 + $0x1278] sm:$0xff]  ;;  %v13289_v15 = vld [vmem:[%s17503_s5 + $0x1280] sm:$0xff] }
 0x129   :  { %18108 = vst [vmem:[#allocation599_spill] sm:$0xff] %v13274_v48  ;;  %18109 = vst [vmem:[#allocation600_spill] sm:$0xff] %v13279_v47  ;;  %v13294_v0 = vld [vmem:[%s17503_s5 + $0x1288] sm:$0xff]  ;;  %v13299_v48 = vld [vmem:[%s17503_s5 + $0x1290] sm:$0xff] }
 0x12a   :  { %18110 = vst [vmem:[#allocation601_spill] sm:$0xff] %v13284_v16  ;;  %18111 = vst [vmem:[#allocation602_spill] sm:$0xff] %v13289_v15  ;;  %v13304_v47 = vld [vmem:[%s17503_s5 + $0x1298] sm:$0xff]  ;;  %v13309_v16 = vld [vmem:[%s17503_s5 + $0x12a0] sm:$0xff] }
 0x12b   :  { %18112 = vst [vmem:[#allocation603_spill] sm:$0xff] %v13294_v0  ;;  %18113 = vst [vmem:[#allocation604_spill] sm:$0xff] %v13299_v48  ;;  %v13314_v15 = vld [vmem:[%s17503_s5 + $0x12a8] sm:$0xff]  ;;  %v13319_v0 = vld [vmem:[%s17503_s5 + $0x12b0] sm:$0xff] }
 0x12c   :  { %18114 = vst [vmem:[#allocation605_spill] sm:$0xff] %v13304_v47  ;;  %18115 = vst [vmem:[#allocation606_spill] sm:$0xff] %v13309_v16  ;;  %v13324_v48 = vld [vmem:[%s17503_s5 + $0x12b8] sm:$0xff]  ;;  %v13329_v47 = vld [vmem:[%s17503_s5 + $0x12c0] sm:$0xff] }
 0x12d   :  { %18116 = vst [vmem:[#allocation607_spill] sm:$0xff] %v13314_v15  ;;  %18117 = vst [vmem:[#allocation608_spill] sm:$0xff] %v13319_v0  ;;  %v13334_v16 = vld [vmem:[%s17503_s5 + $0x12c8] sm:$0xff]  ;;  %v13339_v15 = vld [vmem:[%s17503_s5 + $0x12d0] sm:$0xff] }
 0x12e   :  { %18118 = vst [vmem:[#allocation609_spill] sm:$0xff] %v13324_v48  ;;  %18119 = vst [vmem:[#allocation610_spill] sm:$0xff] %v13329_v47  ;;  %v13344_v0 = vld [vmem:[%s17503_s5 + $0x12d8] sm:$0xff]  ;;  %v13349_v48 = vld [vmem:[%s17503_s5 + $0x12e0] sm:$0xff] }
 0x12f   :  { %18120 = vst [vmem:[#allocation611_spill] sm:$0xff] %v13334_v16  ;;  %18121 = vst [vmem:[#allocation612_spill] sm:$0xff] %v13339_v15  ;;  %v13354_v47 = vld [vmem:[%s17503_s5 + $0x12e8] sm:$0xff]  ;;  %v13359_v16 = vld [vmem:[%s17503_s5 + $0x12f0] sm:$0xff] }
 0x130   :  { %18122 = vst [vmem:[#allocation613_spill] sm:$0xff] %v13344_v0  ;;  %18123 = vst [vmem:[#allocation614_spill] sm:$0xff] %v13349_v48  ;;  %v13364_v15 = vld [vmem:[%s17503_s5 + $0x12f8] sm:$0xff]  ;;  %v13369_v0 = vld [vmem:[%s17503_s5 + $0x1300] sm:$0xff] }
 0x131   :  { %18124 = vst [vmem:[#allocation615_spill] sm:$0xff] %v13354_v47  ;;  %18125 = vst [vmem:[#allocation616_spill] sm:$0xff] %v13359_v16  ;;  %v13374_v48 = vld [vmem:[%s17503_s5 + $0x1308] sm:$0xff]  ;;  %v13379_v47 = vld [vmem:[%s17503_s5 + $0x1310] sm:$0xff] }
 0x132   :  { %18126 = vst [vmem:[#allocation617_spill] sm:$0xff] %v13364_v15  ;;  %18127 = vst [vmem:[#allocation618_spill] sm:$0xff] %v13369_v0  ;;  %v13384_v16 = vld [vmem:[%s17503_s5 + $0x1318] sm:$0xff]  ;;  %v13389_v15 = vld [vmem:[%s17503_s5 + $0x1320] sm:$0xff] }
 0x133   :  { %18128 = vst [vmem:[#allocation619_spill] sm:$0xff] %v13374_v48  ;;  %18129 = vst [vmem:[#allocation620_spill] sm:$0xff] %v13379_v47  ;;  %v13394_v0 = vld [vmem:[%s17503_s5 + $0x1328] sm:$0xff]  ;;  %v13399_v48 = vld [vmem:[%s17503_s5 + $0x1330] sm:$0xff] }
 0x134   :  { %18130 = vst [vmem:[#allocation621_spill] sm:$0xff] %v13384_v16  ;;  %18131 = vst [vmem:[#allocation622_spill] sm:$0xff] %v13389_v15  ;;  %v13404_v47 = vld [vmem:[%s17503_s5 + $0x1338] sm:$0xff]  ;;  %v13409_v16 = vld [vmem:[%s17503_s5 + $0x1340] sm:$0xff] }
 0x135   :  { %18132 = vst [vmem:[#allocation623_spill] sm:$0xff] %v13394_v0  ;;  %18133 = vst [vmem:[#allocation624_spill] sm:$0xff] %v13399_v48  ;;  %v13414_v15 = vld [vmem:[%s17503_s5 + $0x1348] sm:$0xff]  ;;  %v13419_v0 = vld [vmem:[%s17503_s5 + $0x1350] sm:$0xff] }
 0x136   :  { %18134 = vst [vmem:[#allocation625_spill] sm:$0xff] %v13404_v47  ;;  %18135 = vst [vmem:[#allocation626_spill] sm:$0xff] %v13409_v16  ;;  %v13424_v48 = vld [vmem:[%s17503_s5 + $0x1358] sm:$0xff]  ;;  %v13429_v47 = vld [vmem:[%s17503_s5 + $0x1360] sm:$0xff] }
 0x137   :  { %18136 = vst [vmem:[#allocation627_spill] sm:$0xff] %v13414_v15  ;;  %18137 = vst [vmem:[#allocation628_spill] sm:$0xff] %v13419_v0  ;;  %v13434_v16 = vld [vmem:[%s17503_s5 + $0x1368] sm:$0xff]  ;;  %v13439_v15 = vld [vmem:[%s17503_s5 + $0x1370] sm:$0xff] }
 0x138   :  { %18138 = vst [vmem:[#allocation629_spill] sm:$0xff] %v13424_v48  ;;  %18139 = vst [vmem:[#allocation630_spill] sm:$0xff] %v13429_v47  ;;  %v13444_v0 = vld [vmem:[%s17503_s5 + $0x1378] sm:$0xff]  ;;  %v13449_v48 = vld [vmem:[%s17503_s5 + $0x1380] sm:$0xff] }
 0x139   :  { %18140 = vst [vmem:[#allocation631_spill] sm:$0xff] %v13434_v16  ;;  %18141 = vst [vmem:[#allocation632_spill] sm:$0xff] %v13439_v15  ;;  %v13454_v47 = vld [vmem:[%s17503_s5 + $0x1388] sm:$0xff]  ;;  %v13459_v16 = vld [vmem:[%s17503_s5 + $0x1390] sm:$0xff] }
 0x13a   :  { %18142 = vst [vmem:[#allocation633_spill] sm:$0xff] %v13444_v0  ;;  %18143 = vst [vmem:[#allocation634_spill] sm:$0xff] %v13449_v48  ;;  %v13464_v15 = vld [vmem:[%s17503_s5 + $0x1398] sm:$0xff]  ;;  %v13469_v0 = vld [vmem:[%s17503_s5 + $0x13a0] sm:$0xff] }
 0x13b   :  { %18144 = vst [vmem:[#allocation635_spill] sm:$0xff] %v13454_v47  ;;  %18145 = vst [vmem:[#allocation636_spill] sm:$0xff] %v13459_v16  ;;  %v13474_v48 = vld [vmem:[%s17503_s5 + $0x13a8] sm:$0xff]  ;;  %v13479_v47 = vld [vmem:[%s17503_s5 + $0x13b0] sm:$0xff] }
 0x13c   :  { %18146 = vst [vmem:[#allocation637_spill] sm:$0xff] %v13464_v15  ;;  %18147 = vst [vmem:[#allocation638_spill] sm:$0xff] %v13469_v0  ;;  %v13484_v16 = vld [vmem:[%s17503_s5 + $0x13b8] sm:$0xff]  ;;  %v13489_v15 = vld [vmem:[%s17503_s5 + $0x13c0] sm:$0xff] }
 0x13d   :  { %18148 = vst [vmem:[#allocation639_spill] sm:$0xff] %v13474_v48  ;;  %18149 = vst [vmem:[#allocation640_spill] sm:$0xff] %v13479_v47  ;;  %v13494_v0 = vld [vmem:[%s17503_s5 + $0x13c8] sm:$0xff]  ;;  %v13499_v48 = vld [vmem:[%s17503_s5 + $0x13d0] sm:$0xff] }
 0x13e   :  { %18150 = vst [vmem:[#allocation641_spill] sm:$0xff] %v13484_v16  ;;  %18151 = vst [vmem:[#allocation642_spill] sm:$0xff] %v13489_v15  ;;  %v13504_v47 = vld [vmem:[%s17503_s5 + $0x13d8] sm:$0xff]  ;;  %v13509_v16 = vld [vmem:[%s17503_s5 + $0x13e0] sm:$0xff] }
 0x13f   :  { %18152 = vst [vmem:[#allocation643_spill] sm:$0xff] %v13494_v0  ;;  %18153 = vst [vmem:[#allocation644_spill] sm:$0xff] %v13499_v48  ;;  %v13514_v15 = vld [vmem:[%s17503_s5 + $0x13e8] sm:$0xff]  ;;  %v13519_v0 = vld [vmem:[%s17503_s5 + $0x13f0] sm:$0xff] }
 0x140   :  { %18154 = vst [vmem:[#allocation645_spill] sm:$0xff] %v13504_v47  ;;  %18155 = vst [vmem:[#allocation646_spill] sm:$0xff] %v13509_v16  ;;  %v13524_v48 = vld [vmem:[%s17503_s5 + $0x13f8] sm:$0xff]  ;;  %v13529_v47 = vld [vmem:[%s17503_s5 + $0x1400] sm:$0xff] }
 0x141   :  { %18156 = vst [vmem:[#allocation647_spill] sm:$0xff] %v13514_v15  ;;  %18157 = vst [vmem:[#allocation648_spill] sm:$0xff] %v13519_v0  ;;  %v13534_v16 = vld [vmem:[%s17503_s5 + $0x1408] sm:$0xff]  ;;  %v13539_v15 = vld [vmem:[%s17503_s5 + $0x1410] sm:$0xff] }
 0x142   :  { %18158 = vst [vmem:[#allocation649_spill] sm:$0xff] %v13524_v48  ;;  %18159 = vst [vmem:[#allocation650_spill] sm:$0xff] %v13529_v47  ;;  %v13544_v0 = vld [vmem:[%s17503_s5 + $0x1418] sm:$0xff]  ;;  %v13549_v48 = vld [vmem:[%s17503_s5 + $0x1420] sm:$0xff] }
 0x143   :  { %18160 = vst [vmem:[#allocation651_spill] sm:$0xff] %v13534_v16  ;;  %18161 = vst [vmem:[#allocation652_spill] sm:$0xff] %v13539_v15  ;;  %v13554_v47 = vld [vmem:[%s17503_s5 + $0x1428] sm:$0xff]  ;;  %v13559_v16 = vld [vmem:[%s17503_s5 + $0x1430] sm:$0xff] }
 0x144   :  { %18162 = vst [vmem:[#allocation653_spill] sm:$0xff] %v13544_v0  ;;  %18163 = vst [vmem:[#allocation654_spill] sm:$0xff] %v13549_v48  ;;  %v13564_v15 = vld [vmem:[%s17503_s5 + $0x1438] sm:$0xff]  ;;  %v13569_v0 = vld [vmem:[%s17503_s5 + $0x1440] sm:$0xff] }
 0x145   :  { %18164 = vst [vmem:[#allocation655_spill] sm:$0xff] %v13554_v47  ;;  %18165 = vst [vmem:[#allocation656_spill] sm:$0xff] %v13559_v16  ;;  %v13574_v48 = vld [vmem:[%s17503_s5 + $0x1448] sm:$0xff]  ;;  %v13579_v47 = vld [vmem:[%s17503_s5 + $0x1450] sm:$0xff] }
 0x146   :  { %18166 = vst [vmem:[#allocation657_spill] sm:$0xff] %v13564_v15  ;;  %18167 = vst [vmem:[#allocation658_spill] sm:$0xff] %v13569_v0  ;;  %v13584_v16 = vld [vmem:[%s17503_s5 + $0x1458] sm:$0xff]  ;;  %v13589_v15 = vld [vmem:[%s17503_s5 + $0x1460] sm:$0xff] }
 0x147   :  { %18168 = vst [vmem:[#allocation659_spill] sm:$0xff] %v13574_v48  ;;  %18169 = vst [vmem:[#allocation660_spill] sm:$0xff] %v13579_v47  ;;  %v13594_v0 = vld [vmem:[%s17503_s5 + $0x1468] sm:$0xff]  ;;  %v13599_v48 = vld [vmem:[%s17503_s5 + $0x1470] sm:$0xff] }
 0x148   :  { %18170 = vst [vmem:[#allocation661_spill] sm:$0xff] %v13584_v16  ;;  %18171 = vst [vmem:[#allocation662_spill] sm:$0xff] %v13589_v15  ;;  %v13604_v47 = vld [vmem:[%s17503_s5 + $0x1478] sm:$0xff]  ;;  %v13609_v16 = vld [vmem:[%s17503_s5 + $0x1480] sm:$0xff] }
 0x149   :  { %18172 = vst [vmem:[#allocation663_spill] sm:$0xff] %v13594_v0  ;;  %18173 = vst [vmem:[#allocation664_spill] sm:$0xff] %v13599_v48  ;;  %v13614_v15 = vld [vmem:[%s17503_s5 + $0x1488] sm:$0xff]  ;;  %v13619_v0 = vld [vmem:[%s17503_s5 + $0x1490] sm:$0xff] }
 0x14a   :  { %18174 = vst [vmem:[#allocation665_spill] sm:$0xff] %v13604_v47  ;;  %18175 = vst [vmem:[#allocation666_spill] sm:$0xff] %v13609_v16  ;;  %v13624_v48 = vld [vmem:[%s17503_s5 + $0x1498] sm:$0xff]  ;;  %v13629_v47 = vld [vmem:[%s17503_s5 + $0x14a0] sm:$0xff] }
 0x14b   :  { %18176 = vst [vmem:[#allocation667_spill] sm:$0xff] %v13614_v15  ;;  %18177 = vst [vmem:[#allocation668_spill] sm:$0xff] %v13619_v0  ;;  %v13634_v16 = vld [vmem:[%s17503_s5 + $0x14a8] sm:$0xff]  ;;  %v13639_v15 = vld [vmem:[%s17503_s5 + $0x14b0] sm:$0xff] }
 0x14c   :  { %18178 = vst [vmem:[#allocation669_spill] sm:$0xff] %v13624_v48  ;;  %18179 = vst [vmem:[#allocation670_spill] sm:$0xff] %v13629_v47  ;;  %v13644_v0 = vld [vmem:[%s17503_s5 + $0x14b8] sm:$0xff]  ;;  %v13649_v48 = vld [vmem:[%s17503_s5 + $0x14c0] sm:$0xff] }
 0x14d   :  { %18180 = vst [vmem:[#allocation671_spill] sm:$0xff] %v13634_v16  ;;  %18181 = vst [vmem:[#allocation672_spill] sm:$0xff] %v13639_v15  ;;  %v13654_v47 = vld [vmem:[%s17503_s5 + $0x14c8] sm:$0xff]  ;;  %v13659_v16 = vld [vmem:[%s17503_s5 + $0x14d0] sm:$0xff] }
 0x14e   :  { %18182 = vst [vmem:[#allocation673_spill] sm:$0xff] %v13644_v0  ;;  %18183 = vst [vmem:[#allocation674_spill] sm:$0xff] %v13649_v48  ;;  %v13664_v15 = vld [vmem:[%s17503_s5 + $0x14d8] sm:$0xff]  ;;  %v13669_v0 = vld [vmem:[%s17503_s5 + $0x14e0] sm:$0xff] }
 0x14f   :  { %18184 = vst [vmem:[#allocation675_spill] sm:$0xff] %v13654_v47  ;;  %18185 = vst [vmem:[#allocation676_spill] sm:$0xff] %v13659_v16  ;;  %v13674_v48 = vld [vmem:[%s17503_s5 + $0x14e8] sm:$0xff]  ;;  %v13679_v47 = vld [vmem:[%s17503_s5 + $0x14f0] sm:$0xff] }
 0x150   :  { %18186 = vst [vmem:[#allocation677_spill] sm:$0xff] %v13664_v15  ;;  %18187 = vst [vmem:[#allocation678_spill] sm:$0xff] %v13669_v0  ;;  %v13684_v16 = vld [vmem:[%s17503_s5 + $0x14f8] sm:$0xff]  ;;  %v13689_v15 = vld [vmem:[%s17503_s5 + $0x1500] sm:$0xff] }
 0x151   :  { %18188 = vst [vmem:[#allocation679_spill] sm:$0xff] %v13674_v48  ;;  %18189 = vst [vmem:[#allocation680_spill] sm:$0xff] %v13679_v47  ;;  %v13694_v0 = vld [vmem:[%s17503_s5 + $0x1508] sm:$0xff]  ;;  %v13699_v48 = vld [vmem:[%s17503_s5 + $0x1510] sm:$0xff] }
 0x152   :  { %18190 = vst [vmem:[#allocation681_spill] sm:$0xff] %v13684_v16  ;;  %18191 = vst [vmem:[#allocation682_spill] sm:$0xff] %v13689_v15  ;;  %v13704_v47 = vld [vmem:[%s17503_s5 + $0x1518] sm:$0xff]  ;;  %v13709_v16 = vld [vmem:[%s17503_s5 + $0x1520] sm:$0xff] }
 0x153   :  { %18192 = vst [vmem:[#allocation683_spill] sm:$0xff] %v13694_v0  ;;  %18193 = vst [vmem:[#allocation684_spill] sm:$0xff] %v13699_v48  ;;  %v13714_v15 = vld [vmem:[%s17503_s5 + $0x1528] sm:$0xff]  ;;  %v13719_v0 = vld [vmem:[%s17503_s5 + $0x1530] sm:$0xff] }
 0x154   :  { %18194 = vst [vmem:[#allocation685_spill] sm:$0xff] %v13704_v47  ;;  %18195 = vst [vmem:[#allocation686_spill] sm:$0xff] %v13709_v16  ;;  %v13724_v48 = vld [vmem:[%s17503_s5 + $0x1538] sm:$0xff]  ;;  %v13729_v47 = vld [vmem:[%s17503_s5 + $0x1540] sm:$0xff] }
 0x155   :  { %18196 = vst [vmem:[#allocation687_spill] sm:$0xff] %v13714_v15  ;;  %18197 = vst [vmem:[#allocation688_spill] sm:$0xff] %v13719_v0  ;;  %v13734_v16 = vld [vmem:[%s17503_s5 + $0x1548] sm:$0xff]  ;;  %v13739_v15 = vld [vmem:[%s17503_s5 + $0x1550] sm:$0xff] }
 0x156   :  { %18198 = vst [vmem:[#allocation689_spill] sm:$0xff] %v13724_v48  ;;  %18199 = vst [vmem:[#allocation690_spill] sm:$0xff] %v13729_v47  ;;  %v13744_v0 = vld [vmem:[%s17503_s5 + $0x1558] sm:$0xff]  ;;  %v13749_v48 = vld [vmem:[%s17503_s5 + $0x1560] sm:$0xff] }
 0x157   :  { %18200 = vst [vmem:[#allocation691_spill] sm:$0xff] %v13734_v16  ;;  %18201 = vst [vmem:[#allocation692_spill] sm:$0xff] %v13739_v15  ;;  %v13754_v47 = vld [vmem:[%s17503_s5 + $0x1568] sm:$0xff]  ;;  %v13759_v16 = vld [vmem:[%s17503_s5 + $0x1570] sm:$0xff] }
 0x158   :  { %18202 = vst [vmem:[#allocation693_spill] sm:$0xff] %v13744_v0  ;;  %18203 = vst [vmem:[#allocation694_spill] sm:$0xff] %v13749_v48  ;;  %v13764_v15 = vld [vmem:[%s17503_s5 + $0x1578] sm:$0xff]  ;;  %v13769_v0 = vld [vmem:[%s17503_s5 + $0x1580] sm:$0xff] }
 0x159   :  { %18204 = vst [vmem:[#allocation695_spill] sm:$0xff] %v13754_v47  ;;  %18205 = vst [vmem:[#allocation696_spill] sm:$0xff] %v13759_v16  ;;  %v13774_v48 = vld [vmem:[%s17503_s5 + $0x1588] sm:$0xff]  ;;  %v13779_v47 = vld [vmem:[%s17503_s5 + $0x1590] sm:$0xff] }
 0x15a   :  { %18206 = vst [vmem:[#allocation697_spill] sm:$0xff] %v13764_v15  ;;  %18207 = vst [vmem:[#allocation698_spill] sm:$0xff] %v13769_v0  ;;  %v13784_v16 = vld [vmem:[%s17503_s5 + $0x1598] sm:$0xff]  ;;  %v13789_v15 = vld [vmem:[%s17503_s5 + $0x15a0] sm:$0xff] }
 0x15b   :  { %18208 = vst [vmem:[#allocation699_spill] sm:$0xff] %v13774_v48  ;;  %18209 = vst [vmem:[#allocation700_spill] sm:$0xff] %v13779_v47  ;;  %v13794_v0 = vld [vmem:[%s17503_s5 + $0x15a8] sm:$0xff]  ;;  %v13799_v48 = vld [vmem:[%s17503_s5 + $0x15b0] sm:$0xff] }
 0x15c   :  { %18210 = vst [vmem:[#allocation701_spill] sm:$0xff] %v13784_v16  ;;  %18211 = vst [vmem:[#allocation702_spill] sm:$0xff] %v13789_v15  ;;  %v13804_v47 = vld [vmem:[%s17503_s5 + $0x15b8] sm:$0xff]  ;;  %v13809_v16 = vld [vmem:[%s17503_s5 + $0x15c0] sm:$0xff] }
 0x15d   :  { %18212 = vst [vmem:[#allocation703_spill] sm:$0xff] %v13794_v0  ;;  %18213 = vst [vmem:[#allocation704_spill] sm:$0xff] %v13799_v48  ;;  %v13814_v15 = vld [vmem:[%s17503_s5 + $0x15c8] sm:$0xff]  ;;  %v13819_v0 = vld [vmem:[%s17503_s5 + $0x15d0] sm:$0xff] }
 0x15e   :  { %18214 = vst [vmem:[#allocation705_spill] sm:$0xff] %v13804_v47  ;;  %18215 = vst [vmem:[#allocation706_spill] sm:$0xff] %v13809_v16  ;;  %v13824_v48 = vld [vmem:[%s17503_s5 + $0x15d8] sm:$0xff]  ;;  %v13829_v47 = vld [vmem:[%s17503_s5 + $0x15e0] sm:$0xff] }
 0x15f   :  { %18216 = vst [vmem:[#allocation707_spill] sm:$0xff] %v13814_v15  ;;  %18217 = vst [vmem:[#allocation708_spill] sm:$0xff] %v13819_v0  ;;  %v13834_v16 = vld [vmem:[%s17503_s5 + $0x15e8] sm:$0xff]  ;;  %v13839_v15 = vld [vmem:[%s17503_s5 + $0x15f0] sm:$0xff] }
 0x160   :  { %18218 = vst [vmem:[#allocation709_spill] sm:$0xff] %v13824_v48  ;;  %18219 = vst [vmem:[#allocation710_spill] sm:$0xff] %v13829_v47  ;;  %v13844_v0 = vld [vmem:[%s17503_s5 + $0x15f8] sm:$0xff]  ;;  %v13849_v48 = vld [vmem:[%s17503_s5 + $0x1600] sm:$0xff] }
 0x161   :  { %18220 = vst [vmem:[#allocation711_spill] sm:$0xff] %v13834_v16  ;;  %18221 = vst [vmem:[#allocation712_spill] sm:$0xff] %v13839_v15  ;;  %v13854_v47 = vld [vmem:[%s17503_s5 + $0x1608] sm:$0xff]  ;;  %v13859_v16 = vld [vmem:[%s17503_s5 + $0x1610] sm:$0xff] }
 0x162   :  { %18222 = vst [vmem:[#allocation713_spill] sm:$0xff] %v13844_v0  ;;  %18223 = vst [vmem:[#allocation714_spill] sm:$0xff] %v13849_v48  ;;  %v13864_v15 = vld [vmem:[%s17503_s5 + $0x1618] sm:$0xff]  ;;  %v13869_v0 = vld [vmem:[%s17503_s5 + $0x1620] sm:$0xff] }
 0x163   :  { %18224 = vst [vmem:[#allocation715_spill] sm:$0xff] %v13854_v47  ;;  %18225 = vst [vmem:[#allocation716_spill] sm:$0xff] %v13859_v16  ;;  %v13874_v48 = vld [vmem:[%s17503_s5 + $0x1628] sm:$0xff]  ;;  %v13879_v47 = vld [vmem:[%s17503_s5 + $0x1630] sm:$0xff] }
 0x164   :  { %18226 = vst [vmem:[#allocation717_spill] sm:$0xff] %v13864_v15  ;;  %18227 = vst [vmem:[#allocation718_spill] sm:$0xff] %v13869_v0  ;;  %v13884_v16 = vld [vmem:[%s17503_s5 + $0x1638] sm:$0xff]  ;;  %v13889_v15 = vld [vmem:[%s17503_s5 + $0x1640] sm:$0xff] }
 0x165   :  { %18228 = vst [vmem:[#allocation719_spill] sm:$0xff] %v13874_v48  ;;  %18229 = vst [vmem:[#allocation720_spill] sm:$0xff] %v13879_v47  ;;  %v13894_v0 = vld [vmem:[%s17503_s5 + $0x1648] sm:$0xff]  ;;  %v13899_v48 = vld [vmem:[%s17503_s5 + $0x1650] sm:$0xff] }
 0x166   :  { %18230 = vst [vmem:[#allocation721_spill] sm:$0xff] %v13884_v16  ;;  %18231 = vst [vmem:[#allocation722_spill] sm:$0xff] %v13889_v15  ;;  %v13904_v47 = vld [vmem:[%s17503_s5 + $0x1658] sm:$0xff]  ;;  %v13909_v16 = vld [vmem:[%s17503_s5 + $0x1660] sm:$0xff] }
 0x167   :  { %18232 = vst [vmem:[#allocation723_spill] sm:$0xff] %v13894_v0  ;;  %18233 = vst [vmem:[#allocation724_spill] sm:$0xff] %v13899_v48  ;;  %v13914_v15 = vld [vmem:[%s17503_s5 + $0x1668] sm:$0xff]  ;;  %v13919_v0 = vld [vmem:[%s17503_s5 + $0x1670] sm:$0xff] }
 0x168   :  { %18234 = vst [vmem:[#allocation725_spill] sm:$0xff] %v13904_v47  ;;  %18235 = vst [vmem:[#allocation726_spill] sm:$0xff] %v13909_v16  ;;  %v13924_v48 = vld [vmem:[%s17503_s5 + $0x1678] sm:$0xff]  ;;  %v13929_v47 = vld [vmem:[%s17503_s5 + $0x1680] sm:$0xff] }
 0x169   :  { %18236 = vst [vmem:[#allocation727_spill] sm:$0xff] %v13914_v15  ;;  %18237 = vst [vmem:[#allocation728_spill] sm:$0xff] %v13919_v0  ;;  %v13934_v16 = vld [vmem:[%s17503_s5 + $0x1688] sm:$0xff]  ;;  %v13939_v15 = vld [vmem:[%s17503_s5 + $0x1690] sm:$0xff] }
 0x16a   :  { %18238 = vst [vmem:[#allocation729_spill] sm:$0xff] %v13924_v48  ;;  %18239 = vst [vmem:[#allocation730_spill] sm:$0xff] %v13929_v47  ;;  %v13944_v0 = vld [vmem:[%s17503_s5 + $0x1698] sm:$0xff]  ;;  %v13949_v48 = vld [vmem:[%s17503_s5 + $0x16a0] sm:$0xff] }
 0x16b   :  { %18240 = vst [vmem:[#allocation731_spill] sm:$0xff] %v13934_v16  ;;  %18241 = vst [vmem:[#allocation732_spill] sm:$0xff] %v13939_v15  ;;  %v13954_v47 = vld [vmem:[%s17503_s5 + $0x16a8] sm:$0xff]  ;;  %v13959_v16 = vld [vmem:[%s17503_s5 + $0x16b0] sm:$0xff] }
 0x16c   :  { %18242 = vst [vmem:[#allocation733_spill] sm:$0xff] %v13944_v0  ;;  %18243 = vst [vmem:[#allocation734_spill] sm:$0xff] %v13949_v48  ;;  %v13964_v15 = vld [vmem:[%s17503_s5 + $0x16b8] sm:$0xff]  ;;  %v13969_v0 = vld [vmem:[%s17503_s5 + $0x16c0] sm:$0xff] }
 0x16d   :  { %18244 = vst [vmem:[#allocation735_spill] sm:$0xff] %v13954_v47  ;;  %18245 = vst [vmem:[#allocation736_spill] sm:$0xff] %v13959_v16  ;;  %v13974_v48 = vld [vmem:[%s17503_s5 + $0x16c8] sm:$0xff]  ;;  %v13979_v47 = vld [vmem:[%s17503_s5 + $0x16d0] sm:$0xff] }
 0x16e   :  { %18246 = vst [vmem:[#allocation737_spill] sm:$0xff] %v13964_v15  ;;  %18247 = vst [vmem:[#allocation738_spill] sm:$0xff] %v13969_v0  ;;  %v13984_v16 = vld [vmem:[%s17503_s5 + $0x16d8] sm:$0xff]  ;;  %v13989_v15 = vld [vmem:[%s17503_s5 + $0x16e0] sm:$0xff] }
 0x16f   :  { %18248 = vst [vmem:[#allocation739_spill] sm:$0xff] %v13974_v48  ;;  %18249 = vst [vmem:[#allocation740_spill] sm:$0xff] %v13979_v47  ;;  %v13994_v0 = vld [vmem:[%s17503_s5 + $0x16e8] sm:$0xff]  ;;  %v13999_v48 = vld [vmem:[%s17503_s5 + $0x16f0] sm:$0xff] }
 0x170   :  { %18250 = vst [vmem:[#allocation741_spill] sm:$0xff] %v13984_v16  ;;  %18251 = vst [vmem:[#allocation742_spill] sm:$0xff] %v13989_v15  ;;  %v14004_v47 = vld [vmem:[%s17503_s5 + $0x16f8] sm:$0xff]  ;;  %v14009_v16 = vld [vmem:[%s17503_s5 + $0x1700] sm:$0xff] }
 0x171   :  { %18252 = vst [vmem:[#allocation743_spill] sm:$0xff] %v13994_v0  ;;  %18253 = vst [vmem:[#allocation744_spill] sm:$0xff] %v13999_v48  ;;  %v14014_v15 = vld [vmem:[%s17503_s5 + $0x1708] sm:$0xff]  ;;  %v14019_v0 = vld [vmem:[%s17503_s5 + $0x1710] sm:$0xff] }
 0x172   :  { %18254 = vst [vmem:[#allocation745_spill] sm:$0xff] %v14004_v47  ;;  %18255 = vst [vmem:[#allocation746_spill] sm:$0xff] %v14009_v16  ;;  %v14024_v48 = vld [vmem:[%s17503_s5 + $0x1718] sm:$0xff]  ;;  %v14029_v47 = vld [vmem:[%s17503_s5 + $0x1720] sm:$0xff] }
 0x173   :  { %18256 = vst [vmem:[#allocation747_spill] sm:$0xff] %v14014_v15  ;;  %18257 = vst [vmem:[#allocation748_spill] sm:$0xff] %v14019_v0  ;;  %v14034_v16 = vld [vmem:[%s17503_s5 + $0x1728] sm:$0xff]  ;;  %v14039_v15 = vld [vmem:[%s17503_s5 + $0x1730] sm:$0xff] }
 0x174   :  { %18258 = vst [vmem:[#allocation749_spill] sm:$0xff] %v14024_v48  ;;  %18259 = vst [vmem:[#allocation750_spill] sm:$0xff] %v14029_v47  ;;  %v14044_v0 = vld [vmem:[%s17503_s5 + $0x1738] sm:$0xff]  ;;  %v14049_v48 = vld [vmem:[%s17503_s5 + $0x1740] sm:$0xff] }
 0x175   :  { %18260 = vst [vmem:[#allocation751_spill] sm:$0xff] %v14034_v16  ;;  %18261 = vst [vmem:[#allocation752_spill] sm:$0xff] %v14039_v15  ;;  %v14054_v47 = vld [vmem:[%s17503_s5 + $0x1748] sm:$0xff]  ;;  %v14059_v16 = vld [vmem:[%s17503_s5 + $0x1750] sm:$0xff] }
 0x176   :  { %18262 = vst [vmem:[#allocation753_spill] sm:$0xff] %v14044_v0  ;;  %18263 = vst [vmem:[#allocation754_spill] sm:$0xff] %v14049_v48  ;;  %v14064_v15 = vld [vmem:[%s17503_s5 + $0x1758] sm:$0xff]  ;;  %v14069_v0 = vld [vmem:[%s17503_s5 + $0x1760] sm:$0xff] }
 0x177   :  { %18264 = vst [vmem:[#allocation755_spill] sm:$0xff] %v14054_v47  ;;  %18265 = vst [vmem:[#allocation756_spill] sm:$0xff] %v14059_v16  ;;  %v14074_v48 = vld [vmem:[%s17503_s5 + $0x1768] sm:$0xff]  ;;  %v14079_v47 = vld [vmem:[%s17503_s5 + $0x1770] sm:$0xff] }
 0x178   :  { %18266 = vst [vmem:[#allocation757_spill] sm:$0xff] %v14064_v15  ;;  %18267 = vst [vmem:[#allocation758_spill] sm:$0xff] %v14069_v0  ;;  %v14084_v16 = vld [vmem:[%s17503_s5 + $0x1778] sm:$0xff]  ;;  %v14089_v15 = vld [vmem:[%s17503_s5 + $0x1780] sm:$0xff] }
 0x179   :  { %18268 = vst [vmem:[#allocation759_spill] sm:$0xff] %v14074_v48  ;;  %18269 = vst [vmem:[#allocation760_spill] sm:$0xff] %v14079_v47  ;;  %v14094_v0 = vld [vmem:[%s17503_s5 + $0x1788] sm:$0xff]  ;;  %v14099_v48 = vld [vmem:[%s17503_s5 + $0x1790] sm:$0xff] }
 0x17a   :  { %18270 = vst [vmem:[#allocation761_spill] sm:$0xff] %v14084_v16  ;;  %18271 = vst [vmem:[#allocation762_spill] sm:$0xff] %v14089_v15  ;;  %v14104_v47 = vld [vmem:[%s17503_s5 + $0x1798] sm:$0xff]  ;;  %v14109_v16 = vld [vmem:[%s17503_s5 + $0x17a0] sm:$0xff] }
 0x17b   :  { %18272 = vst [vmem:[#allocation763_spill] sm:$0xff] %v14094_v0  ;;  %18273 = vst [vmem:[#allocation764_spill] sm:$0xff] %v14099_v48  ;;  %v14114_v15 = vld [vmem:[%s17503_s5 + $0x17a8] sm:$0xff]  ;;  %v14119_v0 = vld [vmem:[%s17503_s5 + $0x17b0] sm:$0xff] }
 0x17c   :  { %18274 = vst [vmem:[#allocation765_spill] sm:$0xff] %v14104_v47  ;;  %18275 = vst [vmem:[#allocation766_spill] sm:$0xff] %v14109_v16  ;;  %v14124_v48 = vld [vmem:[%s17503_s5 + $0x17b8] sm:$0xff]  ;;  %v14129_v47 = vld [vmem:[%s17503_s5 + $0x17c0] sm:$0xff] }
 0x17d   :  { %18276 = vst [vmem:[#allocation767_spill] sm:$0xff] %v14114_v15  ;;  %18277 = vst [vmem:[#allocation768_spill] sm:$0xff] %v14119_v0  ;;  %v14134_v16 = vld [vmem:[%s17503_s5 + $0x17c8] sm:$0xff]  ;;  %v14139_v15 = vld [vmem:[%s17503_s5 + $0x17d0] sm:$0xff] }
 0x17e   :  { %18278 = vst [vmem:[#allocation769_spill] sm:$0xff] %v14124_v48  ;;  %18279 = vst [vmem:[#allocation770_spill] sm:$0xff] %v14129_v47  ;;  %v14144_v0 = vld [vmem:[%s17503_s5 + $0x17d8] sm:$0xff]  ;;  %v14149_v48 = vld [vmem:[%s17503_s5 + $0x17e0] sm:$0xff] }
 0x17f   :  { %18280 = vst [vmem:[#allocation771_spill] sm:$0xff] %v14134_v16  ;;  %18281 = vst [vmem:[#allocation772_spill] sm:$0xff] %v14139_v15  ;;  %v14154_v47 = vld [vmem:[%s17503_s5 + $0x17e8] sm:$0xff]  ;;  %v14159_v16 = vld [vmem:[%s17503_s5 + $0x17f0] sm:$0xff] }
 0x180   :  { %18282 = vst [vmem:[#allocation773_spill] sm:$0xff] %v14144_v0  ;;  %18283 = vst [vmem:[#allocation774_spill] sm:$0xff] %v14149_v48  ;;  %v14164_v15 = vld [vmem:[%s17503_s5 + $0x17f8] sm:$0xff]  ;;  %v14169_v0 = vld [vmem:[%s17503_s5 + $0x1800] sm:$0xff] }
 0x181   :  { %18284 = vst [vmem:[#allocation775_spill] sm:$0xff] %v14154_v47  ;;  %18285 = vst [vmem:[#allocation776_spill] sm:$0xff] %v14159_v16  ;;  %v14174_v48 = vld [vmem:[%s17503_s5 + $0x1808] sm:$0xff]  ;;  %v14179_v47 = vld [vmem:[%s17503_s5 + $0x1810] sm:$0xff] }
 0x182   :  { %18286 = vst [vmem:[#allocation777_spill] sm:$0xff] %v14164_v15  ;;  %18287 = vst [vmem:[#allocation778_spill] sm:$0xff] %v14169_v0  ;;  %v14184_v16 = vld [vmem:[%s17503_s5 + $0x1818] sm:$0xff]  ;;  %v14189_v15 = vld [vmem:[%s17503_s5 + $0x1820] sm:$0xff] }
 0x183   :  { %18288 = vst [vmem:[#allocation779_spill] sm:$0xff] %v14174_v48  ;;  %18289 = vst [vmem:[#allocation780_spill] sm:$0xff] %v14179_v47  ;;  %v14194_v0 = vld [vmem:[%s17503_s5 + $0x1828] sm:$0xff]  ;;  %v14199_v48 = vld [vmem:[%s17503_s5 + $0x1830] sm:$0xff] }
 0x184   :  { %18290 = vst [vmem:[#allocation781_spill] sm:$0xff] %v14184_v16  ;;  %18291 = vst [vmem:[#allocation782_spill] sm:$0xff] %v14189_v15  ;;  %v14204_v47 = vld [vmem:[%s17503_s5 + $0x1838] sm:$0xff]  ;;  %v14209_v16 = vld [vmem:[%s17503_s5 + $0x1840] sm:$0xff] }
 0x185   :  { %18292 = vst [vmem:[#allocation783_spill] sm:$0xff] %v14194_v0  ;;  %18293 = vst [vmem:[#allocation784_spill] sm:$0xff] %v14199_v48  ;;  %v14214_v15 = vld [vmem:[%s17503_s5 + $0x1848] sm:$0xff]  ;;  %v14219_v0 = vld [vmem:[%s17503_s5 + $0x1850] sm:$0xff] }
 0x186   :  { %18294 = vst [vmem:[#allocation785_spill] sm:$0xff] %v14204_v47  ;;  %18295 = vst [vmem:[#allocation786_spill] sm:$0xff] %v14209_v16  ;;  %v14224_v48 = vld [vmem:[%s17503_s5 + $0x1858] sm:$0xff]  ;;  %v14229_v47 = vld [vmem:[%s17503_s5 + $0x1860] sm:$0xff] }
 0x187   :  { %18296 = vst [vmem:[#allocation787_spill] sm:$0xff] %v14214_v15  ;;  %18297 = vst [vmem:[#allocation788_spill] sm:$0xff] %v14219_v0  ;;  %v14234_v16 = vld [vmem:[%s17503_s5 + $0x1868] sm:$0xff]  ;;  %v14239_v15 = vld [vmem:[%s17503_s5 + $0x1870] sm:$0xff] }
 0x188   :  { %18298 = vst [vmem:[#allocation789_spill] sm:$0xff] %v14224_v48  ;;  %18299 = vst [vmem:[#allocation790_spill] sm:$0xff] %v14229_v47  ;;  %v14244_v0 = vld [vmem:[%s17503_s5 + $0x1878] sm:$0xff]  ;;  %v14249_v48 = vld [vmem:[%s17503_s5 + $0x1880] sm:$0xff] }
 0x189   :  { %18300 = vst [vmem:[#allocation791_spill] sm:$0xff] %v14234_v16  ;;  %18301 = vst [vmem:[#allocation792_spill] sm:$0xff] %v14239_v15  ;;  %v14254_v47 = vld [vmem:[%s17503_s5 + $0x1888] sm:$0xff]  ;;  %v14259_v16 = vld [vmem:[%s17503_s5 + $0x1890] sm:$0xff] }
 0x18a   :  { %18302 = vst [vmem:[#allocation793_spill] sm:$0xff] %v14244_v0  ;;  %18303 = vst [vmem:[#allocation794_spill] sm:$0xff] %v14249_v48  ;;  %v14264_v15 = vld [vmem:[%s17503_s5 + $0x1898] sm:$0xff]  ;;  %v14269_v0 = vld [vmem:[%s17503_s5 + $0x18a0] sm:$0xff] }
 0x18b   :  { %18304 = vst [vmem:[#allocation795_spill] sm:$0xff] %v14254_v47  ;;  %18305 = vst [vmem:[#allocation796_spill] sm:$0xff] %v14259_v16  ;;  %v14274_v48 = vld [vmem:[%s17503_s5 + $0x18a8] sm:$0xff]  ;;  %v14279_v47 = vld [vmem:[%s17503_s5 + $0x18b0] sm:$0xff] }
 0x18c   :  { %18306 = vst [vmem:[#allocation797_spill] sm:$0xff] %v14264_v15  ;;  %18307 = vst [vmem:[#allocation798_spill] sm:$0xff] %v14269_v0  ;;  %v14284_v16 = vld [vmem:[%s17503_s5 + $0x18b8] sm:$0xff]  ;;  %v14289_v15 = vld [vmem:[%s17503_s5 + $0x18c0] sm:$0xff] }
 0x18d   :  { %18308 = vst [vmem:[#allocation799_spill] sm:$0xff] %v14274_v48  ;;  %18309 = vst [vmem:[#allocation800_spill] sm:$0xff] %v14279_v47  ;;  %v14294_v0 = vld [vmem:[%s17503_s5 + $0x18c8] sm:$0xff]  ;;  %v14299_v48 = vld [vmem:[%s17503_s5 + $0x18d0] sm:$0xff] }
 0x18e   :  { %18310 = vst [vmem:[#allocation801_spill] sm:$0xff] %v14284_v16  ;;  %18311 = vst [vmem:[#allocation802_spill] sm:$0xff] %v14289_v15  ;;  %v14304_v47 = vld [vmem:[%s17503_s5 + $0x18d8] sm:$0xff]  ;;  %v14309_v16 = vld [vmem:[%s17503_s5 + $0x18e0] sm:$0xff] }
 0x18f   :  { %18312 = vst [vmem:[#allocation803_spill] sm:$0xff] %v14294_v0  ;;  %18313 = vst [vmem:[#allocation804_spill] sm:$0xff] %v14299_v48  ;;  %v14314_v15 = vld [vmem:[%s17503_s5 + $0x18e8] sm:$0xff]  ;;  %v14319_v0 = vld [vmem:[%s17503_s5 + $0x18f0] sm:$0xff] }
 0x190   :  { %18314 = vst [vmem:[#allocation805_spill] sm:$0xff] %v14304_v47  ;;  %18315 = vst [vmem:[#allocation806_spill] sm:$0xff] %v14309_v16  ;;  %v14324_v48 = vld [vmem:[%s17503_s5 + $0x18f8] sm:$0xff]  ;;  %v14329_v47 = vld [vmem:[%s17503_s5 + $0x1900] sm:$0xff] }
 0x191   :  { %18316 = vst [vmem:[#allocation807_spill] sm:$0xff] %v14314_v15  ;;  %18317 = vst [vmem:[#allocation808_spill] sm:$0xff] %v14319_v0  ;;  %v14334_v16 = vld [vmem:[%s17503_s5 + $0x1908] sm:$0xff]  ;;  %v14339_v15 = vld [vmem:[%s17503_s5 + $0x1910] sm:$0xff] }
 0x192   :  { %18318 = vst [vmem:[#allocation809_spill] sm:$0xff] %v14324_v48  ;;  %18319 = vst [vmem:[#allocation810_spill] sm:$0xff] %v14329_v47  ;;  %v14344_v0 = vld [vmem:[%s17503_s5 + $0x1918] sm:$0xff]  ;;  %v14349_v48 = vld [vmem:[%s17503_s5 + $0x1920] sm:$0xff] }
 0x193   :  { %18320 = vst [vmem:[#allocation811_spill] sm:$0xff] %v14334_v16  ;;  %18321 = vst [vmem:[#allocation812_spill] sm:$0xff] %v14339_v15  ;;  %v14354_v47 = vld [vmem:[%s17503_s5 + $0x1928] sm:$0xff]  ;;  %v14359_v16 = vld [vmem:[%s17503_s5 + $0x1930] sm:$0xff] }
 0x194   :  { %18322 = vst [vmem:[#allocation813_spill] sm:$0xff] %v14344_v0  ;;  %18323 = vst [vmem:[#allocation814_spill] sm:$0xff] %v14349_v48  ;;  %v14364_v15 = vld [vmem:[%s17503_s5 + $0x1938] sm:$0xff]  ;;  %v14369_v0 = vld [vmem:[%s17503_s5 + $0x1940] sm:$0xff] }
 0x195   :  { %18324 = vst [vmem:[#allocation815_spill] sm:$0xff] %v14354_v47  ;;  %18325 = vst [vmem:[#allocation816_spill] sm:$0xff] %v14359_v16  ;;  %v14374_v48 = vld [vmem:[%s17503_s5 + $0x1948] sm:$0xff]  ;;  %v14379_v47 = vld [vmem:[%s17503_s5 + $0x1950] sm:$0xff] }
 0x196   :  { %18326 = vst [vmem:[#allocation817_spill] sm:$0xff] %v14364_v15  ;;  %18327 = vst [vmem:[#allocation818_spill] sm:$0xff] %v14369_v0  ;;  %v14384_v16 = vld [vmem:[%s17503_s5 + $0x1958] sm:$0xff]  ;;  %v14389_v15 = vld [vmem:[%s17503_s5 + $0x1960] sm:$0xff] }
 0x197   :  { %18328 = vst [vmem:[#allocation819_spill] sm:$0xff] %v14374_v48  ;;  %18329 = vst [vmem:[#allocation820_spill] sm:$0xff] %v14379_v47  ;;  %v14394_v0 = vld [vmem:[%s17503_s5 + $0x1968] sm:$0xff]  ;;  %v14399_v48 = vld [vmem:[%s17503_s5 + $0x1970] sm:$0xff] }
 0x198   :  { %18330 = vst [vmem:[#allocation821_spill] sm:$0xff] %v14384_v16  ;;  %18331 = vst [vmem:[#allocation822_spill] sm:$0xff] %v14389_v15  ;;  %v14404_v47 = vld [vmem:[%s17503_s5 + $0x1978] sm:$0xff]  ;;  %v14409_v16 = vld [vmem:[%s17503_s5 + $0x1980] sm:$0xff] }
 0x199   :  { %18332 = vst [vmem:[#allocation823_spill] sm:$0xff] %v14394_v0  ;;  %18333 = vst [vmem:[#allocation824_spill] sm:$0xff] %v14399_v48  ;;  %v14414_v15 = vld [vmem:[%s17503_s5 + $0x1988] sm:$0xff]  ;;  %v14419_v0 = vld [vmem:[%s17503_s5 + $0x1990] sm:$0xff] }
 0x19a   :  { %18334 = vst [vmem:[#allocation825_spill] sm:$0xff] %v14404_v47  ;;  %18335 = vst [vmem:[#allocation826_spill] sm:$0xff] %v14409_v16  ;;  %v14424_v48 = vld [vmem:[%s17503_s5 + $0x1998] sm:$0xff]  ;;  %v14429_v47 = vld [vmem:[%s17503_s5 + $0x19a0] sm:$0xff] }
 0x19b   :  { %18336 = vst [vmem:[#allocation827_spill] sm:$0xff] %v14414_v15  ;;  %18337 = vst [vmem:[#allocation828_spill] sm:$0xff] %v14419_v0  ;;  %v14434_v16 = vld [vmem:[%s17503_s5 + $0x19a8] sm:$0xff]  ;;  %v14439_v15 = vld [vmem:[%s17503_s5 + $0x19b0] sm:$0xff] }
 0x19c   :  { %18338 = vst [vmem:[#allocation829_spill] sm:$0xff] %v14424_v48  ;;  %18339 = vst [vmem:[#allocation830_spill] sm:$0xff] %v14429_v47  ;;  %v14444_v0 = vld [vmem:[%s17503_s5 + $0x19b8] sm:$0xff]  ;;  %v14449_v48 = vld [vmem:[%s17503_s5 + $0x19c0] sm:$0xff] }
 0x19d   :  { %18340 = vst [vmem:[#allocation831_spill] sm:$0xff] %v14434_v16  ;;  %18341 = vst [vmem:[#allocation832_spill] sm:$0xff] %v14439_v15  ;;  %v14454_v47 = vld [vmem:[%s17503_s5 + $0x19c8] sm:$0xff]  ;;  %v14459_v16 = vld [vmem:[%s17503_s5 + $0x19d0] sm:$0xff] }
 0x19e   :  { %18342 = vst [vmem:[#allocation833_spill] sm:$0xff] %v14444_v0  ;;  %18343 = vst [vmem:[#allocation834_spill] sm:$0xff] %v14449_v48  ;;  %v14464_v15 = vld [vmem:[%s17503_s5 + $0x19d8] sm:$0xff]  ;;  %v14469_v0 = vld [vmem:[%s17503_s5 + $0x19e0] sm:$0xff] }
 0x19f   :  { %18344 = vst [vmem:[#allocation835_spill] sm:$0xff] %v14454_v47  ;;  %18345 = vst [vmem:[#allocation836_spill] sm:$0xff] %v14459_v16  ;;  %v14474_v48 = vld [vmem:[%s17503_s5 + $0x19e8] sm:$0xff]  ;;  %v14479_v47 = vld [vmem:[%s17503_s5 + $0x19f0] sm:$0xff] }
 0x1a0   :  { %18346 = vst [vmem:[#allocation837_spill] sm:$0xff] %v14464_v15  ;;  %18347 = vst [vmem:[#allocation838_spill] sm:$0xff] %v14469_v0  ;;  %v14484_v16 = vld [vmem:[%s17503_s5 + $0x19f8] sm:$0xff]  ;;  %v14489_v15 = vld [vmem:[%s17503_s5 + $0x1a00] sm:$0xff] }
 0x1a1   :  { %18348 = vst [vmem:[#allocation839_spill] sm:$0xff] %v14474_v48  ;;  %18349 = vst [vmem:[#allocation840_spill] sm:$0xff] %v14479_v47  ;;  %v14494_v0 = vld [vmem:[%s17503_s5 + $0x1a08] sm:$0xff]  ;;  %v14499_v48 = vld [vmem:[%s17503_s5 + $0x1a10] sm:$0xff] }
 0x1a2   :  { %18350 = vst [vmem:[#allocation841_spill] sm:$0xff] %v14484_v16  ;;  %18351 = vst [vmem:[#allocation842_spill] sm:$0xff] %v14489_v15  ;;  %v14504_v47 = vld [vmem:[%s17503_s5 + $0x1a18] sm:$0xff]  ;;  %v14509_v16 = vld [vmem:[%s17503_s5 + $0x1a20] sm:$0xff] }
 0x1a3   :  { %18352 = vst [vmem:[#allocation843_spill] sm:$0xff] %v14494_v0  ;;  %18353 = vst [vmem:[#allocation844_spill] sm:$0xff] %v14499_v48  ;;  %v14514_v15 = vld [vmem:[%s17503_s5 + $0x1a28] sm:$0xff]  ;;  %v14519_v0 = vld [vmem:[%s17503_s5 + $0x1a30] sm:$0xff] }
 0x1a4   :  { %18354 = vst [vmem:[#allocation845_spill] sm:$0xff] %v14504_v47  ;;  %18355 = vst [vmem:[#allocation846_spill] sm:$0xff] %v14509_v16  ;;  %v14524_v48 = vld [vmem:[%s17503_s5 + $0x1a38] sm:$0xff]  ;;  %v14529_v47 = vld [vmem:[%s17503_s5 + $0x1a40] sm:$0xff] }
 0x1a5   :  { %18356 = vst [vmem:[#allocation847_spill] sm:$0xff] %v14514_v15  ;;  %18357 = vst [vmem:[#allocation848_spill] sm:$0xff] %v14519_v0  ;;  %v14534_v16 = vld [vmem:[%s17503_s5 + $0x1a48] sm:$0xff]  ;;  %v14539_v15 = vld [vmem:[%s17503_s5 + $0x1a50] sm:$0xff] }
 0x1a6   :  { %18358 = vst [vmem:[#allocation849_spill] sm:$0xff] %v14524_v48  ;;  %18359 = vst [vmem:[#allocation850_spill] sm:$0xff] %v14529_v47  ;;  %v14544_v0 = vld [vmem:[%s17503_s5 + $0x1a58] sm:$0xff]  ;;  %v14549_v48 = vld [vmem:[%s17503_s5 + $0x1a60] sm:$0xff] }
 0x1a7   :  { %18360 = vst [vmem:[#allocation851_spill] sm:$0xff] %v14534_v16  ;;  %18361 = vst [vmem:[#allocation852_spill] sm:$0xff] %v14539_v15  ;;  %v14554_v47 = vld [vmem:[%s17503_s5 + $0x1a68] sm:$0xff]  ;;  %v14559_v16 = vld [vmem:[%s17503_s5 + $0x1a70] sm:$0xff] }
 0x1a8   :  { %18362 = vst [vmem:[#allocation853_spill] sm:$0xff] %v14544_v0  ;;  %18363 = vst [vmem:[#allocation854_spill] sm:$0xff] %v14549_v48  ;;  %v14564_v15 = vld [vmem:[%s17503_s5 + $0x1a78] sm:$0xff]  ;;  %v14569_v0 = vld [vmem:[%s17503_s5 + $0x1a80] sm:$0xff] }
 0x1a9   :  { %18364 = vst [vmem:[#allocation855_spill] sm:$0xff] %v14554_v47  ;;  %18365 = vst [vmem:[#allocation856_spill] sm:$0xff] %v14559_v16  ;;  %v14574_v48 = vld [vmem:[%s17503_s5 + $0x1a88] sm:$0xff]  ;;  %v14579_v47 = vld [vmem:[%s17503_s5 + $0x1a90] sm:$0xff] }
 0x1aa   :  { %18366 = vst [vmem:[#allocation857_spill] sm:$0xff] %v14564_v15  ;;  %18367 = vst [vmem:[#allocation858_spill] sm:$0xff] %v14569_v0  ;;  %v14584_v16 = vld [vmem:[%s17503_s5 + $0x1a98] sm:$0xff]  ;;  %v14589_v15 = vld [vmem:[%s17503_s5 + $0x1aa0] sm:$0xff] }
 0x1ab   :  { %18368 = vst [vmem:[#allocation859_spill] sm:$0xff] %v14574_v48  ;;  %18369 = vst [vmem:[#allocation860_spill] sm:$0xff] %v14579_v47  ;;  %v14594_v0 = vld [vmem:[%s17503_s5 + $0x1aa8] sm:$0xff]  ;;  %v14599_v48 = vld [vmem:[%s17503_s5 + $0x1ab0] sm:$0xff] }
 0x1ac   :  { %18370 = vst [vmem:[#allocation861_spill] sm:$0xff] %v14584_v16  ;;  %18371 = vst [vmem:[#allocation862_spill] sm:$0xff] %v14589_v15  ;;  %v14604_v47 = vld [vmem:[%s17503_s5 + $0x1ab8] sm:$0xff]  ;;  %v14609_v16 = vld [vmem:[%s17503_s5 + $0x1ac0] sm:$0xff] }
 0x1ad   :  { %18372 = vst [vmem:[#allocation863_spill] sm:$0xff] %v14594_v0  ;;  %18373 = vst [vmem:[#allocation864_spill] sm:$0xff] %v14599_v48  ;;  %v14614_v15 = vld [vmem:[%s17503_s5 + $0x1ac8] sm:$0xff]  ;;  %v14619_v0 = vld [vmem:[%s17503_s5 + $0x1ad0] sm:$0xff] }
 0x1ae   :  { %18374 = vst [vmem:[#allocation865_spill] sm:$0xff] %v14604_v47  ;;  %18375 = vst [vmem:[#allocation866_spill] sm:$0xff] %v14609_v16  ;;  %v14624_v48 = vld [vmem:[%s17503_s5 + $0x1ad8] sm:$0xff]  ;;  %v14629_v47 = vld [vmem:[%s17503_s5 + $0x1ae0] sm:$0xff] }
 0x1af   :  { %18376 = vst [vmem:[#allocation867_spill] sm:$0xff] %v14614_v15  ;;  %18377 = vst [vmem:[#allocation868_spill] sm:$0xff] %v14619_v0  ;;  %v14634_v16 = vld [vmem:[%s17503_s5 + $0x1ae8] sm:$0xff]  ;;  %v14639_v15 = vld [vmem:[%s17503_s5 + $0x1af0] sm:$0xff] }
 0x1b0   :  { %18378 = vst [vmem:[#allocation869_spill] sm:$0xff] %v14624_v48  ;;  %18379 = vst [vmem:[#allocation870_spill] sm:$0xff] %v14629_v47  ;;  %v14644_v0 = vld [vmem:[%s17503_s5 + $0x1af8] sm:$0xff]  ;;  %v14649_v48 = vld [vmem:[%s17503_s5 + $0x1b00] sm:$0xff] }
 0x1b1   :  { %18380 = vst [vmem:[#allocation871_spill] sm:$0xff] %v14634_v16  ;;  %18381 = vst [vmem:[#allocation872_spill] sm:$0xff] %v14639_v15  ;;  %v14654_v47 = vld [vmem:[%s17503_s5 + $0x1b08] sm:$0xff]  ;;  %v14659_v16 = vld [vmem:[%s17503_s5 + $0x1b10] sm:$0xff] }
 0x1b2   :  { %18382 = vst [vmem:[#allocation873_spill] sm:$0xff] %v14644_v0  ;;  %18383 = vst [vmem:[#allocation874_spill] sm:$0xff] %v14649_v48  ;;  %v14664_v15 = vld [vmem:[%s17503_s5 + $0x1b18] sm:$0xff]  ;;  %v14669_v0 = vld [vmem:[%s17503_s5 + $0x1b20] sm:$0xff] }
 0x1b3   :  { %18384 = vst [vmem:[#allocation875_spill] sm:$0xff] %v14654_v47  ;;  %18385 = vst [vmem:[#allocation876_spill] sm:$0xff] %v14659_v16  ;;  %v14674_v48 = vld [vmem:[%s17503_s5 + $0x1b28] sm:$0xff]  ;;  %v14679_v47 = vld [vmem:[%s17503_s5 + $0x1b30] sm:$0xff] }
 0x1b4   :  { %18386 = vst [vmem:[#allocation877_spill] sm:$0xff] %v14664_v15  ;;  %18387 = vst [vmem:[#allocation878_spill] sm:$0xff] %v14669_v0  ;;  %v14684_v16 = vld [vmem:[%s17503_s5 + $0x1b38] sm:$0xff]  ;;  %v14689_v15 = vld [vmem:[%s17503_s5 + $0x1b40] sm:$0xff] }
 0x1b5   :  { %18388 = vst [vmem:[#allocation879_spill] sm:$0xff] %v14674_v48  ;;  %18389 = vst [vmem:[#allocation880_spill] sm:$0xff] %v14679_v47  ;;  %v14694_v0 = vld [vmem:[%s17503_s5 + $0x1b48] sm:$0xff]  ;;  %v14699_v48 = vld [vmem:[%s17503_s5 + $0x1b50] sm:$0xff] }
 0x1b6   :  { %18390 = vst [vmem:[#allocation881_spill] sm:$0xff] %v14684_v16  ;;  %18391 = vst [vmem:[#allocation882_spill] sm:$0xff] %v14689_v15  ;;  %v14704_v47 = vld [vmem:[%s17503_s5 + $0x1b58] sm:$0xff]  ;;  %v14709_v16 = vld [vmem:[%s17503_s5 + $0x1b60] sm:$0xff] }
 0x1b7   :  { %18392 = vst [vmem:[#allocation883_spill] sm:$0xff] %v14694_v0  ;;  %18393 = vst [vmem:[#allocation884_spill] sm:$0xff] %v14699_v48  ;;  %v14714_v15 = vld [vmem:[%s17503_s5 + $0x1b68] sm:$0xff]  ;;  %v14719_v0 = vld [vmem:[%s17503_s5 + $0x1b70] sm:$0xff] }
 0x1b8   :  { %18394 = vst [vmem:[#allocation885_spill] sm:$0xff] %v14704_v47  ;;  %18395 = vst [vmem:[#allocation886_spill] sm:$0xff] %v14709_v16  ;;  %v14724_v48 = vld [vmem:[%s17503_s5 + $0x1b78] sm:$0xff]  ;;  %v14729_v47 = vld [vmem:[%s17503_s5 + $0x1b80] sm:$0xff] }
 0x1b9   :  { %18396 = vst [vmem:[#allocation887_spill] sm:$0xff] %v14714_v15  ;;  %18397 = vst [vmem:[#allocation888_spill] sm:$0xff] %v14719_v0  ;;  %v14734_v16 = vld [vmem:[%s17503_s5 + $0x1b88] sm:$0xff]  ;;  %v14739_v15 = vld [vmem:[%s17503_s5 + $0x1b90] sm:$0xff] }
 0x1ba   :  { %18398 = vst [vmem:[#allocation889_spill] sm:$0xff] %v14724_v48  ;;  %18399 = vst [vmem:[#allocation890_spill] sm:$0xff] %v14729_v47  ;;  %v14744_v0 = vld [vmem:[%s17503_s5 + $0x1b98] sm:$0xff]  ;;  %v14749_v48 = vld [vmem:[%s17503_s5 + $0x1ba0] sm:$0xff] }
 0x1bb   :  { %18400 = vst [vmem:[#allocation891_spill] sm:$0xff] %v14734_v16  ;;  %18401 = vst [vmem:[#allocation892_spill] sm:$0xff] %v14739_v15  ;;  %v14754_v47 = vld [vmem:[%s17503_s5 + $0x1ba8] sm:$0xff]  ;;  %v14759_v16 = vld [vmem:[%s17503_s5 + $0x1bb0] sm:$0xff] }
 0x1bc   :  { %18402 = vst [vmem:[#allocation893_spill] sm:$0xff] %v14744_v0  ;;  %18403 = vst [vmem:[#allocation894_spill] sm:$0xff] %v14749_v48  ;;  %v14764_v15 = vld [vmem:[%s17503_s5 + $0x1bb8] sm:$0xff]  ;;  %v14769_v0 = vld [vmem:[%s17503_s5 + $0x1bc0] sm:$0xff] }
 0x1bd   :  { %18404 = vst [vmem:[#allocation895_spill] sm:$0xff] %v14754_v47  ;;  %18405 = vst [vmem:[#allocation896_spill] sm:$0xff] %v14759_v16  ;;  %v14774_v48 = vld [vmem:[%s17503_s5 + $0x1bc8] sm:$0xff]  ;;  %v14779_v47 = vld [vmem:[%s17503_s5 + $0x1bd0] sm:$0xff] }
 0x1be   :  { %18406 = vst [vmem:[#allocation897_spill] sm:$0xff] %v14764_v15  ;;  %18407 = vst [vmem:[#allocation898_spill] sm:$0xff] %v14769_v0  ;;  %v14784_v16 = vld [vmem:[%s17503_s5 + $0x1bd8] sm:$0xff]  ;;  %v14789_v15 = vld [vmem:[%s17503_s5 + $0x1be0] sm:$0xff] }
 0x1bf   :  { %18408 = vst [vmem:[#allocation899_spill] sm:$0xff] %v14774_v48  ;;  %18409 = vst [vmem:[#allocation900_spill] sm:$0xff] %v14779_v47  ;;  %v14794_v0 = vld [vmem:[%s17503_s5 + $0x1be8] sm:$0xff]  ;;  %v14799_v48 = vld [vmem:[%s17503_s5 + $0x1bf0] sm:$0xff] }
 0x1c0   :  { %18410 = vst [vmem:[#allocation901_spill] sm:$0xff] %v14784_v16  ;;  %18411 = vst [vmem:[#allocation902_spill] sm:$0xff] %v14789_v15  ;;  %v14804_v47 = vld [vmem:[%s17503_s5 + $0x1bf8] sm:$0xff]  ;;  %v14809_v16 = vld [vmem:[%s17503_s5 + $0x1c00] sm:$0xff] }
 0x1c1   :  { %18412 = vst [vmem:[#allocation903_spill] sm:$0xff] %v14794_v0  ;;  %18413 = vst [vmem:[#allocation904_spill] sm:$0xff] %v14799_v48  ;;  %v14814_v15 = vld [vmem:[%s17503_s5 + $0x1c08] sm:$0xff]  ;;  %v14819_v0 = vld [vmem:[%s17503_s5 + $0x1c10] sm:$0xff] }
 0x1c2   :  { %18414 = vst [vmem:[#allocation905_spill] sm:$0xff] %v14804_v47  ;;  %18415 = vst [vmem:[#allocation906_spill] sm:$0xff] %v14809_v16  ;;  %v14824_v48 = vld [vmem:[%s17503_s5 + $0x1c18] sm:$0xff]  ;;  %v14829_v47 = vld [vmem:[%s17503_s5 + $0x1c20] sm:$0xff] }
 0x1c3   :  { %18416 = vst [vmem:[#allocation907_spill] sm:$0xff] %v14814_v15  ;;  %18417 = vst [vmem:[#allocation908_spill] sm:$0xff] %v14819_v0  ;;  %v14834_v16 = vld [vmem:[%s17503_s5 + $0x1c28] sm:$0xff]  ;;  %v14839_v15 = vld [vmem:[%s17503_s5 + $0x1c30] sm:$0xff] }
 0x1c4   :  { %18418 = vst [vmem:[#allocation909_spill] sm:$0xff] %v14824_v48  ;;  %18419 = vst [vmem:[#allocation910_spill] sm:$0xff] %v14829_v47  ;;  %v14844_v0 = vld [vmem:[%s17503_s5 + $0x1c38] sm:$0xff]  ;;  %v14849_v48 = vld [vmem:[%s17503_s5 + $0x1c40] sm:$0xff] }
 0x1c5   :  { %18420 = vst [vmem:[#allocation911_spill] sm:$0xff] %v14834_v16  ;;  %18421 = vst [vmem:[#allocation912_spill] sm:$0xff] %v14839_v15  ;;  %v14854_v47 = vld [vmem:[%s17503_s5 + $0x1c48] sm:$0xff]  ;;  %v14859_v16 = vld [vmem:[%s17503_s5 + $0x1c50] sm:$0xff] }
 0x1c6   :  { %18422 = vst [vmem:[#allocation913_spill] sm:$0xff] %v14844_v0  ;;  %18423 = vst [vmem:[#allocation914_spill] sm:$0xff] %v14849_v48  ;;  %v14864_v15 = vld [vmem:[%s17503_s5 + $0x1c58] sm:$0xff]  ;;  %v14869_v0 = vld [vmem:[%s17503_s5 + $0x1c60] sm:$0xff] }
 0x1c7   :  { %18424 = vst [vmem:[#allocation915_spill] sm:$0xff] %v14854_v47  ;;  %18425 = vst [vmem:[#allocation916_spill] sm:$0xff] %v14859_v16  ;;  %v14874_v48 = vld [vmem:[%s17503_s5 + $0x1c68] sm:$0xff]  ;;  %v14879_v47 = vld [vmem:[%s17503_s5 + $0x1c70] sm:$0xff] }
 0x1c8   :  { %18426 = vst [vmem:[#allocation917_spill] sm:$0xff] %v14864_v15  ;;  %18427 = vst [vmem:[#allocation918_spill] sm:$0xff] %v14869_v0  ;;  %v14884_v16 = vld [vmem:[%s17503_s5 + $0x1c78] sm:$0xff]  ;;  %v14889_v15 = vld [vmem:[%s17503_s5 + $0x1c80] sm:$0xff] }
 0x1c9   :  { %18428 = vst [vmem:[#allocation919_spill] sm:$0xff] %v14874_v48  ;;  %18429 = vst [vmem:[#allocation920_spill] sm:$0xff] %v14879_v47  ;;  %v14894_v0 = vld [vmem:[%s17503_s5 + $0x1c88] sm:$0xff]  ;;  %v14899_v48 = vld [vmem:[%s17503_s5 + $0x1c90] sm:$0xff] }
 0x1ca   :  { %18430 = vst [vmem:[#allocation921_spill] sm:$0xff] %v14884_v16  ;;  %18431 = vst [vmem:[#allocation922_spill] sm:$0xff] %v14889_v15  ;;  %v14904_v47 = vld [vmem:[%s17503_s5 + $0x1c98] sm:$0xff]  ;;  %v14909_v16 = vld [vmem:[%s17503_s5 + $0x1ca0] sm:$0xff] }
 0x1cb   :  { %18432 = vst [vmem:[#allocation923_spill] sm:$0xff] %v14894_v0  ;;  %18433 = vst [vmem:[#allocation924_spill] sm:$0xff] %v14899_v48  ;;  %v14914_v15 = vld [vmem:[%s17503_s5 + $0x1ca8] sm:$0xff]  ;;  %v14919_v0 = vld [vmem:[%s17503_s5 + $0x1cb0] sm:$0xff] }
 0x1cc   :  { %18434 = vst [vmem:[#allocation925_spill] sm:$0xff] %v14904_v47  ;;  %18435 = vst [vmem:[#allocation926_spill] sm:$0xff] %v14909_v16  ;;  %v14924_v48 = vld [vmem:[%s17503_s5 + $0x1cb8] sm:$0xff]  ;;  %v14929_v47 = vld [vmem:[%s17503_s5 + $0x1cc0] sm:$0xff] }
 0x1cd   :  { %18436 = vst [vmem:[#allocation927_spill] sm:$0xff] %v14914_v15  ;;  %18437 = vst [vmem:[#allocation928_spill] sm:$0xff] %v14919_v0  ;;  %v14934_v16 = vld [vmem:[%s17503_s5 + $0x1cc8] sm:$0xff]  ;;  %v14939_v15 = vld [vmem:[%s17503_s5 + $0x1cd0] sm:$0xff] }
 0x1ce   :  { %18438 = vst [vmem:[#allocation929_spill] sm:$0xff] %v14924_v48  ;;  %18439 = vst [vmem:[#allocation930_spill] sm:$0xff] %v14929_v47  ;;  %v14944_v0 = vld [vmem:[%s17503_s5 + $0x1cd8] sm:$0xff]  ;;  %v14949_v48 = vld [vmem:[%s17503_s5 + $0x1ce0] sm:$0xff] }
 0x1cf   :  { %18440 = vst [vmem:[#allocation931_spill] sm:$0xff] %v14934_v16  ;;  %18441 = vst [vmem:[#allocation932_spill] sm:$0xff] %v14939_v15  ;;  %v14954_v47 = vld [vmem:[%s17503_s5 + $0x1ce8] sm:$0xff]  ;;  %v14959_v16 = vld [vmem:[%s17503_s5 + $0x1cf0] sm:$0xff] }
 0x1d0   :  { %18442 = vst [vmem:[#allocation933_spill] sm:$0xff] %v14944_v0  ;;  %18443 = vst [vmem:[#allocation934_spill] sm:$0xff] %v14949_v48  ;;  %v14964_v15 = vld [vmem:[%s17503_s5 + $0x1cf8] sm:$0xff]  ;;  %v14969_v0 = vld [vmem:[%s17503_s5 + $0x1d00] sm:$0xff] }
 0x1d1   :  { %18444 = vst [vmem:[#allocation935_spill] sm:$0xff] %v14954_v47  ;;  %18445 = vst [vmem:[#allocation936_spill] sm:$0xff] %v14959_v16  ;;  %v14974_v48 = vld [vmem:[%s17503_s5 + $0x1d08] sm:$0xff]  ;;  %v14979_v47 = vld [vmem:[%s17503_s5 + $0x1d10] sm:$0xff] }
 0x1d2   :  { %18446 = vst [vmem:[#allocation937_spill] sm:$0xff] %v14964_v15  ;;  %18447 = vst [vmem:[#allocation938_spill] sm:$0xff] %v14969_v0  ;;  %v14984_v16 = vld [vmem:[%s17503_s5 + $0x1d18] sm:$0xff]  ;;  %v14989_v15 = vld [vmem:[%s17503_s5 + $0x1d20] sm:$0xff] }
 0x1d3   :  { %18448 = vst [vmem:[#allocation939_spill] sm:$0xff] %v14974_v48  ;;  %18449 = vst [vmem:[#allocation940_spill] sm:$0xff] %v14979_v47  ;;  %v14994_v0 = vld [vmem:[%s17503_s5 + $0x1d28] sm:$0xff]  ;;  %v14999_v48 = vld [vmem:[%s17503_s5 + $0x1d30] sm:$0xff] }
 0x1d4   :  { %18450 = vst [vmem:[#allocation941_spill] sm:$0xff] %v14984_v16  ;;  %18451 = vst [vmem:[#allocation942_spill] sm:$0xff] %v14989_v15  ;;  %v15004_v47 = vld [vmem:[%s17503_s5 + $0x1d38] sm:$0xff]  ;;  %v15009_v16 = vld [vmem:[%s17503_s5 + $0x1d40] sm:$0xff] }
 0x1d5   :  { %18452 = vst [vmem:[#allocation943_spill] sm:$0xff] %v14994_v0  ;;  %18453 = vst [vmem:[#allocation944_spill] sm:$0xff] %v14999_v48  ;;  %v15014_v15 = vld [vmem:[%s17503_s5 + $0x1d48] sm:$0xff]  ;;  %v15019_v0 = vld [vmem:[%s17503_s5 + $0x1d50] sm:$0xff] }
 0x1d6   :  { %18454 = vst [vmem:[#allocation945_spill] sm:$0xff] %v15004_v47  ;;  %18455 = vst [vmem:[#allocation946_spill] sm:$0xff] %v15009_v16  ;;  %v15024_v48 = vld [vmem:[%s17503_s5 + $0x1d58] sm:$0xff]  ;;  %v15029_v47 = vld [vmem:[%s17503_s5 + $0x1d60] sm:$0xff] }
 0x1d7   :  { %18456 = vst [vmem:[#allocation947_spill] sm:$0xff] %v15014_v15  ;;  %18457 = vst [vmem:[#allocation948_spill] sm:$0xff] %v15019_v0  ;;  %v15034_v16 = vld [vmem:[%s17503_s5 + $0x1d68] sm:$0xff]  ;;  %v15039_v15 = vld [vmem:[%s17503_s5 + $0x1d70] sm:$0xff] }
 0x1d8   :  { %18458 = vst [vmem:[#allocation949_spill] sm:$0xff] %v15024_v48  ;;  %18459 = vst [vmem:[#allocation950_spill] sm:$0xff] %v15029_v47  ;;  %v15044_v0 = vld [vmem:[%s17503_s5 + $0x1d78] sm:$0xff]  ;;  %v15049_v48 = vld [vmem:[%s17503_s5 + $0x1d80] sm:$0xff] }
 0x1d9   :  { %18460 = vst [vmem:[#allocation951_spill] sm:$0xff] %v15034_v16  ;;  %18461 = vst [vmem:[#allocation952_spill] sm:$0xff] %v15039_v15  ;;  %v15054_v47 = vld [vmem:[%s17503_s5 + $0x1d88] sm:$0xff]  ;;  %v15059_v16 = vld [vmem:[%s17503_s5 + $0x1d90] sm:$0xff] }
 0x1da   :  { %18462 = vst [vmem:[#allocation953_spill] sm:$0xff] %v15044_v0  ;;  %18463 = vst [vmem:[#allocation954_spill] sm:$0xff] %v15049_v48  ;;  %v15064_v15 = vld [vmem:[%s17503_s5 + $0x1d98] sm:$0xff]  ;;  %v15069_v0 = vld [vmem:[%s17503_s5 + $0x1da0] sm:$0xff] }
 0x1db   :  { %18464 = vst [vmem:[#allocation955_spill] sm:$0xff] %v15054_v47  ;;  %18465 = vst [vmem:[#allocation956_spill] sm:$0xff] %v15059_v16  ;;  %v15074_v48 = vld [vmem:[%s17503_s5 + $0x1da8] sm:$0xff]  ;;  %v15079_v47 = vld [vmem:[%s17503_s5 + $0x1db0] sm:$0xff] }
 0x1dc   :  { %18466 = vst [vmem:[#allocation957_spill] sm:$0xff] %v15064_v15  ;;  %18467 = vst [vmem:[#allocation958_spill] sm:$0xff] %v15069_v0  ;;  %v15084_v16 = vld [vmem:[%s17503_s5 + $0x1db8] sm:$0xff]  ;;  %v15089_v15 = vld [vmem:[%s17503_s5 + $0x1dc0] sm:$0xff] }
 0x1dd   :  { %18468 = vst [vmem:[#allocation959_spill] sm:$0xff] %v15074_v48  ;;  %18469 = vst [vmem:[#allocation960_spill] sm:$0xff] %v15079_v47  ;;  %v15094_v0 = vld [vmem:[%s17503_s5 + $0x1dc8] sm:$0xff]  ;;  %v15099_v48 = vld [vmem:[%s17503_s5 + $0x1dd0] sm:$0xff] }
 0x1de   :  { %18470 = vst [vmem:[#allocation961_spill] sm:$0xff] %v15084_v16  ;;  %18471 = vst [vmem:[#allocation962_spill] sm:$0xff] %v15089_v15  ;;  %v15104_v47 = vld [vmem:[%s17503_s5 + $0x1dd8] sm:$0xff]  ;;  %v15109_v16 = vld [vmem:[%s17503_s5 + $0x1de0] sm:$0xff] }
 0x1df   :  { %18472 = vst [vmem:[#allocation963_spill] sm:$0xff] %v15094_v0  ;;  %18473 = vst [vmem:[#allocation964_spill] sm:$0xff] %v15099_v48  ;;  %v15114_v15 = vld [vmem:[%s17503_s5 + $0x1de8] sm:$0xff]  ;;  %v15119_v0 = vld [vmem:[%s17503_s5 + $0x1df0] sm:$0xff] }
 0x1e0   :  { %18474 = vst [vmem:[#allocation965_spill] sm:$0xff] %v15104_v47  ;;  %18475 = vst [vmem:[#allocation966_spill] sm:$0xff] %v15109_v16  ;;  %v15124_v48 = vld [vmem:[%s17503_s5 + $0x1df8] sm:$0xff] }
 0x1e1   :  { %18476 = vst [vmem:[#allocation967_spill] sm:$0xff] %v15114_v15  ;;  %18477 = vst [vmem:[#allocation968_spill] sm:$0xff] %v15119_v0 }
 0x1e2   :  { %18478 = vst [vmem:[#allocation969_spill] sm:$0xff] %v15124_v48 }
 0x1e3   :  { %1991 = vsyncadd [#allocation6], 122880  ;;  %v1995_v16 = vld [vmem:[%s17498_s0 + $0x8] sm:$0xff]  ;;  %v2000_v47 = vld [vmem:[%s17498_s0 + $0x30] sm:$0xff]  ;;  %v10253_v32 = vmov 0.0   ;;  %v10254_v46 = vmov 0  }
 0x1e4   :  { %v8737_v15 = vpack.c.bf16 %v2000_v47, %v1995_v16  ;;  %v1994_v63 = vld [vmem:[%s17498_s0] sm:$0xff]  ;;  %v1999_v0 = vld [vmem:[%s17498_s0 + $0x28] sm:$0xff]  ;;  %2087 = vmatprep.mubr.f32.mxu0 %v10253_v32  ;;  %2093 = vmatprep.mubr.f32.mxu1 %v10253_v32  ;;  %v1997_v16 = vld [vmem:[%s17498_s0 + $0x18] sm:$0xff]  ;;  %vm2016_vm0 = vcmask 130048   ;;  %s10258_s21 = smov 110   ;;  %s10259_s22 = smov 95  }
 0x1e5   :  { %v8739_v48 = vpack.c.bf16 %v1999_v0, %v1994_v63  ;;  %v1992_v31 = vld [vmem:[%s17499_s1] sm:$0xff]  ;;  %9859 = vset.pattern.permute.xlu0 %v10254_v46  ;;  %10235 = vset.pattern.permute.xlu1 %v10254_v46  ;;  %v2003_v0 = vld [vmem:[%s17498_s0 + $0x48] sm:$0xff]  ;;  %v1996_v14 = vld [vmem:[%s17498_s0 + $0x10] sm:$0xff]  ;;  %s10260_s23 = smov 96   ;;  %s10261_s5 = smov 125   ;;  %vm2300_vm1 = vcmask 1039360  }
 0x1e6   :  { %v2002_v47 = vld [vmem:[%s17498_s0 + $0x40] sm:$0xff]  ;;  %8738 = vmatprep.subr.bf16.mxu0 %v8737_v15  ;;  %9837 = vmatprep.subr.bf16.mxu1 %v8737_v15  ;;  %v1993_v15 = vld [vmem:[%s17499_s1 + $0x8] sm:$0xff]  ;;  %s10256_s1 = smov 112   ;;  %s10262_s24 = smov 94   ;;  %v3098_v27 = vld [vmem:[%s17502_s4 + $0x18] sm:$0xff]  ;;  %vm2345_vm2 = vcmask 1031168  }
 0x1e7   :  { %v8741_v45 = vpack.c.bf16 %v2002_v47, %v1997_v16  ;;  %v1998_v63 = vld [vmem:[%s17498_s0 + $0x20] sm:$0xff]  ;;  %8740 = vmatpush1.bf16.msra.mxu0 %v8739_v48  ;;  %9838 = vmatpush1.bf16.msra.mxu1 %v8739_v48  ;;  %v2001_v16 = vld [vmem:[%s17498_s0 + $0x38] sm:$0xff]  ;;  %v2005_v48 = vld [vmem:[%s17500_s2 + $0x8] sm:$0xff]  ;;  %s10255_s0 = smov 111   ;;  %s10263_s25 = smov 127   ;;  %vm2390_vm3 = vcmask 1022976  }
 0x1e8   :  { %v8745_v46 = vpack.c.bf16 %v2003_v0, %v1998_v63  ;;  %v2004_v47 = vld [vmem:[%s17500_s2] sm:$0xff]  ;;  %v8743_v13 = vpack.c.bf16 %v2001_v16, %v1996_v14  ;;  %s10257_s2 = smov 109   ;;  %s10264_s26 = smov 126   ;;  %v3100_v42 = vld [vmem:[%s17502_s4 + $0x28] sm:$0xff]  ;;  %vm2480_vm4 = vcmask 908288   ;;  %vm2570_vm5 = vcmask 891904  }
 0x1e9   :  { %8742 = vmatprep.subr.bf16.mxu1 %v8741_v45  ;;  %2008 = vperm.xlu0 %9859, %v2004_v47   ;;  %s10265_s27 = smov 93   ;;  %s10266_s28 = smov 80   ;;  %v3095_v57 = vld [vmem:[%s17502_s4] sm:$0xff]  ;;  %vm2435_vm6 = vcmask 916480   ;;  %vm2660_vm7 = vcmask 777216   ;;  %vm2525_vm8 = vcmask 900096  }
 0x1ea   :  { %8746 = vmatprep.subr.bf16.mxu0 %v8745_v46  ;;  %7666 = vmatmul.mubr.msk.f32.vlgmr.msra.gmra.mrb[0].mxu0 %vm2016_vm0, %v1992_v31  ;;  %s10267_s29 = smov 79   ;;  %s10268_s30 = smov 78   ;;  %v3099_v40 = vld [vmem:[%s17502_s4 + $0x20] sm:$0xff]  ;;  %vm2615_vm9 = vcmask 785408   ;;  %vm2750_vm10 = vcmask 760832   ;;  %vm2705_vm11 = vcmask 769024  }
 0x1eb   :  { %7667 = vmatmul.mubr.msk.f32.vlgmr.msra.gmra.mrb[0].mxu1 %vm2016_vm0, %v1993_v15  ;;  %8748 = vmatpush3.bf16.msra.mxu0 %v8745_v46  ;;  %s10269_s10 = smov 77   ;;  %vm2795_vm12 = vcmask 654336   ;;  %vm2840_vm13 = vcmask 646144   ;;  %vm2885_vm14 = vcmask 637952   ;;  %vm2930_vm15 = vcmask 629760   ;;  %s10271_s20 = smov 32  }
 0x1ec   :  { %8744 = vmatpush1.bf16.msra.mxu1 %v8743_v13  ;;  %2164 = vmatprep.mubr.f32.mxu1 %v10253_v32 }
 0x1ed   :  { %8734 = vmatprep.mubr.msk.f32.mxu0 %vm2016_vm0, %v1992_v31  ;;  %2013 = vperm.xlu0 %9859, %v2005_v48  }
 0x1ee   :  { %8735 = vmatmul.mubr.msk.f32.vlgmr.msra.gmra.mrb[2].mxu0 %vm2016_vm0, %v1993_v15 }
 0x1ef   :  { %7668 = vmatmul.mubr.msk.f32.vlgmr.msra.gmra.mrb[2].mxu1 %vm2016_vm0, %v1992_v31 }
 0x1f0   :  { %2170 = vmatprep.mubr.f32.mxu1 %v10253_v32 }
 0x1f3   :  { %7669 = vmatmul.mubr.msk.f32.gmra.mrb[4].mxu1 %vm2016_vm0, %v1993_v15 }
 0x268   :  { %v2009_v14 = vpop.permute.xlu0 %2008 }
 0x26c   :  { %v2014_v45 = vpop.permute.xlu0 %2013 }
 0x2bd   :  { %v2089_v63 = vpop.f32.mrb[0].mxu0 }
 0x2be   :  { %v2095_v0 = vpop.f32.mrb[0].mxu1  ;;  %v2090_v16 = vadd.f32 %v2089_v63, %v2009_v14  ;;  %v2091_v62 = vpop.f32.mrb[1].mxu0 }
 0x2bf   :  { %v2096_v47 = vadd.f32 %v2095_v0, %v2014_v45  ;;  %v2097_v13 = vpop.f32.mrb[1].mxu1  ;;  %v2092_v46 = vadd.f32 %v2091_v62, %v2009_v14 }
 0x2c0   :  { %v2098_v61 = vadd.f32 %v2097_v13, %v2014_v45  ;;  %v2252_v30 = vmax.f32 %v2090_v16, 0.0 }
 0x2c1   :  { %v2257_v29 = vmax.f32 %v2096_v47, 0.0  ;;  %v2253_v48 = vmax.f32 %v2092_v46, 0.0  ;;  %v8736_v43 = vpop.f32.mrb[2].mxu0 }
 0x2c2   :  { %v15174_v44 = vmax.f32 %v2098_v61, 0.0  ;;  %v2166_v31 = vpop.f32.mrb[2].mxu1  ;;  %v2249_v12 = vadd.f32 %v8736_v43, %v2014_v45  ;;  %v2243_v11 = vpop.f32.mrb[3].mxu0 }
 0x2c3   :  { %v2167_v32 = vadd.f32 %v2166_v31, %v2009_v14  ;;  %v2168_v15 = vpop.f32.mrb[3].mxu1  ;;  %v15176_v60 = vpack.i.bf16 %v2257_v29, %v2252_v30  ;;  %v2244_v63 = vadd.f32 %v2243_v11, %v2009_v14  ;;  %v8751_v28 = vpack.c.bf16 %v2257_v29, %v2252_v30 }
 0x2c4   :  { %v2169_v59 = vadd.f32 %v2168_v15, %v2009_v14  ;;  %v8749_v0 = vpack.c.bf16 %v15174_v44, %v2253_v48  ;;  %v2261_v13 = vmax.f32 %v2249_v12, 0.0  ;;  %v9905_v11 = vpack.i.bf16 %v2253_v48, %v2252_v30 }
 0x2c5   :  { %v2254_v62 = vmax.f32 %v2167_v32, 0.0  ;;  %9866 = vrot.lane.b32.xlu0 %v15176_v60, %s10255_s0  ;;  %9861 = vrot.lane.b32.xlu1 %v15176_v60, %s10256_s1  ;;  %v2256_v61 = vmax.f32 %v2244_v63, 0.0 }
 0x2c6   :  { %v2255_v43 = vmax.f32 %v2169_v59, 0.0  ;;  %v2172_v16 = vpop.f32.mrb[4].mxu1  ;;  %8750 = vmatprep.subr.bf16.mxu1 %v8749_v0  ;;  %v9910_v14 = vpack.i.bf16 %v2257_v29, %v2261_v13 }
 0x2c7   :  { %v2173_v47 = vadd.f32 %v2172_v16, %v2014_v45  ;;  %v2174_v46 = vpop.f32.mrb[5].mxu1  ;;  %8752 = vmatpush1.bf16.msra.mxu1 %v8751_v28  ;;  %v15183_v32 = vpack.i.bf16 %v2254_v62, %v2253_v48  ;;  %v9960_v28 = vpack.i.bf16 %v2257_v29, %v2256_v61  ;;  %v9980_v48 = vpack.i.bf16 %v15174_v44, %v2256_v61 }
 0x2c8   :  { %v2175_v31 = vadd.f32 %v2174_v46, %v2014_v45  ;;  %v9965_v30 = vpack.i.bf16 %v2255_v43, %v2254_v62  ;;  %v15200_v63 = vpack.i.bf16 %v2256_v61, %v2255_v43 }
 0x2c9   :  { %v15185_v12 = vmax.f32 %v2173_v47, 0.0  ;;  %9876 = vrot.lane.b32.xlu0 %v15176_v60, %s10257_s2  ;;  %9871 = vrot.lane.b32.xlu1 %v15176_v60, %s10258_s21 }
 0x2ca   :  { %v15191_v59 = vmax.f32 %v2175_v31, 0.0 }
 0x2cb   :  { %v8815_v15 = vpack.c.bf16 %v15185_v12, %v2254_v62  ;;  %v15204_v29 = vpack.i.bf16 %v15185_v12, %v15174_v44 }
 0x2cc   :  { %v8813_v45 = vpack.c.bf16 %v15191_v59, %v2255_v43  ;;  %v15210_v0 = vpack.i.bf16 %v2261_v13, %v15191_v59  ;;  %v10105_v62 = vpack.i.bf16 %v15191_v59, %v15185_v12 }
 0x2cd   :  { %9886 = vrot.lane.b32.xlu0 %v15176_v60, %s10259_s22  ;;  %9881 = vrot.lane.b32.xlu1 %v15176_v60, %s10260_s23 }
 0x2ce   :  { %8814 = vmatprep.subr.bf16.mxu0 %v8813_v45  ;;  %v2956_v45 = vld [vmem:[%s17501_s3 + $0x8] sm:$0xff] }
 0x2cf   :  { %8816 = vmatpush1.bf16.msra.mxu0 %v8815_v15  ;;  %3195 = vmatprep.mubr.f32.mxu1 %v2956_v45 }
 0x2d0   :  { %3296 = vmatprep.mubr.f32.mxu0 %v2956_v45 }
 0x2d1   :  { %9906 = vrot.lane.b32.xlu0 %v9905_v11, %s10261_s5  ;;  %9891 = vrot.lane.b32.xlu1 %v15176_v60, %s10262_s24 }
 0x2d5   :  { %9911 = vrot.lane.b32.xlu0 %v9910_v14, %s10261_s5  ;;  %9896 = vrot.lane.b32.xlu1 %v9905_v11, %s10263_s25 }
 0x2d9   :  { %9921 = vrot.lane.b32.xlu0 %v15183_v32, %s10255_s0  ;;  %9901 = vrot.lane.b32.xlu1 %v9905_v11, %s10264_s26 }
 0x2dd   :  { %9931 = vrot.lane.b32.xlu0 %v15183_v32, %s10257_s2  ;;  %9916 = vrot.lane.b32.xlu1 %v15183_v32, %s10256_s1 }
 0x2e1   :  { %9941 = vrot.lane.b32.xlu0 %v15183_v32, %s10259_s22  ;;  %9926 = vrot.lane.b32.xlu1 %v15183_v32, %s10258_s21 }
 0x2e5   :  { %9951 = vrot.lane.b32.xlu0 %v15183_v32, %s10265_s27  ;;  %9936 = vrot.lane.b32.xlu1 %v15183_v32, %s10260_s23 }
 0x2e9   :  { %9961 = vrot.lane.b32.xlu0 %v9960_v28, %s10263_s25  ;;  %9946 = vrot.lane.b32.xlu1 %v15183_v32, %s10262_s24 }
 0x2ed   :  { %9966 = vrot.lane.b32.xlu0 %v9965_v30, %s10264_s26  ;;  %9956 = vrot.lane.b32.xlu1 %v9965_v30, %s10263_s25 }
 0x2f1   :  { %9981 = vrot.lane.b32.xlu0 %v9980_v48, %s10261_s5  ;;  %9971 = vrot.lane.b32.xlu1 %v9960_v28, %s10264_s26  ;;  %v3096_v48 = vld [vmem:[%s17502_s4 + $0x8] sm:$0xff] }
 0x2f5   :  { %9986 = vrot.lane.b32.xlu0 %v15200_v63, %s10256_s1  ;;  %9976 = vrot.lane.b32.xlu1 %v9965_v30, %s10261_s5 }
 0x2f9   :  { %9996 = vrot.lane.b32.xlu0 %v15200_v63, %s10258_s21  ;;  %9991 = vrot.lane.b32.xlu1 %v15200_v63, %s10255_s0 }
 0x2fd   :  { %10006 = vrot.lane.b32.xlu0 %v15200_v63, %s10260_s23  ;;  %10001 = vrot.lane.b32.xlu1 %v15200_v63, %s10257_s2 }
 0x301   :  { %10016 = vrot.lane.b32.xlu0 %v15200_v63, %s10262_s24  ;;  %10011 = vrot.lane.b32.xlu1 %v15200_v63, %s10259_s22 }
 0x305   :  { %10031 = vrot.lane.b32.xlu0 %v15204_v29, %s10264_s26  ;;  %10021 = vrot.lane.b32.xlu1 %v15200_v63, %s10265_s27 }
 0x309   :  { %10041 = vrot.lane.b32.xlu0 %v15204_v29, %s10255_s0  ;;  %10026 = vrot.lane.b32.xlu1 %v15204_v29, %s10263_s25 }
 0x30d   :  { %10051 = vrot.lane.b32.xlu0 %v15204_v29, %s10257_s2  ;;  %10036 = vrot.lane.b32.xlu1 %v15204_v29, %s10256_s1 }
 0x311   :  { %10061 = vrot.lane.b32.xlu0 %v15204_v29, %s10259_s22  ;;  %10046 = vrot.lane.b32.xlu1 %v15204_v29, %s10258_s21 }
 0x315   :  { %10071 = vrot.lane.b32.xlu0 %v15204_v29, %s10265_s27  ;;  %10056 = vrot.lane.b32.xlu1 %v15204_v29, %s10260_s23 }
 0x319   :  { %10076 = vrot.lane.b32.xlu0 %v15210_v0, %s10263_s25  ;;  %10066 = vrot.lane.b32.xlu1 %v15204_v29, %s10262_s24 }
 0x31d   :  { %10081 = vrot.lane.b32.xlu0 %v15176_v60, %s10265_s27  ;;  %10086 = vrot.lane.b32.xlu1 %v15183_v32, %s10266_s28 }
 0x321   :  { %10091 = vrot.lane.b32.xlu0 %v15200_v63, %s10266_s28  ;;  %10096 = vrot.lane.b32.xlu1 %v15204_v29, %s10266_s28 }
 0x325   :  { %10116 = vrot.lane.b32.xlu0 %v15210_v0, %s10256_s1  ;;  %10101 = vrot.lane.b32.xlu1 %v15210_v0, %s10264_s26 }
 0x329   :  { %10121 = vrot.lane.b32.xlu0 %v15183_v32, %s10267_s29  ;;  %10106 = vrot.lane.b32.xlu1 %v10105_v62, %s10261_s5 }
 0x32d   :  { %10136 = vrot.lane.b32.xlu0 %v15210_v0, %s10258_s21  ;;  %10111 = vrot.lane.b32.xlu1 %v15176_v60, %s10266_s28 }
 0x331   :  { %10141 = vrot.lane.b32.xlu0 %v15204_v29, %s10267_s29  ;;  %10126 = vrot.lane.b32.xlu1 %v15210_v0, %s10255_s0 }
 0x335   :  { %10151 = vrot.lane.b32.xlu0 %v15210_v0, %s10260_s23  ;;  %10131 = vrot.lane.b32.xlu1 %v15200_v63, %s10267_s29 }
 0x337   :  { %v15300_v44 = vpop.permute.xlu0 %9866  ;;  %v15302_v13 = vpop.permute.xlu1 %9861 }
 0x339   :  { %10156 = vrot.lane.b32.xlu0 %v15176_v60, %s10267_s29  ;;  %10146 = vrot.lane.b32.xlu1 %v15210_v0, %s10257_s2 }
 0x33b   :  { %v15308_v43 = vpop.permute.xlu0 %9876  ;;  %v15310_v61 = vpop.permute.xlu1 %9871 }
 0x33d   :  { %10171 = vrot.lane.b32.xlu0 %v15210_v0, %s10262_s24  ;;  %10161 = vrot.lane.b32.xlu1 %v15183_v32, %s10268_s30 }
 0x33f   :  { %v15315_v16 = vpop.permute.xlu0 %9886  ;;  %v15317_v47 = vpop.permute.xlu1 %9881 }
 0x340   :  { %18479 = vst [vmem:[#allocation970_spill] sm:$0xff] %v15317_v47 }
 0x341   :  { %10176 = vrot.lane.b32.xlu0 %v15200_v63, %s10268_s30  ;;  %10166 = vrot.lane.b32.xlu1 %v15210_v0, %s10259_s22 }
 0x343   :  { %v15322_v46 = vpop.permute.xlu0 %9906  ;;  %v15324_v11 = vpop.permute.xlu1 %9891 }
 0x344   :  { %18480 = vst [vmem:[#allocation971_spill] sm:$0xff] %v15324_v11 }
 0x345   :  { %10196 = vrot.lane.b32.xlu0 %v15210_v0, %s10266_s28  ;;  %10181 = vrot.lane.b32.xlu1 %v15204_v29, %s10268_s30 }
 0x347   :  { %v15328_v14 = vpop.permute.xlu0 %9911  ;;  %v15330_v31 = vpop.permute.xlu1 %9896 }
 0x348   :  { %v9899_v56 = vunpack.i.h.bf16 %v15330_v31  ;;  %v9898_v55 = vunpack.i.l.bf16 %v15330_v31 }
 0x349   :  { %10201 = vrot.lane.b32.xlu0 %v15183_v32, %s10269_s10  ;;  %10186 = vrot.lane.b32.xlu1 %v15210_v0, %s10265_s27 }
 0x34a   :  { %v2301_v31 = vsel %vm2300_vm1, %v9898_v55, %v9899_v56 }
 0x34b   :  { %v15335_v12 = vpop.permute.xlu0 %9921  ;;  %v15337_v59 = vpop.permute.xlu1 %9901 }
 0x34c   :  { %v9903_v35 = vunpack.i.l.bf16 %v15337_v59  ;;  %v18486_v34 = vunpack.i.h.bf16 %v15335_v12 }
 0x34d   :  { %10216 = vrot.lane.b32.xlu0 %v15210_v0, %s10268_s30  ;;  %10191 = vrot.lane.b32.xlu1 %v15176_v60, %s10268_s30 }
 0x34f   :  { %v15341_v15 = vpop.permute.xlu0 %9931  ;;  %v15343_v28 = vpop.permute.xlu1 %9916 }
 0x350   :  { %v9918_v51 = vunpack.i.l.bf16 %v15343_v28 }
 0x351   :  { %10221 = vrot.lane.b32.xlu0 %v15204_v29, %s10269_s10  ;;  %10206 = vrot.lane.b32.xlu1 %v15210_v0, %s10267_s29 }
 0x353   :  { %v15348_v32 = vpop.permute.xlu0 %9941  ;;  %v15350_v30 = vpop.permute.xlu1 %9926 }
 0x354   :  { %v9928_v33 = vunpack.i.l.bf16 %v15350_v30  ;;  %v9929_v1 = vunpack.i.h.bf16 %v15350_v30 }
 0x355   :  { %10231 = vrot.lane.b32.xlu0 %v15176_v60, %s10269_s10  ;;  %10211 = vrot.lane.b32.xlu1 %v15200_v63, %s10269_s10 }
 0x357   :  { %v15360_v29 = vpop.permute.xlu0 %9951  ;;  %v15362_v62 = vpop.permute.xlu1 %9936 }
 0x359   :  { %3108 = vperm.xlu0 %9859, %v3096_v48   ;;  %10226 = vrot.lane.b32.xlu1 %v15210_v0, %s10269_s10 }
 0x35b   :  { %v15368_v60 = vpop.permute.xlu0 %9961  ;;  %v15370_v63 = vpop.permute.xlu1 %9946 }
 0x35d   :  { %3118 = vperm.xlu0 %9859, %v3098_v27   ;;  %3103 = vperm.xlu1 %10235, %v3095_v57  }
 0x35f   :  { %v15375_v41 = vpop.permute.xlu0 %9966  ;;  %v15377_v10 = vpop.permute.xlu1 %9956 }
 0x360   :  { %v18481_v53 = vunpack.i.l.bf16 %v15377_v10  ;;  %v9959_v50 = vunpack.i.h.bf16 %v15377_v10 }
 0x361   :  { %3128 = vperm.xlu0 %9859, %v3100_v42   ;;  %v3097_v42 = vld [vmem:[%s17502_s4 + $0x10] sm:$0xff] }
 0x362   :  { %3113 = vperm.xlu1 %10235, %v3097_v42   ;;  %v9904_v42 = vunpack.i.h.bf16 %v15337_v59  ;;  %v2302_v22 = vsel %vm2300_vm1, %v9899_v56, %v18481_v53  ;;  %v18483_v53 = vunpack.i.l.bf16 %v15375_v41  ;;  %v9873_v59 = vunpack.i.l.bf16 %v15310_v61 }
 0x363   :  { %v15379_v45 = vpop.permute.xlu0 %9981  ;;  %v15381_v0 = vpop.permute.xlu1 %9971 }
 0x364   :  { %v9974_v55 = vunpack.i.h.bf16 %v15381_v0 }
 0x366   :  { %3123 = vperm.xlu1 %10235, %v3099_v40   ;;  %v9964_v40 = vunpack.i.h.bf16 %v15368_v60 }
 0x367   :  { %v15383_v48 = vpop.permute.xlu0 %9986  ;;  %v15385_v9 = vpop.permute.xlu1 %9976 }
 0x36b   :  { %v15387_v58 = vpop.permute.xlu0 %9996  ;;  %v15389_v27 = vpop.permute.xlu1 %9991 }
 0x36f   :  { %v15397_v26 = vpop.permute.xlu0 %10006  ;;  %v15399_v25 = vpop.permute.xlu1 %10001 }
 0x373   :  { %v15404_v39 = vpop.permute.xlu0 %10016  ;;  %v15406_v8 = vpop.permute.xlu1 %10011 }
 0x377   :  { %v15408_v7 = vpop.permute.xlu0 %10031  ;;  %v15410_v57 = vpop.permute.xlu1 %10021 }
 0x378   :  { %v10033_v23 = vunpack.i.l.bf16 %v15408_v7  ;;  %v18482_v6 = vunpack.i.h.bf16 %v15408_v7 }
 0x37a   :  { %v2351_v36 = vsel %vm2345_vm2, %v10033_v23, %v18482_v6  ;;  %v2350_v6 = vsel %vm2345_vm2, %v9974_v55, %v10033_v23 }
 0x37b   :  { %v15417_v38 = vpop.permute.xlu0 %10041  ;;  %v15419_v37 = vpop.permute.xlu1 %10026 }
 0x37c   :  { %v17508_v5 = vunpack.i.h.bf16 %v15419_v37  ;;  %v10028_v54 = vunpack.i.l.bf16 %v15419_v37 }
 0x37e   :  { %v2305_v24 = vsel %vm2300_vm1, %v9964_v40, %v10028_v54  ;;  %v2306_v21 = vsel %vm2300_vm1, %v10028_v54, %v17508_v5  ;;  %v2347_v54 = vsel %vm2345_vm2, %v9904_v42, %v18483_v53  ;;  %v9868_v5 = vunpack.i.l.bf16 %v15300_v44 }
 0x37f   :  { %v15439_v4 = vpop.permute.xlu0 %10051  ;;  %v15441_v3 = vpop.permute.xlu1 %10036  ;;  %v8753_v40 = vpack.c.bf16 %v2306_v21, %v2302_v22  ;;  %v8755_v52 = vpack.c.bf16 %v2305_v24, %v2301_v31  ;;  %v8757_v56 = vpack.c.bf16 %v2351_v36, %v2347_v54  ;;  %v9863_v22 = vunpack.i.l.bf16 %v15302_v13 }
 0x380   :  { %v2346_v31 = vsel %vm2345_vm2, %v9903_v35, %v9904_v42  ;;  %v9878_v36 = vunpack.i.l.bf16 %v15308_v43  ;;  %v9888_v35 = vunpack.i.l.bf16 %v15315_v16  ;;  %v9923_v21 = vunpack.i.l.bf16 %v15335_v12 }
 0x381   :  { %8754 = vmatprep.subr.bf16.mxu1 %v8753_v40  ;;  %v9908_v40 = vunpack.i.l.bf16 %v15322_v46  ;;  %v18484_v42 = vunpack.i.h.bf16 %v15322_v46  ;;  %v9914_v54 = vunpack.i.h.bf16 %v15328_v14 }
 0x382   :  { %8756 = vmatpush1.bf16.msra.mxu1 %v8755_v52  ;;  %v8759_v52 = vpack.c.bf16 %v2350_v6, %v2346_v31  ;;  %v9883_v31 = vunpack.i.l.bf16 %v15317_v47  ;;  %v9943_v6 = vunpack.i.l.bf16 %v15348_v32  ;;  %v15489_v49 = vsel %vm2480_vm4, %v9868_v5, %v9923_v21 }
 0x383   :  { %v15453_v53 = vpop.permute.xlu0 %10061  ;;  %v15455_v23 = vpop.permute.xlu1 %10046  ;;  %8758 = vmatprep.subr.bf16.mxu1 %v8757_v56  ;;  %v9933_v56 = vunpack.i.l.bf16 %v15341_v15  ;;  %v15479_v19 = vsel %vm2390_vm3, %v9908_v40, %v18484_v42  ;;  %v15495_v42 = vsel %vm2435_vm6, %v9863_v22, %v9918_v51  ;;  %v15500_v2 = vsel %vm2480_vm4, %v9923_v21, %v18486_v34 }
 0x384   :  { %v18488_v5 = vunpack.i.h.bf16 %v15343_v28  ;;  %v18489_v22 = vunpack.i.h.bf16 %v15341_v15  ;;  %v15517_v34 = vsel %vm2660_vm7, %v9888_v35, %v9943_v6  ;;  %v9963_v21 = vunpack.i.l.bf16 %v15368_v60 }
 0x385   :  { %v15492_v40 = vsel %vm2570_vm5, %v9878_v36, %v9933_v56  ;;  %18491 = vst [vmem:[#allocation975_spill] sm:$0xff] %v15517_v34  ;;  %v18493_v35 = vunpack.i.h.bf16 %v15419_v37  ;;  %v17515_v47 = vunpack.i.l.bf16 %v15360_v29  ;;  %v9948_v37 = vunpack.i.l.bf16 %v15370_v63 }
 0x386   :  { %8760 = vmatpush1.bf16.msra.mxu1 %v8759_v52  ;;  %v9893_v52 = vunpack.i.l.bf16 %v15324_v11  ;;  %18485 = vst [vmem:[#allocation972_spill] sm:$0xff] %v15492_v40  ;;  %v15509_v36 = vsel %vm2435_vm6, %v9918_v51, %v18488_v5  ;;  %v15514_v11 = vsel %vm2570_vm5, %v9933_v56, %v18489_v22  ;;  %v15521_v40 = vsel %vm2525_vm8, %v9873_v59, %v9928_v33 }
 0x387   :  { %v15472_v55 = vpop.permute.xlu0 %10071  ;;  %v15474_v20 = vpop.permute.xlu1 %10056  ;;  %18490 = vst [vmem:[#allocation974_spill] sm:$0xff] %v15514_v11  ;;  %v9938_v51 = vunpack.i.l.bf16 %v15362_v62  ;;  %v18492_v5 = vunpack.i.l.bf16 %v15377_v10  ;;  %v2304_v60 = vsel %vm2300_vm1, %v9959_v50, %v9963_v21  ;;  %v17516_v59 = vunpack.i.h.bf16 %v15360_v29 }
 0x388   :  { %v9993_v56 = vunpack.i.l.bf16 %v15389_v27 }
 0x389   :  { %v15551_v21 = vsel %vm2615_vm9, %v9883_v31, %v9938_v51  ;;  %v9979_v31 = vunpack.i.h.bf16 %v15385_v9 }
 0x38a   :  { %18496 = vst [vmem:[#allocation977_spill] sm:$0xff] %v15551_v21  ;;  %v9999_v21 = vunpack.i.h.bf16 %v15387_v58 }
 0x38b   :  { %v10077_v18 = vpop.permute.xlu0 %10076  ;;  %v15504_v17 = vpop.permute.xlu1 %10066 }
 0x38c   :  { %18487 = vst [vmem:[#allocation973_spill] sm:$0xff] %v15504_v17  ;;  %v10079_v24 = vunpack.i.h.bf16 %v10077_v18  ;;  %v10078_v30 = vunpack.i.l.bf16 %v10077_v18  ;;  %v2303_v17 = vsel %vm2300_vm1, %v18492_v5, %v9959_v50  ;;  %v18495_v50 = vunpack.i.h.bf16 %v15348_v32 }
 0x38e   :  { %v2307_v22 = vsel %vm2300_vm1, %v18493_v35, %v10078_v30  ;;  %v2308_v18 = vsel %vm2300_vm1, %v10078_v30, %v10079_v24  ;;  %v15543_v35 = vsel %vm2525_vm8, %v9928_v33, %v9929_v1  ;;  %v15548_v24 = vsel %vm2660_vm7, %v9943_v6, %v18495_v50 }
 0x38f   :  { %v15536_v34 = vpop.permute.xlu0 %10081  ;;  %v15538_v11 = vpop.permute.xlu1 %10086  ;;  %v8817_v10 = vpack.c.bf16 %v2308_v18, %v2304_v60  ;;  %v8819_v5 = vpack.c.bf16 %v2307_v22, %v2303_v17  ;;  %v9969_v30 = vunpack.i.h.bf16 %v15375_v41  ;;  %v9973_v60 = vunpack.i.l.bf16 %v15381_v0 }
 0x390   :  { %18494 = vst [vmem:[#allocation976_spill] sm:$0xff] %v15538_v11  ;;  %v18497_v17 = vunpack.i.h.bf16 %v15362_v62  ;;  %v18499_v33 = vunpack.i.h.bf16 %v15379_v45  ;;  %v9988_v6 = vunpack.i.l.bf16 %v15383_v48  ;;  %v9978_v50 = vunpack.i.l.bf16 %v15385_v9 }
 0x391   :  { %8818 = vmatprep.subr.bf16.mxu0 %v8817_v10  ;;  %v9989_v0 = vunpack.i.h.bf16 %v15383_v48  ;;  %v9998_v10 = vunpack.i.l.bf16 %v15387_v58  ;;  %v15583_v9 = vsel %vm2705_vm11, %v9893_v52, %v9948_v37  ;;  %v9983_v48 = vunpack.i.l.bf16 %v15379_v45 }
 0x392   :  { %v15558_v22 = vsel %vm2615_vm9, %v9938_v51, %v18497_v17  ;;  %v15563_v18 = vsel %vm2390_vm3, %v9914_v54, %v18499_v33  ;;  %8820 = vmatpush1.bf16.msra.mxu0 %v8819_v5  ;;  %v15580_v54 = vsel %vm2750_vm10, %v17515_v47, %v17516_v59  ;;  %18503 = vst [vmem:[#allocation982_spill] sm:$0xff] %v15583_v9  ;;  %v9994_v5 = vunpack.i.h.bf16 %v15389_v27 }
 0x393   :  { %18498 = vst [vmem:[#allocation978_spill] sm:$0xff] %v15558_v22  ;;  %v15571_v51 = vpop.permute.xlu0 %10091  ;;  %v15573_v17 = vpop.permute.xlu1 %10096  ;;  %18502 = vst [vmem:[#allocation981_spill] sm:$0xff] %v15580_v54  ;;  %v18504_v33 = vunpack.i.h.bf16 %v15370_v63  ;;  %v2349_v47 = vsel %vm2345_vm2, %v9969_v30, %v9973_v60  ;;  %v8763_v52 = vpack.c.bf16 %v15563_v18, %v15479_v19  ;;  %v18507_v59 = vunpack.i.h.bf16 %v15343_v28 }
 0x394   :  { %18500 = vst [vmem:[#allocation979_spill] sm:$0xff] %v15571_v51  ;;  %18501 = vst [vmem:[#allocation980_spill] sm:$0xff] %v15573_v17  ;;  %v18506_v17 = vunpack.i.l.bf16 %v15375_v41  ;;  %v2393_v9 = vsel %vm2390_vm3, %v9978_v50, %v9979_v31  ;;  %v15610_v58 = vsel %vm2525_vm8, %v9929_v1, %v9998_v10  ;;  %v10008_v28 = vunpack.i.l.bf16 %v15397_v26 }
 0x395   :  { %v15590_v51 = vsel %vm2705_vm11, %v9948_v37, %v18504_v33  ;;  %v15602_v27 = vsel %vm2435_vm6, %v18507_v59, %v9988_v6  ;;  %v18508_v37 = vunpack.i.h.bf16 %v15322_v46  ;;  %v2439_v18 = vsel %vm2435_vm6, %v9988_v6, %v9989_v0 }
 0x396   :  { %18505 = vst [vmem:[#allocation983_spill] sm:$0xff] %v15590_v51  ;;  %v2348_v11 = vsel %vm2345_vm2, %v18506_v17, %v9969_v30  ;;  %v2394_v17 = vsel %vm2390_vm3, %v9979_v31, %v9983_v48  ;;  %v18509_v30 = vunpack.i.h.bf16 %v15335_v12  ;;  %v10003_v46 = vunpack.i.l.bf16 %v15399_v25 }
 0x397   :  { %v2392_v41 = vsel %vm2390_vm3, %v18508_v37, %v9978_v50  ;;  %v10117_v59 = vpop.permute.xlu0 %10116  ;;  %v10102_v60 = vpop.permute.xlu1 %10101  ;;  %v15621_v31 = vsel %vm2480_vm4, %v9993_v56, %v9994_v5  ;;  %v10009_v1 = vunpack.i.h.bf16 %v15397_v26  ;;  %v10039_v12 = vunpack.i.h.bf16 %v15441_v3 }
 0x398   :  { %v15615_v19 = vsel %vm2480_vm4, %v18509_v30, %v9993_v56  ;;  %v10104_v33 = vunpack.i.h.bf16 %v10102_v60  ;;  %v10103_v50 = vunpack.i.l.bf16 %v10102_v60  ;;  %v10038_v48 = vunpack.i.l.bf16 %v15441_v3 }
 0x399   :  { %v15627_v37 = vsel %vm2525_vm8, %v9998_v10, %v9999_v21  ;;  %v10119_v30 = vunpack.i.h.bf16 %v10117_v59  ;;  %v10118_v51 = vunpack.i.l.bf16 %v10117_v59  ;;  %v18510_v6 = vunpack.i.h.bf16 %v15408_v7 }
 0x39a   :  { %v2353_v60 = vsel %vm2345_vm2, %v10103_v50, %v10104_v33  ;;  %v18511_v56 = vunpack.i.h.bf16 %v15362_v62  ;;  %v10004_v26 = vunpack.i.h.bf16 %v15399_v25  ;;  %v18514_v59 = vunpack.i.h.bf16 %v15341_v15 }
 0x39b   :  { %v2352_v0 = vsel %vm2345_vm2, %v18510_v6, %v10103_v50  ;;  %v15639_v54 = vpop.permute.xlu0 %10121  ;;  %v10107_v3 = vpop.permute.xlu1 %10106  ;;  %v8821_v21 = vpack.c.bf16 %v2353_v60, %v2349_v47  ;;  %v10014_v62 = vunpack.i.h.bf16 %v15406_v8  ;;  %v10043_v25 = vunpack.i.l.bf16 %v15417_v38 }
 0x39c   :  { %v15636_v5 = vsel %vm2615_vm9, %v18511_v56, %v10008_v28  ;;  %18513 = vst [vmem:[#allocation985_spill] sm:$0xff] %v15639_v54  ;;  %v8823_v10 = vpack.c.bf16 %v2352_v0, %v2348_v11  ;;  %v15644_v7 = vsel %vm2570_vm5, %v18514_v59, %v10003_v46  ;;  %v10109_v33 = vunpack.i.h.bf16 %v10107_v3 }
 0x39d   :  { %18512 = vst [vmem:[#allocation984_spill] sm:$0xff] %v15636_v5  ;;  %v10108_v50 = vunpack.i.l.bf16 %v10107_v3  ;;  %v10044_v56 = vunpack.i.h.bf16 %v15417_v38  ;;  %8822 = vmatprep.subr.bf16.mxu0 %v8821_v21  ;;  %v2441_v54 = vsel %vm2435_vm6, %v10038_v48, %v10039_v12  ;;  %v18515_v11 = vunpack.i.h.bf16 %v15379_v45 }
 0x39e   :  { %8824 = vmatpush1.bf16.msra.mxu0 %v8823_v10  ;;  %v18516_v0 = vunpack.i.l.bf16 %v15328_v14  ;;  %v2443_v3 = vsel %vm2435_vm6, %v10118_v51, %v10119_v30  ;;  %v10013_v59 = vunpack.i.l.bf16 %v15406_v8  ;;  %v18517_v10 = vunpack.i.h.bf16 %v15302_v13 }
 0x39f   :  { %v2397_v47 = vsel %vm2390_vm3, %v10108_v50, %v10109_v33  ;;  %v2396_v15 = vsel %vm2390_vm3, %v18515_v11, %v10108_v50  ;;  %v10137_v6 = vpop.permute.xlu0 %10136  ;;  %v15660_v38 = vpop.permute.xlu1 %10111  ;;  %v8765_v50 = vpack.c.bf16 %v2441_v54, %v15509_v36  ;;  %v15667_v14 = vsel %vm2570_vm5, %v10003_v46, %v10004_v26 }
 0x3a0   :  { %v2398_v60 = vsel %vm2390_vm3, %v10109_v33, %v18516_v0  ;;  %v8761_v21 = vpack.c.bf16 %v2396_v15, %v2392_v41  ;;  %v8827_v22 = vpack.c.bf16 %v2397_v47, %v2393_v9  ;;  %v2440_v45 = vsel %vm2435_vm6, %v18517_v10, %v10038_v48 }
 0x3a1   :  { %v8825_v5 = vpack.c.bf16 %v2398_v60, %v2394_v17  ;;  %v15670_v33 = vsel %vm2615_vm9, %v10008_v28, %v10009_v1  ;;  %v10049_v8 = vunpack.i.h.bf16 %v15455_v23  ;;  %v10048_v30 = vunpack.i.l.bf16 %v15455_v23 }
 0x3a2   :  { %v2442_v41 = vsel %vm2435_vm6, %v10039_v12, %v10118_v51  ;;  %8762 = vmatprep.subr.bf16.mxu1 %v8761_v21  ;;  %v8829_v9 = vpack.c.bf16 %v2443_v3, %v2439_v18  ;;  %v10019_v13 = vunpack.i.h.bf16 %v15404_v39  ;;  %v10139_v17 = vunpack.i.h.bf16 %v10137_v6 }
 0x3a3   :  { %8826 = vmatprep.subr.bf16.mxu0 %v8825_v5  ;;  %v10138_v48 = vunpack.i.l.bf16 %v10137_v6  ;;  %8764 = vmatpush1.bf16.msra.mxu1 %v8763_v52  ;;  %v2486_v36 = vsel %vm2480_vm4, %v10043_v25, %v10044_v56  ;;  %v18518_v54 = vunpack.i.l.bf16 %v15404_v39  ;;  %v18519_v28 = vunpack.i.h.bf16 %v15370_v63  ;;  %v15690_v1 = vpop.permute.xlu0 %10141  ;;  %v10127_v52 = vpop.permute.xlu1 %10126 }
 0x3a4   :  { %8828 = vmatpush1.bf16.msra.mxu0 %v8827_v22  ;;  %v18520_v23 = vunpack.i.h.bf16 %v15348_v32  ;;  %v10023_v18 = vunpack.i.l.bf16 %v15410_v57  ;;  %8766 = vmatprep.subr.bf16.mxu1 %v8765_v50  ;;  %v15693_v22 = vsel %vm2660_vm7, %v10013_v59, %v10014_v62  ;;  %v10129_v12 = vunpack.i.h.bf16 %v10127_v52 }
 0x3a5   :  { %v15682_v46 = vsel %vm2705_vm11, %v18519_v28, %v18518_v54  ;;  %8830 = vmatprep.subr.bf16.mxu0 %v8829_v9  ;;  %v10128_v63 = vunpack.i.l.bf16 %v10127_v52  ;;  %v8767_v5 = vpack.c.bf16 %v2440_v45, %v15495_v42  ;;  %v8831_v26 = vpack.c.bf16 %v2442_v41, %v15602_v27 }
 0x3a6   :  { %v15687_v51 = vsel %vm2660_vm7, %v18520_v23, %v10013_v59  ;;  %v18521_v32 = vunpack.i.h.bf16 %v15300_v44  ;;  %v10054_v47 = vunpack.i.h.bf16 %v15439_v4  ;;  %v8769_v11 = vpack.c.bf16 %v2486_v36, %v15500_v2 }
 0x3a7   :  { %v2531_v15 = vsel %vm2525_vm8, %v10048_v30, %v10049_v8  ;;  %v10053_v0 = vunpack.i.l.bf16 %v15439_v4  ;;  %v2487_v62 = vsel %vm2480_vm4, %v10044_v56, %v10128_v63  ;;  %8768 = vmatpush1.bf16.msra.mxu1 %v8767_v5  ;;  %v2488_v42 = vsel %vm2480_vm4, %v10128_v63, %v10129_v12  ;;  %v15708_v60 = vpop.permute.xlu0 %10151  ;;  %v18527_v12 = vld [vmem:[#allocation974_spill] sm:$0xff] }
 0x3a8   :  { %v2485_v6 = vsel %vm2480_vm4, %v18521_v32, %v10043_v25  ;;  %8832 = vmatpush1.bf16.msra.mxu0 %v8831_v26  ;;  %v2533_v27 = vsel %vm2525_vm8, %v10138_v48, %v10139_v17  ;;  %v10024_v44 = vunpack.i.h.bf16 %v15410_v57  ;;  %v15710_v25 = vpop.permute.xlu1 %10131  ;;  %8770 = vmatprep.subr.bf16.mxu1 %v8769_v11  ;;  %v8833_v2 = vpack.c.bf16 %v2488_v42, %v15621_v31  ;;  %v18529_v11 = vld [vmem:[#allocation970_spill] sm:$0xff] }
 0x3a9   :  { %v8835_v3 = vpack.c.bf16 %v2487_v62, %v15615_v19  ;;  %v18522_v4 = vmov %v18518_v54  ;;  %v18523_v59 = vunpack.i.h.bf16 %v15360_v29  ;;  %v18524_v57 = vunpack.i.h.bf16 %v15310_v61 }
 0x3aa   :  { %v15717_v56 = vsel %vm2705_vm11, %v18522_v4, %v10019_v13  ;;  %v2532_v45 = vsel %vm2525_vm8, %v10049_v8, %v10138_v48  ;;  %v8771_v31 = vpack.c.bf16 %v2485_v6, %v15489_v49  ;;  %v10064_v19 = vunpack.i.h.bf16 %v15453_v53  ;;  %8834 = vmatprep.subr.bf16.mxu0 %v8833_v2  ;;  %v18532_v4 = vld [vmem:[#allocation975_spill] sm:$0xff] }
 0x3ab   :  { %v15722_v21 = vsel %vm2750_vm10, %v18523_v59, %v10023_v18  ;;  %v2530_v10 = vsel %vm2525_vm8, %v18524_v57, %v10048_v30  ;;  %v10063_v39 = vunpack.i.l.bf16 %v15453_v53  ;;  %v8773_v50 = vpack.c.bf16 %v2531_v15, %v15543_v35  ;;  %v15741_v48 = vpop.permute.xlu0 %10156 }
 0x3ac   :  { %v8837_v41 = vpack.c.bf16 %v2533_v27, %v15627_v37  ;;  %v18525_v9 = vunpack.i.h.bf16 %v15308_v43  ;;  %v10059_v61 = vunpack.i.h.bf16 %v15474_v20  ;;  %v10058_v30 = vunpack.i.l.bf16 %v15474_v20  ;;  %8772 = vmatpush1.bf16.msra.mxu1 %v8771_v31  ;;  %8836 = vmatpush1.bf16.msra.mxu0 %v8835_v3  ;;  %v10147_v35 = vpop.permute.xlu1 %10146  ;;  %v18531_v27 = vld [vmem:[#allocation972_spill] sm:$0xff]  ;;  %v18533_v31 = vld [vmem:[#allocation978_spill] sm:$0xff] }
 0x3ad   :  { %v2576_v49 = vsel %vm2570_vm5, %v10053_v0, %v10054_v47  ;;  %v10074_v8 = vunpack.i.h.bf16 %v15472_v55  ;;  %v10073_v17 = vunpack.i.l.bf16 %v15472_v55  ;;  %8774 = vmatprep.subr.bf16.mxu1 %v8773_v50  ;;  %v8775_v43 = vpack.c.bf16 %v2530_v10, %v15521_v40  ;;  %v18534_v50 = vld [vmem:[#allocation971_spill] sm:$0xff] }
 0x3ae   :  { %v2575_v13 = vsel %vm2570_vm5, %v18525_v9, %v10053_v0  ;;  %8838 = vmatprep.subr.bf16.mxu0 %v8837_v41  ;;  %v8839_v37 = vpack.c.bf16 %v2532_v45, %v15610_v58  ;;  %v10154_v36 = vunpack.i.h.bf16 %v15708_v60  ;;  %v10153_v20 = vunpack.i.l.bf16 %v15708_v60  ;;  %v18528_v58 = vld [vmem:[#allocation973_spill] sm:$0xff] }
 0x3af   :  { %v10149_v54 = vunpack.i.h.bf16 %v10147_v35  ;;  %v10148_v28 = vunpack.i.l.bf16 %v10147_v35  ;;  %v18526_v23 = vunpack.i.h.bf16 %v15315_v16  ;;  %v8777_v63 = vpack.c.bf16 %v2576_v49, %v18527_v12  ;;  %v15766_v62 = vpop.permute.xlu0 %10171  ;;  %v18538_v49 = vld [vmem:[#allocation976_spill] sm:$0xff] }
 0x3b0   :  { %v2666_v5 = vsel %vm2660_vm7, %v10063_v39, %v10064_v19  ;;  %v15757_v40 = vsel %vm2750_vm10, %v10023_v18, %v10024_v44  ;;  %v10069_v26 = vunpack.i.h.bf16 %v18528_v58  ;;  %v10068_v32 = vunpack.i.l.bf16 %v18528_v58  ;;  %8776 = vmatpush1.bf16.msra.mxu1 %v8775_v43  ;;  %8840 = vmatpush1.bf16.msra.mxu0 %v8839_v37  ;;  %v15768_v42 = vpop.permute.xlu1 %10161 }
 0x3b1   :  { %v15750_v52 = vsel %vm2660_vm7, %v18526_v23, %v10063_v39  ;;  %v2577_v6 = vsel %vm2570_vm5, %v10054_v47, %v10148_v28  ;;  %v2621_v16 = vsel %vm2615_vm9, %v10058_v30, %v10059_v61  ;;  %v18530_v15 = vunpack.i.h.bf16 %v18529_v11  ;;  %8778 = vmatprep.subr.bf16.mxu1 %v8777_v63 }
 0x3b2   :  { %v2578_v18 = vsel %vm2570_vm5, %v10148_v28, %v10149_v54  ;;  %v8779_v44 = vpack.c.bf16 %v2575_v13, %v18531_v27  ;;  %v15775_v47 = vsel %vm2750_vm10, %v10073_v17, %v10074_v8  ;;  %v8843_v60 = vpack.c.bf16 %v2577_v6, %v15644_v7  ;;  %v18536_v7 = vld [vmem:[#allocation977_spill] sm:$0xff] }
 0x3b3   :  { %v2620_v0 = vsel %vm2615_vm9, %v18530_v15, %v10058_v30  ;;  %v2623_v2 = vsel %vm2615_vm9, %v10153_v20, %v10154_v36  ;;  %v8785_v3 = vpack.c.bf16 %v2666_v5, %v15548_v24  ;;  %v8787_v59 = vpack.c.bf16 %v15750_v52, %v18532_v4  ;;  %v18537_v30 = vld [vmem:[#allocation981_spill] sm:$0xff]  ;;  %v15800_v37 = vpop.permute.xlu0 %10176 }
 0x3b4   :  { %v10084_v57 = vunpack.i.h.bf16 %v15536_v34  ;;  %v10083_v10 = vunpack.i.l.bf16 %v15536_v34  ;;  %v8841_v45 = vpack.c.bf16 %v2578_v18, %v15667_v14  ;;  %v8781_v39 = vpack.c.bf16 %v2621_v16, %v18533_v31  ;;  %8780 = vmatpush1.bf16.msra.mxu1 %v8779_v44  ;;  %v10167_v36 = vpop.permute.xlu1 %10166  ;;  %v18541_v16 = vld [vmem:[#allocation984_spill] sm:$0xff] }
 0x3b5   :  { %v18535_v41 = vunpack.i.h.bf16 %v18534_v50  ;;  %v8783_v24 = vpack.c.bf16 %v2620_v0, %v18536_v7  ;;  %v2711_v13 = vsel %vm2705_vm11, %v10068_v32, %v10069_v26  ;;  %v8793_v34 = vpack.c.bf16 %v15775_v47, %v18537_v30 }
 0x3b6   :  { %v10089_v14 = vunpack.i.h.bf16 %v18538_v49  ;;  %v10088_v35 = vunpack.i.l.bf16 %v18538_v49  ;;  %v2622_v43 = vsel %vm2615_vm9, %v10059_v61, %v10153_v20  ;;  %8842 = vmatprep.subr.bf16.mxu0 %v8841_v45  ;;  %8782 = vmatprep.subr.bf16.mxu1 %v8781_v39  ;;  %v8845_v54 = vpack.c.bf16 %v2623_v2, %v15670_v33  ;;  %v18540_v20 = vld [vmem:[#allocation980_spill] sm:$0xff] }
 0x3b7   :  { %v15789_v9 = vsel %vm2705_vm11, %v18535_v41, %v10068_v32  ;;  %v10174_v28 = vunpack.i.h.bf16 %v15766_v62  ;;  %v10173_v23 = vunpack.i.l.bf16 %v15766_v62  ;;  %8844 = vmatpush1.bf16.msra.mxu0 %v8843_v60  ;;  %v10169_v52 = vunpack.i.h.bf16 %v10167_v36  ;;  %v15824_v18 = vpop.permute.xlu0 %10196 }
 0x3b8   :  { %v10168_v12 = vunpack.i.l.bf16 %v10167_v36  ;;  %v18539_v63 = vunpack.i.l.bf16 %v15360_v29  ;;  %v15811_v61 = vsel %vm2750_vm10, %v10084_v57, %v10073_v17  ;;  %v10099_v32 = vunpack.i.h.bf16 %v18540_v20  ;;  %8846 = vmatprep.subr.bf16.mxu0 %v8845_v54  ;;  %8784 = vmatpush1.bf16.msra.mxu1 %v8783_v24  ;;  %v15826_v27 = vpop.permute.xlu1 %10181  ;;  %v18544_v57 = vld [vmem:[#allocation979_spill] sm:$0xff] }
 0x3b9   :  { %v10098_v6 = vunpack.i.l.bf16 %v18540_v20  ;;  %v10113_v33 = vunpack.i.l.bf16 %v15660_v38  ;;  %v8847_v11 = vpack.c.bf16 %v2622_v43, %v18541_v16  ;;  %v10114_v0 = vunpack.i.h.bf16 %v15660_v38  ;;  %8786 = vmatprep.subr.bf16.mxu1 %v8785_v3  ;;  %v18543_v38 = vld [vmem:[#allocation982_spill] sm:$0xff] }
 0x3ba   :  { %v15808_v5 = vsel %vm2750_vm10, %v10083_v10, %v18539_v63  ;;  %v2667_v15 = vsel %vm2660_vm7, %v10064_v19, %v10168_v12  ;;  %v2668_v29 = vsel %vm2660_vm7, %v10168_v12, %v10169_v52  ;;  %v10144_v17 = vunpack.i.h.bf16 %v15690_v1  ;;  %v18542_v19 = vld [vmem:[#allocation983_spill] sm:$0xff] }
 0x3bb   :  { %v10143_v62 = vunpack.i.l.bf16 %v15690_v1  ;;  %v8849_v44 = vpack.c.bf16 %v2668_v29, %v15693_v22  ;;  %v8851_v53 = vpack.c.bf16 %v2667_v15, %v15687_v51  ;;  %8848 = vmatpush1.bf16.msra.mxu0 %v8847_v11  ;;  %v8789_v60 = vpack.c.bf16 %v2711_v13, %v18542_v19  ;;  %v18545_v22 = vld [vmem:[#allocation985_spill] sm:$0xff]  ;;  %v15855_v24 = vpop.permute.xlu0 %10201 }
 0x3bc   :  { %v2713_v2 = vsel %vm2705_vm11, %v10173_v23, %v10174_v28  ;;  %v8791_v4 = vpack.c.bf16 %v15789_v9, %v18543_v38  ;;  %v10094_v10 = vunpack.i.h.bf16 %v18544_v57  ;;  %v10093_v45 = vunpack.i.l.bf16 %v18544_v57  ;;  %8788 = vmatpush1.bf16.msra.mxu1 %v8787_v59  ;;  %v10187_v13 = vpop.permute.xlu1 %10186 }
 0x3bd   :  { %8850 = vmatprep.subr.bf16.mxu0 %v8849_v44  ;;  %v8795_v3 = vpack.c.bf16 %v15811_v61, %v15808_v5  ;;  %v2797_v51 = vsel %vm2795_vm12, %v10088_v35, %v10089_v14  ;;  %v10124_v31 = vunpack.i.h.bf16 %v18545_v22  ;;  %v10123_v39 = vunpack.i.l.bf16 %v18545_v22  ;;  %8790 = vmatprep.subr.bf16.mxu1 %v8789_v60 }
 0x3be   :  { %v15844_v50 = vsel %vm2795_vm12, %v10113_v33, %v10088_v35  ;;  %v2801_v41 = vsel %vm2795_vm12, %v10098_v6, %v10099_v32  ;;  %v15850_v9 = vsel %vm2795_vm12, %v10114_v0, %v10098_v6  ;;  %v2712_v7 = vsel %vm2705_vm11, %v10069_v26, %v10173_v23 }
 0x3bf   :  { %v8853_v43 = vpack.c.bf16 %v2713_v2, %v15717_v56  ;;  %v15863_v59 = vsel %vm2840_vm13, %v10143_v62, %v10144_v17  ;;  %v10199_v35 = vunpack.i.h.bf16 %v15824_v18  ;;  %v10198_v36 = vunpack.i.l.bf16 %v15824_v18  ;;  %8852 = vmatpush1.bf16.msra.mxu0 %v8851_v53  ;;  %v15880_v33 = vpop.permute.xlu0 %10216 }
 0x3c0   :  { %v10189_v58 = vunpack.i.h.bf16 %v10187_v13  ;;  %v10188_v26 = vunpack.i.l.bf16 %v10187_v13  ;;  %v10134_v54 = vunpack.i.h.bf16 %v15710_v25  ;;  %v10133_v28 = vunpack.i.l.bf16 %v15710_v25  ;;  %8792 = vmatpush1.bf16.msra.mxu1 %v8791_v4 }
 0x3c1   :  { %v10159_v56 = vunpack.i.h.bf16 %v15741_v48  ;;  %v10158_v23 = vunpack.i.l.bf16 %v15741_v48  ;;  %8854 = vmatprep.subr.bf16.mxu0 %v8853_v43  ;;  %v8855_v52 = vpack.c.bf16 %v2712_v7, %v15682_v46  ;;  %v10164_v12 = vunpack.i.h.bf16 %v15768_v42  ;;  %v10192_v48 = vpop.permute.xlu1 %10191  ;;  %8794 = vmatprep.subr.bf16.mxu1 %v8793_v34 }
 0x3c2   :  { %v2757_v63 = vsel %vm2750_vm10, %v10074_v8, %v10188_v26  ;;  %v2758_v5 = vsel %vm2750_vm10, %v10188_v26, %v10189_v58  ;;  %v10163_v61 = vunpack.i.l.bf16 %v15768_v42  ;;  %v10184_v25 = vunpack.i.h.bf16 %v15826_v27 }
 0x3c3   :  { %v10183_v6 = vunpack.i.l.bf16 %v15826_v27  ;;  %v8857_v55 = vpack.c.bf16 %v2758_v5, %v15757_v40  ;;  %v2798_v46 = vsel %vm2795_vm12, %v10089_v14, %v10093_v45  ;;  %v8859_v8 = vpack.c.bf16 %v2757_v63, %v15722_v21  ;;  %8856 = vmatpush1.bf16.msra.mxu0 %v8855_v52  ;;  %v10222_v0 = vpop.permute.xlu0 %10221 }
 0x3c4   :  { %v2803_v16 = vsel %vm2795_vm12, %v10198_v36, %v10199_v35  ;;  %v2842_v11 = vsel %vm2840_vm13, %v10123_v39, %v10124_v31  ;;  %v8797_v15 = vpack.c.bf16 %v2801_v41, %v2797_v51  ;;  %v2799_v47 = vsel %vm2795_vm12, %v10093_v45, %v10094_v10  ;;  %8796 = vmatpush1.bf16.msra.mxu1 %v8795_v3 }
 0x3c5   :  { %8858 = vmatprep.subr.bf16.mxu0 %v8857_v55  ;;  %v8799_v40 = vpack.c.bf16 %v15850_v9, %v15844_v50  ;;  %v8801_v30 = vpack.c.bf16 %v15863_v59, %v2842_v11  ;;  %v2841_v34 = vsel %vm2840_vm13, %v10158_v23, %v10123_v39  ;;  %v2845_v21 = vsel %vm2840_vm13, %v10159_v56, %v10143_v62  ;;  %v10207_v18 = vpop.permute.xlu1 %10206  ;;  %v2955_v11 = vld [vmem:[%s17501_s3] sm:$0xff] }
 0x3c6   :  { %v2802_v49 = vsel %vm2795_vm12, %v10099_v32, %v10198_v36  ;;  %v2844_v14 = vsel %vm2840_vm13, %v10133_v28, %v10134_v54  ;;  %v10179_v29 = vunpack.i.h.bf16 %v15800_v37  ;;  %8798 = vmatprep.subr.bf16.mxu1 %v8797_v15  ;;  %v8861_v44 = vpack.c.bf16 %v2803_v16, %v2799_v47  ;;  %v2958_v15 = vld [vmem:[%s17501_s3 + $0x18] sm:$0xff]  ;;  %v2957_v47 = vld [vmem:[%s17501_s3 + $0x10] sm:$0xff] }
 0x3c7   :  { %v2887_v53 = vsel %vm2885_vm14, %v10163_v61, %v10164_v12  ;;  %v2891_v62 = vsel %vm2885_vm14, %v10183_v6, %v10184_v25  ;;  %v10219_v20 = vunpack.i.h.bf16 %v15880_v33  ;;  %v10218_v32 = vunpack.i.l.bf16 %v15880_v33  ;;  %8860 = vmatpush1.bf16.msra.mxu0 %v8859_v8  ;;  %v10232_v41 = vpop.permute.xlu0 %10231 }
 0x3c8   :  { %v10209_v19 = vunpack.i.h.bf16 %v10207_v18  ;;  %v10208_v60 = vunpack.i.l.bf16 %v10207_v18  ;;  %v10178_v2 = vunpack.i.l.bf16 %v15800_v37  ;;  %v8863_v38 = vpack.c.bf16 %v2802_v49, %v2798_v46  ;;  %8862 = vmatprep.subr.bf16.mxu0 %v8861_v44  ;;  %8800 = vmatpush1.bf16.msra.mxu1 %v8799_v40  ;;  %v2960_v40 = vld [vmem:[%s17501_s3 + $0x28] sm:$0xff] }
 0x3c9   :  { %v10194_v4 = vunpack.i.h.bf16 %v10192_v48  ;;  %v10193_v57 = vunpack.i.l.bf16 %v10192_v48  ;;  %v10224_v10 = vunpack.i.h.bf16 %v10222_v0  ;;  %v10223_v45 = vunpack.i.l.bf16 %v10222_v0  ;;  %v10212_v37 = vpop.permute.xlu1 %10211  ;;  %8802 = vmatprep.subr.bf16.mxu1 %v8801_v30  ;;  %v2959_v30 = vld [vmem:[%s17501_s3 + $0x20] sm:$0xff]  ;;  %v2964_v49 = vld [vmem:[%s17501_s3 + $0x48] sm:$0xff]  ;;  %v2965_v0 = vld [vmem:[%s17501_s3 + $0x50] sm:$0xff] }
 0x3ca   :  { %v2847_v3 = vsel %vm2840_vm13, %v10144_v17, %v10208_v60  ;;  %v2848_v51 = vsel %vm2840_vm13, %v10208_v60, %v10209_v19  ;;  %v2843_v39 = vsel %vm2840_vm13, %v10124_v31, %v10133_v28  ;;  %v8803_v50 = vpack.c.bf16 %v2845_v21, %v2841_v34  ;;  %v2962_v34 = vld [vmem:[%s17501_s3 + $0x38] sm:$0xff]  ;;  %v2961_v21 = vld [vmem:[%s17501_s3 + $0x30] sm:$0xff] }
 0x3cb   :  { %v8865_v9 = vpack.c.bf16 %v2848_v51, %v2844_v14  ;;  %v8805_v7 = vpack.c.bf16 %v2891_v62, %v2887_v53  ;;  %v10204_v13 = vunpack.i.h.bf16 %v15855_v24  ;;  %v10203_v43 = vunpack.i.l.bf16 %v15855_v24  ;;  %8864 = vmatpush1.bf16.msra.mxu0 %v8863_v38  ;;  %v2963_v14 = vld [vmem:[%s17501_s3 + $0x40] sm:$0xff] }
 0x3cc   :  { %v8867_v1 = vpack.c.bf16 %v2847_v3, %v2843_v39  ;;  %v2893_v17 = vsel %vm2885_vm14, %v10218_v32, %v10219_v20  ;;  %v2886_v59 = vsel %vm2885_vm14, %v10193_v57, %v10163_v61  ;;  %v2890_v22 = vsel %vm2885_vm14, %v10194_v4, %v10183_v6  ;;  %8804 = vmatpush1.bf16.msra.mxu1 %v8803_v50 }
 0x3cd   :  { %v10234_v35 = vunpack.i.h.bf16 %v10232_v41  ;;  %v10233_v31 = vunpack.i.l.bf16 %v10232_v41  ;;  %8866 = vmatprep.subr.bf16.mxu0 %v8865_v9  ;;  %v10214_v36 = vunpack.i.h.bf16 %v10212_v37  ;;  %v10213_v58 = vunpack.i.l.bf16 %v10212_v37  ;;  %v10227_v28 = vpop.permute.xlu1 %10226  ;;  %8806 = vmatprep.subr.bf16.mxu1 %v8805_v7 }
 0x3ce   :  { %v2889_v26 = vsel %vm2885_vm14, %v10178_v2, %v10179_v29  ;;  %v2936_v54 = vsel %vm2930_vm15, %v10223_v45, %v10224_v10  ;;  %v2892_v24 = vsel %vm2885_vm14, %v10184_v25, %v10218_v32  ;;  %v8807_v23 = vpack.c.bf16 %v2890_v22, %v2886_v59  ;;  %v2966_v29 = vld [vmem:[%s17501_s3 + $0x58] sm:$0xff]  ;;  %s10270_s3 = smov 64  }
 0x3cf   :  { %v8869_v56 = vpack.c.bf16 %v2893_v17, %v2889_v26  ;;  %8868 = vmatpush1.bf16.msra.mxu0 %v8867_v1  ;;  %v10229_v52 = vunpack.i.h.bf16 %v10227_v28  ;;  %v10228_v63 = vunpack.i.l.bf16 %v10227_v28  ;;  %v2932_v5 = vsel %vm2930_vm15, %v10203_v43, %v10204_v13 }
 0x3d0   :  { %v2888_v61 = vsel %vm2885_vm14, %v10164_v12, %v10178_v2  ;;  %v2931_v6 = vsel %vm2930_vm15, %v10233_v31, %v10203_v43  ;;  %v2935_v33 = vsel %vm2930_vm15, %v10234_v35, %v10223_v45  ;;  %v8809_v27 = vpack.c.bf16 %v2936_v54, %v2932_v5  ;;  %8808 = vmatpush1.bf16.msra.mxu1 %v8807_v23 }
 0x3d1   :  { %8870 = vmatprep.subr.bf16.mxu0 %v8869_v56  ;;  %v8871_v25 = vpack.c.bf16 %v2892_v24, %v2888_v61  ;;  %v2937_v48 = vsel %vm2930_vm15, %v10224_v10, %v10228_v63  ;;  %v2934_v55 = vsel %vm2930_vm15, %v10213_v58, %v10214_v36  ;;  %v2938_v46 = vsel %vm2930_vm15, %v10228_v63, %v10229_v52 }
 0x3d2   :  { %v2933_v8 = vsel %vm2930_vm15, %v10204_v13, %v10213_v58  ;;  %8810 = vmatprep.subr.bf16.mxu1 %v8809_v27  ;;  %v8873_v42 = vpack.c.bf16 %v2938_v46, %v2934_v55  ;;  %v8811_v16 = vpack.c.bf16 %v2935_v33, %v2931_v6  ;;  %vm3407_vm3 = vcmask 523264  }
 0x3d3   :  { %v8875_v12 = vpack.c.bf16 %v2937_v48, %v2933_v8  ;;  %8872 = vmatpush1.bf16.msra.mxu0 %v8871_v25  ;;  %vm3393_vm6 = vcmask 261120  }
 0x3d4   :  { %8874 = vmatprep.subr.bf16.mxu0 %v8873_v42  ;;  %8812 = vmatpush1.bf16.msra.mxu1 %v8811_v16 }
 0x3d7   :  { %8876 = vmatpush1.bf16.msra.mxu0 %v8875_v12  ;;  %3196 = vmatmul.mubr.f32.vlgmr.msra.gmra.mrb[6].mxu1 %v2955_v11 }
 0x3d8   :  { %3201 = vmatprep.mubr.f32.mxu1 %v2958_v15  ;;  %v3109_v38 = vpop.permute.xlu0 %3108 }
 0x3da   :  { %3297 = vmatmul.mubr.f32.vlgmr.msra.gmra.mrb[4].mxu0 %v2955_v11 }
 0x3db   :  { %3302 = vmatprep.mubr.f32.mxu0 %v2958_v15  ;;  %3202 = vmatmul.mubr.f32.gmra.mrb[8].mxu1 %v2957_v47 }
 0x3dc   :  { %3207 = vmatprep.mubr.f32.mxu1 %v2960_v40  ;;  %v3104_v18 = vpop.permute.xlu1 %3103  ;;  %v3119_v28 = vpop.permute.xlu0 %3118 }
 0x3de   :  { %3303 = vmatmul.mubr.f32.gmra.mrb[6].mxu0 %v2957_v47 }
 0x3df   :  { %3308 = vmatprep.mubr.f32.mxu0 %v2960_v40  ;;  %3208 = vmatmul.mubr.f32.gmra.mrb[10].mxu1 %v2959_v30 }
 0x3e0   :  { %3213 = vmatprep.mubr.f32.mxu1 %v2962_v34 }
 0x3e1   :  { %v3114_v13 = vpop.permute.xlu1 %3113 }
 0x3e2   :  { %3309 = vmatmul.mubr.f32.gmra.mrb[8].mxu0 %v2959_v30 }
 0x3e3   :  { %3314 = vmatprep.mubr.f32.mxu0 %v2962_v34  ;;  %3214 = vmatmul.mubr.f32.gmra.mrb[12].mxu1 %v2961_v21 }
 0x3e4   :  { %3219 = vmatprep.mubr.f32.mxu1 %v2964_v49 }
 0x3e5   :  { %v3124_v42 = vpop.permute.xlu1 %3123 }
 0x3e6   :  { %3315 = vmatmul.mubr.f32.gmra.mrb[10].mxu0 %v2961_v21 }
 0x3e7   :  { %3320 = vmatprep.mubr.f32.mxu0 %v2964_v49  ;;  %3220 = vmatmul.mubr.f32.gmra.mrb[14].mxu1 %v2963_v14 }
 0x3e8   :  { %3225 = vmatprep.mubr.f32.mxu1 %v2966_v29 }
 0x3ea   :  { %3321 = vmatmul.mubr.f32.gmra.mrb[12].mxu0 %v2963_v14 }
 0x3eb   :  { %3326 = vmatprep.mubr.f32.mxu0 %v2966_v29  ;;  %3226 = vmatmul.mubr.f32.gmra.mrb[16].mxu1 %v2965_v0 }
 0x3ee   :  { %3327 = vmatmul.mubr.f32.gmra.mrb[14].mxu0 %v2965_v0 }
 0x4aa   :  { %v3197_v44 = vpop.f32.mrb[6].mxu1 }
 0x4ab   :  { %v3198_v53 = vadd.f32 %v3197_v44, %v3104_v18  ;;  %v3199_v62 = vpop.f32.mrb[7].mxu1  ;;  %v3129_v44 = vpop.permute.xlu0 %3128 }
 0x4ac   :  { %v3200_v32 = vadd.f32 %v3199_v62, %v3104_v18 }
 0x4ad   :  { %v3298_v20 = vpop.f32.mrb[4].mxu0  ;;  %v3333_v19 = vmax.f32 %v3198_v53, 0.0 }
 0x4ae   :  { %v3299_v60 = vadd.f32 %v3298_v20, %v3104_v18  ;;  %v3300_v2 = vpop.f32.mrb[5].mxu0  ;;  %v3334_v4 = vmax.f32 %v3200_v32, 0.0  ;;  %v3203_v10 = vpop.f32.mrb[8].mxu1 }
 0x4af   :  { %v3301_v57 = vadd.f32 %v3300_v2, %v3104_v18  ;;  %3357 = vst [vmem:[#allocation3] sm:$0xff] %v3333_v19  ;;  %v3204_v3 = vadd.f32 %v3203_v10, %v3109_v38  ;;  %v3205_v51 = vpop.f32.mrb[9].mxu1 }
 0x4b0   :  { %v3335_v45 = vmax.f32 %v3299_v60, 0.0  ;;  %3358 = vst [vmem:[#allocation3 + $0x8] sm:$0xff] %v3334_v4  ;;  %v3206_v41 = vadd.f32 %v3205_v51, %v3109_v38 }
 0x4b1   :  { %v3336_v39 = vmax.f32 %v3301_v57, 0.0  ;;  %v3304_v50 = vpop.f32.mrb[6].mxu0  ;;  %v3337_v37 = vmax.f32 %v3204_v3, 0.0 }
 0x4b2   :  { %3359 = vst [vmem:[#allocation3 + $0x10] sm:$0xff] %v3335_v45  ;;  %v3305_v9 = vadd.f32 %v3304_v50, %v3109_v38  ;;  %v3306_v7 = vpop.f32.mrb[7].mxu0  ;;  %v3338_v43 = vmax.f32 %v3206_v41, 0.0  ;;  %v3209_v17 = vpop.f32.mrb[10].mxu1 }
 0x4b3   :  { %3360 = vst [vmem:[#allocation3 + $0x18] sm:$0xff] %v3336_v39  ;;  %v3307_v1 = vadd.f32 %v3306_v7, %v3109_v38  ;;  %3361 = vst [vmem:[#allocation3 + $0x20] sm:$0xff] %v3337_v37  ;;  %v3210_v22 = vadd.f32 %v3209_v17, %v3114_v13  ;;  %v3211_v35 = vpop.f32.mrb[11].mxu1 }
 0x4b4   :  { %v3339_v59 = vmax.f32 %v3305_v9, 0.0  ;;  %3362 = vst [vmem:[#allocation3 + $0x28] sm:$0xff] %v3338_v43  ;;  %v3212_v58 = vadd.f32 %v3211_v35, %v3114_v13 }
 0x4b5   :  { %v3340_v31 = vmax.f32 %v3307_v1, 0.0  ;;  %v3310_v36 = vpop.f32.mrb[8].mxu0  ;;  %v3341_v26 = vmax.f32 %v3210_v22, 0.0 }
 0x4b6   :  { %3363 = vst [vmem:[#allocation3 + $0x30] sm:$0xff] %v3339_v59  ;;  %v3311_v54 = vadd.f32 %v3310_v36, %v3114_v13  ;;  %v3312_v24 = vpop.f32.mrb[9].mxu0  ;;  %v3342_v56 = vmax.f32 %v3212_v58, 0.0  ;;  %v3215_v52 = vpop.f32.mrb[12].mxu1  ;;  %v3382_v36 = vlaneseq }
 0x4b7   :  { %3364 = vst [vmem:[#allocation3 + $0x38] sm:$0xff] %v3340_v31  ;;  %v3313_v23 = vadd.f32 %v3312_v24, %v3114_v13  ;;  %3365 = vst [vmem:[#allocation3 + $0x40] sm:$0xff] %v3341_v26  ;;  %v3216_v5 = vadd.f32 %v3215_v52, %v3119_v28  ;;  %v3217_v61 = vpop.f32.mrb[13].mxu1  ;;  %v3402_v6 = vld [vmem:[#allocation3 + $0x2] ss:$8 sm:$0x3] }
 0x4b8   :  { %v3343_v63 = vmax.f32 %v3311_v54, 0.0  ;;  %3366 = vst [vmem:[#allocation3 + $0x48] sm:$0xff] %v3342_v56  ;;  %v3218_v25 = vadd.f32 %v3217_v61, %v3119_v28  ;;  %3404 = vrot.lane.b32.xlu0 %v3402_v6, %s10270_s3  ;;  %v3388_v48 = vld [vmem:[#allocation3 + $0x1] ss:$8 sm:$0x3]  ;;  %vm15995_vm0 = vcmp.lt.s32.totalorder %v3382_v36, 160 }
 0x4b9   :  { %v3344_v33 = vmax.f32 %v3313_v23, 0.0  ;;  %v3316_v27 = vpop.f32.mrb[10].mxu0  ;;  %v3345_v55 = vmax.f32 %v3216_v5, 0.0  ;;  %3390 = vrot.lane.b32.xlu1 %v3388_v48, %s10271_s20  ;;  %v3433_v30 = vld [vmem:[#allocation3 + $0x5] ss:$8 sm:$0x3] }
 0x4ba   :  { %3367 = vst [vmem:[#allocation3 + $0x50] sm:$0xff] %v3343_v63  ;;  %v3317_v46 = vadd.f32 %v3316_v27, %v3119_v28  ;;  %v3318_v8 = vpop.f32.mrb[11].mxu0  ;;  %v3346_v16 = vmax.f32 %v3218_v25, 0.0  ;;  %v3221_v11 = vpop.f32.mrb[14].mxu1  ;;  %vm3396_vm1 = vcmp.ge.s32.totalorder %v3382_v36, 32  ;;  %vm3397_vm2 = vcmp.lt.s32.totalorder %v3382_v36, 192 }
 0x4bb   :  { %3368 = vst [vmem:[#allocation3 + $0x58] sm:$0xff] %v3344_v33  ;;  %v3319_v12 = vadd.f32 %v3318_v8, %v3119_v28  ;;  %3369 = vst [vmem:[#allocation3 + $0x60] sm:$0xff] %v3345_v55  ;;  %v3222_v47 = vadd.f32 %v3221_v11, %v3124_v42  ;;  %v3223_v40 = vpop.f32.mrb[15].mxu1  ;;  %v3416_v14 = vld [vmem:[#allocation3 + $0x3] ss:$8 sm:$0x3] }
 0x4bc   :  { %v3347_v15 = vmax.f32 %v3317_v46, 0.0  ;;  %3370 = vst [vmem:[#allocation3 + $0x68] sm:$0xff] %v3346_v16  ;;  %v3224_v49 = vadd.f32 %v3223_v40, %v3124_v42  ;;  %3435 = vrot.lane.b32.xlu0 %v3433_v30, %s10271_s20  ;;  %v3453_v2 = vld [vmem:[#allocation3 + $0x7] ss:$8 sm:$0x3]  ;;  %vm3410_vm4 = vcmp.ge.s32.totalorder %v3382_v36, 64  ;;  %vm16091_vm7 = vmand %vm3396_vm1, %vm3397_vm2 }
 0x4bd   :  { %v3348_v34 = vmax.f32 %v3319_v12, 0.0  ;;  %v3322_v21 = vpop.f32.mrb[12].mxu0  ;;  %v3349_v29 = vmax.f32 %v3222_v47, 0.0  ;;  %3418 = vrot.lane.b32.xlu1 %v3416_v14, %s10260_s23  ;;  %v3443_v10 = vld [vmem:[#allocation3 + $0x6] ss:$8 sm:$0x3] }
 0x4be   :  { %3371 = vst [vmem:[#allocation3 + $0x70] sm:$0xff] %v3347_v15  ;;  %v3323_v0 = vadd.f32 %v3322_v21, %v3124_v42  ;;  %v3324_v18 = vpop.f32.mrb[13].mxu0  ;;  %v3350_v53 = vmax.f32 %v3224_v49, 0.0  ;;  %v3227_v20 = vpop.f32.mrb[16].mxu1  ;;  %vm3411_vm5 = vcmp.lt.s32.totalorder %v3382_v36, 224  ;;  %vm3423_vm10 = vcmp.ge.s32.totalorder %v3382_v36, 96 }
 0x4bf   :  { %3372 = vst [vmem:[#allocation3 + $0x78] sm:$0xff] %v3348_v34  ;;  %v3325_v62 = vadd.f32 %v3324_v18, %v3124_v42  ;;  %3373 = vst [vmem:[#allocation3 + $0x80] sm:$0xff] %v3349_v29  ;;  %v3228_v19 = vadd.f32 %v3227_v20, %v3129_v44  ;;  %v3229_v60 = vpop.f32.mrb[17].mxu1  ;;  %v3817_v37 = vld [vmem:[#allocation3 + $0x12] ss:$8 sm:$0x3] }
 0x4c0   :  { %v3351_v32 = vmax.f32 %v3323_v0, 0.0  ;;  %3374 = vst [vmem:[#allocation3 + $0x88] sm:$0xff] %v3350_v53  ;;  %v3230_v57 = vadd.f32 %v3229_v60, %v3129_v44  ;;  %3455 = vrot.lane.b32.xlu0 %v3453_v2, %s10260_s23  ;;  %v3807_v7 = vld [vmem:[#allocation3 + $0x11] ss:$8 sm:$0x3]  ;;  %vm16098_vm8 = vmand %vm3410_vm4, %vm3411_vm5  ;;  %vm3424_vm11 = vcmp.lt.s32.totalorder %v3382_v36, 256 }
 0x4c1   :  { %v3352_v38 = vmax.f32 %v3325_v62, 0.0  ;;  %v3328_v4 = vpop.f32.mrb[14].mxu0  ;;  %v3353_v45 = vmax.f32 %v3228_v19, 0.0  ;;  %3445 = vrot.lane.b32.xlu1 %v3443_v10, %s10270_s3  ;;  %v3841_v13 = vld [vmem:[#allocation3 + $0x15] ss:$8 sm:$0x3]  ;;  %vm16107_vm12 = vmand %vm3423_vm10, %vm3424_vm11 }
 0x4c2   :  { %3375 = vst [vmem:[#allocation3 + $0x90] sm:$0xff] %v3351_v32  ;;  %v3329_v3 = vadd.f32 %v3328_v4, %v3129_v44  ;;  %v3330_v51 = vpop.f32.mrb[15].mxu0  ;;  %v3354_v39 = vmax.f32 %v3230_v57, 0.0  ;;  %v3827_v43 = vld [vmem:[#allocation3 + $0x13] ss:$8 sm:$0x3] }
 0x4c3   :  { %3376 = vst [vmem:[#allocation3 + $0x98] sm:$0xff] %v3352_v38  ;;  %v3331_v50 = vadd.f32 %v3330_v51, %v3129_v44  ;;  %3377 = vst [vmem:[#allocation3 + $0xa0] sm:$0xff] %v3353_v45  ;;  %v3861_v1 = vld [vmem:[#allocation3 + $0x17] ss:$8 sm:$0x3] }
 0x4c4   :  { %v3355_v41 = vmax.f32 %v3329_v3, 0.0  ;;  %3378 = vst [vmem:[#allocation3 + $0xa8] sm:$0xff] %v3354_v39  ;;  %3819 = vrot.lane.b32.xlu0 %v3817_v37, %s10270_s3  ;;  %v3851_v17 = vld [vmem:[#allocation3 + $0x16] ss:$8 sm:$0x3] }
 0x4c5   :  { %v3356_v9 = vmax.f32 %v3331_v50, 0.0  ;;  %3809 = vrot.lane.b32.xlu1 %v3807_v7, %s10271_s20  ;;  %v3477_v59 = vld [vmem:[#allocation3 + $0x22] ss:$8 sm:$0x3] }
 0x4c6   :  { %3379 = vst [vmem:[#allocation3 + $0xb0] sm:$0xff] %v3355_v41  ;;  %v3467_v22 = vld [vmem:[#allocation3 + $0x21] ss:$8 sm:$0x3] }
 0x4c7   :  { %3380 = vst [vmem:[#allocation3 + $0xb8] sm:$0xff] %v3356_v9  ;;  %v3501_v35 = vld [vmem:[#allocation3 + $0x25] ss:$8 sm:$0x3] }
 0x4c8   :  { %3843 = vrot.lane.b32.xlu0 %v3841_v13, %s10271_s20  ;;  %v3487_v31 = vld [vmem:[#allocation3 + $0x23] ss:$8 sm:$0x3]  ;;  %v3521_v58 = vld [vmem:[#allocation3 + $0x27] ss:$8 sm:$0x3] }
 0x4c9   :  { %3829 = vrot.lane.b32.xlu1 %v3827_v43, %s10260_s23  ;;  %v3511_v26 = vld [vmem:[#allocation3 + $0x26] ss:$8 sm:$0x3]  ;;  %v3875_v24 = vld [vmem:[#allocation3 + $0x31] ss:$8 sm:$0x3] }
 0x4ca   :  { %v3381_v28 = vld [vmem:[#allocation3] ss:$8 sm:$0x3]  ;;  %v3909_v56 = vld [vmem:[#allocation3 + $0x35] ss:$8 sm:$0x3] }
 0x4cb   :  { %3386 = vst.msk [vmem:[#allocation4] ss:$2 sm:$0x3] %vm15995_vm0, %v3381_v28  ;;  %v3429_v23 = vld [vmem:[#allocation3 + $0x4] ss:$8 sm:$0x3] }
 0x4cc   :  { %3863 = vrot.lane.b32.xlu0 %v3861_v1, %s10260_s23  ;;  %3431 = vst.msk [vmem:[#allocation4 + $0xa] ss:$2 sm:$0x3] %vm15995_vm0, %v3429_v23  ;;  %v3885_v52 = vld [vmem:[#allocation3 + $0x32] ss:$8 sm:$0x3] }
 0x4cd   :  { %3853 = vrot.lane.b32.xlu1 %v3851_v17, %s10270_s3  ;;  %v3803_v63 = vld [vmem:[#allocation3 + $0x10] ss:$8 sm:$0x3]  ;;  %v3919_v5 = vld [vmem:[#allocation3 + $0x36] ss:$8 sm:$0x3] }
 0x4ce   :  { %3805 = vst.msk [vmem:[#allocation4 + $0x1] ss:$2 sm:$0x3] %vm15995_vm0, %v3803_v63  ;;  %v3837_v61 = vld [vmem:[#allocation3 + $0x14] ss:$8 sm:$0x3] }
 0x4cf   :  { %3839 = vst.msk [vmem:[#allocation4 + $0xb] ss:$2 sm:$0x3] %vm15995_vm0, %v3837_v61  ;;  %v3929_v6 = vld [vmem:[#allocation3 + $0x37] ss:$8 sm:$0x3] }
 0x4d0   :  { %3479 = vrot.lane.b32.xlu0 %v3477_v59, %s10270_s3  ;;  %v3463_v33 = vld [vmem:[#allocation3 + $0x20] ss:$8 sm:$0x3]  ;;  %v3895_v27 = vld [vmem:[#allocation3 + $0x33] ss:$8 sm:$0x3] }
 0x4d1   :  { %3469 = vrot.lane.b32.xlu1 %v3467_v22, %s10271_s20  ;;  %3465 = vst.msk [vmem:[#allocation4 + $0x14] ss:$2 sm:$0x3] %vm15995_vm0, %v3463_v33  ;;  %v3497_v25 = vld [vmem:[#allocation3 + $0x24] ss:$8 sm:$0x3] }
 0x4d2   :  { %v3545_v48 = vld [vmem:[#allocation3 + $0x42] ss:$8 sm:$0x3]  ;;  %3499 = vst.msk [vmem:[#allocation4 + $0x1e] ss:$2 sm:$0x3] %vm15995_vm0, %v3497_v25 }
 0x4d3   :  { %v3871_v55 = vld [vmem:[#allocation3 + $0x30] ss:$8 sm:$0x3]  ;;  %v3905_v46 = vld [vmem:[#allocation3 + $0x34] ss:$8 sm:$0x3] }
 0x4d4   :  { %3503 = vrot.lane.b32.xlu0 %v3501_v35, %s10271_s20  ;;  %v3535_v8 = vld [vmem:[#allocation3 + $0x41] ss:$8 sm:$0x3]  ;;  %3873 = vst.msk [vmem:[#allocation4 + $0x15] ss:$2 sm:$0x3] %vm15995_vm0, %v3871_v55 }
 0x4d5   :  { %3489 = vrot.lane.b32.xlu1 %v3487_v31, %s10260_s23  ;;  %3907 = vst.msk [vmem:[#allocation4 + $0x1f] ss:$2 sm:$0x3] %vm15995_vm0, %v3905_v46  ;;  %v3531_v42 = vld [vmem:[#allocation3 + $0x40] ss:$8 sm:$0x3] }
 0x4d6   :  { %v3565_v16 = vld [vmem:[#allocation3 + $0x44] ss:$8 sm:$0x3]  ;;  %3533 = vst.msk [vmem:[#allocation4 + $0x28] ss:$2 sm:$0x3] %vm15995_vm0, %v3531_v42 }
 0x4d7   :  { %3567 = vst.msk [vmem:[#allocation4 + $0x32] ss:$2 sm:$0x3] %vm15995_vm0, %v3565_v16  ;;  %v3939_v12 = vld [vmem:[#allocation3 + $0x50] ss:$8 sm:$0x3] }
 0x4d8   :  { %3523 = vrot.lane.b32.xlu0 %v3521_v58, %s10260_s23  ;;  %v3973_v11 = vld [vmem:[#allocation3 + $0x54] ss:$8 sm:$0x3]  ;;  %3941 = vst.msk [vmem:[#allocation4 + $0x29] ss:$2 sm:$0x3] %vm15995_vm0, %v3939_v12 }
 0x4d9   :  { %3513 = vrot.lane.b32.xlu1 %v3511_v26, %s10270_s3  ;;  %3975 = vst.msk [vmem:[#allocation4 + $0x33] ss:$2 sm:$0x3] %vm15995_vm0, %v3973_v11  ;;  %v3599_v15 = vld [vmem:[#allocation3 + $0x60] ss:$8 sm:$0x3] }
 0x4da   :  { %v3633_v47 = vld [vmem:[#allocation3 + $0x64] ss:$8 sm:$0x3]  ;;  %v3569_v40 = vld [vmem:[#allocation3 + $0x45] ss:$8 sm:$0x3] }
 0x4db   :  { %3601 = vst.msk [vmem:[#allocation4 + $0x3c] ss:$2 sm:$0x3] %vm15995_vm0, %v3599_v15  ;;  %3635 = vst.msk [vmem:[#allocation4 + $0x46] ss:$2 sm:$0x3] %vm15995_vm0, %v3633_v47 }
 0x4dc   :  { %3877 = vrot.lane.b32.xlu0 %v3875_v24, %s10271_s20  ;;  %v4007_v30 = vld [vmem:[#allocation3 + $0x70] ss:$8 sm:$0x3]  ;;  %v4041_v34 = vld [vmem:[#allocation3 + $0x74] ss:$8 sm:$0x3] }
 0x4dd   :  { %3911 = vrot.lane.b32.xlu1 %v3909_v56, %s10271_s20  ;;  %v3555_v21 = vld [vmem:[#allocation3 + $0x43] ss:$8 sm:$0x3]  ;;  %4009 = vst.msk [vmem:[#allocation4 + $0x3d] ss:$2 sm:$0x3] %vm15995_vm0, %v4007_v30 }
 0x4de   :  { %4043 = vst.msk [vmem:[#allocation4 + $0x47] ss:$2 sm:$0x3] %vm15995_vm0, %v4041_v34  ;;  %v3667_v49 = vld [vmem:[#allocation3 + $0x80] ss:$8 sm:$0x3] }
 0x4df   :  { %v3701_v14 = vld [vmem:[#allocation3 + $0x84] ss:$8 sm:$0x3]  ;;  %3669 = vst.msk [vmem:[#allocation4 + $0x50] ss:$2 sm:$0x3] %vm15995_vm0, %v3667_v49 }
 0x4e0   :  { %3887 = vrot.lane.b32.xlu0 %v3885_v52, %s10270_s3  ;;  %3703 = vst.msk [vmem:[#allocation4 + $0x5a] ss:$2 sm:$0x3] %vm15995_vm0, %v3701_v14  ;;  %v4075_v29 = vld [vmem:[#allocation3 + $0x90] ss:$8 sm:$0x3] }
 0x4e1   :  { %3921 = vrot.lane.b32.xlu1 %v3919_v5, %s10270_s3  ;;  %v4109_v0 = vld [vmem:[#allocation3 + $0x94] ss:$8 sm:$0x3]  ;;  %4077 = vst.msk [vmem:[#allocation4 + $0x51] ss:$2 sm:$0x3] %vm15995_vm0, %v4075_v29 }
 0x4e2   :  { %4111 = vst.msk [vmem:[#allocation4 + $0x5b] ss:$2 sm:$0x3] %vm15995_vm0, %v4109_v0  ;;  %v3735_v18 = vld [vmem:[#allocation3 + $0xa0] ss:$8 sm:$0x3] }
 0x4e3   :  { %v3769_v44 = vld [vmem:[#allocation3 + $0xa4] ss:$8 sm:$0x3]  ;;  %3737 = vst.msk [vmem:[#allocation4 + $0x64] ss:$2 sm:$0x3] %vm15995_vm0, %v3735_v18 }
 0x4e4   :  { %3931 = vrot.lane.b32.xlu0 %v3929_v6, %s10260_s23  ;;  %3771 = vst.msk [vmem:[#allocation4 + $0x6e] ss:$2 sm:$0x3] %vm15995_vm0, %v3769_v44  ;;  %v4143_v53 = vld [vmem:[#allocation3 + $0xb0] ss:$8 sm:$0x3] }
 0x4e5   :  { %3897 = vrot.lane.b32.xlu1 %v3895_v27, %s10260_s23  ;;  %v4177_v62 = vld [vmem:[#allocation3 + $0xb4] ss:$8 sm:$0x3]  ;;  %4145 = vst.msk [vmem:[#allocation4 + $0x65] ss:$2 sm:$0x3] %vm15995_vm0, %v4143_v53 }
 0x4e6   :  { %4179 = vst.msk [vmem:[#allocation4 + $0x6f] ss:$2 sm:$0x3] %vm15995_vm0, %v4177_v62  ;;  %v3589_v20 = vld [vmem:[#allocation3 + $0x47] ss:$8 sm:$0x3] }
 0x4e7   :  { %v3579_v32 = vld [vmem:[#allocation3 + $0x46] ss:$8 sm:$0x3]  ;;  %v3943_v19 = vld [vmem:[#allocation3 + $0x51] ss:$8 sm:$0x3] }
 0x4e8   :  { %3547 = vrot.lane.b32.xlu0 %v3545_v48, %s10270_s3  ;;  %v3977_v60 = vld [vmem:[#allocation3 + $0x55] ss:$8 sm:$0x3]  ;;  %v3953_v2 = vld [vmem:[#allocation3 + $0x52] ss:$8 sm:$0x3] }
 0x4e9   :  { %3537 = vrot.lane.b32.xlu1 %v3535_v8, %s10271_s20  ;;  %v3987_v38 = vld [vmem:[#allocation3 + $0x56] ss:$8 sm:$0x3]  ;;  %v3997_v4 = vld [vmem:[#allocation3 + $0x57] ss:$8 sm:$0x3] }
 0x4ea   :  { %v3963_v57 = vld [vmem:[#allocation3 + $0x53] ss:$8 sm:$0x3]  ;;  %v3613_v10 = vld [vmem:[#allocation3 + $0x62] ss:$8 sm:$0x3] }
 0x4eb   :  { %v3603_v45 = vld [vmem:[#allocation3 + $0x61] ss:$8 sm:$0x3]  ;;  %v3637_v3 = vld [vmem:[#allocation3 + $0x65] ss:$8 sm:$0x3] }
 0x4ec   :  { %3571 = vrot.lane.b32.xlu0 %v3569_v40, %s10271_s20  ;;  %v3623_v51 = vld [vmem:[#allocation3 + $0x63] ss:$8 sm:$0x3]  ;;  %v3657_v39 = vld [vmem:[#allocation3 + $0x67] ss:$8 sm:$0x3] }
 0x4ed   :  { %3557 = vrot.lane.b32.xlu1 %v3555_v21, %s10260_s23  ;;  %v3647_v50 = vld [vmem:[#allocation3 + $0x66] ss:$8 sm:$0x3]  ;;  %v4011_v41 = vld [vmem:[#allocation3 + $0x71] ss:$8 sm:$0x3] }
 0x4ee   :  { %v4045_v37 = vld [vmem:[#allocation3 + $0x75] ss:$8 sm:$0x3]  ;;  %v4021_v9 = vld [vmem:[#allocation3 + $0x72] ss:$8 sm:$0x3] }
 0x4ef   :  { %v4055_v7 = vld [vmem:[#allocation3 + $0x76] ss:$8 sm:$0x3]  ;;  %v4065_v13 = vld [vmem:[#allocation3 + $0x77] ss:$8 sm:$0x3] }
 0x4f0   :  { %3591 = vrot.lane.b32.xlu0 %v3589_v20, %s10260_s23  ;;  %v4031_v43 = vld [vmem:[#allocation3 + $0x73] ss:$8 sm:$0x3]  ;;  %v3681_v1 = vld [vmem:[#allocation3 + $0x82] ss:$8 sm:$0x3] }
 0x4f1   :  { %3581 = vrot.lane.b32.xlu1 %v3579_v32, %s10270_s3  ;;  %v3671_v17 = vld [vmem:[#allocation3 + $0x81] ss:$8 sm:$0x3]  ;;  %v3705_v59 = vld [vmem:[#allocation3 + $0x85] ss:$8 sm:$0x3] }
 0x4f2   :  { %v3691_v22 = vld [vmem:[#allocation3 + $0x83] ss:$8 sm:$0x3]  ;;  %v3725_v35 = vld [vmem:[#allocation3 + $0x87] ss:$8 sm:$0x3] }
 0x4f3   :  { %v3715_v31 = vld [vmem:[#allocation3 + $0x86] ss:$8 sm:$0x3]  ;;  %v4079_v58 = vld [vmem:[#allocation3 + $0x91] ss:$8 sm:$0x3] }
 0x4f4   :  { %3945 = vrot.lane.b32.xlu0 %v3943_v19, %s10271_s20  ;;  %v4113_v26 = vld [vmem:[#allocation3 + $0x95] ss:$8 sm:$0x3]  ;;  %v4089_v54 = vld [vmem:[#allocation3 + $0x92] ss:$8 sm:$0x3] }
 0x4f5   :  { %3979 = vrot.lane.b32.xlu1 %v3977_v60, %s10271_s20  ;;  %v4123_v24 = vld [vmem:[#allocation3 + $0x96] ss:$8 sm:$0x3]  ;;  %v4133_v52 = vld [vmem:[#allocation3 + $0x97] ss:$8 sm:$0x3] }
 0x4f6   :  { %v4099_v61 = vld [vmem:[#allocation3 + $0x93] ss:$8 sm:$0x3]  ;;  %v3749_v46 = vld [vmem:[#allocation3 + $0xa2] ss:$8 sm:$0x3] }
 0x4f7   :  { %v3739_v16 = vld [vmem:[#allocation3 + $0xa1] ss:$8 sm:$0x3]  ;;  %v3773_v30 = vld [vmem:[#allocation3 + $0xa5] ss:$8 sm:$0x3] }
 0x4f8   :  { %3955 = vrot.lane.b32.xlu0 %v3953_v2, %s10270_s3  ;;  %v3759_v21 = vld [vmem:[#allocation3 + $0xa3] ss:$8 sm:$0x3]  ;;  %v3793_v44 = vld [vmem:[#allocation3 + $0xa7] ss:$8 sm:$0x3] }
 0x4f9   :  { %3989 = vrot.lane.b32.xlu1 %v3987_v38, %s10270_s3  ;;  %v3783_v62 = vld [vmem:[#allocation3 + $0xa6] ss:$8 sm:$0x3]  ;;  %v4147_v38 = vld [vmem:[#allocation3 + $0xb1] ss:$8 sm:$0x3] }
 0x4fc   :  { %3999 = vrot.lane.b32.xlu0 %v3997_v4, %s10260_s23 }
 0x4fd   :  { %3965 = vrot.lane.b32.xlu1 %v3963_v57, %s10260_s23  ;;  %v4181_v57 = vld [vmem:[#allocation3 + $0xb5] ss:$8 sm:$0x3] }
 0x500   :  { %3615 = vrot.lane.b32.xlu0 %v3613_v10, %s10270_s3 }
 0x501   :  { %3605 = vrot.lane.b32.xlu1 %v3603_v45, %s10271_s20 }
 0x504   :  { %3639 = vrot.lane.b32.xlu0 %v3637_v3, %s10271_s20 }
 0x505   :  { %3625 = vrot.lane.b32.xlu1 %v3623_v51, %s10260_s23 }
 0x508   :  { %3659 = vrot.lane.b32.xlu0 %v3657_v39, %s10260_s23 }
 0x509   :  { %3649 = vrot.lane.b32.xlu1 %v3647_v50, %s10270_s3  ;;  %v4157_v50 = vld [vmem:[#allocation3 + $0xb2] ss:$8 sm:$0x3] }
 0x50c   :  { %4013 = vrot.lane.b32.xlu0 %v4011_v41, %s10271_s20 }
 0x50d   :  { %4047 = vrot.lane.b32.xlu1 %v4045_v37, %s10271_s20  ;;  %v4191_v37 = vld [vmem:[#allocation3 + $0xb6] ss:$8 sm:$0x3] }
 0x510   :  { %4023 = vrot.lane.b32.xlu0 %v4021_v9, %s10270_s3 }
 0x511   :  { %4057 = vrot.lane.b32.xlu1 %v4055_v7, %s10270_s3 }
 0x514   :  { %4067 = vrot.lane.b32.xlu0 %v4065_v13, %s10260_s23 }
 0x515   :  { %4033 = vrot.lane.b32.xlu1 %v4031_v43, %s10260_s23 }
 0x518   :  { %3683 = vrot.lane.b32.xlu0 %v3681_v1, %s10270_s3 }
 0x519   :  { %3673 = vrot.lane.b32.xlu1 %v3671_v17, %s10271_s20  ;;  %v4201_v17 = vld [vmem:[#allocation3 + $0xb7] ss:$8 sm:$0x3] }
 0x51c   :  { %3707 = vrot.lane.b32.xlu0 %v3705_v59, %s10271_s20 }
 0x51d   :  { %3693 = vrot.lane.b32.xlu1 %v3691_v22, %s10260_s23  ;;  %v4167_v22 = vld [vmem:[#allocation3 + $0xb3] ss:$8 sm:$0x3] }
 0x520   :  { %3727 = vrot.lane.b32.xlu0 %v3725_v35, %s10260_s23 }
 0x521   :  { %3717 = vrot.lane.b32.xlu1 %v3715_v31, %s10270_s3 }
 0x524   :  { %4081 = vrot.lane.b32.xlu0 %v4079_v58, %s10271_s20 }
 0x525   :  { %4115 = vrot.lane.b32.xlu1 %v4113_v26, %s10271_s20 }
 0x528   :  { %4091 = vrot.lane.b32.xlu0 %v4089_v54, %s10270_s3 }
 0x529   :  { %4125 = vrot.lane.b32.xlu1 %v4123_v24, %s10270_s3 }
 0x52a   :  { %v3405_v28 = vpop.permute.xlu0 %3404 }
 0x52b   :  { %v3406_v56 = vrot.slane %v3405_v28, 7  ;;  %v3391_v23 = vpop.permute.xlu1 %3390 }
 0x52c   :  { %v3392_v5 = vrot.slane %v3391_v23, 7  ;;  %4135 = vrot.lane.b32.xlu0 %v4133_v52, %s10260_s23 }
 0x52d   :  { %v3408_v6 = vsel %vm3407_vm3, %v3406_v56, %v3405_v28  ;;  %4101 = vrot.lane.b32.xlu1 %v4099_v61, %s10260_s23 }
 0x52e   :  { %v3394_v27 = vsel %vm3393_vm6, %v3392_v5, %v3391_v23  ;;  %v3436_v25 = vpop.permute.xlu0 %3435 }
 0x52f   :  { %3400 = vst.msk [vmem:[#allocation4 + $0x2] ss:$2 sm:$0x3] %vm16091_vm7, %v3394_v27  ;;  %v3437_v48 = vrot.slane %v3436_v25, 7  ;;  %v3419_v55 = vpop.permute.xlu1 %3418 }
 0x530   :  { %3414 = vst.msk [vmem:[#allocation4 + $0x4] ss:$2 sm:$0x3] %vm16098_vm8, %v3408_v6  ;;  %v3420_v42 = vrot.slane %v3419_v55, 7  ;;  %3751 = vrot.lane.b32.xlu0 %v3749_v46, %s10270_s3 }
 0x531   :  { %v3438_v12 = vsel %vm3393_vm6, %v3437_v48, %v3436_v25  ;;  %3741 = vrot.lane.b32.xlu1 %v3739_v16, %s10271_s20 }
 0x532   :  { %3441 = vst.msk [vmem:[#allocation4 + $0xc] ss:$2 sm:$0x3] %vm16091_vm7, %v3438_v12  ;;  %v3421_v11 = vsel %vm2615_vm9, %v3420_v42, %v3419_v55  ;;  %v3456_v15 = vpop.permute.xlu0 %3455 }
 0x533   :  { %3427 = vst.msk [vmem:[#allocation4 + $0x6] ss:$2 sm:$0x3] %vm16107_vm12, %v3421_v11  ;;  %v3457_v47 = vrot.slane %v3456_v15, 7  ;;  %v3446_v40 = vpop.permute.xlu1 %3445 }
 0x534   :  { %v3447_v34 = vrot.slane %v3446_v40, 7  ;;  %3775 = vrot.lane.b32.xlu0 %v3773_v30, %s10271_s20 }
 0x535   :  { %v3458_v49 = vsel %vm2615_vm9, %v3457_v47, %v3456_v15  ;;  %3761 = vrot.lane.b32.xlu1 %v3759_v21, %s10260_s23 }
 0x536   :  { %v3448_v14 = vsel %vm3407_vm3, %v3447_v34, %v3446_v40  ;;  %v3820_v29 = vpop.permute.xlu0 %3819 }
 0x537   :  { %3451 = vst.msk [vmem:[#allocation4 + $0xe] ss:$2 sm:$0x3] %vm16098_vm8, %v3448_v14  ;;  %v3821_v0 = vrot.slane %v3820_v29, 7  ;;  %v3810_v18 = vpop.permute.xlu1 %3809 }
 0x538   :  { %3461 = vst.msk [vmem:[#allocation4 + $0x10] ss:$2 sm:$0x3] %vm16107_vm12, %v3458_v49  ;;  %v3811_v53 = vrot.slane %v3810_v18, 7  ;;  %3795 = vrot.lane.b32.xlu0 %v3793_v44, %s10260_s23 }
 0x539   :  { %v3822_v20 = vsel %vm3407_vm3, %v3821_v0, %v3820_v29  ;;  %3785 = vrot.lane.b32.xlu1 %v3783_v62, %s10270_s3 }
 0x53a   :  { %v3812_v32 = vsel %vm3393_vm6, %v3811_v53, %v3810_v18  ;;  %v3844_v19 = vpop.permute.xlu0 %3843 }
 0x53b   :  { %3815 = vst.msk [vmem:[#allocation4 + $0x3] ss:$2 sm:$0x3] %vm16091_vm7, %v3812_v32  ;;  %v3845_v60 = vrot.slane %v3844_v19, 7  ;;  %v3830_v2 = vpop.permute.xlu1 %3829 }
 0x53c   :  { %3825 = vst.msk [vmem:[#allocation4 + $0x5] ss:$2 sm:$0x3] %vm16098_vm8, %v3822_v20  ;;  %v3831_v4 = vrot.slane %v3830_v2, 7  ;;  %4149 = vrot.lane.b32.xlu0 %v4147_v38, %s10271_s20 }
 0x53d   :  { %v3846_v10 = vsel %vm3393_vm6, %v3845_v60, %v3844_v19  ;;  %4183 = vrot.lane.b32.xlu1 %v4181_v57, %s10271_s20 }
 0x53e   :  { %3849 = vst.msk [vmem:[#allocation4 + $0xd] ss:$2 sm:$0x3] %vm16091_vm7, %v3846_v10  ;;  %v3832_v45 = vsel %vm2615_vm9, %v3831_v4, %v3830_v2  ;;  %v3864_v3 = vpop.permute.xlu0 %3863 }
 0x53f   :  { %3835 = vst.msk [vmem:[#allocation4 + $0x7] ss:$2 sm:$0x3] %vm16107_vm12, %v3832_v45  ;;  %v3865_v51 = vrot.slane %v3864_v3, 7  ;;  %v3854_v39 = vpop.permute.xlu1 %3853 }
 0x540   :  { %v3855_v41 = vrot.slane %v3854_v39, 7  ;;  %4159 = vrot.lane.b32.xlu0 %v4157_v50, %s10270_s3 }
 0x541   :  { %v3866_v9 = vsel %vm2615_vm9, %v3865_v51, %v3864_v3  ;;  %4193 = vrot.lane.b32.xlu1 %v4191_v37, %s10270_s3 }
 0x542   :  { %v3856_v7 = vsel %vm3407_vm3, %v3855_v41, %v3854_v39  ;;  %v3480_v13 = vpop.permute.xlu0 %3479 }
 0x543   :  { %3859 = vst.msk [vmem:[#allocation4 + $0xf] ss:$2 sm:$0x3] %vm16098_vm8, %v3856_v7  ;;  %v3481_v43 = vrot.slane %v3480_v13, 7  ;;  %v3470_v1 = vpop.permute.xlu1 %3469 }
 0x544   :  { %3869 = vst.msk [vmem:[#allocation4 + $0x11] ss:$2 sm:$0x3] %vm16107_vm12, %v3866_v9  ;;  %v3471_v59 = vrot.slane %v3470_v1, 7  ;;  %4203 = vrot.lane.b32.xlu0 %v4201_v17, %s10260_s23 }
 0x545   :  { %v3482_v35 = vsel %vm3407_vm3, %v3481_v43, %v3480_v13  ;;  %4169 = vrot.lane.b32.xlu1 %v4167_v22, %s10260_s23 }
 0x546   :  { %v3472_v31 = vsel %vm3393_vm6, %v3471_v59, %v3470_v1  ;;  %v3504_v58 = vpop.permute.xlu0 %3503 }
 0x547   :  { %3475 = vst.msk [vmem:[#allocation4 + $0x16] ss:$2 sm:$0x3] %vm16091_vm7, %v3472_v31  ;;  %v3505_v26 = vrot.slane %v3504_v58, 7  ;;  %v3490_v54 = vpop.permute.xlu1 %3489 }
 0x548   :  { %3485 = vst.msk [vmem:[#allocation4 + $0x18] ss:$2 sm:$0x3] %vm16098_vm8, %v3482_v35  ;;  %v3491_v24 = vrot.slane %v3490_v54, 7 }
 0x549   :  { %v3506_v28 = vsel %vm3393_vm6, %v3505_v26, %v3504_v58 }
 0x54a   :  { %3509 = vst.msk [vmem:[#allocation4 + $0x20] ss:$2 sm:$0x3] %vm16091_vm7, %v3506_v28  ;;  %v3492_v56 = vsel %vm2615_vm9, %v3491_v24, %v3490_v54  ;;  %v3524_v23 = vpop.permute.xlu0 %3523 }
 0x54b   :  { %3495 = vst.msk [vmem:[#allocation4 + $0x1a] ss:$2 sm:$0x3] %vm16107_vm12, %v3492_v56  ;;  %v3525_v52 = vrot.slane %v3524_v23, 7  ;;  %v3514_v5 = vpop.permute.xlu1 %3513 }
 0x54c   :  { %v3515_v61 = vrot.slane %v3514_v5, 7 }
 0x54d   :  { %v3526_v6 = vsel %vm2615_vm9, %v3525_v52, %v3524_v23 }
 0x54e   :  { %v3516_v27 = vsel %vm3407_vm3, %v3515_v61, %v3514_v5  ;;  %v3878_v25 = vpop.permute.xlu0 %3877 }
 0x54f   :  { %3519 = vst.msk [vmem:[#allocation4 + $0x22] ss:$2 sm:$0x3] %vm16098_vm8, %v3516_v27  ;;  %v3879_v48 = vrot.slane %v3878_v25, 7  ;;  %v3912_v55 = vpop.permute.xlu1 %3911 }
 0x550   :  { %3529 = vst.msk [vmem:[#allocation4 + $0x24] ss:$2 sm:$0x3] %vm16107_vm12, %v3526_v6  ;;  %v3913_v46 = vrot.slane %v3912_v55, 7 }
 0x551   :  { %v3880_v42 = vsel %vm3393_vm6, %v3879_v48, %v3878_v25 }
 0x552   :  { %3883 = vst.msk [vmem:[#allocation4 + $0x17] ss:$2 sm:$0x3] %vm16091_vm7, %v3880_v42  ;;  %v3914_v16 = vsel %vm3393_vm6, %v3913_v46, %v3912_v55  ;;  %v3888_v12 = vpop.permute.xlu0 %3887 }
 0x553   :  { %3917 = vst.msk [vmem:[#allocation4 + $0x21] ss:$2 sm:$0x3] %vm16091_vm7, %v3914_v16  ;;  %v3889_v11 = vrot.slane %v3888_v12, 7  ;;  %v3922_v15 = vpop.permute.xlu1 %3921 }
 0x554   :  { %v3923_v47 = vrot.slane %v3922_v15, 7 }
 0x555   :  { %v3890_v40 = vsel %vm3407_vm3, %v3889_v11, %v3888_v12 }
 0x556   :  { %3893 = vst.msk [vmem:[#allocation4 + $0x19] ss:$2 sm:$0x3] %vm16098_vm8, %v3890_v40  ;;  %v3924_v30 = vsel %vm3407_vm3, %v3923_v47, %v3922_v15  ;;  %v3932_v34 = vpop.permute.xlu0 %3931 }
 0x557   :  { %3927 = vst.msk [vmem:[#allocation4 + $0x23] ss:$2 sm:$0x3] %vm16098_vm8, %v3924_v30  ;;  %v3933_v21 = vrot.slane %v3932_v34, 7  ;;  %v3898_v49 = vpop.permute.xlu1 %3897 }
 0x558   :  { %v3899_v14 = vrot.slane %v3898_v49, 7 }
 0x559   :  { %v3934_v29 = vsel %vm2615_vm9, %v3933_v21, %v3932_v34 }
 0x55a   :  { %3937 = vst.msk [vmem:[#allocation4 + $0x25] ss:$2 sm:$0x3] %vm16107_vm12, %v3934_v29  ;;  %v3900_v0 = vsel %vm2615_vm9, %v3899_v14, %v3898_v49  ;;  %v3548_v18 = vpop.permute.xlu0 %3547 }
 0x55b   :  { %3903 = vst.msk [vmem:[#allocation4 + $0x1b] ss:$2 sm:$0x3] %vm16107_vm12, %v3900_v0  ;;  %v3549_v44 = vrot.slane %v3548_v18, 7  ;;  %v3538_v53 = vpop.permute.xlu1 %3537 }
 0x55c   :  { %v3539_v62 = vrot.slane %v3538_v53, 7 }
 0x55d   :  { %v3550_v20 = vsel %vm3407_vm3, %v3549_v44, %v3548_v18 }
 0x55e   :  { %v3540_v32 = vsel %vm3393_vm6, %v3539_v62, %v3538_v53  ;;  %v3572_v19 = vpop.permute.xlu0 %3571 }
 0x55f   :  { %3543 = vst.msk [vmem:[#allocation4 + $0x2a] ss:$2 sm:$0x3] %vm16091_vm7, %v3540_v32  ;;  %v3573_v60 = vrot.slane %v3572_v19, 7  ;;  %v3558_v2 = vpop.permute.xlu1 %3557 }
 0x560   :  { %3553 = vst.msk [vmem:[#allocation4 + $0x2c] ss:$2 sm:$0x3] %vm16098_vm8, %v3550_v20  ;;  %v3559_v38 = vrot.slane %v3558_v2, 7 }
 0x561   :  { %v3574_v4 = vsel %vm3393_vm6, %v3573_v60, %v3572_v19 }
 0x562   :  { %3577 = vst.msk [vmem:[#allocation4 + $0x34] ss:$2 sm:$0x3] %vm16091_vm7, %v3574_v4  ;;  %v3560_v57 = vsel %vm2615_vm9, %v3559_v38, %v3558_v2  ;;  %v3592_v10 = vpop.permute.xlu0 %3591 }
 0x563   :  { %3563 = vst.msk [vmem:[#allocation4 + $0x2e] ss:$2 sm:$0x3] %vm16107_vm12, %v3560_v57  ;;  %v3593_v45 = vrot.slane %v3592_v10, 7  ;;  %v3582_v3 = vpop.permute.xlu1 %3581 }
 0x564   :  { %v3583_v51 = vrot.slane %v3582_v3, 7 }
 0x565   :  { %v3594_v39 = vsel %vm2615_vm9, %v3593_v45, %v3592_v10 }
 0x566   :  { %v3584_v50 = vsel %vm3407_vm3, %v3583_v51, %v3582_v3  ;;  %v3946_v41 = vpop.permute.xlu0 %3945 }
 0x567   :  { %3587 = vst.msk [vmem:[#allocation4 + $0x36] ss:$2 sm:$0x3] %vm16098_vm8, %v3584_v50  ;;  %v3947_v37 = vrot.slane %v3946_v41, 7  ;;  %v3980_v9 = vpop.permute.xlu1 %3979 }
 0x568   :  { %3597 = vst.msk [vmem:[#allocation4 + $0x38] ss:$2 sm:$0x3] %vm16107_vm12, %v3594_v39  ;;  %v3981_v7 = vrot.slane %v3980_v9, 7 }
 0x569   :  { %v3948_v13 = vsel %vm3393_vm6, %v3947_v37, %v3946_v41 }
 0x56a   :  { %3951 = vst.msk [vmem:[#allocation4 + $0x2b] ss:$2 sm:$0x3] %vm16091_vm7, %v3948_v13  ;;  %v3982_v43 = vsel %vm3393_vm6, %v3981_v7, %v3980_v9  ;;  %v3956_v1 = vpop.permute.xlu0 %3955 }
 0x56b   :  { %3985 = vst.msk [vmem:[#allocation4 + $0x35] ss:$2 sm:$0x3] %vm16091_vm7, %v3982_v43  ;;  %v3957_v17 = vrot.slane %v3956_v1, 7  ;;  %v3990_v59 = vpop.permute.xlu1 %3989 }
 0x56c   :  { %v3991_v22 = vrot.slane %v3990_v59, 7 }
 0x56d   :  { %v3958_v35 = vsel %vm3407_vm3, %v3957_v17, %v3956_v1 }
 0x56e   :  { %3961 = vst.msk [vmem:[#allocation4 + $0x2d] ss:$2 sm:$0x3] %vm16098_vm8, %v3958_v35  ;;  %v3992_v31 = vsel %vm3407_vm3, %v3991_v22, %v3990_v59  ;;  %v4000_v58 = vpop.permute.xlu0 %3999 }
 0x56f   :  { %3995 = vst.msk [vmem:[#allocation4 + $0x37] ss:$2 sm:$0x3] %vm16098_vm8, %v3992_v31  ;;  %v4001_v26 = vrot.slane %v4000_v58, 7  ;;  %v3966_v54 = vpop.permute.xlu1 %3965 }
 0x570   :  { %v3967_v24 = vrot.slane %v3966_v54, 7 }
 0x571   :  { %v4002_v28 = vsel %vm2615_vm9, %v4001_v26, %v4000_v58 }
 0x572   :  { %4005 = vst.msk [vmem:[#allocation4 + $0x39] ss:$2 sm:$0x3] %vm16107_vm12, %v4002_v28  ;;  %v3968_v56 = vsel %vm2615_vm9, %v3967_v24, %v3966_v54  ;;  %v3616_v23 = vpop.permute.xlu0 %3615 }
 0x573   :  { %3971 = vst.msk [vmem:[#allocation4 + $0x2f] ss:$2 sm:$0x3] %vm16107_vm12, %v3968_v56  ;;  %v3617_v52 = vrot.slane %v3616_v23, 7  ;;  %v3606_v5 = vpop.permute.xlu1 %3605 }
 0x574   :  { %v3607_v61 = vrot.slane %v3606_v5, 7 }
 0x575   :  { %v3618_v6 = vsel %vm3407_vm3, %v3617_v52, %v3616_v23 }
 0x576   :  { %v3608_v27 = vsel %vm3393_vm6, %v3607_v61, %v3606_v5  ;;  %v3640_v25 = vpop.permute.xlu0 %3639 }
 0x577   :  { %3611 = vst.msk [vmem:[#allocation4 + $0x3e] ss:$2 sm:$0x3] %vm16091_vm7, %v3608_v27  ;;  %v3641_v48 = vrot.slane %v3640_v25, 7  ;;  %v3626_v55 = vpop.permute.xlu1 %3625 }
 0x578   :  { %3621 = vst.msk [vmem:[#allocation4 + $0x40] ss:$2 sm:$0x3] %vm16098_vm8, %v3618_v6  ;;  %v3627_v46 = vrot.slane %v3626_v55, 7 }
 0x579   :  { %v3642_v42 = vsel %vm3393_vm6, %v3641_v48, %v3640_v25 }
 0x57a   :  { %3645 = vst.msk [vmem:[#allocation4 + $0x48] ss:$2 sm:$0x3] %vm16091_vm7, %v3642_v42  ;;  %v3628_v16 = vsel %vm2615_vm9, %v3627_v46, %v3626_v55  ;;  %v3660_v12 = vpop.permute.xlu0 %3659 }
 0x57b   :  { %3631 = vst.msk [vmem:[#allocation4 + $0x42] ss:$2 sm:$0x3] %vm16107_vm12, %v3628_v16  ;;  %v3661_v11 = vrot.slane %v3660_v12, 7  ;;  %v3650_v15 = vpop.permute.xlu1 %3649 }
 0x57c   :  { %v3651_v47 = vrot.slane %v3650_v15, 7 }
 0x57d   :  { %v3662_v40 = vsel %vm2615_vm9, %v3661_v11, %v3660_v12 }
 0x57e   :  { %v3652_v30 = vsel %vm3407_vm3, %v3651_v47, %v3650_v15  ;;  %v4014_v34 = vpop.permute.xlu0 %4013 }
 0x57f   :  { %3655 = vst.msk [vmem:[#allocation4 + $0x4a] ss:$2 sm:$0x3] %vm16098_vm8, %v3652_v30  ;;  %v4015_v21 = vrot.slane %v4014_v34, 7  ;;  %v4048_v49 = vpop.permute.xlu1 %4047 }
 0x580   :  { %3665 = vst.msk [vmem:[#allocation4 + $0x4c] ss:$2 sm:$0x3] %vm16107_vm12, %v3662_v40  ;;  %v4049_v14 = vrot.slane %v4048_v49, 7 }
 0x581   :  { %v4016_v29 = vsel %vm3393_vm6, %v4015_v21, %v4014_v34 }
 0x582   :  { %4019 = vst.msk [vmem:[#allocation4 + $0x3f] ss:$2 sm:$0x3] %vm16091_vm7, %v4016_v29  ;;  %v4050_v0 = vsel %vm3393_vm6, %v4049_v14, %v4048_v49  ;;  %v4024_v18 = vpop.permute.xlu0 %4023 }
 0x583   :  { %4053 = vst.msk [vmem:[#allocation4 + $0x49] ss:$2 sm:$0x3] %vm16091_vm7, %v4050_v0  ;;  %v4025_v44 = vrot.slane %v4024_v18, 7  ;;  %v4058_v53 = vpop.permute.xlu1 %4057 }
 0x584   :  { %v4059_v62 = vrot.slane %v4058_v53, 7 }
 0x585   :  { %v4026_v20 = vsel %vm3407_vm3, %v4025_v44, %v4024_v18 }
 0x586   :  { %4029 = vst.msk [vmem:[#allocation4 + $0x41] ss:$2 sm:$0x3] %vm16098_vm8, %v4026_v20  ;;  %v4060_v32 = vsel %vm3407_vm3, %v4059_v62, %v4058_v53  ;;  %v4068_v19 = vpop.permute.xlu0 %4067 }
 0x587   :  { %4063 = vst.msk [vmem:[#allocation4 + $0x4b] ss:$2 sm:$0x3] %vm16098_vm8, %v4060_v32  ;;  %v4069_v60 = vrot.slane %v4068_v19, 7  ;;  %v4034_v2 = vpop.permute.xlu1 %4033 }
 0x588   :  { %v4035_v38 = vrot.slane %v4034_v2, 7 }
 0x589   :  { %v4070_v4 = vsel %vm2615_vm9, %v4069_v60, %v4068_v19 }
 0x58a   :  { %4073 = vst.msk [vmem:[#allocation4 + $0x4d] ss:$2 sm:$0x3] %vm16107_vm12, %v4070_v4  ;;  %v4036_v57 = vsel %vm2615_vm9, %v4035_v38, %v4034_v2  ;;  %v3684_v10 = vpop.permute.xlu0 %3683 }
 0x58b   :  { %4039 = vst.msk [vmem:[#allocation4 + $0x43] ss:$2 sm:$0x3] %vm16107_vm12, %v4036_v57  ;;  %v3685_v45 = vrot.slane %v3684_v10, 7  ;;  %v3674_v3 = vpop.permute.xlu1 %3673 }
 0x58c   :  { %v3675_v51 = vrot.slane %v3674_v3, 7 }
 0x58d   :  { %v3686_v39 = vsel %vm3407_vm3, %v3685_v45, %v3684_v10 }
 0x58e   :  { %v3676_v50 = vsel %vm3393_vm6, %v3675_v51, %v3674_v3  ;;  %v3708_v41 = vpop.permute.xlu0 %3707 }
 0x58f   :  { %3679 = vst.msk [vmem:[#allocation4 + $0x52] ss:$2 sm:$0x3] %vm16091_vm7, %v3676_v50  ;;  %v3709_v37 = vrot.slane %v3708_v41, 7  ;;  %v3694_v9 = vpop.permute.xlu1 %3693 }
 0x590   :  { %3689 = vst.msk [vmem:[#allocation4 + $0x54] ss:$2 sm:$0x3] %vm16098_vm8, %v3686_v39  ;;  %v3695_v7 = vrot.slane %v3694_v9, 7 }
 0x591   :  { %v3710_v13 = vsel %vm3393_vm6, %v3709_v37, %v3708_v41 }
 0x592   :  { %3713 = vst.msk [vmem:[#allocation4 + $0x5c] ss:$2 sm:$0x3] %vm16091_vm7, %v3710_v13  ;;  %v3696_v43 = vsel %vm2615_vm9, %v3695_v7, %v3694_v9  ;;  %v3728_v1 = vpop.permute.xlu0 %3727 }
 0x593   :  { %3699 = vst.msk [vmem:[#allocation4 + $0x56] ss:$2 sm:$0x3] %vm16107_vm12, %v3696_v43  ;;  %v3729_v17 = vrot.slane %v3728_v1, 7  ;;  %v3718_v59 = vpop.permute.xlu1 %3717  ;;  %v18554_v43 = vld [vmem:[#allocation26_spill] sm:$0xff] }
 0x594   :  { %v3719_v22 = vrot.slane %v3718_v59, 7 }
 0x595   :  { %v3730_v35 = vsel %vm2615_vm9, %v3729_v17, %v3728_v1  ;;  %v18555_v1 = vld [vmem:[#allocation27_spill] sm:$0xff] }
 0x596   :  { %v3720_v31 = vsel %vm3407_vm3, %v3719_v22, %v3718_v59  ;;  %v4082_v58 = vpop.permute.xlu0 %4081  ;;  %v8877_v17 = vpack.c.bf16 %v18555_v1, %v18554_v43  ;;  %v18556_v59 = vld [vmem:[#allocation10_spill] sm:$0xff]  ;;  %v18557_v22 = vld [vmem:[#allocation11_spill] sm:$0xff] }
 0x597   :  { %3723 = vst.msk [vmem:[#allocation4 + $0x5e] ss:$2 sm:$0x3] %vm16098_vm8, %v3720_v31  ;;  %v4083_v26 = vrot.slane %v4082_v58, 7  ;;  %v4116_v54 = vpop.permute.xlu1 %4115  ;;  %v8879_v33 = vpack.c.bf16 %v18557_v22, %v18556_v59  ;;  %v18559_v31 = vld [vmem:[#allocation59_spill] sm:$0xff] }
 0x598   :  { %3733 = vst.msk [vmem:[#allocation4 + $0x60] ss:$2 sm:$0x3] %vm16107_vm12, %v3730_v35  ;;  %v4117_v24 = vrot.slane %v4116_v54, 7  ;;  %v18558_v35 = vld [vmem:[#allocation58_spill] sm:$0xff] }
 0x599   :  { %v4084_v28 = vsel %vm3393_vm6, %v4083_v26, %v4082_v58  ;;  %v8909_v58 = vpack.c.bf16 %v18559_v31, %v18558_v35  ;;  %v18560_v26 = vld [vmem:[#allocation42_spill] sm:$0xff] }
 0x59a   :  { %4087 = vst.msk [vmem:[#allocation4 + $0x53] ss:$2 sm:$0x3] %vm16091_vm7, %v4084_v28  ;;  %v4118_v56 = vsel %vm3393_vm6, %v4117_v24, %v4116_v54  ;;  %v4092_v23 = vpop.permute.xlu0 %4091  ;;  %v18561_v54 = vld [vmem:[#allocation43_spill] sm:$0xff] }
 0x59b   :  { %4121 = vst.msk [vmem:[#allocation4 + $0x5d] ss:$2 sm:$0x3] %vm16091_vm7, %v4118_v56  ;;  %v4093_v52 = vrot.slane %v4092_v23, 7  ;;  %v4126_v5 = vpop.permute.xlu1 %4125  ;;  %v8911_v24 = vpack.c.bf16 %v18561_v54, %v18560_v26 }
 0x59c   :  { %v4127_v61 = vrot.slane %v4126_v5, 7 }
 0x59d   :  { %v4094_v6 = vsel %vm3407_vm3, %v4093_v52, %v4092_v23 }
 0x59e   :  { %4097 = vst.msk [vmem:[#allocation4 + $0x55] ss:$2 sm:$0x3] %vm16098_vm8, %v4094_v6  ;;  %v4128_v27 = vsel %vm3407_vm3, %v4127_v61, %v4126_v5  ;;  %v4136_v25 = vpop.permute.xlu0 %4135 }
 0x59f   :  { %4131 = vst.msk [vmem:[#allocation4 + $0x5f] ss:$2 sm:$0x3] %vm16098_vm8, %v4128_v27  ;;  %v4137_v48 = vrot.slane %v4136_v25, 7  ;;  %v4102_v55 = vpop.permute.xlu1 %4101 }
 0x5a0   :  { %v4103_v46 = vrot.slane %v4102_v55, 7 }
 0x5a1   :  { %v4138_v42 = vsel %vm2615_vm9, %v4137_v48, %v4136_v25 }
 0x5a2   :  { %4141 = vst.msk [vmem:[#allocation4 + $0x61] ss:$2 sm:$0x3] %vm16107_vm12, %v4138_v42  ;;  %v4104_v16 = vsel %vm2615_vm9, %v4103_v46, %v4102_v55  ;;  %v3752_v12 = vpop.permute.xlu0 %3751 }
 0x5a3   :  { %4107 = vst.msk [vmem:[#allocation4 + $0x57] ss:$2 sm:$0x3] %vm16107_vm12, %v4104_v16  ;;  %v3753_v11 = vrot.slane %v3752_v12, 7  ;;  %v3742_v15 = vpop.permute.xlu1 %3741 }
 0x5a4   :  { %v3743_v47 = vrot.slane %v3742_v15, 7 }
 0x5a5   :  { %v3754_v40 = vsel %vm3407_vm3, %v3753_v11, %v3752_v12 }
 0x5a6   :  { %v3744_v30 = vsel %vm3393_vm6, %v3743_v47, %v3742_v15  ;;  %v3776_v34 = vpop.permute.xlu0 %3775 }
 0x5a7   :  { %3747 = vst.msk [vmem:[#allocation4 + $0x66] ss:$2 sm:$0x3] %vm16091_vm7, %v3744_v30  ;;  %v3777_v21 = vrot.slane %v3776_v34, 7  ;;  %v3762_v49 = vpop.permute.xlu1 %3761 }
 0x5a8   :  { %3757 = vst.msk [vmem:[#allocation4 + $0x68] ss:$2 sm:$0x3] %vm16098_vm8, %v3754_v40  ;;  %v3763_v14 = vrot.slane %v3762_v49, 7 }
 0x5a9   :  { %v3778_v29 = vsel %vm3393_vm6, %v3777_v21, %v3776_v34 }
 0x5aa   :  { %3781 = vst.msk [vmem:[#allocation4 + $0x70] ss:$2 sm:$0x3] %vm16091_vm7, %v3778_v29  ;;  %v3764_v0 = vsel %vm2615_vm9, %v3763_v14, %v3762_v49  ;;  %v3796_v18 = vpop.permute.xlu0 %3795 }
 0x5ab   :  { %3767 = vst.msk [vmem:[#allocation4 + $0x6a] ss:$2 sm:$0x3] %vm16107_vm12, %v3764_v0  ;;  %v3797_v44 = vrot.slane %v3796_v18, 7  ;;  %v3786_v53 = vpop.permute.xlu1 %3785 }
 0x5ac   :  { %v3787_v62 = vrot.slane %v3786_v53, 7 }
 0x5ad   :  { %v3798_v20 = vsel %vm2615_vm9, %v3797_v44, %v3796_v18 }
 0x5ae   :  { %v3788_v32 = vsel %vm3407_vm3, %v3787_v62, %v3786_v53  ;;  %v4150_v19 = vpop.permute.xlu0 %4149 }
 0x5af   :  { %3791 = vst.msk [vmem:[#allocation4 + $0x72] ss:$2 sm:$0x3] %vm16098_vm8, %v3788_v32  ;;  %v4151_v60 = vrot.slane %v4150_v19, 7  ;;  %v4184_v2 = vpop.permute.xlu1 %4183 }
 0x5b0   :  { %3801 = vst.msk [vmem:[#allocation4 + $0x74] ss:$2 sm:$0x3] %vm16107_vm12, %v3798_v20  ;;  %v4185_v38 = vrot.slane %v4184_v2, 7 }
 0x5b1   :  { %v4152_v4 = vsel %vm3393_vm6, %v4151_v60, %v4150_v19 }
 0x5b2   :  { %4155 = vst.msk [vmem:[#allocation4 + $0x67] ss:$2 sm:$0x3] %vm16091_vm7, %v4152_v4  ;;  %v4186_v57 = vsel %vm3393_vm6, %v4185_v38, %v4184_v2  ;;  %v4160_v10 = vpop.permute.xlu0 %4159 }
 0x5b3   :  { %4189 = vst.msk [vmem:[#allocation4 + $0x71] ss:$2 sm:$0x3] %vm16091_vm7, %v4186_v57  ;;  %v4161_v45 = vrot.slane %v4160_v10, 7  ;;  %v4194_v3 = vpop.permute.xlu1 %4193 }
 0x5b4   :  { %v4195_v51 = vrot.slane %v4194_v3, 7 }
 0x5b5   :  { %v4162_v39 = vsel %vm3407_vm3, %v4161_v45, %v4160_v10 }
 0x5b6   :  { %4165 = vst.msk [vmem:[#allocation4 + $0x69] ss:$2 sm:$0x3] %vm16098_vm8, %v4162_v39  ;;  %v4196_v50 = vsel %vm3407_vm3, %v4195_v51, %v4194_v3  ;;  %v4204_v41 = vpop.permute.xlu0 %4203 }
 0x5b7   :  { %4199 = vst.msk [vmem:[#allocation4 + $0x73] ss:$2 sm:$0x3] %vm16098_vm8, %v4196_v50  ;;  %v4205_v37 = vrot.slane %v4204_v41, 7  ;;  %v4170_v9 = vpop.permute.xlu1 %4169 }
 0x5b8   :  { %v4171_v7 = vrot.slane %v4170_v9, 7 }
 0x5b9   :  { %v4206_v63 = vsel %vm2615_vm9, %v4205_v37, %v4204_v41 }
 0x5ba   :  { %4209 = vst.msk [vmem:[#allocation4 + $0x75] ss:$2 sm:$0x3] %vm16107_vm12, %v4206_v63  ;;  %v4172_v13 = vsel %vm2615_vm9, %v4171_v7, %v4170_v9 }
 0x5bb   :  { %4175 = vst.msk [vmem:[#allocation4 + $0x6b] ss:$2 sm:$0x3] %vm16107_vm12, %v4172_v13 }
 0x5bc   :  { %10251 = dma.done.wait [#allocation6], 122880 }
 0x5bd   :  { %10252 = vsyncadd [#allocation6], 4294844416  ;;  %v18562_v28 = vld [vmem:[#allocation28_spill] sm:$0xff]  ;;  %v18563_v56 = vld [vmem:[#allocation29_spill] sm:$0xff]  ;;  %8878 = vmatprep.subr.bf16.mxu1 %v8877_v17  ;;  %8910 = vmatprep.subr.bf16.mxu0 %v8909_v58  ;;  %v10272_v46 = vmov 1983009808  }
 0x5be   :  { %v8881_v23 = vpack.c.bf16 %v18563_v56, %v18562_v28  ;;  %v18564_v52 = vld [vmem:[#allocation60_spill] sm:$0xff]  ;;  %v18565_v8 = vld [vmem:[#allocation61_spill] sm:$0xff]  ;;  %8880 = vmatpush3.bf16.msra.mxu1 %v8879_v33  ;;  %8912 = vmatpush3.bf16.msra.mxu0 %v8911_v24  ;;  %v5212_v42 = vunpack.c.l.s4 %v10272_v46  ;;  %v18570_v16 = vld [vmem:[#allocation30_spill] sm:$0xff]  ;;  %v5215_v30 = vshrl.u32 %v3382_v36, 7  ;;  %vm7634_vm9 = vcmask 812032  }
 0x5bf   :  { %v8913_v5 = vpack.c.bf16 %v18565_v8, %v18564_v52  ;;  %v18566_v61 = vld [vmem:[#allocation12_spill] sm:$0xff]  ;;  %v18567_v6 = vld [vmem:[#allocation13_spill] sm:$0xff]  ;;  %v18571_v12 = vld [vmem:[#allocation31_spill] sm:$0xff]  ;;  %vm7646_vm13 = vcmask 1024  }
 0x5c0   :  { %v8883_v27 = vpack.c.bf16 %v18567_v6, %v18566_v61  ;;  %v18568_v25 = vld [vmem:[#allocation44_spill] sm:$0xff]  ;;  %v18569_v48 = vld [vmem:[#allocation45_spill] sm:$0xff]  ;;  %8882 = vmatprep.subr.bf16.mxu1 %v8881_v23  ;;  %v8885_v11 = vpack.c.bf16 %v18571_v12, %v18570_v16  ;;  %v18572_v15 = vld [vmem:[#allocation62_spill] sm:$0xff]  ;;  %v5213_v44 = vunpack.c.0.s8 %v5212_v42 }
 0x5c1   :  { %v8915_v55 = vpack.c.bf16 %v18569_v48, %v18568_v25  ;;  %8914 = vmatprep.subr.bf16.mxu0 %v8913_v5  ;;  %v18573_v47 = vld [vmem:[#allocation63_spill] sm:$0xff]  ;;  %v18574_v34 = vld [vmem:[#allocation14_spill] sm:$0xff]  ;;  %v18578_v53 = vld [vmem:[#allocation32_spill] sm:$0xff] }
 0x5c2   :  { %v8917_v40 = vpack.c.bf16 %v18573_v47, %v18572_v15  ;;  %8884 = vmatpush3.bf16.msra.mxu1 %v8883_v27  ;;  %v18575_v21 = vld [vmem:[#allocation15_spill] sm:$0xff]  ;;  %v18576_v14 = vld [vmem:[#allocation46_spill] sm:$0xff]  ;;  %v18579_v62 = vld [vmem:[#allocation33_spill] sm:$0xff]  ;;  %v16364_v2 = vsub.s32 %v5213_v44, %v5215_v30 }
 0x5c3   :  { %8916 = vmatpush3.bf16.msra.mxu0 %v8915_v55  ;;  %v8887_v49 = vpack.c.bf16 %v18575_v21, %v18574_v34  ;;  %v18577_v29 = vld [vmem:[#allocation47_spill] sm:$0xff]  ;;  %8886 = vmatprep.subr.bf16.mxu1 %v8885_v11  ;;  %v8889_v20 = vpack.c.bf16 %v18579_v62, %v18578_v53  ;;  %v18580_v32 = vld [vmem:[#allocation64_spill] sm:$0xff]  ;;  %v18581_v19 = vld [vmem:[#allocation65_spill] sm:$0xff] }
 0x5c4   :  { %v8919_v0 = vpack.c.bf16 %v18577_v29, %v18576_v14  ;;  %v4213_v18 = vld [vmem:[#allocation4] sm:$0xff]  ;;  %8918 = vmatprep.subr.bf16.mxu0 %v8917_v40  ;;  %v8921_v60 = vpack.c.bf16 %v18581_v19, %v18580_v32  ;;  %v18582_v38 = vld [vmem:[#allocation16_spill] sm:$0xff]  ;;  %v18583_v4 = vld [vmem:[#allocation17_spill] sm:$0xff] }
 0x5c5   :  { %v5210_v36 = vcombine.high %v4213_v18, %v4213_v18  ;;  %v8891_v57 = vpack.c.bf16 %v18583_v4, %v18582_v38  ;;  %v18584_v10 = vld [vmem:[#allocation48_spill] sm:$0xff]  ;;  %v18585_v45 = vld [vmem:[#allocation49_spill] sm:$0xff]  ;;  %v5217_v51 = vrot.slane %v4213_v18, %v16364_v2  ;;  %v18586_v50 = vld [vmem:[#allocation34_spill] sm:$0xff] }
 0x5c6   :  { %8888 = vmatpush3.bf16.msra.mxu1 %v8887_v49  ;;  %v8923_v3 = vpack.c.bf16 %v18585_v45, %v18584_v10  ;;  %v18587_v41 = vld [vmem:[#allocation35_spill] sm:$0xff]  ;;  %v18588_v9 = vld [vmem:[#allocation66_spill] sm:$0xff]  ;;  %v18594_v31 = vld [vmem:[#allocation36_spill] sm:$0xff] }
 0x5c7   :  { %8920 = vmatpush3.bf16.msra.mxu0 %v8919_v0  ;;  %v5224_v39 = vrot.slane %v5210_v36, %v16364_v2  ;;  %8890 = vmatprep.subr.bf16.mxu1 %v8889_v20  ;;  %v8893_v37 = vpack.c.bf16 %v18587_v41, %v18586_v50  ;;  %v18589_v7 = vld [vmem:[#allocation67_spill] sm:$0xff]  ;;  %v5225_v13 = vcombine.high %v5217_v51, %v5217_v51  ;;  %v18590_v1 = vld [vmem:[#allocation18_spill] sm:$0xff]  ;;  %v18595_v58 = vld [vmem:[#allocation37_spill] sm:$0xff] }
 0x5c8   :  { %8922 = vmatprep.subr.bf16.mxu0 %v8921_v60  ;;  %v8925_v63 = vpack.c.bf16 %v18589_v7, %v18588_v9  ;;  %v18591_v17 = vld [vmem:[#allocation19_spill] sm:$0xff]  ;;  %v18592_v22 = vld [vmem:[#allocation50_spill] sm:$0xff]  ;;  %v8897_v26 = vpack.c.bf16 %v18595_v58, %v18594_v31  ;;  %v18596_v54 = vld [vmem:[#allocation68_spill] sm:$0xff] }
 0x5c9   :  { %v5226_v43 = vcombine.high %v5224_v39, %v5224_v39  ;;  %v8895_v59 = vpack.c.bf16 %v18591_v17, %v18590_v1  ;;  %v18593_v33 = vld [vmem:[#allocation51_spill] sm:$0xff]  ;;  %v18597_v24 = vld [vmem:[#allocation69_spill] sm:$0xff]  ;;  %5589 = vmatprep.mubr.f32.mxu1 %v5225_v13  ;;  %v18598_v56 = vld [vmem:[#allocation20_spill] sm:$0xff] }
 0x5ca   :  { %8892 = vmatpush3.bf16.msra.mxu1 %v8891_v57  ;;  %v8927_v35 = vpack.c.bf16 %v18593_v33, %v18592_v22  ;;  %v8929_v28 = vpack.c.bf16 %v18597_v24, %v18596_v54  ;;  %v18599_v23 = vld [vmem:[#allocation21_spill] sm:$0xff]  ;;  %v18600_v8 = vld [vmem:[#allocation52_spill] sm:$0xff]  ;;  %v18602_v6 = vld [vmem:[#allocation38_spill] sm:$0xff] }
 0x5cb   :  { %8924 = vmatpush3.bf16.msra.mxu0 %v8923_v3  ;;  %8894 = vmatprep.subr.bf16.mxu1 %v8893_v37  ;;  %v8899_v52 = vpack.c.bf16 %v18599_v23, %v18598_v56  ;;  %v18601_v5 = vld [vmem:[#allocation53_spill] sm:$0xff]  ;;  %v18603_v27 = vld [vmem:[#allocation39_spill] sm:$0xff]  ;;  %v18604_v48 = vld [vmem:[#allocation70_spill] sm:$0xff] }
 0x5cc   :  { %8926 = vmatprep.subr.bf16.mxu0 %v8925_v63  ;;  %5659 = vmatprep.mubr.f32.mxu0 %v5226_v43  ;;  %v8931_v61 = vpack.c.bf16 %v18601_v5, %v18600_v8  ;;  %v8901_v25 = vpack.c.bf16 %v18603_v27, %v18602_v6  ;;  %v18605_v55 = vld [vmem:[#allocation71_spill] sm:$0xff]  ;;  %v18606_v16 = vld [vmem:[#allocation22_spill] sm:$0xff]  ;;  %v18610_v30 = vld [vmem:[#allocation40_spill] sm:$0xff] }
 0x5cd   :  { %v8933_v46 = vpack.c.bf16 %v18605_v55, %v18604_v48  ;;  %v4214_v42 = vld [vmem:[#allocation4 + $0x8] sm:$0xff]  ;;  %v18608_v15 = vld [vmem:[#allocation54_spill] sm:$0xff]  ;;  %v18611_v34 = vld [vmem:[#allocation41_spill] sm:$0xff] }
 0x5ce   :  { %8896 = vmatpush3.bf16.msra.mxu1 %v8895_v59  ;;  %v18607_v12 = vld [vmem:[#allocation23_spill] sm:$0xff]  ;;  %v8905_v21 = vpack.c.bf16 %v18611_v34, %v18610_v30  ;;  %v18612_v49 = vld [vmem:[#allocation72_spill] sm:$0xff]  ;;  %v18613_v14 = vld [vmem:[#allocation73_spill] sm:$0xff]  ;;  %v5227_v0 = vcombine.high %v4214_v42, %v4214_v42  ;;  %v16409_v10 = vrot.slane %v4214_v42, %v16364_v2 }
 0x5cf   :  { %8928 = vmatpush3.bf16.msra.mxu0 %v8927_v35  ;;  %8898 = vmatprep.subr.bf16.mxu1 %v8897_v26  ;;  %v8903_v11 = vpack.c.bf16 %v18607_v12, %v18606_v16  ;;  %v18609_v47 = vld [vmem:[#allocation55_spill] sm:$0xff]  ;;  %v8937_v29 = vpack.c.bf16 %v18613_v14, %v18612_v49  ;;  %v18614_v18 = vld [vmem:[#allocation24_spill] sm:$0xff]  ;;  %v18615_v44 = vld [vmem:[#allocation25_spill] sm:$0xff] }
 0x5d0   :  { %8930 = vmatprep.subr.bf16.mxu0 %v8929_v28  ;;  %v8935_v40 = vpack.c.bf16 %v18609_v47, %v18608_v15  ;;  %v8907_v53 = vpack.c.bf16 %v18615_v44, %v18614_v18  ;;  %v18616_v62 = vld [vmem:[#allocation56_spill] sm:$0xff]  ;;  %v18617_v20 = vld [vmem:[#allocation57_spill] sm:$0xff]  ;;  %v18618_v19 = vld [vmem:[#allocation90_spill] sm:$0xff]  ;;  %v16412_v45 = vrot.slane %v5227_v0, %v16364_v2  ;;  %v5242_v22 = vcombine.high %v16409_v10, %v16409_v10 }
 0x5d1   :  { %v8939_v32 = vpack.c.bf16 %v18617_v20, %v18616_v62  ;;  %v18619_v60 = vld [vmem:[#allocation91_spill] sm:$0xff]  ;;  %v18620_v38 = vld [vmem:[#allocation122_spill] sm:$0xff]  ;;  %v18626_v63 = vld [vmem:[#allocation92_spill] sm:$0xff] }
 0x5d2   :  { %8900 = vmatpush3.bf16.msra.mxu1 %v8899_v52  ;;  %v8941_v36 = vpack.c.bf16 %v18619_v60, %v18618_v19  ;;  %v18621_v4 = vld [vmem:[#allocation123_spill] sm:$0xff]  ;;  %v18622_v3 = vld [vmem:[#allocation74_spill] sm:$0xff]  ;;  %v18627_v13 = vld [vmem:[#allocation93_spill] sm:$0xff]  ;;  %v5243_v33 = vcombine.high %v16412_v45, %v16412_v45 }
 0x5d3   :  { %8932 = vmatpush3.bf16.msra.mxu0 %v8931_v61  ;;  %8902 = vmatprep.subr.bf16.mxu1 %v8901_v25  ;;  %v8973_v57 = vpack.c.bf16 %v18621_v4, %v18620_v38  ;;  %v18623_v50 = vld [vmem:[#allocation75_spill] sm:$0xff]  ;;  %v18624_v37 = vld [vmem:[#allocation106_spill] sm:$0xff]  ;;  %v8945_v43 = vpack.c.bf16 %v18627_v13, %v18626_v63  ;;  %v18628_v1 = vld [vmem:[#allocation124_spill] sm:$0xff] }
 0x5d4   :  { %8934 = vmatprep.subr.bf16.mxu0 %v8933_v46  ;;  %v8943_v41 = vpack.c.bf16 %v18623_v50, %v18622_v3  ;;  %v18625_v9 = vld [vmem:[#allocation107_spill] sm:$0xff]  ;;  %v18629_v17 = vld [vmem:[#allocation125_spill] sm:$0xff]  ;;  %v18630_v35 = vld [vmem:[#allocation76_spill] sm:$0xff] }
 0x5d5   :  { %v8975_v7 = vpack.c.bf16 %v18625_v9, %v18624_v37  ;;  %v8977_v59 = vpack.c.bf16 %v18629_v17, %v18628_v1  ;;  %v18631_v31 = vld [vmem:[#allocation77_spill] sm:$0xff]  ;;  %v18632_v26 = vld [vmem:[#allocation108_spill] sm:$0xff]  ;;  %v18634_v28 = vld [vmem:[#allocation94_spill] sm:$0xff] }
 0x5d6   :  { %8904 = vmatpush3.bf16.msra.mxu1 %v8903_v11  ;;  %v8947_v58 = vpack.c.bf16 %v18631_v31, %v18630_v35  ;;  %v18633_v54 = vld [vmem:[#allocation109_spill] sm:$0xff]  ;;  %v18635_v56 = vld [vmem:[#allocation95_spill] sm:$0xff]  ;;  %v18636_v52 = vld [vmem:[#allocation126_spill] sm:$0xff] }
 0x5d7   :  { %8936 = vmatpush3.bf16.msra.mxu0 %v8935_v40  ;;  %8906 = vmatprep.subr.bf16.mxu1 %v8905_v21  ;;  %v8979_v24 = vpack.c.bf16 %v18633_v54, %v18632_v26  ;;  %v8949_v23 = vpack.c.bf16 %v18635_v56, %v18634_v28  ;;  %v18637_v8 = vld [vmem:[#allocation127_spill] sm:$0xff]  ;;  %v18640_v6 = vld [vmem:[#allocation110_spill] sm:$0xff]  ;;  %v18642_v48 = vld [vmem:[#allocation96_spill] sm:$0xff] }
 0x5d8   :  { %8938 = vmatprep.subr.bf16.mxu0 %v8937_v29  ;;  %v8981_v5 = vpack.c.bf16 %v18637_v8, %v18636_v52  ;;  %v18641_v27 = vld [vmem:[#allocation111_spill] sm:$0xff]  ;;  %v18643_v55 = vld [vmem:[#allocation97_spill] sm:$0xff]  ;;  %v18644_v42 = vld [vmem:[#allocation128_spill] sm:$0xff] }
 0x5d9   :  { %v8983_v25 = vpack.c.bf16 %v18641_v27, %v18640_v6  ;;  %v8953_v46 = vpack.c.bf16 %v18643_v55, %v18642_v48  ;;  %v18645_v16 = vld [vmem:[#allocation129_spill] sm:$0xff]  ;;  %v18646_v11 = vld [vmem:[#allocation80_spill] sm:$0xff]  ;;  %v18650_v21 = vld [vmem:[#allocation98_spill] sm:$0xff] }
 0x5da   :  { %8908 = vmatpush3.bf16.msra.mxu1 %v8907_v53  ;;  %v8985_v12 = vpack.c.bf16 %v18645_v16, %v18644_v42  ;;  %v18647_v15 = vld [vmem:[#allocation81_spill] sm:$0xff]  ;;  %v18648_v40 = vld [vmem:[#allocation112_spill] sm:$0xff]  ;;  %v18651_v49 = vld [vmem:[#allocation99_spill] sm:$0xff] }
 0x5db   :  { %8940 = vmatpush3.bf16.msra.mxu0 %v8939_v32  ;;  %8942 = vmatprep.subr.bf16.mxu1 %v8941_v36  ;;  %v8955_v47 = vpack.c.bf16 %v18647_v15, %v18646_v11  ;;  %v18649_v30 = vld [vmem:[#allocation113_spill] sm:$0xff]  ;;  %v8957_v14 = vpack.c.bf16 %v18651_v49, %v18650_v21  ;;  %v18652_v29 = vld [vmem:[#allocation130_spill] sm:$0xff]  ;;  %v18653_v0 = vld [vmem:[#allocation131_spill] sm:$0xff] }
 0x5dc   :  { %8974 = vmatprep.subr.bf16.mxu0 %v8973_v57  ;;  %v8987_v34 = vpack.c.bf16 %v18649_v30, %v18648_v40  ;;  %v8989_v18 = vpack.c.bf16 %v18653_v0, %v18652_v29  ;;  %v18654_v44 = vld [vmem:[#allocation82_spill] sm:$0xff]  ;;  %v18655_v53 = vld [vmem:[#allocation83_spill] sm:$0xff]  ;;  %v18658_v60 = vld [vmem:[#allocation100_spill] sm:$0xff] }
 0x5dd   :  { %5590 = vmatmul.mubr.f32.vlgmr.msra.gmra.mrb[18].mxu1 %v5217_v51  ;;  %v18638_v51 = vld [vmem:[#allocation78_spill] sm:$0xff]  ;;  %v8959_v62 = vpack.c.bf16 %v18655_v53, %v18654_v44  ;;  %v18657_v32 = vld [vmem:[#allocation115_spill] sm:$0xff]  ;;  %v18659_v36 = vld [vmem:[#allocation101_spill] sm:$0xff] }
 0x5de   :  { %5660 = vmatmul.mubr.f32.vlgmr.msra.gmra.mrb[16].mxu0 %v5224_v39  ;;  %8944 = vmatpush3.bf16.msra.mxu1 %v8943_v41  ;;  %v18639_v39 = vld [vmem:[#allocation79_spill] sm:$0xff]  ;;  %v18656_v20 = vld [vmem:[#allocation114_spill] sm:$0xff]  ;;  %v8961_v38 = vpack.c.bf16 %v18659_v36, %v18658_v60  ;;  %v18660_v4 = vld [vmem:[#allocation132_spill] sm:$0xff] }
 0x5df   :  { %8976 = vmatpush3.bf16.msra.mxu0 %v8975_v7  ;;  %8946 = vmatprep.subr.bf16.mxu1 %v8945_v43  ;;  %v8951_v61 = vpack.c.bf16 %v18639_v39, %v18638_v51  ;;  %v8991_v19 = vpack.c.bf16 %v18657_v32, %v18656_v20  ;;  %v18661_v57 = vld [vmem:[#allocation133_spill] sm:$0xff]  ;;  %v18662_v50 = vld [vmem:[#allocation84_spill] sm:$0xff]  ;;  %v18666_v13 = vld [vmem:[#allocation102_spill] sm:$0xff] }
 0x5e0   :  { %8978 = vmatprep.subr.bf16.mxu0 %v8977_v59  ;;  %5729 = vmatprep.mubr.f32.mxu1 %v5242_v22  ;;  %v8993_v3 = vpack.c.bf16 %v18661_v57, %v18660_v4  ;;  %v18663_v41 = vld [vmem:[#allocation85_spill] sm:$0xff]  ;;  %v18664_v9 = vld [vmem:[#allocation116_spill] sm:$0xff]  ;;  %v18667_v43 = vld [vmem:[#allocation103_spill] sm:$0xff] }
 0x5e1   :  { %5799 = vmatprep.mubr.f32.mxu0 %v5243_v33  ;;  %v8963_v37 = vpack.c.bf16 %v18663_v41, %v18662_v50  ;;  %v18665_v7 = vld [vmem:[#allocation117_spill] sm:$0xff]  ;;  %v8965_v1 = vpack.c.bf16 %v18667_v43, %v18666_v13  ;;  %v18668_v17 = vld [vmem:[#allocation134_spill] sm:$0xff]  ;;  %v18669_v59 = vld [vmem:[#allocation135_spill] sm:$0xff] }
 0x5e2   :  { %8948 = vmatpush3.bf16.msra.mxu1 %v8947_v58  ;;  %v8995_v63 = vpack.c.bf16 %v18665_v7, %v18664_v9  ;;  %v8997_v22 = vpack.c.bf16 %v18669_v59, %v18668_v17  ;;  %v4215_v33 = vld [vmem:[#allocation4 + $0x10] sm:$0xff]  ;;  %v18670_v35 = vld [vmem:[#allocation86_spill] sm:$0xff]  ;;  %v18671_v31 = vld [vmem:[#allocation87_spill] sm:$0xff] }
 0x5e3   :  { %8980 = vmatpush3.bf16.msra.mxu0 %v8979_v24  ;;  %8950 = vmatprep.subr.bf16.mxu1 %v8949_v23  ;;  %v8967_v58 = vpack.c.bf16 %v18671_v31, %v18670_v35  ;;  %v18672_v26 = vld [vmem:[#allocation118_spill] sm:$0xff]  ;;  %v18673_v54 = vld [vmem:[#allocation119_spill] sm:$0xff]  ;;  %v18674_v28 = vld [vmem:[#allocation104_spill] sm:$0xff]  ;;  %v5244_v51 = vcombine.high %v4215_v33, %v4215_v33  ;;  %v16483_v15 = vrot.slane %v4215_v33, %v16364_v2 }
 0x5e4   :  { %8982 = vmatprep.subr.bf16.mxu0 %v8981_v5  ;;  %v8999_v24 = vpack.c.bf16 %v18673_v54, %v18672_v26  ;;  %v18675_v56 = vld [vmem:[#allocation105_spill] sm:$0xff]  ;;  %v18676_v52 = vld [vmem:[#allocation136_spill] sm:$0xff]  ;;  %v18682_v55 = vld [vmem:[#allocation154_spill] sm:$0xff] }
 0x5e5   :  { %v8969_v23 = vpack.c.bf16 %v18675_v56, %v18674_v28  ;;  %v18677_v8 = vld [vmem:[#allocation137_spill] sm:$0xff]  ;;  %v18678_v39 = vld [vmem:[#allocation88_spill] sm:$0xff]  ;;  %v18684_v16 = vld [vmem:[#allocation186_spill] sm:$0xff]  ;;  %v5259_v20 = vcombine.high %v16483_v15, %v16483_v15 }
 0x5e6   :  { %8952 = vmatpush3.bf16.msra.mxu1 %v8951_v61  ;;  %v9001_v5 = vpack.c.bf16 %v18677_v8, %v18676_v52  ;;  %v18679_v61 = vld [vmem:[#allocation89_spill] sm:$0xff]  ;;  %v18680_v27 = vld [vmem:[#allocation120_spill] sm:$0xff]  ;;  %v18686_v40 = vld [vmem:[#allocation138_spill] sm:$0xff] }
 0x5e7   :  { %8984 = vmatpush3.bf16.msra.mxu0 %v8983_v25  ;;  %8954 = vmatprep.subr.bf16.mxu1 %v8953_v46  ;;  %v8971_v6 = vpack.c.bf16 %v18679_v61, %v18678_v39  ;;  %v18681_v25 = vld [vmem:[#allocation121_spill] sm:$0xff]  ;;  %v18683_v46 = vld [vmem:[#allocation155_spill] sm:$0xff]  ;;  %v18688_v21 = vld [vmem:[#allocation170_spill] sm:$0xff] }
 0x5e8   :  { %8986 = vmatprep.subr.bf16.mxu0 %v8985_v12  ;;  %v9003_v48 = vpack.c.bf16 %v18681_v25, %v18680_v27  ;;  %v9005_v42 = vpack.c.bf16 %v18683_v46, %v18682_v55  ;;  %v18685_v12 = vld [vmem:[#allocation187_spill] sm:$0xff]  ;;  %v18690_v29 = vld [vmem:[#allocation156_spill] sm:$0xff]  ;;  %v18691_v0 = vld [vmem:[#allocation157_spill] sm:$0xff] }
 0x5e9   :  { %v9037_v11 = vpack.c.bf16 %v18685_v12, %v18684_v16  ;;  %v18687_v30 = vld [vmem:[#allocation139_spill] sm:$0xff]  ;;  %v18692_v44 = vld [vmem:[#allocation188_spill] sm:$0xff]  ;;  %v18693_v53 = vld [vmem:[#allocation189_spill] sm:$0xff] }
 0x5ea   :  { %8956 = vmatpush3.bf16.msra.mxu1 %v8955_v47  ;;  %v16486_v47 = vrot.slane %v5244_v51, %v16364_v2  ;;  %v18689_v49 = vld [vmem:[#allocation171_spill] sm:$0xff]  ;;  %v18695_v60 = vld [vmem:[#allocation141_spill] sm:$0xff]  ;;  %v18704_v13 = vld [vmem:[#allocation174_spill] sm:$0xff] }
 0x5eb   :  { %8988 = vmatpush3.bf16.msra.mxu0 %v8987_v34  ;;  %8958 = vmatprep.subr.bf16.mxu1 %v8957_v14  ;;  %v9007_v34 = vpack.c.bf16 %v18687_v30, %v18686_v40  ;;  %v9039_v14 = vpack.c.bf16 %v18689_v49, %v18688_v21  ;;  %v18697_v4 = vld [vmem:[#allocation173_spill] sm:$0xff]  ;;  %v18699_v50 = vld [vmem:[#allocation159_spill] sm:$0xff]  ;;  %v18706_v17 = vld [vmem:[#allocation160_spill] sm:$0xff] }
 0x5ec   :  { %8990 = vmatprep.subr.bf16.mxu0 %v8989_v18  ;;  %v9009_v18 = vpack.c.bf16 %v18691_v0, %v18690_v29  ;;  %v5260_v32 = vcombine.high %v16486_v47, %v16486_v47  ;;  %v18701_v9 = vld [vmem:[#allocation191_spill] sm:$0xff]  ;;  %v18707_v59 = vld [vmem:[#allocation161_spill] sm:$0xff]  ;;  %v18708_v33 = vld [vmem:[#allocation192_spill] sm:$0xff] }
 0x5ed   :  { %v18705_v43 = vld [vmem:[#allocation175_spill] sm:$0xff]  ;;  %v18709_v35 = vld [vmem:[#allocation193_spill] sm:$0xff]  ;;  %v18718_v61 = vld [vmem:[#allocation146_spill] sm:$0xff] }
 0x5ee   :  { %8960 = vmatpush3.bf16.msra.mxu1 %v8959_v62  ;;  %v9041_v62 = vpack.c.bf16 %v18693_v53, %v18692_v44  ;;  %v9049_v31 = vpack.c.bf16 %v18709_v35, %v18708_v33  ;;  %v18711_v26 = vld [vmem:[#allocation145_spill] sm:$0xff]  ;;  %v18715_v52 = vld [vmem:[#allocation163_spill] sm:$0xff]  ;;  %v18720_v25 = vld [vmem:[#allocation178_spill] sm:$0xff] }
 0x5ef   :  { %8992 = vmatpush3.bf16.msra.mxu0 %v8991_v19  ;;  %8962 = vmatprep.subr.bf16.mxu1 %v8961_v38  ;;  %v18694_v19 = vld [vmem:[#allocation140_spill] sm:$0xff]  ;;  %v18713_v28 = vld [vmem:[#allocation177_spill] sm:$0xff]  ;;  %v18717_v51 = vld [vmem:[#allocation195_spill] sm:$0xff] }
 0x5f0   :  { %8994 = vmatprep.subr.bf16.mxu0 %v8993_v3  ;;  %v9011_v36 = vpack.c.bf16 %v18695_v60, %v18694_v19  ;;  %v18696_v38 = vld [vmem:[#allocation172_spill] sm:$0xff]  ;;  %v18698_v3 = vld [vmem:[#allocation158_spill] sm:$0xff]  ;;  %v18735_v60 = vld [vmem:[#allocation151_spill] sm:$0xff] }
 0x5f1   :  { %v9043_v57 = vpack.c.bf16 %v18697_v4, %v18696_v38  ;;  %v9013_v41 = vpack.c.bf16 %v18699_v50, %v18698_v3  ;;  %v18722_v46 = vld [vmem:[#allocation164_spill] sm:$0xff]  ;;  %v18730_v0 = vld [vmem:[#allocation166_spill] sm:$0xff]  ;;  %v18737_v4 = vld [vmem:[#allocation183_spill] sm:$0xff] }
 0x5f2   :  { %8964 = vmatpush3.bf16.msra.mxu1 %v8963_v37  ;;  %v18700_v37 = vld [vmem:[#allocation190_spill] sm:$0xff]  ;;  %v18724_v12 = vld [vmem:[#allocation196_spill] sm:$0xff]  ;;  %v18739_v50 = vld [vmem:[#allocation169_spill] sm:$0xff] }
 0x5f3   :  { %8996 = vmatpush3.bf16.msra.mxu0 %v8995_v63  ;;  %8966 = vmatprep.subr.bf16.mxu1 %v8965_v1  ;;  %v9045_v7 = vpack.c.bf16 %v18701_v9, %v18700_v37  ;;  %v9047_v1 = vpack.c.bf16 %v18705_v43, %v18704_v13  ;;  %v18726_v30 = vld [vmem:[#allocation148_spill] sm:$0xff]  ;;  %v18732_v53 = vld [vmem:[#allocation198_spill] sm:$0xff]  ;;  %v18741_v9 = vld [vmem:[#allocation201_spill] sm:$0xff] }
 0x5f4   :  { %8998 = vmatprep.subr.bf16.mxu0 %v8997_v22  ;;  %v9017_v22 = vpack.c.bf16 %v18707_v59, %v18706_v17  ;;  %v18728_v49 = vld [vmem:[#allocation180_spill] sm:$0xff]  ;;  %v18734_v19 = vld [vmem:[#allocation150_spill] sm:$0xff] }
 0x5f5   :  { %v18736_v38 = vld [vmem:[#allocation182_spill] sm:$0xff]  ;;  %v18738_v3 = vld [vmem:[#allocation168_spill] sm:$0xff] }
 0x5f6   :  { %8968 = vmatpush3.bf16.msra.mxu1 %v8967_v58  ;;  %v18710_v58 = vld [vmem:[#allocation144_spill] sm:$0xff]  ;;  %v18746_v59 = vld [vmem:[#allocation218_spill] sm:$0xff] }
 0x5f7   :  { %9000 = vmatpush3.bf16.msra.mxu0 %v8999_v24  ;;  %8970 = vmatprep.subr.bf16.mxu1 %v8969_v23  ;;  %v9019_v54 = vpack.c.bf16 %v18711_v26, %v18710_v58  ;;  %v18712_v24 = vld [vmem:[#allocation176_spill] sm:$0xff]  ;;  %v18714_v23 = vld [vmem:[#allocation162_spill] sm:$0xff] }
 0x5f8   :  { %9002 = vmatprep.subr.bf16.mxu0 %v9001_v5  ;;  %v9051_v56 = vpack.c.bf16 %v18713_v28, %v18712_v24  ;;  %v9021_v8 = vpack.c.bf16 %v18715_v52, %v18714_v23  ;;  %v18716_v5 = vld [vmem:[#allocation194_spill] sm:$0xff]  ;;  %v18740_v37 = vld [vmem:[#allocation200_spill] sm:$0xff]  ;;  %v18751_v28 = vld [vmem:[#allocation203_spill] sm:$0xff] }
 0x5f9   :  { %v9053_v39 = vpack.c.bf16 %v18717_v51, %v18716_v5  ;;  %v18744_v43 = vld [vmem:[#allocation184_spill] sm:$0xff]  ;;  %v18748_v35 = vld [vmem:[#allocation250_spill] sm:$0xff]  ;;  %v18753_v52 = vld [vmem:[#allocation235_spill] sm:$0xff] }
 0x5fa   :  { %8972 = vmatpush3.bf16.msra.mxu1 %v8971_v6  ;;  %v18719_v6 = vld [vmem:[#allocation147_spill] sm:$0xff]  ;;  %v18750_v24 = vld [vmem:[#allocation202_spill] sm:$0xff]  ;;  %v18754_v5 = vld [vmem:[#allocation220_spill] sm:$0xff] }
 0x5fb   :  { %9004 = vmatpush3.bf16.msra.mxu0 %v9003_v48  ;;  %9006 = vmatprep.subr.bf16.mxu1 %v9005_v42  ;;  %v9023_v27 = vpack.c.bf16 %v18719_v6, %v18718_v61  ;;  %v18721_v48 = vld [vmem:[#allocation179_spill] sm:$0xff]  ;;  %v18723_v42 = vld [vmem:[#allocation165_spill] sm:$0xff]  ;;  %v18752_v23 = vld [vmem:[#allocation234_spill] sm:$0xff] }
 0x5fc   :  { %9038 = vmatprep.subr.bf16.mxu0 %v9037_v11  ;;  %v9055_v55 = vpack.c.bf16 %v18721_v48, %v18720_v25  ;;  %v9025_v16 = vpack.c.bf16 %v18723_v42, %v18722_v46  ;;  %v18725_v11 = vld [vmem:[#allocation197_spill] sm:$0xff]  ;;  %v18756_v61 = vld [vmem:[#allocation252_spill] sm:$0xff] }
 0x5fd   :  { %5730 = vmatmul.mubr.f32.vlgmr.msra.gmra.mrb[20].mxu1 %v16409_v10  ;;  %v18702_v10 = vld [vmem:[#allocation142_spill] sm:$0xff]  ;;  %v9057_v40 = vpack.c.bf16 %v18725_v11, %v18724_v12  ;;  %v18755_v51 = vld [vmem:[#allocation221_spill] sm:$0xff] }
 0x5fe   :  { %5800 = vmatmul.mubr.f32.vlgmr.msra.gmra.mrb[18].mxu0 %v16412_v45  ;;  %9008 = vmatpush3.bf16.msra.mxu1 %v9007_v34  ;;  %v18703_v45 = vld [vmem:[#allocation143_spill] sm:$0xff]  ;;  %v18727_v34 = vld [vmem:[#allocation149_spill] sm:$0xff] }
 0x5ff   :  { %9040 = vmatpush3.bf16.msra.mxu0 %v9039_v14  ;;  %9010 = vmatprep.subr.bf16.mxu1 %v9009_v18  ;;  %v9015_v63 = vpack.c.bf16 %v18703_v45, %v18702_v10  ;;  %v9027_v21 = vpack.c.bf16 %v18727_v34, %v18726_v30  ;;  %v18729_v14 = vld [vmem:[#allocation181_spill] sm:$0xff]  ;;  %v18731_v18 = vld [vmem:[#allocation167_spill] sm:$0xff]  ;;  %v18742_v45 = vld [vmem:[#allocation152_spill] sm:$0xff] }
 0x600   :  { %9042 = vmatprep.subr.bf16.mxu0 %v9041_v62  ;;  %5869 = vmatprep.mubr.f32.mxu1 %v5259_v20  ;;  %v9059_v29 = vpack.c.bf16 %v18729_v14, %v18728_v49  ;;  %v9029_v44 = vpack.c.bf16 %v18731_v18, %v18730_v0  ;;  %v18733_v62 = vld [vmem:[#allocation199_spill] sm:$0xff]  ;;  %v18757_v6 = vld [vmem:[#allocation253_spill] sm:$0xff]  ;;  %v18768_v0 = vld [vmem:[#allocation238_spill] sm:$0xff] }
 0x601   :  { %5939 = vmatprep.mubr.f32.mxu0 %v5260_v32  ;;  %v9061_v20 = vpack.c.bf16 %v18733_v62, %v18732_v53  ;;  %v4216_v32 = vld [vmem:[#allocation4 + $0x18] sm:$0xff]  ;;  %v18763_v30 = vld [vmem:[#allocation223_spill] sm:$0xff]  ;;  %v18770_v53 = vld [vmem:[#allocation224_spill] sm:$0xff] }
 0x602   :  { %9012 = vmatpush3.bf16.msra.mxu1 %v9011_v36  ;;  %v9031_v36 = vpack.c.bf16 %v18735_v60, %v18734_v19  ;;  %v5261_v10 = vcombine.high %v4216_v32, %v4216_v32  ;;  %v16559_v26 = vrot.slane %v4216_v32, %v16364_v2  ;;  %v18759_v46 = vld [vmem:[#allocation205_spill] sm:$0xff]  ;;  %v18765_v49 = vld [vmem:[#allocation255_spill] sm:$0xff]  ;;  %v18772_v32 = vld [vmem:[#allocation256_spill] sm:$0xff] }
 0x603   :  { %9044 = vmatpush3.bf16.msra.mxu0 %v9043_v57  ;;  %9014 = vmatprep.subr.bf16.mxu1 %v9013_v41  ;;  %v9063_v57 = vpack.c.bf16 %v18737_v4, %v18736_v38  ;;  %v9033_v41 = vpack.c.bf16 %v18739_v50, %v18738_v3  ;;  %v18761_v12 = vld [vmem:[#allocation237_spill] sm:$0xff]  ;;  %v18769_v18 = vld [vmem:[#allocation239_spill] sm:$0xff] }
 0x604   :  { %9046 = vmatprep.subr.bf16.mxu0 %v9045_v7  ;;  %v9065_v7 = vpack.c.bf16 %v18741_v9, %v18740_v37  ;;  %v5276_v25 = vcombine.high %v16559_v26, %v16559_v26  ;;  %v18771_v62 = vld [vmem:[#allocation225_spill] sm:$0xff]  ;;  %v18779_v37 = vld [vmem:[#allocation227_spill] sm:$0xff] }
 0x605   :  { %v18773_v19 = vld [vmem:[#allocation257_spill] sm:$0xff] }
 0x606   :  { %9016 = vmatpush3.bf16.msra.mxu1 %v9015_v63  ;;  %v18743_v63 = vld [vmem:[#allocation153_spill] sm:$0xff]  ;;  %v9113_v60 = vpack.c.bf16 %v18773_v19, %v18772_v32  ;;  %v18812_v19 = vld [vmem:[#allocation314_spill] sm:$0xff] }
 0x607   :  { %9048 = vmatpush3.bf16.msra.mxu0 %v9047_v1  ;;  %9018 = vmatprep.subr.bf16.mxu1 %v9017_v22  ;;  %v9035_v13 = vpack.c.bf16 %v18743_v63, %v18742_v45  ;;  %v18745_v1 = vld [vmem:[#allocation185_spill] sm:$0xff]  ;;  %v18747_v22 = vld [vmem:[#allocation219_spill] sm:$0xff]  ;;  %v18782_v63 = vld [vmem:[#allocation210_spill] sm:$0xff] }
 0x608   :  { %9050 = vmatprep.subr.bf16.mxu0 %v9049_v31  ;;  %v9067_v17 = vpack.c.bf16 %v18745_v1, %v18744_v43  ;;  %v9069_v33 = vpack.c.bf16 %v18747_v22, %v18746_v59  ;;  %v18749_v31 = vld [vmem:[#allocation251_spill] sm:$0xff]  ;;  %v18775_v38 = vld [vmem:[#allocation209_spill] sm:$0xff]  ;;  %v18784_v1 = vld [vmem:[#allocation242_spill] sm:$0xff] }
 0x609   :  { %v9101_v58 = vpack.c.bf16 %v18749_v31, %v18748_v35  ;;  %v18777_v3 = vld [vmem:[#allocation241_spill] sm:$0xff]  ;;  %v18786_v22 = vld [vmem:[#allocation228_spill] sm:$0xff] }
 0x60a   :  { %9020 = vmatpush3.bf16.msra.mxu1 %v9019_v54  ;;  %v16562_v54 = vrot.slane %v5261_v10, %v16364_v2  ;;  %v18781_v10 = vld [vmem:[#allocation259_spill] sm:$0xff]  ;;  %v18788_v31 = vld [vmem:[#allocation260_spill] sm:$0xff] }
 0x60b   :  { %9052 = vmatpush3.bf16.msra.mxu0 %v9051_v56  ;;  %9022 = vmatprep.subr.bf16.mxu1 %v9021_v8  ;;  %v9071_v56 = vpack.c.bf16 %v18751_v28, %v18750_v24  ;;  %v9103_v8 = vpack.c.bf16 %v18753_v52, %v18752_v23  ;;  %v18790_v28 = vld [vmem:[#allocation212_spill] sm:$0xff] }
 0x60c   :  { %9054 = vmatprep.subr.bf16.mxu0 %v9053_v39  ;;  %v9073_v39 = vpack.c.bf16 %v18755_v51, %v18754_v5  ;;  %v5277_v48 = vcombine.high %v16562_v54, %v16562_v54  ;;  %v18792_v52 = vld [vmem:[#allocation244_spill] sm:$0xff]  ;;  %v18794_v51 = vld [vmem:[#allocation230_spill] sm:$0xff] }
 0x60e   :  { %9024 = vmatpush3.bf16.msra.mxu1 %v9023_v27  ;;  %v9105_v27 = vpack.c.bf16 %v18757_v6, %v18756_v61  ;;  %v18796_v6 = vld [vmem:[#allocation262_spill] sm:$0xff] }
 0x60f   :  { %9056 = vmatpush3.bf16.msra.mxu0 %v9055_v55  ;;  %9026 = vmatprep.subr.bf16.mxu1 %v9025_v16  ;;  %v18758_v55 = vld [vmem:[#allocation204_spill] sm:$0xff] }
 0x610   :  { %9058 = vmatprep.subr.bf16.mxu0 %v9057_v40  ;;  %v9075_v42 = vpack.c.bf16 %v18759_v46, %v18758_v55  ;;  %v18760_v16 = vld [vmem:[#allocation236_spill] sm:$0xff]  ;;  %v18762_v40 = vld [vmem:[#allocation222_spill] sm:$0xff]  ;;  %v18799_v46 = vld [vmem:[#allocation215_spill] sm:$0xff] }
 0x611   :  { %v9107_v11 = vpack.c.bf16 %v18761_v12, %v18760_v16  ;;  %v9077_v34 = vpack.c.bf16 %v18763_v30, %v18762_v40  ;;  %v18798_v55 = vld [vmem:[#allocation214_spill] sm:$0xff]  ;;  %v18801_v12 = vld [vmem:[#allocation247_spill] sm:$0xff]  ;;  %v18802_v40 = vld [vmem:[#allocation232_spill] sm:$0xff] }
 0x612   :  { %9028 = vmatpush3.bf16.msra.mxu1 %v9027_v21  ;;  %v18764_v21 = vld [vmem:[#allocation254_spill] sm:$0xff]  ;;  %v18803_v30 = vld [vmem:[#allocation233_spill] sm:$0xff] }
 0x613   :  { %9060 = vmatpush3.bf16.msra.mxu0 %v9059_v29  ;;  %9030 = vmatprep.subr.bf16.mxu1 %v9029_v44  ;;  %v9109_v14 = vpack.c.bf16 %v18765_v49, %v18764_v21  ;;  %v9111_v44 = vpack.c.bf16 %v18769_v18, %v18768_v0  ;;  %v18800_v16 = vld [vmem:[#allocation246_spill] sm:$0xff]  ;;  %v18804_v21 = vld [vmem:[#allocation264_spill] sm:$0xff]  ;;  %v18805_v49 = vld [vmem:[#allocation265_spill] sm:$0xff] }
 0x614   :  { %9062 = vmatprep.subr.bf16.mxu0 %v9061_v20  ;;  %v9081_v20 = vpack.c.bf16 %v18771_v62, %v18770_v53  ;;  %v18808_v18 = vld [vmem:[#allocation248_spill] sm:$0xff]  ;;  %v18810_v62 = vld [vmem:[#allocation282_spill] sm:$0xff] }
 0x616   :  { %9032 = vmatpush3.bf16.msra.mxu1 %v9031_v36  ;;  %v18774_v36 = vld [vmem:[#allocation208_spill] sm:$0xff] }
 0x617   :  { %9064 = vmatpush3.bf16.msra.mxu0 %v9063_v57  ;;  %9034 = vmatprep.subr.bf16.mxu1 %v9033_v41  ;;  %v9083_v4 = vpack.c.bf16 %v18775_v38, %v18774_v36  ;;  %v18776_v57 = vld [vmem:[#allocation240_spill] sm:$0xff]  ;;  %v18778_v41 = vld [vmem:[#allocation226_spill] sm:$0xff] }
 0x618   :  { %9066 = vmatprep.subr.bf16.mxu0 %v9065_v7  ;;  %v9115_v50 = vpack.c.bf16 %v18777_v3, %v18776_v57  ;;  %v9085_v9 = vpack.c.bf16 %v18779_v37, %v18778_v41  ;;  %v18780_v7 = vld [vmem:[#allocation258_spill] sm:$0xff]  ;;  %v18815_v3 = vld [vmem:[#allocation267_spill] sm:$0xff] }
 0x619   :  { %v9117_v45 = vpack.c.bf16 %v18781_v10, %v18780_v7  ;;  %v18814_v57 = vld [vmem:[#allocation266_spill] sm:$0xff]  ;;  %v18817_v37 = vld [vmem:[#allocation299_spill] sm:$0xff]  ;;  %v18818_v7 = vld [vmem:[#allocation284_spill] sm:$0xff] }
 0x61a   :  { %9036 = vmatpush3.bf16.msra.mxu1 %v9035_v13  ;;  %v18783_v13 = vld [vmem:[#allocation211_spill] sm:$0xff]  ;;  %v18816_v41 = vld [vmem:[#allocation298_spill] sm:$0xff]  ;;  %v18819_v10 = vld [vmem:[#allocation285_spill] sm:$0xff] }
 0x61b   :  { %9068 = vmatpush3.bf16.msra.mxu0 %v9067_v17  ;;  %9070 = vmatprep.subr.bf16.mxu1 %v9069_v33  ;;  %v9087_v43 = vpack.c.bf16 %v18783_v13, %v18782_v63  ;;  %v18785_v17 = vld [vmem:[#allocation243_spill] sm:$0xff]  ;;  %v18787_v33 = vld [vmem:[#allocation229_spill] sm:$0xff]  ;;  %v18820_v63 = vld [vmem:[#allocation316_spill] sm:$0xff] }
 0x61c   :  { %9102 = vmatprep.subr.bf16.mxu0 %v9101_v58  ;;  %v9119_v59 = vpack.c.bf16 %v18785_v17, %v18784_v1  ;;  %v9089_v35 = vpack.c.bf16 %v18787_v33, %v18786_v22  ;;  %v18789_v58 = vld [vmem:[#allocation261_spill] sm:$0xff] }
 0x61d   :  { %5870 = vmatmul.mubr.f32.vlgmr.msra.gmra.mrb[22].mxu1 %v16483_v15  ;;  %v18766_v15 = vld [vmem:[#allocation206_spill] sm:$0xff]  ;;  %v9121_v24 = vpack.c.bf16 %v18789_v58, %v18788_v31  ;;  %v18821_v13 = vld [vmem:[#allocation317_spill] sm:$0xff] }
 0x61e   :  { %5940 = vmatmul.mubr.f32.vlgmr.msra.gmra.mrb[20].mxu0 %v16486_v47  ;;  %9072 = vmatpush3.bf16.msra.mxu1 %v9071_v56  ;;  %v18767_v47 = vld [vmem:[#allocation207_spill] sm:$0xff]  ;;  %v18791_v56 = vld [vmem:[#allocation213_spill] sm:$0xff] }
 0x61f   :  { %9104 = vmatpush3.bf16.msra.mxu0 %v9103_v8  ;;  %9074 = vmatprep.subr.bf16.mxu1 %v9073_v39  ;;  %v9079_v29 = vpack.c.bf16 %v18767_v47, %v18766_v15  ;;  %v9091_v23 = vpack.c.bf16 %v18791_v56, %v18790_v28  ;;  %v18793_v8 = vld [vmem:[#allocation245_spill] sm:$0xff]  ;;  %v18795_v39 = vld [vmem:[#allocation231_spill] sm:$0xff]  ;;  %v18806_v47 = vld [vmem:[#allocation216_spill] sm:$0xff] }
 0x620   :  { %9106 = vmatprep.subr.bf16.mxu0 %v9105_v27  ;;  %6009 = vmatprep.mubr.f32.mxu1 %v5276_v25  ;;  %v9123_v5 = vpack.c.bf16 %v18793_v8, %v18792_v52  ;;  %v9093_v61 = vpack.c.bf16 %v18795_v39, %v18794_v51  ;;  %v18797_v27 = vld [vmem:[#allocation263_spill] sm:$0xff]  ;;  %v18823_v22 = vld [vmem:[#allocation269_spill] sm:$0xff]  ;;  %v18832_v51 = vld [vmem:[#allocation302_spill] sm:$0xff] }
 0x621   :  { %6079 = vmatprep.mubr.f32.mxu0 %v5277_v48  ;;  %v9125_v25 = vpack.c.bf16 %v18797_v27, %v18796_v6  ;;  %v4217_v48 = vld [vmem:[#allocation4 + $0x20] sm:$0xff]  ;;  %v18825_v31 = vld [vmem:[#allocation301_spill] sm:$0xff]  ;;  %v18834_v6 = vld [vmem:[#allocation288_spill] sm:$0xff] }
 0x622   :  { %9076 = vmatpush3.bf16.msra.mxu1 %v9075_v42  ;;  %v9095_v42 = vpack.c.bf16 %v18799_v46, %v18798_v55  ;;  %v5278_v15 = vcombine.high %v4217_v48, %v4217_v48  ;;  %v16635_v38 = vrot.slane %v4217_v48, %v16364_v2  ;;  %v18827_v28 = vld [vmem:[#allocation287_spill] sm:$0xff]  ;;  %v18835_v27 = vld [vmem:[#allocation289_spill] sm:$0xff]  ;;  %v18836_v48 = vld [vmem:[#allocation320_spill] sm:$0xff] }
 0x623   :  { %9108 = vmatpush3.bf16.msra.mxu0 %v9107_v11  ;;  %9078 = vmatprep.subr.bf16.mxu1 %v9077_v34  ;;  %v9127_v11 = vpack.c.bf16 %v18801_v12, %v18800_v16  ;;  %v9097_v34 = vpack.c.bf16 %v18803_v30, %v18802_v40  ;;  %v18829_v52 = vld [vmem:[#allocation319_spill] sm:$0xff]  ;;  %v18837_v55 = vld [vmem:[#allocation321_spill] sm:$0xff] }
 0x624   :  { %9110 = vmatprep.subr.bf16.mxu0 %v9109_v14  ;;  %v9129_v14 = vpack.c.bf16 %v18805_v49, %v18804_v21  ;;  %v5293_v1 = vcombine.high %v16635_v38, %v16635_v38  ;;  %v18833_v39 = vld [vmem:[#allocation303_spill] sm:$0xff]  ;;  %v9177_v46 = vpack.c.bf16 %v18837_v55, %v18836_v48  ;;  %v18839_v16 = vld [vmem:[#allocation273_spill] sm:$0xff]  ;;  %v18876_v55 = vld [vmem:[#allocation378_spill] sm:$0xff] }
 0x625   :  { %v18841_v40 = vld [vmem:[#allocation305_spill] sm:$0xff]  ;;  %v18843_v21 = vld [vmem:[#allocation291_spill] sm:$0xff] }
 0x626   :  { %9080 = vmatpush3.bf16.msra.mxu1 %v9079_v29  ;;  %v18807_v29 = vld [vmem:[#allocation217_spill] sm:$0xff] }
 0x627   :  { %9112 = vmatpush3.bf16.msra.mxu0 %v9111_v44  ;;  %9082 = vmatprep.subr.bf16.mxu1 %v9081_v20  ;;  %v9099_v0 = vpack.c.bf16 %v18807_v29, %v18806_v47  ;;  %v18809_v44 = vld [vmem:[#allocation249_spill] sm:$0xff]  ;;  %v18811_v20 = vld [vmem:[#allocation283_spill] sm:$0xff]  ;;  %v18846_v29 = vld [vmem:[#allocation274_spill] sm:$0xff] }
 0x628   :  { %9114 = vmatprep.subr.bf16.mxu0 %v9113_v60  ;;  %v9131_v53 = vpack.c.bf16 %v18809_v44, %v18808_v18  ;;  %v9133_v32 = vpack.c.bf16 %v18811_v20, %v18810_v62  ;;  %v18813_v60 = vld [vmem:[#allocation315_spill] sm:$0xff]  ;;  %v18848_v44 = vld [vmem:[#allocation306_spill] sm:$0xff]  ;;  %v18850_v20 = vld [vmem:[#allocation292_spill] sm:$0xff] }
 0x629   :  { %v9165_v36 = vpack.c.bf16 %v18813_v60, %v18812_v19  ;;  %v18852_v60 = vld [vmem:[#allocation324_spill] sm:$0xff] }
 0x62a   :  { %9084 = vmatpush3.bf16.msra.mxu1 %v9083_v4  ;;  %v16638_v4 = vrot.slane %v5278_v15, %v16364_v2  ;;  %v18845_v15 = vld [vmem:[#allocation323_spill] sm:$0xff] }
 0x62b   :  { %9116 = vmatpush3.bf16.msra.mxu0 %v9115_v50  ;;  %9086 = vmatprep.subr.bf16.mxu1 %v9085_v9  ;;  %v9135_v50 = vpack.c.bf16 %v18815_v3, %v18814_v57  ;;  %v9167_v9 = vpack.c.bf16 %v18817_v37, %v18816_v41  ;;  %v18854_v3 = vld [vmem:[#allocation276_spill] sm:$0xff] }
 0x62c   :  { %9118 = vmatprep.subr.bf16.mxu0 %v9117_v45  ;;  %v9137_v45 = vpack.c.bf16 %v18819_v10, %v18818_v7  ;;  %v5294_v17 = vcombine.high %v16638_v4, %v16638_v4  ;;  %v18856_v37 = vld [vmem:[#allocation308_spill] sm:$0xff]  ;;  %v18858_v10 = vld [vmem:[#allocation294_spill] sm:$0xff] }
 0x62e   :  { %9088 = vmatpush3.bf16.msra.mxu1 %v9087_v43  ;;  %v9169_v43 = vpack.c.bf16 %v18821_v13, %v18820_v63  ;;  %v18860_v13 = vld [vmem:[#allocation326_spill] sm:$0xff] }
 0x62f   :  { %9120 = vmatpush3.bf16.msra.mxu0 %v9119_v59  ;;  %9090 = vmatprep.subr.bf16.mxu1 %v9089_v35  ;;  %v18822_v59 = vld [vmem:[#allocation268_spill] sm:$0xff] }
 0x630   :  { %9122 = vmatprep.subr.bf16.mxu0 %v9121_v24  ;;  %v9139_v33 = vpack.c.bf16 %v18823_v22, %v18822_v59  ;;  %v18824_v35 = vld [vmem:[#allocation300_spill] sm:$0xff]  ;;  %v18826_v24 = vld [vmem:[#allocation286_spill] sm:$0xff]  ;;  %v18863_v22 = vld [vmem:[#allocation279_spill] sm:$0xff] }
 0x631   :  { %v9171_v58 = vpack.c.bf16 %v18825_v31, %v18824_v35  ;;  %v9141_v56 = vpack.c.bf16 %v18827_v28, %v18826_v24  ;;  %v18862_v59 = vld [vmem:[#allocation278_spill] sm:$0xff]  ;;  %v18865_v31 = vld [vmem:[#allocation311_spill] sm:$0xff]  ;;  %v18866_v24 = vld [vmem:[#allocation296_spill] sm:$0xff] }
 0x632   :  { %9092 = vmatpush3.bf16.msra.mxu1 %v9091_v23  ;;  %v18828_v23 = vld [vmem:[#allocation318_spill] sm:$0xff]  ;;  %v18867_v28 = vld [vmem:[#allocation297_spill] sm:$0xff] }
 0x633   :  { %9124 = vmatpush3.bf16.msra.mxu0 %v9123_v5  ;;  %9094 = vmatprep.subr.bf16.mxu1 %v9093_v61  ;;  %v9173_v8 = vpack.c.bf16 %v18829_v52, %v18828_v23  ;;  %v9175_v61 = vpack.c.bf16 %v18833_v39, %v18832_v51  ;;  %v18864_v35 = vld [vmem:[#allocation310_spill] sm:$0xff]  ;;  %v18868_v23 = vld [vmem:[#allocation328_spill] sm:$0xff]  ;;  %v18869_v52 = vld [vmem:[#allocation329_spill] sm:$0xff] }
 0x634   :  { %9126 = vmatprep.subr.bf16.mxu0 %v9125_v25  ;;  %v9145_v25 = vpack.c.bf16 %v18835_v27, %v18834_v6  ;;  %v18872_v39 = vld [vmem:[#allocation312_spill] sm:$0xff]  ;;  %v18874_v27 = vld [vmem:[#allocation346_spill] sm:$0xff] }
 0x636   :  { %9096 = vmatpush3.bf16.msra.mxu1 %v9095_v42  ;;  %v18838_v42 = vld [vmem:[#allocation272_spill] sm:$0xff] }
 0x637   :  { %9128 = vmatpush3.bf16.msra.mxu0 %v9127_v11  ;;  %9098 = vmatprep.subr.bf16.mxu1 %v9097_v34  ;;  %v9147_v12 = vpack.c.bf16 %v18839_v16, %v18838_v42  ;;  %v18840_v11 = vld [vmem:[#allocation304_spill] sm:$0xff]  ;;  %v18842_v34 = vld [vmem:[#allocation290_spill] sm:$0xff] }
 0x638   :  { %9130 = vmatprep.subr.bf16.mxu0 %v9129_v14  ;;  %v9179_v30 = vpack.c.bf16 %v18841_v40, %v18840_v11  ;;  %v9149_v49 = vpack.c.bf16 %v18843_v21, %v18842_v34  ;;  %v18844_v14 = vld [vmem:[#allocation322_spill] sm:$0xff]  ;;  %v18879_v40 = vld [vmem:[#allocation331_spill] sm:$0xff] }
 0x639   :  { %v9181_v47 = vpack.c.bf16 %v18845_v15, %v18844_v14  ;;  %v18878_v11 = vld [vmem:[#allocation330_spill] sm:$0xff]  ;;  %v18881_v21 = vld [vmem:[#allocation363_spill] sm:$0xff]  ;;  %v18882_v14 = vld [vmem:[#allocation348_spill] sm:$0xff] }
 0x63a   :  { %9100 = vmatpush3.bf16.msra.mxu1 %v9099_v0  ;;  %v18847_v0 = vld [vmem:[#allocation275_spill] sm:$0xff]  ;;  %v18880_v34 = vld [vmem:[#allocation362_spill] sm:$0xff]  ;;  %v18883_v15 = vld [vmem:[#allocation349_spill] sm:$0xff] }
 0x63b   :  { %9132 = vmatpush3.bf16.msra.mxu0 %v9131_v53  ;;  %9134 = vmatprep.subr.bf16.mxu1 %v9133_v32  ;;  %v9151_v18 = vpack.c.bf16 %v18847_v0, %v18846_v29  ;;  %v18849_v53 = vld [vmem:[#allocation307_spill] sm:$0xff]  ;;  %v18851_v32 = vld [vmem:[#allocation293_spill] sm:$0xff]  ;;  %v18884_v29 = vld [vmem:[#allocation380_spill] sm:$0xff] }
 0x63c   :  { %9166 = vmatprep.subr.bf16.mxu0 %v9165_v36  ;;  %v9183_v62 = vpack.c.bf16 %v18849_v53, %v18848_v44  ;;  %v9153_v19 = vpack.c.bf16 %v18851_v32, %v18850_v20  ;;  %v18853_v36 = vld [vmem:[#allocation325_spill] sm:$0xff] }
 0x63d   :  { %6010 = vmatmul.mubr.f32.vlgmr.msra.gmra.mrb[24].mxu1 %v16559_v26  ;;  %v18830_v26 = vld [vmem:[#allocation270_spill] sm:$0xff]  ;;  %v9185_v57 = vpack.c.bf16 %v18853_v36, %v18852_v60  ;;  %v18885_v0 = vld [vmem:[#allocation381_spill] sm:$0xff] }
 0x63e   :  { %6080 = vmatmul.mubr.f32.vlgmr.msra.gmra.mrb[22].mxu0 %v16562_v54  ;;  %9136 = vmatpush3.bf16.msra.mxu1 %v9135_v50  ;;  %v18831_v54 = vld [vmem:[#allocation271_spill] sm:$0xff]  ;;  %v18855_v50 = vld [vmem:[#allocation277_spill] sm:$0xff] }
 0x63f   :  { %9168 = vmatpush3.bf16.msra.mxu0 %v9167_v9  ;;  %9138 = vmatprep.subr.bf16.mxu1 %v9137_v45  ;;  %v9143_v5 = vpack.c.bf16 %v18831_v54, %v18830_v26  ;;  %v9155_v41 = vpack.c.bf16 %v18855_v50, %v18854_v3  ;;  %v18857_v9 = vld [vmem:[#allocation309_spill] sm:$0xff]  ;;  %v18859_v45 = vld [vmem:[#allocation295_spill] sm:$0xff]  ;;  %v18870_v54 = vld [vmem:[#allocation280_spill] sm:$0xff] }
 0x640   :  { %9170 = vmatprep.subr.bf16.mxu0 %v9169_v43  ;;  %6149 = vmatprep.mubr.f32.mxu1 %v5293_v1  ;;  %v9187_v7 = vpack.c.bf16 %v18857_v9, %v18856_v37  ;;  %v9157_v63 = vpack.c.bf16 %v18859_v45, %v18858_v10  ;;  %v18861_v43 = vld [vmem:[#allocation327_spill] sm:$0xff]  ;;  %v18887_v20 = vld [vmem:[#allocation333_spill] sm:$0xff]  ;;  %v18896_v10 = vld [vmem:[#allocation366_spill] sm:$0xff] }
 0x641   :  { %6219 = vmatprep.mubr.f32.mxu0 %v5294_v17  ;;  %v9189_v1 = vpack.c.bf16 %v18861_v43, %v18860_v13  ;;  %v4218_v17 = vld [vmem:[#allocation4 + $0x28] sm:$0xff]  ;;  %v18889_v60 = vld [vmem:[#allocation365_spill] sm:$0xff] }
 0x642   :  { %9140 = vmatpush3.bf16.msra.mxu1 %v9139_v33  ;;  %v9159_v33 = vpack.c.bf16 %v18863_v22, %v18862_v59  ;;  %v5295_v26 = vcombine.high %v4218_v17, %v4218_v17  ;;  %v16711_v16 = vrot.slane %v4218_v17, %v16364_v2  ;;  %v18891_v3 = vld [vmem:[#allocation351_spill] sm:$0xff]  ;;  %v18898_v13 = vld [vmem:[#allocation352_spill] sm:$0xff]  ;;  %v18899_v43 = vld [vmem:[#allocation353_spill] sm:$0xff] }
 0x643   :  { %9172 = vmatpush3.bf16.msra.mxu0 %v9171_v58  ;;  %9142 = vmatprep.subr.bf16.mxu1 %v9141_v56  ;;  %v9191_v58 = vpack.c.bf16 %v18865_v31, %v18864_v35  ;;  %v9161_v56 = vpack.c.bf16 %v18867_v28, %v18866_v24  ;;  %v18893_v37 = vld [vmem:[#allocation383_spill] sm:$0xff]  ;;  %v18900_v17 = vld [vmem:[#allocation384_spill] sm:$0xff]  ;;  %v18901_v59 = vld [vmem:[#allocation385_spill] sm:$0xff] }
 0x644   :  { %9174 = vmatprep.subr.bf16.mxu0 %v9173_v8  ;;  %v9193_v8 = vpack.c.bf16 %v18869_v52, %v18868_v23  ;;  %v5310_v44 = vcombine.high %v16711_v16, %v16711_v16  ;;  %v18897_v45 = vld [vmem:[#allocation367_spill] sm:$0xff]  ;;  %v9241_v22 = vpack.c.bf16 %v18901_v59, %v18900_v17  ;;  %v18903_v35 = vld [vmem:[#allocation337_spill] sm:$0xff]  ;;  %v18940_v59 = vld [vmem:[#allocation442_spill] sm:$0xff] }
 0x645   :  { %v18905_v24 = vld [vmem:[#allocation369_spill] sm:$0xff]  ;;  %v18907_v23 = vld [vmem:[#allocation355_spill] sm:$0xff] }
 0x646   :  { %9144 = vmatpush3.bf16.msra.mxu1 %v9143_v5  ;;  %v18871_v5 = vld [vmem:[#allocation281_spill] sm:$0xff] }
 0x647   :  { %9176 = vmatpush3.bf16.msra.mxu0 %v9175_v61  ;;  %9146 = vmatprep.subr.bf16.mxu1 %v9145_v25  ;;  %v9163_v51 = vpack.c.bf16 %v18871_v5, %v18870_v54  ;;  %v18873_v61 = vld [vmem:[#allocation313_spill] sm:$0xff]  ;;  %v18875_v25 = vld [vmem:[#allocation347_spill] sm:$0xff]  ;;  %v18910_v5 = vld [vmem:[#allocation338_spill] sm:$0xff] }
 0x648   :  { %9178 = vmatprep.subr.bf16.mxu0 %v9177_v46  ;;  %v9195_v6 = vpack.c.bf16 %v18873_v61, %v18872_v39  ;;  %v9197_v48 = vpack.c.bf16 %v18875_v25, %v18874_v27  ;;  %v18877_v46 = vld [vmem:[#allocation379_spill] sm:$0xff]  ;;  %v18912_v61 = vld [vmem:[#allocation370_spill] sm:$0xff]  ;;  %v18914_v25 = vld [vmem:[#allocation356_spill] sm:$0xff] }
 0x649   :  { %v9229_v42 = vpack.c.bf16 %v18877_v46, %v18876_v55  ;;  %v18916_v46 = vld [vmem:[#allocation388_spill] sm:$0xff] }
 0x64a   :  { %9148 = vmatpush3.bf16.msra.mxu1 %v9147_v12  ;;  %v16714_v12 = vrot.slane %v5295_v26, %v16364_v2  ;;  %v18909_v26 = vld [vmem:[#allocation387_spill] sm:$0xff] }
 0x64b   :  { %9180 = vmatpush3.bf16.msra.mxu0 %v9179_v30  ;;  %9150 = vmatprep.subr.bf16.mxu1 %v9149_v49  ;;  %v9199_v30 = vpack.c.bf16 %v18879_v40, %v18878_v11  ;;  %v9231_v49 = vpack.c.bf16 %v18881_v21, %v18880_v34  ;;  %v18918_v40 = vld [vmem:[#allocation340_spill] sm:$0xff] }
 0x64c   :  { %9182 = vmatprep.subr.bf16.mxu0 %v9181_v47  ;;  %v9201_v47 = vpack.c.bf16 %v18883_v15, %v18882_v14  ;;  %v5311_v53 = vcombine.high %v16714_v12, %v16714_v12  ;;  %v18920_v21 = vld [vmem:[#allocation372_spill] sm:$0xff]  ;;  %v18922_v15 = vld [vmem:[#allocation358_spill] sm:$0xff] }
 0x64e   :  { %9152 = vmatpush3.bf16.msra.mxu1 %v9151_v18  ;;  %v9233_v18 = vpack.c.bf16 %v18885_v0, %v18884_v29  ;;  %v18924_v0 = vld [vmem:[#allocation390_spill] sm:$0xff] }
 0x64f   :  { %9184 = vmatpush3.bf16.msra.mxu0 %v9183_v62  ;;  %9154 = vmatprep.subr.bf16.mxu1 %v9153_v19  ;;  %v18886_v62 = vld [vmem:[#allocation332_spill] sm:$0xff] }
 0x650   :  { %9186 = vmatprep.subr.bf16.mxu0 %v9185_v57  ;;  %v9203_v32 = vpack.c.bf16 %v18887_v20, %v18886_v62  ;;  %v18888_v19 = vld [vmem:[#allocation364_spill] sm:$0xff]  ;;  %v18890_v57 = vld [vmem:[#allocation350_spill] sm:$0xff]  ;;  %v18927_v20 = vld [vmem:[#allocation343_spill] sm:$0xff] }
 0x651   :  { %v9235_v36 = vpack.c.bf16 %v18889_v60, %v18888_v19  ;;  %v9205_v50 = vpack.c.bf16 %v18891_v3, %v18890_v57  ;;  %v18926_v62 = vld [vmem:[#allocation342_spill] sm:$0xff]  ;;  %v18929_v60 = vld [vmem:[#allocation375_spill] sm:$0xff]  ;;  %v18930_v57 = vld [vmem:[#allocation360_spill] sm:$0xff] }
 0x652   :  { %9156 = vmatpush3.bf16.msra.mxu1 %v9155_v41  ;;  %v18892_v41 = vld [vmem:[#allocation382_spill] sm:$0xff]  ;;  %v18931_v3 = vld [vmem:[#allocation361_spill] sm:$0xff] }
 0x653   :  { %9188 = vmatpush3.bf16.msra.mxu0 %v9187_v7  ;;  %9158 = vmatprep.subr.bf16.mxu1 %v9157_v63  ;;  %v9237_v9 = vpack.c.bf16 %v18893_v37, %v18892_v41  ;;  %v9239_v63 = vpack.c.bf16 %v18897_v45, %v18896_v10  ;;  %v18928_v19 = vld [vmem:[#allocation374_spill] sm:$0xff]  ;;  %v18932_v41 = vld [vmem:[#allocation392_spill] sm:$0xff]  ;;  %v18933_v37 = vld [vmem:[#allocation393_spill] sm:$0xff] }
 0x654   :  { %9190 = vmatprep.subr.bf16.mxu0 %v9189_v1  ;;  %v9209_v1 = vpack.c.bf16 %v18899_v43, %v18898_v13  ;;  %v18936_v45 = vld [vmem:[#allocation376_spill] sm:$0xff]  ;;  %v18938_v43 = vld [vmem:[#allocation410_spill] sm:$0xff] }
 0x656   :  { %9160 = vmatpush3.bf16.msra.mxu1 %v9159_v33  ;;  %v18902_v33 = vld [vmem:[#allocation336_spill] sm:$0xff] }
 0x657   :  { %9192 = vmatpush3.bf16.msra.mxu0 %v9191_v58  ;;  %9162 = vmatprep.subr.bf16.mxu1 %v9161_v56  ;;  %v9211_v31 = vpack.c.bf16 %v18903_v35, %v18902_v33  ;;  %v18904_v58 = vld [vmem:[#allocation368_spill] sm:$0xff]  ;;  %v18906_v56 = vld [vmem:[#allocation354_spill] sm:$0xff] }
 0x658   :  { %9194 = vmatprep.subr.bf16.mxu0 %v9193_v8  ;;  %v9243_v28 = vpack.c.bf16 %v18905_v24, %v18904_v58  ;;  %v9213_v52 = vpack.c.bf16 %v18907_v23, %v18906_v56  ;;  %v18908_v8 = vld [vmem:[#allocation386_spill] sm:$0xff]  ;;  %v18943_v24 = vld [vmem:[#allocation395_spill] sm:$0xff] }
 0x659   :  { %v9245_v54 = vpack.c.bf16 %v18909_v26, %v18908_v8  ;;  %v18942_v58 = vld [vmem:[#allocation394_spill] sm:$0xff]  ;;  %v18945_v23 = vld [vmem:[#allocation427_spill] sm:$0xff]  ;;  %v18946_v8 = vld [vmem:[#allocation412_spill] sm:$0xff] }
 0x65a   :  { %9164 = vmatpush3.bf16.msra.mxu1 %v9163_v51  ;;  %v18911_v51 = vld [vmem:[#allocation339_spill] sm:$0xff]  ;;  %v18944_v56 = vld [vmem:[#allocation426_spill] sm:$0xff]  ;;  %v18947_v26 = vld [vmem:[#allocation413_spill] sm:$0xff] }
 0x65b   :  { %9196 = vmatpush3.bf16.msra.mxu0 %v9195_v6  ;;  %9198 = vmatprep.subr.bf16.mxu1 %v9197_v48  ;;  %v9215_v39 = vpack.c.bf16 %v18911_v51, %v18910_v5  ;;  %v18913_v6 = vld [vmem:[#allocation371_spill] sm:$0xff]  ;;  %v18915_v48 = vld [vmem:[#allocation357_spill] sm:$0xff]  ;;  %v18948_v5 = vld [vmem:[#allocation444_spill] sm:$0xff] }
 0x65c   :  { %9230 = vmatprep.subr.bf16.mxu0 %v9229_v42  ;;  %v9247_v27 = vpack.c.bf16 %v18913_v6, %v18912_v61  ;;  %v9217_v55 = vpack.c.bf16 %v18915_v48, %v18914_v25  ;;  %v18917_v42 = vld [vmem:[#allocation389_spill] sm:$0xff] }
 0x65d   :  { %6150 = vmatmul.mubr.f32.vlgmr.msra.gmra.mrb[26].mxu1 %v16635_v38  ;;  %v18894_v38 = vld [vmem:[#allocation334_spill] sm:$0xff]  ;;  %v9249_v11 = vpack.c.bf16 %v18917_v42, %v18916_v46  ;;  %v18949_v51 = vld [vmem:[#allocation445_spill] sm:$0xff] }
 0x65e   :  { %6220 = vmatmul.mubr.f32.vlgmr.msra.gmra.mrb[24].mxu0 %v16638_v4  ;;  %9200 = vmatpush3.bf16.msra.mxu1 %v9199_v30  ;;  %v18895_v4 = vld [vmem:[#allocation335_spill] sm:$0xff]  ;;  %v18919_v30 = vld [vmem:[#allocation341_spill] sm:$0xff] }
 0x65f   :  { %9232 = vmatpush3.bf16.msra.mxu0 %v9231_v49  ;;  %9202 = vmatprep.subr.bf16.mxu1 %v9201_v47  ;;  %v9207_v7 = vpack.c.bf16 %v18895_v4, %v18894_v38  ;;  %v9219_v34 = vpack.c.bf16 %v18919_v30, %v18918_v40  ;;  %v18921_v49 = vld [vmem:[#allocation373_spill] sm:$0xff]  ;;  %v18923_v47 = vld [vmem:[#allocation359_spill] sm:$0xff]  ;;  %v18934_v4 = vld [vmem:[#allocation344_spill] sm:$0xff] }
 0x660   :  { %9234 = vmatprep.subr.bf16.mxu0 %v9233_v18  ;;  %6289 = vmatprep.mubr.f32.mxu1 %v5310_v44  ;;  %v9251_v14 = vpack.c.bf16 %v18921_v49, %v18920_v21  ;;  %v9221_v29 = vpack.c.bf16 %v18923_v47, %v18922_v15  ;;  %v18925_v18 = vld [vmem:[#allocation391_spill] sm:$0xff]  ;;  %v18951_v25 = vld [vmem:[#allocation397_spill] sm:$0xff]  ;;  %v18960_v15 = vld [vmem:[#allocation430_spill] sm:$0xff] }
 0x661   :  { %6359 = vmatprep.mubr.f32.mxu0 %v5311_v53  ;;  %v9253_v44 = vpack.c.bf16 %v18925_v18, %v18924_v0  ;;  %v4219_v53 = vld [vmem:[#allocation4 + $0x30] sm:$0xff]  ;;  %v18955_v40 = vld [vmem:[#allocation415_spill] sm:$0xff] }
 0x662   :  { %9204 = vmatpush3.bf16.msra.mxu1 %v9203_v32  ;;  %v9223_v32 = vpack.c.bf16 %v18927_v20, %v18926_v62  ;;  %v5312_v38 = vcombine.high %v4219_v53, %v4219_v53  ;;  %v16787_v35 = vrot.slane %v4219_v53, %v16364_v2  ;;  %v18953_v46 = vld [vmem:[#allocation429_spill] sm:$0xff]  ;;  %v18957_v21 = vld [vmem:[#allocation447_spill] sm:$0xff]  ;;  %v18962_v0 = vld [vmem:[#allocation416_spill] sm:$0xff] }
 0x663   :  { %9236 = vmatpush3.bf16.msra.mxu0 %v9235_v36  ;;  %9206 = vmatprep.subr.bf16.mxu1 %v9205_v50  ;;  %v9255_v36 = vpack.c.bf16 %v18929_v60, %v18928_v19  ;;  %v9225_v50 = vpack.c.bf16 %v18931_v3, %v18930_v57  ;;  %v18961_v47 = vld [vmem:[#allocation431_spill] sm:$0xff]  ;;  %v18963_v18 = vld [vmem:[#allocation417_spill] sm:$0xff]  ;;  %v18964_v53 = vld [vmem:[#allocation448_spill] sm:$0xff] }
 0x664   :  { %9238 = vmatprep.subr.bf16.mxu0 %v9237_v9  ;;  %v9257_v9 = vpack.c.bf16 %v18933_v37, %v18932_v41  ;;  %v5327_v61 = vcombine.high %v16787_v35, %v16787_v35  ;;  %v18965_v62 = vld [vmem:[#allocation449_spill] sm:$0xff]  ;;  %v18971_v41 = vld [vmem:[#allocation419_spill] sm:$0xff] }
 0x665   :  { %v9305_v20 = vpack.c.bf16 %v18965_v62, %v18964_v53  ;;  %v18967_v19 = vld [vmem:[#allocation401_spill] sm:$0xff]  ;;  %v19004_v62 = vld [vmem:[#allocation506_spill] sm:$0xff] }
 0x666   :  { %9208 = vmatpush3.bf16.msra.mxu1 %v9207_v7  ;;  %v18935_v7 = vld [vmem:[#allocation345_spill] sm:$0xff] }
 0x667   :  { %9240 = vmatpush3.bf16.msra.mxu0 %v9239_v63  ;;  %9210 = vmatprep.subr.bf16.mxu1 %v9209_v1  ;;  %v9227_v10 = vpack.c.bf16 %v18935_v7, %v18934_v4  ;;  %v18937_v63 = vld [vmem:[#allocation377_spill] sm:$0xff]  ;;  %v18939_v1 = vld [vmem:[#allocation411_spill] sm:$0xff]  ;;  %v18974_v7 = vld [vmem:[#allocation402_spill] sm:$0xff] }
 0x668   :  { %9242 = vmatprep.subr.bf16.mxu0 %v9241_v22  ;;  %v9259_v13 = vpack.c.bf16 %v18937_v63, %v18936_v45  ;;  %v9261_v17 = vpack.c.bf16 %v18939_v1, %v18938_v43  ;;  %v18941_v22 = vld [vmem:[#allocation443_spill] sm:$0xff]  ;;  %v18969_v57 = vld [vmem:[#allocation433_spill] sm:$0xff]  ;;  %v18976_v63 = vld [vmem:[#allocation434_spill] sm:$0xff] }
 0x669   :  { %v9293_v33 = vpack.c.bf16 %v18941_v22, %v18940_v59  ;;  %v18978_v1 = vld [vmem:[#allocation420_spill] sm:$0xff] }
 0x66a   :  { %9212 = vmatpush3.bf16.msra.mxu1 %v9211_v31  ;;  %v16790_v31 = vrot.slane %v5312_v38, %v16364_v2  ;;  %v18973_v38 = vld [vmem:[#allocation451_spill] sm:$0xff]  ;;  %v18980_v22 = vld [vmem:[#allocation452_spill] sm:$0xff] }
 0x66b   :  { %9244 = vmatpush3.bf16.msra.mxu0 %v9243_v28  ;;  %9214 = vmatprep.subr.bf16.mxu1 %v9213_v52  ;;  %v9263_v28 = vpack.c.bf16 %v18943_v24, %v18942_v58  ;;  %v9295_v52 = vpack.c.bf16 %v18945_v23, %v18944_v56  ;;  %v18982_v24 = vld [vmem:[#allocation404_spill] sm:$0xff] }
 0x66c   :  { %9246 = vmatprep.subr.bf16.mxu0 %v9245_v54  ;;  %v9265_v54 = vpack.c.bf16 %v18947_v26, %v18946_v8  ;;  %v5328_v6 = vcombine.high %v16790_v31, %v16790_v31  ;;  %v18984_v23 = vld [vmem:[#allocation436_spill] sm:$0xff]  ;;  %v18986_v26 = vld [vmem:[#allocation422_spill] sm:$0xff] }
 0x66e   :  { %9216 = vmatpush3.bf16.msra.mxu1 %v9215_v39  ;;  %v9297_v39 = vpack.c.bf16 %v18949_v51, %v18948_v5  ;;  %v18988_v51 = vld [vmem:[#allocation454_spill] sm:$0xff] }
 0x66f   :  { %9248 = vmatpush3.bf16.msra.mxu0 %v9247_v27  ;;  %9218 = vmatprep.subr.bf16.mxu1 %v9217_v55  ;;  %v18950_v27 = vld [vmem:[#allocation396_spill] sm:$0xff] }
 0x670   :  { %9250 = vmatprep.subr.bf16.mxu0 %v9249_v11  ;;  %v9267_v48 = vpack.c.bf16 %v18951_v25, %v18950_v27  ;;  %v18952_v55 = vld [vmem:[#allocation428_spill] sm:$0xff]  ;;  %v18954_v11 = vld [vmem:[#allocation414_spill] sm:$0xff]  ;;  %v18991_v25 = vld [vmem:[#allocation407_spill] sm:$0xff] }
 0x671   :  { %v9299_v42 = vpack.c.bf16 %v18953_v46, %v18952_v55  ;;  %v9269_v30 = vpack.c.bf16 %v18955_v40, %v18954_v11  ;;  %v18990_v27 = vld [vmem:[#allocation406_spill] sm:$0xff]  ;;  %v18993_v46 = vld [vmem:[#allocation439_spill] sm:$0xff]  ;;  %v18994_v11 = vld [vmem:[#allocation424_spill] sm:$0xff] }
 0x672   :  { %9220 = vmatpush3.bf16.msra.mxu1 %v9219_v34  ;;  %v18956_v34 = vld [vmem:[#allocation446_spill] sm:$0xff]  ;;  %v18995_v40 = vld [vmem:[#allocation425_spill] sm:$0xff] }
 0x673   :  { %9252 = vmatpush3.bf16.msra.mxu0 %v9251_v14  ;;  %9222 = vmatprep.subr.bf16.mxu1 %v9221_v29  ;;  %v9301_v49 = vpack.c.bf16 %v18957_v21, %v18956_v34  ;;  %v9303_v29 = vpack.c.bf16 %v18961_v47, %v18960_v15  ;;  %v18992_v55 = vld [vmem:[#allocation438_spill] sm:$0xff]  ;;  %v18996_v34 = vld [vmem:[#allocation456_spill] sm:$0xff]  ;;  %v18997_v21 = vld [vmem:[#allocation457_spill] sm:$0xff] }
 0x674   :  { %9254 = vmatprep.subr.bf16.mxu0 %v9253_v44  ;;  %v9273_v44 = vpack.c.bf16 %v18963_v18, %v18962_v0  ;;  %v19000_v47 = vld [vmem:[#allocation440_spill] sm:$0xff]  ;;  %v19002_v18 = vld [vmem:[#allocation474_spill] sm:$0xff] }
 0x676   :  { %9224 = vmatpush3.bf16.msra.mxu1 %v9223_v32  ;;  %v18966_v32 = vld [vmem:[#allocation400_spill] sm:$0xff] }
 0x677   :  { %9256 = vmatpush3.bf16.msra.mxu0 %v9255_v36  ;;  %9226 = vmatprep.subr.bf16.mxu1 %v9225_v50  ;;  %v9275_v60 = vpack.c.bf16 %v18967_v19, %v18966_v32  ;;  %v18968_v36 = vld [vmem:[#allocation432_spill] sm:$0xff]  ;;  %v18970_v50 = vld [vmem:[#allocation418_spill] sm:$0xff] }
 0x678   :  { %9258 = vmatprep.subr.bf16.mxu0 %v9257_v9  ;;  %v9307_v3 = vpack.c.bf16 %v18969_v57, %v18968_v36  ;;  %v9277_v37 = vpack.c.bf16 %v18971_v41, %v18970_v50  ;;  %v18972_v9 = vld [vmem:[#allocation450_spill] sm:$0xff]  ;;  %v19007_v57 = vld [vmem:[#allocation459_spill] sm:$0xff] }
 0x679   :  { %v9309_v4 = vpack.c.bf16 %v18973_v38, %v18972_v9  ;;  %v19006_v36 = vld [vmem:[#allocation458_spill] sm:$0xff]  ;;  %v19009_v41 = vld [vmem:[#allocation491_spill] sm:$0xff]  ;;  %v19010_v9 = vld [vmem:[#allocation476_spill] sm:$0xff] }
 0x67a   :  { %9228 = vmatpush3.bf16.msra.mxu1 %v9227_v10  ;;  %v18975_v10 = vld [vmem:[#allocation403_spill] sm:$0xff]  ;;  %v19008_v50 = vld [vmem:[#allocation490_spill] sm:$0xff]  ;;  %v19011_v38 = vld [vmem:[#allocation477_spill] sm:$0xff] }
 0x67b   :  { %9260 = vmatpush3.bf16.msra.mxu0 %v9259_v13  ;;  %9262 = vmatprep.subr.bf16.mxu1 %v9261_v17  ;;  %v9279_v45 = vpack.c.bf16 %v18975_v10, %v18974_v7  ;;  %v18977_v13 = vld [vmem:[#allocation435_spill] sm:$0xff]  ;;  %v18979_v17 = vld [vmem:[#allocation421_spill] sm:$0xff]  ;;  %v19012_v7 = vld [vmem:[#allocation508_spill] sm:$0xff] }
 0x67c   :  { %9294 = vmatprep.subr.bf16.mxu0 %v9293_v33  ;;  %v9311_v43 = vpack.c.bf16 %v18977_v13, %v18976_v63  ;;  %v9281_v59 = vpack.c.bf16 %v18979_v17, %v18978_v1  ;;  %v18981_v33 = vld [vmem:[#allocation453_spill] sm:$0xff] }
 0x67d   :  { %6290 = vmatmul.mubr.f32.vlgmr.msra.gmra.mrb[28].mxu1 %v16711_v16  ;;  %v18958_v16 = vld [vmem:[#allocation398_spill] sm:$0xff]  ;;  %v9313_v58 = vpack.c.bf16 %v18981_v33, %v18980_v22  ;;  %v19013_v10 = vld [vmem:[#allocation509_spill] sm:$0xff] }
 0x67e   :  { %6360 = vmatmul.mubr.f32.vlgmr.msra.gmra.mrb[26].mxu0 %v16714_v12  ;;  %9264 = vmatpush3.bf16.msra.mxu1 %v9263_v28  ;;  %v18959_v12 = vld [vmem:[#allocation399_spill] sm:$0xff]  ;;  %v18983_v28 = vld [vmem:[#allocation405_spill] sm:$0xff] }
 0x67f   :  { %9296 = vmatpush3.bf16.msra.mxu0 %v9295_v52  ;;  %9266 = vmatprep.subr.bf16.mxu1 %v9265_v54  ;;  %v9271_v14 = vpack.c.bf16 %v18959_v12, %v18958_v16  ;;  %v9283_v56 = vpack.c.bf16 %v18983_v28, %v18982_v24  ;;  %v18985_v52 = vld [vmem:[#allocation437_spill] sm:$0xff]  ;;  %v18987_v54 = vld [vmem:[#allocation423_spill] sm:$0xff]  ;;  %v18998_v12 = vld [vmem:[#allocation408_spill] sm:$0xff] }
 0x680   :  { %9298 = vmatprep.subr.bf16.mxu0 %v9297_v39  ;;  %6429 = vmatprep.mubr.f32.mxu1 %v5327_v61  ;;  %v9315_v8 = vpack.c.bf16 %v18985_v52, %v18984_v23  ;;  %v9285_v5 = vpack.c.bf16 %v18987_v54, %v18986_v26  ;;  %v18989_v39 = vld [vmem:[#allocation455_spill] sm:$0xff]  ;;  %v19015_v1 = vld [vmem:[#allocation461_spill] sm:$0xff]  ;;  %v19024_v26 = vld [vmem:[#allocation494_spill] sm:$0xff] }
 0x681   :  { %6499 = vmatprep.mubr.f32.mxu0 %v5328_v6  ;;  %v9317_v61 = vpack.c.bf16 %v18989_v39, %v18988_v51  ;;  %v4220_v6 = vld [vmem:[#allocation4 + $0x38] sm:$0xff]  ;;  %v19019_v24 = vld [vmem:[#allocation479_spill] sm:$0xff]  ;;  %v19026_v51 = vld [vmem:[#allocation480_spill] sm:$0xff] }
 0x682   :  { %9268 = vmatpush3.bf16.msra.mxu1 %v9267_v48  ;;  %v9287_v48 = vpack.c.bf16 %v18991_v25, %v18990_v27  ;;  %v5329_v16 = vcombine.high %v4220_v6, %v4220_v6  ;;  %v16863_v19 = vrot.slane %v4220_v6, %v16364_v2  ;;  %v19017_v22 = vld [vmem:[#allocation493_spill] sm:$0xff]  ;;  %v19021_v23 = vld [vmem:[#allocation511_spill] sm:$0xff]  ;;  %v19028_v6 = vld [vmem:[#allocation512_spill] sm:$0xff] }
 0x683   :  { %9300 = vmatpush3.bf16.msra.mxu0 %v9299_v42  ;;  %9270 = vmatprep.subr.bf16.mxu1 %v9269_v30  ;;  %v9319_v42 = vpack.c.bf16 %v18993_v46, %v18992_v55  ;;  %v9289_v30 = vpack.c.bf16 %v18995_v40, %v18994_v11  ;;  %v19025_v54 = vld [vmem:[#allocation495_spill] sm:$0xff]  ;;  %v19027_v39 = vld [vmem:[#allocation481_spill] sm:$0xff] }
 0x684   :  { %9302 = vmatprep.subr.bf16.mxu0 %v9301_v49  ;;  %v9321_v49 = vpack.c.bf16 %v18997_v21, %v18996_v34  ;;  %v5344_v63 = vcombine.high %v16863_v19, %v16863_v19  ;;  %v19029_v27 = vld [vmem:[#allocation513_spill] sm:$0xff]  ;;  %v19035_v34 = vld [vmem:[#allocation483_spill] sm:$0xff] }
 0x685   :  { %v9369_v25 = vpack.c.bf16 %v19029_v27, %v19028_v6  ;;  %v19031_v55 = vld [vmem:[#allocation465_spill] sm:$0xff]  ;;  %v19062_v27 = vld [vmem:[#allocation472_spill] sm:$0xff] }
 0x686   :  { %9272 = vmatpush3.bf16.msra.mxu1 %v9271_v14  ;;  %v18999_v14 = vld [vmem:[#allocation409_spill] sm:$0xff] }
 0x687   :  { %9304 = vmatpush3.bf16.msra.mxu0 %v9303_v29  ;;  %9274 = vmatprep.subr.bf16.mxu1 %v9273_v44  ;;  %v9291_v15 = vpack.c.bf16 %v18999_v14, %v18998_v12  ;;  %v19001_v29 = vld [vmem:[#allocation441_spill] sm:$0xff]  ;;  %v19003_v44 = vld [vmem:[#allocation475_spill] sm:$0xff]  ;;  %v19038_v14 = vld [vmem:[#allocation466_spill] sm:$0xff] }
 0x688   :  { %9306 = vmatprep.subr.bf16.mxu0 %v9305_v20  ;;  %v9323_v0 = vpack.c.bf16 %v19001_v29, %v19000_v47  ;;  %v9325_v53 = vpack.c.bf16 %v19003_v44, %v19002_v18  ;;  %v19005_v20 = vld [vmem:[#allocation507_spill] sm:$0xff]  ;;  %v19033_v11 = vld [vmem:[#allocation497_spill] sm:$0xff]  ;;  %v19040_v29 = vld [vmem:[#allocation498_spill] sm:$0xff] }
 0x689   :  { %v9357_v32 = vpack.c.bf16 %v19005_v20, %v19004_v62  ;;  %v19042_v44 = vld [vmem:[#allocation484_spill] sm:$0xff] }
 0x68a   :  { %9276 = vmatpush3.bf16.msra.mxu1 %v9275_v60  ;;  %v16866_v60 = vrot.slane %v5329_v16, %v16364_v2  ;;  %v19037_v16 = vld [vmem:[#allocation515_spill] sm:$0xff]  ;;  %v19044_v20 = vld [vmem:[#allocation516_spill] sm:$0xff] }
 0x68b   :  { %9308 = vmatpush3.bf16.msra.mxu0 %v9307_v3  ;;  %9278 = vmatprep.subr.bf16.mxu1 %v9277_v37  ;;  %v9327_v3 = vpack.c.bf16 %v19007_v57, %v19006_v36  ;;  %v9359_v37 = vpack.c.bf16 %v19009_v41, %v19008_v50  ;;  %v19046_v57 = vld [vmem:[#allocation468_spill] sm:$0xff] }
 0x68c   :  { %9310 = vmatprep.subr.bf16.mxu0 %v9309_v4  ;;  %v9329_v4 = vpack.c.bf16 %v19011_v38, %v19010_v9  ;;  %v5345_v13 = vcombine.high %v16866_v60, %v16866_v60  ;;  %v19048_v41 = vld [vmem:[#allocation500_spill] sm:$0xff]  ;;  %v19050_v38 = vld [vmem:[#allocation486_spill] sm:$0xff] }
 0x68e   :  { %9280 = vmatpush3.bf16.msra.mxu1 %v9279_v45  ;;  %v9361_v45 = vpack.c.bf16 %v19013_v10, %v19012_v7  ;;  %v19052_v10 = vld [vmem:[#allocation518_spill] sm:$0xff] }
 0x68f   :  { %9312 = vmatpush3.bf16.msra.mxu0 %v9311_v43  ;;  %9282 = vmatprep.subr.bf16.mxu1 %v9281_v59  ;;  %v19014_v43 = vld [vmem:[#allocation460_spill] sm:$0xff] }
 0x690   :  { %9314 = vmatprep.subr.bf16.mxu0 %v9313_v58  ;;  %v9331_v17 = vpack.c.bf16 %v19015_v1, %v19014_v43  ;;  %v19016_v59 = vld [vmem:[#allocation492_spill] sm:$0xff]  ;;  %v19018_v58 = vld [vmem:[#allocation478_spill] sm:$0xff] }
 0x691   :  { %v9363_v33 = vpack.c.bf16 %v19017_v22, %v19016_v59  ;;  %v9333_v28 = vpack.c.bf16 %v19019_v24, %v19018_v58  ;;  %v7672_v1 = vld [vmem:[%s17504_s6] ss:$0 sm:$0xff] }
 0x692   :  { %9284 = vmatpush3.bf16.msra.mxu1 %v9283_v56  ;;  %v19020_v56 = vld [vmem:[#allocation510_spill] sm:$0xff] }
 0x693   :  { %9316 = vmatpush3.bf16.msra.mxu0 %v9315_v8  ;;  %9286 = vmatprep.subr.bf16.mxu1 %v9285_v5  ;;  %v9365_v52 = vpack.c.bf16 %v19021_v23, %v19020_v56  ;;  %v9367_v5 = vpack.c.bf16 %v19025_v54, %v19024_v26  ;;  %v19054_v22 = vld [vmem:[#allocation470_spill] sm:$0xff]  ;;  %v19060_v54 = vld [vmem:[#allocation520_spill] sm:$0xff] }
 0x694   :  { %9318 = vmatprep.subr.bf16.mxu0 %v9317_v61  ;;  %v9337_v61 = vpack.c.bf16 %v19027_v39, %v19026_v51  ;;  %v4221_v24 = vld [vmem:[#allocation4 + $0x40] sm:$0xff] }
 0x695   :  { %v19056_v23 = vld [vmem:[#allocation502_spill] sm:$0xff] }
 0x696   :  { %9288 = vmatpush3.bf16.msra.mxu1 %v9287_v48  ;;  %v19030_v48 = vld [vmem:[#allocation464_spill] sm:$0xff] }
 0x697   :  { %9320 = vmatpush3.bf16.msra.mxu0 %v9319_v42  ;;  %9290 = vmatprep.subr.bf16.mxu1 %v9289_v30  ;;  %v9339_v46 = vpack.c.bf16 %v19031_v55, %v19030_v48  ;;  %v19032_v42 = vld [vmem:[#allocation496_spill] sm:$0xff]  ;;  %v19034_v30 = vld [vmem:[#allocation482_spill] sm:$0xff] }
 0x698   :  { %9322 = vmatprep.subr.bf16.mxu0 %v9321_v49  ;;  %v9371_v40 = vpack.c.bf16 %v19033_v11, %v19032_v42  ;;  %v9341_v21 = vpack.c.bf16 %v19035_v34, %v19034_v30  ;;  %v19036_v49 = vld [vmem:[#allocation514_spill] sm:$0xff]  ;;  %v19064_v55 = vld [vmem:[#allocation504_spill] sm:$0xff] }
 0x699   :  { %v9373_v12 = vpack.c.bf16 %v19037_v16, %v19036_v49  ;;  %v19066_v11 = vld [vmem:[#allocation538_spill] sm:$0xff]  ;;  %v16944_v16 = vrot.slane %v4221_v24, %v16364_v2 }
 0x69a   :  { %9292 = vmatpush3.bf16.msra.mxu1 %v9291_v15  ;;  %v19039_v15 = vld [vmem:[#allocation467_spill] sm:$0xff]  ;;  %v19068_v34 = vld [vmem:[#allocation570_spill] sm:$0xff] }
 0x69b   :  { %9324 = vmatpush3.bf16.msra.mxu0 %v9323_v0  ;;  %9326 = vmatprep.subr.bf16.mxu1 %v9325_v53  ;;  %v9343_v47 = vpack.c.bf16 %v19039_v15, %v19038_v14  ;;  %v19041_v0 = vld [vmem:[#allocation499_spill] sm:$0xff]  ;;  %v19043_v53 = vld [vmem:[#allocation485_spill] sm:$0xff]  ;;  %v19070_v14 = vld [vmem:[#allocation522_spill] sm:$0xff] }
 0x69c   :  { %9358 = vmatprep.subr.bf16.mxu0 %v9357_v32  ;;  %v9375_v18 = vpack.c.bf16 %v19041_v0, %v19040_v29  ;;  %v9345_v62 = vpack.c.bf16 %v19043_v53, %v19042_v44  ;;  %v19045_v32 = vld [vmem:[#allocation517_spill] sm:$0xff]  ;;  %v19071_v15 = vld [vmem:[#allocation523_spill] sm:$0xff]  ;;  %v19072_v29 = vld [vmem:[#allocation554_spill] sm:$0xff] }
 0x69d   :  { %6430 = vmatmul.mubr.f32.vlgmr.msra.gmra.mrb[30].mxu1 %v16787_v35  ;;  %v19022_v35 = vld [vmem:[#allocation462_spill] sm:$0xff]  ;;  %v9377_v36 = vpack.c.bf16 %v19045_v32, %v19044_v20  ;;  %v19073_v0 = vld [vmem:[#allocation555_spill] sm:$0xff]  ;;  %v19074_v44 = vld [vmem:[#allocation540_spill] sm:$0xff] }
 0x69e   :  { %6500 = vmatmul.mubr.f32.vlgmr.msra.gmra.mrb[28].mxu0 %v16790_v31  ;;  %9328 = vmatpush3.bf16.msra.mxu1 %v9327_v3  ;;  %v19023_v31 = vld [vmem:[#allocation463_spill] sm:$0xff]  ;;  %v19047_v3 = vld [vmem:[#allocation469_spill] sm:$0xff]  ;;  %v19076_v20 = vld [vmem:[#allocation572_spill] sm:$0xff] }
 0x69f   :  { %9360 = vmatpush3.bf16.msra.mxu0 %v9359_v37  ;;  %9330 = vmatprep.subr.bf16.mxu1 %v9329_v4  ;;  %v9335_v8 = vpack.c.bf16 %v19023_v31, %v19022_v35  ;;  %v9347_v50 = vpack.c.bf16 %v19047_v3, %v19046_v57  ;;  %v19049_v37 = vld [vmem:[#allocation501_spill] sm:$0xff]  ;;  %v19051_v4 = vld [vmem:[#allocation487_spill] sm:$0xff]  ;;  %v19058_v31 = vld [vmem:[#allocation488_spill] sm:$0xff]  ;;  %v5361_v57 = vcombine.high %v16944_v16, %v16944_v16 }
 0x6a0   :  { %9362 = vmatprep.subr.bf16.mxu0 %v9361_v45  ;;  %6569 = vmatprep.mubr.f32.mxu1 %v5344_v63  ;;  %v9379_v9 = vpack.c.bf16 %v19049_v37, %v19048_v41  ;;  %v9349_v7 = vpack.c.bf16 %v19051_v4, %v19050_v38  ;;  %v19053_v45 = vld [vmem:[#allocation519_spill] sm:$0xff]  ;;  %v19075_v53 = vld [vmem:[#allocation541_spill] sm:$0xff] }
 0x6a1   :  { %6639 = vmatprep.mubr.f32.mxu0 %v5345_v13  ;;  %v9381_v63 = vpack.c.bf16 %v19053_v45, %v19052_v10  ;;  %v19077_v32 = vld [vmem:[#allocation573_spill] sm:$0xff]  ;;  %v19083_v10 = vld [vmem:[#allocation543_spill] sm:$0xff] }
 0x6a2   :  { %9332 = vmatpush3.bf16.msra.mxu1 %v9331_v17  ;;  %v19079_v41 = vld [vmem:[#allocation525_spill] sm:$0xff] }
 0x6a3   :  { %9364 = vmatpush3.bf16.msra.mxu0 %v9363_v33  ;;  %9334 = vmatprep.subr.bf16.mxu1 %v9333_v28  ;;  %v19055_v33 = vld [vmem:[#allocation471_spill] sm:$0xff]  ;;  %v19081_v38 = vld [vmem:[#allocation557_spill] sm:$0xff] }
 0x6a4   :  { %9366 = vmatprep.subr.bf16.mxu0 %v9365_v52  ;;  %v9351_v58 = vpack.c.bf16 %v19055_v33, %v19054_v22  ;;  %v19057_v52 = vld [vmem:[#allocation503_spill] sm:$0xff]  ;;  %v19090_v33 = vld [vmem:[#allocation544_spill] sm:$0xff] }
 0x6a5   :  { %v9383_v35 = vpack.c.bf16 %v19057_v52, %v19056_v23  ;;  %v19094_v52 = vld [vmem:[#allocation528_spill] sm:$0xff] }
 0x6a6   :  { %9336 = vmatpush3.bf16.msra.mxu1 %v9335_v8  ;;  %v19059_v8 = vld [vmem:[#allocation489_spill] sm:$0xff] }
 0x6a7   :  { %9368 = vmatpush3.bf16.msra.mxu0 %v9367_v5  ;;  %9338 = vmatprep.subr.bf16.mxu1 %v9337_v61  ;;  %v9353_v26 = vpack.c.bf16 %v19059_v8, %v19058_v31  ;;  %v19061_v5 = vld [vmem:[#allocation521_spill] sm:$0xff]  ;;  %v5346_v61 = vcombine.high %v4221_v24, %v4221_v24  ;;  %v19096_v8 = vld [vmem:[#allocation560_spill] sm:$0xff] }
 0x6a8   :  { %9370 = vmatprep.subr.bf16.mxu0 %v9369_v25  ;;  %v9385_v51 = vpack.c.bf16 %v19061_v5, %v19060_v54  ;;  %v19063_v25 = vld [vmem:[#allocation473_spill] sm:$0xff]  ;;  %v19098_v5 = vld [vmem:[#allocation546_spill] sm:$0xff] }
 0x6a9   :  { %v9355_v48 = vpack.c.bf16 %v19063_v25, %v19062_v27  ;;  %v19101_v27 = vld [vmem:[#allocation579_spill] sm:$0xff] }
 0x6aa   :  { %9340 = vmatpush3.bf16.msra.mxu1 %v9339_v46  ;;  %v19065_v46 = vld [vmem:[#allocation505_spill] sm:$0xff] }
 0x6ab   :  { %9372 = vmatpush3.bf16.msra.mxu0 %v9371_v40  ;;  %9342 = vmatprep.subr.bf16.mxu1 %v9341_v21  ;;  %v9387_v42 = vpack.c.bf16 %v19065_v46, %v19064_v55  ;;  %v19067_v40 = vld [vmem:[#allocation539_spill] sm:$0xff] }
 0x6ac   :  { %9374 = vmatprep.subr.bf16.mxu0 %v9373_v12  ;;  %v9389_v30 = vpack.c.bf16 %v19067_v40, %v19066_v11  ;;  %v19069_v21 = vld [vmem:[#allocation571_spill] sm:$0xff]  ;;  %v16947_v12 = vrot.slane %v5346_v61, %v16364_v2  ;;  %v19100_v61 = vld [vmem:[#allocation578_spill] sm:$0xff] }
 0x6ad   :  { %v9421_v49 = vpack.c.bf16 %v19069_v21, %v19068_v34  ;;  %v9437_v25 = vpack.c.bf16 %v19101_v27, %v19100_v61  ;;  %v19103_v55 = vld [vmem:[#allocation531_spill] sm:$0xff]  ;;  %v19107_v34 = vld [vmem:[#allocation549_spill] sm:$0xff] }
 0x6ae   :  { %9344 = vmatpush3.bf16.msra.mxu1 %v9343_v47  ;;  %v9391_v47 = vpack.c.bf16 %v19071_v15, %v19070_v14  ;;  %v5362_v3 = vcombine.high %v16947_v12, %v16947_v12  ;;  %v19105_v11 = vld [vmem:[#allocation563_spill] sm:$0xff]  ;;  %v19109_v14 = vld [vmem:[#allocation581_spill] sm:$0xff] }
 0x6af   :  { %9376 = vmatpush3.bf16.msra.mxu0 %v9375_v18  ;;  %9346 = vmatprep.subr.bf16.mxu1 %v9345_v62  ;;  %v9423_v18 = vpack.c.bf16 %v19073_v0, %v19072_v29  ;;  %v9393_v62 = vpack.c.bf16 %v19075_v53, %v19074_v44  ;;  %v19111_v29 = vld [vmem:[#allocation533_spill] sm:$0xff] }
 0x6b0   :  { %9378 = vmatprep.subr.bf16.mxu0 %v9377_v36  ;;  %v7712_v13 = vpop.f32.mrb[18].mxu1  ;;  %v9425_v36 = vpack.c.bf16 %v19077_v32, %v19076_v20  ;;  %v19113_v44 = vld [vmem:[#allocation565_spill] sm:$0xff]  ;;  %v19115_v20 = vld [vmem:[#allocation551_spill] sm:$0xff] }
 0x6b1   :  { %v7747_v43 = vpop.f32.mrb[16].mxu0  ;;  %v7713_v17 = vpop.f32.mrb[19].mxu1 }
 0x6b2   :  { %v7748_v59 = vpop.f32.mrb[17].mxu0  ;;  %v7714_v28 = vadd.f32 %v7713_v17, %v7712_v13  ;;  %9348 = vmatpush3.bf16.msra.mxu1 %v9347_v50  ;;  %v19078_v50 = vld [vmem:[#allocation524_spill] sm:$0xff]  ;;  %v19085_v13 = vld [vmem:[#allocation575_spill] sm:$0xff]  ;;  %v19088_v17 = vld [vmem:[#allocation558_spill] sm:$0xff] }
 0x6b3   :  { %v7749_v56 = vadd.f32 %v7748_v59, %v7747_v43  ;;  %9380 = vmatpush3.bf16.msra.mxu0 %v9379_v9  ;;  %9350 = vmatprep.subr.bf16.mxu1 %v9349_v7  ;;  %v9395_v37 = vpack.c.bf16 %v19079_v41, %v19078_v50  ;;  %v19080_v9 = vld [vmem:[#allocation556_spill] sm:$0xff]  ;;  %v19082_v7 = vld [vmem:[#allocation542_spill] sm:$0xff]  ;;  %v19089_v59 = vld [vmem:[#allocation559_spill] sm:$0xff] }
 0x6b4   :  { %9382 = vmatprep.subr.bf16.mxu0 %v9381_v63  ;;  %v5592_v39 = vadd.f32 %v7714_v28, %v7672_v1  ;;  %v9427_v4 = vpack.c.bf16 %v19081_v38, %v19080_v9  ;;  %v9397_v45 = vpack.c.bf16 %v19083_v10, %v19082_v7  ;;  %v19084_v63 = vld [vmem:[#allocation574_spill] sm:$0xff]  ;;  %v9431_v22 = vpack.c.bf16 %v19089_v59, %v19088_v17  ;;  %v19092_v28 = vld [vmem:[#allocation576_spill] sm:$0xff] }
 0x6b5   :  { %v9429_v43 = vpack.c.bf16 %v19085_v13, %v19084_v63  ;;  %v19118_v38 = vld [vmem:[#allocation534_spill] sm:$0xff]  ;;  %v4222_v10 = vld [vmem:[#allocation4 + $0x48] sm:$0xff] }
 0x6b6   :  { %v16933_v6 = vadd.f32 %v7749_v56, %v5592_v39  ;;  %9352 = vmatpush3.bf16.msra.mxu1 %v9351_v58  ;;  %v19091_v58 = vld [vmem:[#allocation545_spill] sm:$0xff]  ;;  %v19120_v13 = vld [vmem:[#allocation566_spill] sm:$0xff]  ;;  %v19124_v59 = vld [vmem:[#allocation584_spill] sm:$0xff] }
 0x6b7   :  { %9384 = vmatpush3.bf16.msra.mxu0 %v9383_v35  ;;  %9354 = vmatprep.subr.bf16.mxu1 %v9353_v26  ;;  %v9401_v24 = vpack.c.bf16 %v19091_v58, %v19090_v33  ;;  %v19093_v56 = vld [vmem:[#allocation577_spill] sm:$0xff] }
 0x6b8   :  { %9386 = vmatprep.subr.bf16.mxu0 %v9385_v51  ;;  %v9433_v23 = vpack.c.bf16 %v19093_v56, %v19092_v28  ;;  %v19095_v35 = vld [vmem:[#allocation529_spill] sm:$0xff]  ;;  %v19099_v51 = vld [vmem:[#allocation547_spill] sm:$0xff]  ;;  %v19126_v56 = vld [vmem:[#allocation536_spill] sm:$0xff] }
 0x6b9   :  { %v9403_v31 = vpack.c.bf16 %v19095_v35, %v19094_v52  ;;  %v19097_v26 = vld [vmem:[#allocation561_spill] sm:$0xff]  ;;  %v9405_v39 = vpack.c.bf16 %v19099_v51, %v19098_v5  ;;  %v19128_v35 = vld [vmem:[#allocation568_spill] sm:$0xff]  ;;  %v19132_v51 = vld [vmem:[#allocation634_spill] sm:$0xff] }
 0x6ba   :  { %9356 = vmatpush3.bf16.msra.mxu1 %v9355_v48  ;;  %v9435_v54 = vpack.c.bf16 %v19097_v26, %v19096_v8  ;;  %v19102_v48 = vld [vmem:[#allocation530_spill] sm:$0xff] }
 0x6bb   :  { %9388 = vmatpush3.bf16.msra.mxu0 %v9387_v42  ;;  %9390 = vmatprep.subr.bf16.mxu1 %v9389_v30  ;;  %v9407_v46 = vpack.c.bf16 %v19103_v55, %v19102_v48  ;;  %v19104_v42 = vld [vmem:[#allocation562_spill] sm:$0xff]  ;;  %v19106_v30 = vld [vmem:[#allocation548_spill] sm:$0xff]  ;;  %v19135_v48 = vld [vmem:[#allocation587_spill] sm:$0xff] }
 0x6bc   :  { %9422 = vmatprep.subr.bf16.mxu0 %v9421_v49  ;;  %v9439_v40 = vpack.c.bf16 %v19105_v11, %v19104_v42  ;;  %v9409_v21 = vpack.c.bf16 %v19107_v34, %v19106_v30  ;;  %v19108_v49 = vld [vmem:[#allocation580_spill] sm:$0xff]  ;;  %v19130_v26 = vld [vmem:[#allocation602_spill] sm:$0xff]  ;;  %v19137_v42 = vld [vmem:[#allocation619_spill] sm:$0xff] }
 0x6bd   :  { %6570 = vmatmul.mubr.f32.vlgmr.msra.gmra.mrb[32].mxu1 %v16863_v19  ;;  %v19086_v19 = vld [vmem:[#allocation526_spill] sm:$0xff]  ;;  %v9441_v15 = vpack.c.bf16 %v19109_v14, %v19108_v49  ;;  %v19139_v30 = vld [vmem:[#allocation605_spill] sm:$0xff] }
 0x6be   :  { %6640 = vmatmul.mubr.f32.vlgmr.msra.gmra.mrb[30].mxu0 %v16866_v60  ;;  %9392 = vmatpush3.bf16.msra.mxu1 %v9391_v47  ;;  %v19087_v60 = vld [vmem:[#allocation527_spill] sm:$0xff]  ;;  %v19110_v47 = vld [vmem:[#allocation532_spill] sm:$0xff]  ;;  %v19141_v49 = vld [vmem:[#allocation637_spill] sm:$0xff] }
 0x6bf   :  { %9424 = vmatpush3.bf16.msra.mxu0 %v9423_v18  ;;  %9394 = vmatprep.subr.bf16.mxu1 %v9393_v62  ;;  %v9399_v1 = vpack.c.bf16 %v19087_v60, %v19086_v19  ;;  %v9411_v0 = vpack.c.bf16 %v19111_v29, %v19110_v47  ;;  %v19112_v18 = vld [vmem:[#allocation564_spill] sm:$0xff]  ;;  %v19114_v62 = vld [vmem:[#allocation550_spill] sm:$0xff] }
 0x6c0   :  { %9426 = vmatprep.subr.bf16.mxu0 %v9425_v36  ;;  %6709 = vmatprep.mubr.f32.mxu1 %v5361_v57  ;;  %v9443_v53 = vpack.c.bf16 %v19113_v44, %v19112_v18  ;;  %v9413_v32 = vpack.c.bf16 %v19115_v20, %v19114_v62  ;;  %v19116_v36 = vld [vmem:[#allocation582_spill] sm:$0xff]  ;;  %v19117_v57 = vld [vmem:[#allocation583_spill] sm:$0xff]  ;;  %v19122_v60 = vld [vmem:[#allocation552_spill] sm:$0xff] }
 0x6c1   :  { %6779 = vmatprep.mubr.f32.mxu0 %v5362_v3  ;;  %v9445_v3 = vpack.c.bf16 %v19117_v57, %v19116_v36  ;;  %v19142_v29 = vld [vmem:[#allocation588_spill] sm:$0xff]  ;;  %v19146_v20 = vld [vmem:[#allocation606_spill] sm:$0xff] }
 0x6c2   :  { %9396 = vmatpush3.bf16.msra.mxu1 %v9395_v37  ;;  %v19144_v44 = vld [vmem:[#allocation620_spill] sm:$0xff]  ;;  %v19148_v57 = vld [vmem:[#allocation638_spill] sm:$0xff] }
 0x6c3   :  { %9428 = vmatpush3.bf16.msra.mxu0 %v9427_v4  ;;  %9398 = vmatprep.subr.bf16.mxu1 %v9397_v45  ;;  %v19119_v4 = vld [vmem:[#allocation535_spill] sm:$0xff] }
 0x6c4   :  { %9430 = vmatprep.subr.bf16.mxu0 %v9429_v43  ;;  %v9415_v7 = vpack.c.bf16 %v19119_v4, %v19118_v38  ;;  %v19121_v43 = vld [vmem:[#allocation567_spill] sm:$0xff]  ;;  %v19154_v4 = vld [vmem:[#allocation608_spill] sm:$0xff] }
 0x6c5   :  { %v9447_v19 = vpack.c.bf16 %v19121_v43, %v19120_v13  ;;  %v19158_v43 = vld [vmem:[#allocation592_spill] sm:$0xff] }
 0x6c6   :  { %9400 = vmatpush3.bf16.msra.mxu1 %v9399_v1  ;;  %v19123_v1 = vld [vmem:[#allocation553_spill] sm:$0xff] }
 0x6c7   :  { %9432 = vmatpush3.bf16.msra.mxu0 %v9431_v22  ;;  %9402 = vmatprep.subr.bf16.mxu1 %v9401_v24  ;;  %v9417_v17 = vpack.c.bf16 %v19123_v1, %v19122_v60  ;;  %v19125_v22 = vld [vmem:[#allocation585_spill] sm:$0xff]  ;;  %v5363_v24 = vcombine.high %v4222_v10, %v4222_v10  ;;  %v19160_v1 = vld [vmem:[#allocation624_spill] sm:$0xff] }
 0x6c8   :  { %9434 = vmatprep.subr.bf16.mxu0 %v9433_v23  ;;  %v9449_v33 = vpack.c.bf16 %v19125_v22, %v19124_v59  ;;  %v19127_v23 = vld [vmem:[#allocation537_spill] sm:$0xff]  ;;  %v19162_v22 = vld [vmem:[#allocation610_spill] sm:$0xff] }
 0x6c9   :  { %v9419_v52 = vpack.c.bf16 %v19127_v23, %v19126_v56  ;;  %v17026_v27 = vrot.slane %v5363_v24, %v16364_v2  ;;  %v19164_v24 = vld [vmem:[#allocation642_spill] sm:$0xff]  ;;  %v19165_v56 = vld [vmem:[#allocation643_spill] sm:$0xff] }
 0x6ca   :  { %9404 = vmatpush3.bf16.msra.mxu1 %v9403_v31  ;;  %v19129_v31 = vld [vmem:[#allocation569_spill] sm:$0xff]  ;;  %v9501_v23 = vpack.c.bf16 %v19165_v56, %v19164_v24 }
 0x6cb   :  { %9436 = vmatpush3.bf16.msra.mxu0 %v9435_v54  ;;  %9406 = vmatprep.subr.bf16.mxu1 %v9405_v39  ;;  %v9451_v8 = vpack.c.bf16 %v19129_v31, %v19128_v35  ;;  %v19131_v54 = vld [vmem:[#allocation603_spill] sm:$0xff]  ;;  %v5379_v47 = vcombine.high %v17026_v27, %v17026_v27 }
 0x6cc   :  { %9438 = vmatprep.subr.bf16.mxu0 %v9437_v25  ;;  %v9453_v5 = vpack.c.bf16 %v19131_v54, %v19130_v26  ;;  %v19133_v39 = vld [vmem:[#allocation635_spill] sm:$0xff]  ;;  %v19134_v25 = vld [vmem:[#allocation586_spill] sm:$0xff] }
 0x6cd   :  { %v9485_v61 = vpack.c.bf16 %v19133_v39, %v19132_v51  ;;  %v9455_v55 = vpack.c.bf16 %v19135_v48, %v19134_v25  ;;  %v19167_v35 = vld [vmem:[#allocation595_spill] sm:$0xff]  ;;  %v19171_v51 = vld [vmem:[#allocation613_spill] sm:$0xff] }
 0x6ce   :  { %9408 = vmatpush3.bf16.msra.mxu1 %v9407_v46  ;;  %v19136_v46 = vld [vmem:[#allocation618_spill] sm:$0xff]  ;;  %v19169_v26 = vld [vmem:[#allocation627_spill] sm:$0xff]  ;;  %v19173_v25 = vld [vmem:[#allocation645_spill] sm:$0xff] }
 0x6cf   :  { %9440 = vmatpush3.bf16.msra.mxu0 %v9439_v40  ;;  %9410 = vmatprep.subr.bf16.mxu1 %v9409_v21  ;;  %v9487_v11 = vpack.c.bf16 %v19137_v42, %v19136_v46  ;;  %v19138_v40 = vld [vmem:[#allocation604_spill] sm:$0xff]  ;;  %v19175_v46 = vld [vmem:[#allocation597_spill] sm:$0xff] }
 0x6d0   :  { %9442 = vmatprep.subr.bf16.mxu0 %v9441_v15  ;;  %v7782_v50 = vpop.f32.mrb[20].mxu1  ;;  %v9457_v34 = vpack.c.bf16 %v19139_v30, %v19138_v40  ;;  %v19140_v21 = vld [vmem:[#allocation636_spill] sm:$0xff]  ;;  %v19177_v40 = vld [vmem:[#allocation629_spill] sm:$0xff] }
 0x6d1   :  { %v7817_v41 = vpop.f32.mrb[18].mxu0  ;;  %v7783_v37 = vpop.f32.mrb[21].mxu1  ;;  %v9489_v14 = vpack.c.bf16 %v19141_v49, %v19140_v21  ;;  %v19179_v21 = vld [vmem:[#allocation615_spill] sm:$0xff] }
 0x6d2   :  { %v7818_v9 = vpop.f32.mrb[19].mxu0  ;;  %v7784_v45 = vadd.f32 %v7783_v37, %v7782_v50  ;;  %9412 = vmatpush3.bf16.msra.mxu1 %v9411_v0  ;;  %v19143_v0 = vld [vmem:[#allocation589_spill] sm:$0xff]  ;;  %v19152_v37 = vld [vmem:[#allocation622_spill] sm:$0xff] }
 0x6d3   :  { %v7819_v63 = vadd.f32 %v7818_v9, %v7817_v41  ;;  %9444 = vmatpush3.bf16.msra.mxu0 %v9443_v53  ;;  %9414 = vmatprep.subr.bf16.mxu1 %v9413_v32  ;;  %v9459_v18 = vpack.c.bf16 %v19143_v0, %v19142_v29  ;;  %v19145_v53 = vld [vmem:[#allocation621_spill] sm:$0xff]  ;;  %v19147_v32 = vld [vmem:[#allocation607_spill] sm:$0xff] }
 0x6d4   :  { %9446 = vmatprep.subr.bf16.mxu0 %v9445_v3  ;;  %v5732_v58 = vadd.f32 %v7784_v45, %v16933_v6  ;;  %v17023_v6 = vrot.slane %v4222_v10, %v16364_v2  ;;  %v9491_v62 = vpack.c.bf16 %v19145_v53, %v19144_v44  ;;  %v9461_v36 = vpack.c.bf16 %v19147_v32, %v19146_v20  ;;  %v19149_v3 = vld [vmem:[#allocation639_spill] sm:$0xff]  ;;  %v19156_v45 = vld [vmem:[#allocation640_spill] sm:$0xff]  ;;  %v19182_v53 = vld [vmem:[#allocation598_spill] sm:$0xff] }
 0x6d5   :  { %v9493_v50 = vpack.c.bf16 %v19149_v3, %v19148_v57  ;;  %v19153_v9 = vld [vmem:[#allocation623_spill] sm:$0xff]  ;;  %v4223_v32 = vld [vmem:[#allocation4 + $0x50] sm:$0xff]  ;;  %v19184_v3 = vld [vmem:[#allocation630_spill] sm:$0xff] }
 0x6d6   :  { %v17012_v28 = vadd.f32 %v7819_v63, %v5732_v58  ;;  %9416 = vmatpush3.bf16.msra.mxu1 %v9415_v7  ;;  %v5378_v15 = vcombine.high %v17023_v6, %v17023_v6  ;;  %v9495_v38 = vpack.c.bf16 %v19153_v9, %v19152_v37  ;;  %v19155_v7 = vld [vmem:[#allocation609_spill] sm:$0xff]  ;;  %v19188_v9 = vld [vmem:[#allocation648_spill] sm:$0xff] }
 0x6d7   :  { %9448 = vmatpush3.bf16.msra.mxu0 %v9447_v19  ;;  %9418 = vmatprep.subr.bf16.mxu1 %v9417_v17  ;;  %v9465_v10 = vpack.c.bf16 %v19155_v7, %v19154_v4  ;;  %v19157_v63 = vld [vmem:[#allocation641_spill] sm:$0xff] }
 0x6d8   :  { %9450 = vmatprep.subr.bf16.mxu0 %v9449_v33  ;;  %v9497_v13 = vpack.c.bf16 %v19157_v63, %v19156_v45  ;;  %v19159_v19 = vld [vmem:[#allocation593_spill] sm:$0xff]  ;;  %v19163_v33 = vld [vmem:[#allocation611_spill] sm:$0xff]  ;;  %v19190_v63 = vld [vmem:[#allocation600_spill] sm:$0xff] }
 0x6d9   :  { %v9467_v60 = vpack.c.bf16 %v19159_v19, %v19158_v43  ;;  %v19161_v17 = vld [vmem:[#allocation625_spill] sm:$0xff]  ;;  %v9469_v58 = vpack.c.bf16 %v19163_v33, %v19162_v22  ;;  %v19192_v19 = vld [vmem:[#allocation632_spill] sm:$0xff]  ;;  %v19196_v33 = vld [vmem:[#allocation698_spill] sm:$0xff] }
 0x6da   :  { %9420 = vmatpush3.bf16.msra.mxu1 %v9419_v52  ;;  %v9499_v59 = vpack.c.bf16 %v19161_v17, %v19160_v1  ;;  %v19166_v52 = vld [vmem:[#allocation594_spill] sm:$0xff] }
 0x6db   :  { %9452 = vmatpush3.bf16.msra.mxu0 %v9451_v8  ;;  %9454 = vmatprep.subr.bf16.mxu1 %v9453_v5  ;;  %v9471_v31 = vpack.c.bf16 %v19167_v35, %v19166_v52  ;;  %v19168_v8 = vld [vmem:[#allocation626_spill] sm:$0xff]  ;;  %v19170_v5 = vld [vmem:[#allocation612_spill] sm:$0xff]  ;;  %v19199_v52 = vld [vmem:[#allocation651_spill] sm:$0xff] }
 0x6dc   :  { %9486 = vmatprep.subr.bf16.mxu0 %v9485_v61  ;;  %v9503_v54 = vpack.c.bf16 %v19169_v26, %v19168_v8  ;;  %v9473_v39 = vpack.c.bf16 %v19171_v51, %v19170_v5  ;;  %v19172_v61 = vld [vmem:[#allocation644_spill] sm:$0xff]  ;;  %v19194_v17 = vld [vmem:[#allocation666_spill] sm:$0xff]  ;;  %v19201_v8 = vld [vmem:[#allocation683_spill] sm:$0xff] }
 0x6dd   :  { %6710 = vmatmul.mubr.f32.vlgmr.msra.gmra.mrb[34].mxu1 %v16944_v16  ;;  %v19150_v16 = vld [vmem:[#allocation590_spill] sm:$0xff]  ;;  %v9505_v48 = vpack.c.bf16 %v19173_v25, %v19172_v61  ;;  %v19203_v5 = vld [vmem:[#allocation669_spill] sm:$0xff] }
 0x6de   :  { %6780 = vmatmul.mubr.f32.vlgmr.msra.gmra.mrb[32].mxu0 %v16947_v12  ;;  %9456 = vmatpush3.bf16.msra.mxu1 %v9455_v55  ;;  %v19151_v12 = vld [vmem:[#allocation591_spill] sm:$0xff]  ;;  %v19174_v55 = vld [vmem:[#allocation596_spill] sm:$0xff]  ;;  %v19205_v61 = vld [vmem:[#allocation701_spill] sm:$0xff] }
 0x6df   :  { %9488 = vmatpush3.bf16.msra.mxu0 %v9487_v11  ;;  %9458 = vmatprep.subr.bf16.mxu1 %v9457_v34  ;;  %v9463_v41 = vpack.c.bf16 %v19151_v12, %v19150_v16  ;;  %v9475_v42 = vpack.c.bf16 %v19175_v46, %v19174_v55  ;;  %v19176_v11 = vld [vmem:[#allocation628_spill] sm:$0xff]  ;;  %v19178_v34 = vld [vmem:[#allocation614_spill] sm:$0xff] }
 0x6e0   :  { %9490 = vmatprep.subr.bf16.mxu0 %v9489_v14  ;;  %6849 = vmatprep.mubr.f32.mxu1 %v5378_v15  ;;  %v9507_v30 = vpack.c.bf16 %v19177_v40, %v19176_v11  ;;  %v9477_v49 = vpack.c.bf16 %v19179_v21, %v19178_v34  ;;  %v19180_v14 = vld [vmem:[#allocation646_spill] sm:$0xff]  ;;  %v19181_v15 = vld [vmem:[#allocation647_spill] sm:$0xff]  ;;  %v19186_v12 = vld [vmem:[#allocation616_spill] sm:$0xff] }
 0x6e1   :  { %6919 = vmatprep.mubr.f32.mxu0 %v5379_v47  ;;  %v9509_v47 = vpack.c.bf16 %v19181_v15, %v19180_v14  ;;  %v19206_v46 = vld [vmem:[#allocation652_spill] sm:$0xff]  ;;  %v19210_v21 = vld [vmem:[#allocation670_spill] sm:$0xff] }
 0x6e2   :  { %9460 = vmatpush3.bf16.msra.mxu1 %v9459_v18  ;;  %v19208_v40 = vld [vmem:[#allocation684_spill] sm:$0xff]  ;;  %v19212_v15 = vld [vmem:[#allocation702_spill] sm:$0xff] }
 0x6e3   :  { %9492 = vmatpush3.bf16.msra.mxu0 %v9491_v62  ;;  %9462 = vmatprep.subr.bf16.mxu1 %v9461_v36  ;;  %v19183_v62 = vld [vmem:[#allocation599_spill] sm:$0xff] }
 0x6e4   :  { %9494 = vmatprep.subr.bf16.mxu0 %v9493_v50  ;;  %v9479_v20 = vpack.c.bf16 %v19183_v62, %v19182_v53  ;;  %v19185_v50 = vld [vmem:[#allocation631_spill] sm:$0xff]  ;;  %v19218_v62 = vld [vmem:[#allocation672_spill] sm:$0xff] }
 0x6e5   :  { %v9511_v16 = vpack.c.bf16 %v19185_v50, %v19184_v3  ;;  %v19222_v50 = vld [vmem:[#allocation656_spill] sm:$0xff] }
 0x6e6   :  { %9464 = vmatpush3.bf16.msra.mxu1 %v9463_v41  ;;  %v19187_v41 = vld [vmem:[#allocation617_spill] sm:$0xff] }
 0x6e7   :  { %9496 = vmatpush3.bf16.msra.mxu0 %v9495_v38  ;;  %9466 = vmatprep.subr.bf16.mxu1 %v9465_v10  ;;  %v9481_v37 = vpack.c.bf16 %v19187_v41, %v19186_v12  ;;  %v19189_v38 = vld [vmem:[#allocation649_spill] sm:$0xff]  ;;  %v5380_v10 = vcombine.high %v4223_v32, %v4223_v32  ;;  %v19224_v41 = vld [vmem:[#allocation688_spill] sm:$0xff] }
 0x6e8   :  { %9498 = vmatprep.subr.bf16.mxu0 %v9497_v13  ;;  %v9513_v4 = vpack.c.bf16 %v19189_v38, %v19188_v9  ;;  %v19191_v13 = vld [vmem:[#allocation601_spill] sm:$0xff]  ;;  %v19226_v38 = vld [vmem:[#allocation674_spill] sm:$0xff] }
 0x6e9   :  { %v9483_v43 = vpack.c.bf16 %v19191_v13, %v19190_v63  ;;  %v17105_v56 = vrot.slane %v5380_v10, %v16364_v2  ;;  %v19228_v10 = vld [vmem:[#allocation706_spill] sm:$0xff]  ;;  %v19229_v63 = vld [vmem:[#allocation707_spill] sm:$0xff] }
 0x6ea   :  { %9468 = vmatpush3.bf16.msra.mxu1 %v9467_v60  ;;  %v19193_v60 = vld [vmem:[#allocation633_spill] sm:$0xff]  ;;  %v9565_v13 = vpack.c.bf16 %v19229_v63, %v19228_v10 }
 0x6eb   :  { %9500 = vmatpush3.bf16.msra.mxu0 %v9499_v59  ;;  %9470 = vmatprep.subr.bf16.mxu1 %v9469_v58  ;;  %v9515_v1 = vpack.c.bf16 %v19193_v60, %v19192_v19  ;;  %v19195_v59 = vld [vmem:[#allocation667_spill] sm:$0xff]  ;;  %v5396_v55 = vcombine.high %v17105_v56, %v17105_v56 }
 0x6ec   :  { %9502 = vmatprep.subr.bf16.mxu0 %v9501_v23  ;;  %v9517_v22 = vpack.c.bf16 %v19195_v59, %v19194_v17  ;;  %v19197_v58 = vld [vmem:[#allocation699_spill] sm:$0xff]  ;;  %v19198_v23 = vld [vmem:[#allocation650_spill] sm:$0xff] }
 0x6ed   :  { %v9549_v24 = vpack.c.bf16 %v19197_v58, %v19196_v33  ;;  %v9519_v35 = vpack.c.bf16 %v19199_v52, %v19198_v23  ;;  %v19231_v19 = vld [vmem:[#allocation659_spill] sm:$0xff]  ;;  %v19235_v33 = vld [vmem:[#allocation677_spill] sm:$0xff] }
 0x6ee   :  { %9472 = vmatpush3.bf16.msra.mxu1 %v9471_v31  ;;  %v19200_v31 = vld [vmem:[#allocation682_spill] sm:$0xff]  ;;  %v19233_v17 = vld [vmem:[#allocation691_spill] sm:$0xff]  ;;  %v19237_v23 = vld [vmem:[#allocation709_spill] sm:$0xff] }
 0x6ef   :  { %9504 = vmatpush3.bf16.msra.mxu0 %v9503_v54  ;;  %9474 = vmatprep.subr.bf16.mxu1 %v9473_v39  ;;  %v9551_v26 = vpack.c.bf16 %v19201_v8, %v19200_v31  ;;  %v19202_v54 = vld [vmem:[#allocation668_spill] sm:$0xff]  ;;  %v19239_v31 = vld [vmem:[#allocation661_spill] sm:$0xff] }
 0x6f0   :  { %9506 = vmatprep.subr.bf16.mxu0 %v9505_v48  ;;  %v7852_v29 = vpop.f32.mrb[22].mxu1  ;;  %v9521_v51 = vpack.c.bf16 %v19203_v5, %v19202_v54  ;;  %v19204_v39 = vld [vmem:[#allocation700_spill] sm:$0xff]  ;;  %v19241_v54 = vld [vmem:[#allocation693_spill] sm:$0xff] }
 0x6f1   :  { %v7887_v0 = vpop.f32.mrb[20].mxu0  ;;  %v7853_v18 = vpop.f32.mrb[23].mxu1  ;;  %v9553_v25 = vpack.c.bf16 %v19205_v61, %v19204_v39  ;;  %v19243_v39 = vld [vmem:[#allocation679_spill] sm:$0xff] }
 0x6f2   :  { %v7888_v44 = vpop.f32.mrb[21].mxu0  ;;  %v7854_v36 = vadd.f32 %v7853_v18, %v7852_v29  ;;  %9476 = vmatpush3.bf16.msra.mxu1 %v9475_v42  ;;  %v19207_v42 = vld [vmem:[#allocation653_spill] sm:$0xff]  ;;  %v19216_v18 = vld [vmem:[#allocation686_spill] sm:$0xff] }
 0x6f3   :  { %v7889_v57 = vadd.f32 %v7888_v44, %v7887_v0  ;;  %9508 = vmatpush3.bf16.msra.mxu0 %v9507_v30  ;;  %9478 = vmatprep.subr.bf16.mxu1 %v9477_v49  ;;  %v9523_v11 = vpack.c.bf16 %v19207_v42, %v19206_v46  ;;  %v19209_v30 = vld [vmem:[#allocation685_spill] sm:$0xff]  ;;  %v19211_v49 = vld [vmem:[#allocation671_spill] sm:$0xff] }
 0x6f4   :  { %9510 = vmatprep.subr.bf16.mxu0 %v9509_v47  ;;  %v5872_v7 = vadd.f32 %v7854_v36, %v17012_v28  ;;  %v17102_v28 = vrot.slane %v4223_v32, %v16364_v2  ;;  %v9555_v34 = vpack.c.bf16 %v19209_v30, %v19208_v40  ;;  %v9525_v14 = vpack.c.bf16 %v19211_v49, %v19210_v21  ;;  %v19213_v47 = vld [vmem:[#allocation703_spill] sm:$0xff]  ;;  %v19220_v36 = vld [vmem:[#allocation704_spill] sm:$0xff]  ;;  %v19246_v30 = vld [vmem:[#allocation662_spill] sm:$0xff] }
 0x6f5   :  { %v9557_v29 = vpack.c.bf16 %v19213_v47, %v19212_v15  ;;  %v19217_v44 = vld [vmem:[#allocation687_spill] sm:$0xff]  ;;  %v4224_v49 = vld [vmem:[#allocation4 + $0x58] sm:$0xff] }
 0x6f6   :  { %v17091_v45 = vadd.f32 %v7889_v57, %v5872_v7  ;;  %9480 = vmatpush3.bf16.msra.mxu1 %v9479_v20  ;;  %v5395_v48 = vcombine.high %v17102_v28, %v17102_v28  ;;  %v9559_v53 = vpack.c.bf16 %v19217_v44, %v19216_v18  ;;  %v19219_v20 = vld [vmem:[#allocation673_spill] sm:$0xff]  ;;  %v19248_v47 = vld [vmem:[#allocation694_spill] sm:$0xff]  ;;  %v19252_v44 = vld [vmem:[#allocation712_spill] sm:$0xff] }
 0x6f7   :  { %9512 = vmatpush3.bf16.msra.mxu0 %v9511_v16  ;;  %9482 = vmatprep.subr.bf16.mxu1 %v9481_v37  ;;  %v9529_v32 = vpack.c.bf16 %v19219_v20, %v19218_v62  ;;  %v19221_v57 = vld [vmem:[#allocation705_spill] sm:$0xff] }
 0x6f8   :  { %9514 = vmatprep.subr.bf16.mxu0 %v9513_v4  ;;  %v9561_v3 = vpack.c.bf16 %v19221_v57, %v19220_v36  ;;  %v19223_v16 = vld [vmem:[#allocation657_spill] sm:$0xff]  ;;  %v19227_v4 = vld [vmem:[#allocation675_spill] sm:$0xff]  ;;  %v19254_v57 = vld [vmem:[#allocation664_spill] sm:$0xff] }
 0x6f9   :  { %v9531_v12 = vpack.c.bf16 %v19223_v16, %v19222_v50  ;;  %v19225_v37 = vld [vmem:[#allocation689_spill] sm:$0xff]  ;;  %v9533_v7 = vpack.c.bf16 %v19227_v4, %v19226_v38  ;;  %v19256_v16 = vld [vmem:[#allocation696_spill] sm:$0xff]  ;;  %v19260_v4 = vld [vmem:[#allocation762_spill] sm:$0xff] }
 0x6fa   :  { %9484 = vmatpush3.bf16.msra.mxu1 %v9483_v43  ;;  %v9563_v9 = vpack.c.bf16 %v19225_v37, %v19224_v41  ;;  %v19230_v43 = vld [vmem:[#allocation658_spill] sm:$0xff] }
 0x6fb   :  { %9516 = vmatpush3.bf16.msra.mxu0 %v9515_v1  ;;  %9518 = vmatprep.subr.bf16.mxu1 %v9517_v22  ;;  %v9535_v60 = vpack.c.bf16 %v19231_v19, %v19230_v43  ;;  %v19232_v1 = vld [vmem:[#allocation690_spill] sm:$0xff]  ;;  %v19234_v22 = vld [vmem:[#allocation676_spill] sm:$0xff]  ;;  %v19263_v43 = vld [vmem:[#allocation715_spill] sm:$0xff] }
 0x6fc   :  { %9550 = vmatprep.subr.bf16.mxu0 %v9549_v24  ;;  %v9567_v59 = vpack.c.bf16 %v19233_v17, %v19232_v1  ;;  %v9537_v58 = vpack.c.bf16 %v19235_v33, %v19234_v22  ;;  %v19236_v24 = vld [vmem:[#allocation708_spill] sm:$0xff]  ;;  %v19258_v37 = vld [vmem:[#allocation730_spill] sm:$0xff]  ;;  %v19265_v1 = vld [vmem:[#allocation747_spill] sm:$0xff] }
 0x6fd   :  { %6850 = vmatmul.mubr.f32.vlgmr.msra.gmra.mrb[36].mxu1 %v17023_v6  ;;  %v19214_v6 = vld [vmem:[#allocation654_spill] sm:$0xff]  ;;  %v9569_v52 = vpack.c.bf16 %v19237_v23, %v19236_v24  ;;  %v19267_v22 = vld [vmem:[#allocation733_spill] sm:$0xff] }
 0x6fe   :  { %6920 = vmatmul.mubr.f32.vlgmr.msra.gmra.mrb[34].mxu0 %v17026_v27  ;;  %9520 = vmatpush3.bf16.msra.mxu1 %v9519_v35  ;;  %v19215_v27 = vld [vmem:[#allocation655_spill] sm:$0xff]  ;;  %v19238_v35 = vld [vmem:[#allocation660_spill] sm:$0xff]  ;;  %v19269_v24 = vld [vmem:[#allocation765_spill] sm:$0xff] }
 0x6ff   :  { %9552 = vmatpush3.bf16.msra.mxu0 %v9551_v26  ;;  %9522 = vmatprep.subr.bf16.mxu1 %v9521_v51  ;;  %v9527_v0 = vpack.c.bf16 %v19215_v27, %v19214_v6  ;;  %v9539_v8 = vpack.c.bf16 %v19239_v31, %v19238_v35  ;;  %v19240_v26 = vld [vmem:[#allocation692_spill] sm:$0xff]  ;;  %v19242_v51 = vld [vmem:[#allocation678_spill] sm:$0xff] }
 0x700   :  { %9554 = vmatprep.subr.bf16.mxu0 %v9553_v25  ;;  %6989 = vmatprep.mubr.f32.mxu1 %v5395_v48  ;;  %v9571_v5 = vpack.c.bf16 %v19241_v54, %v19240_v26  ;;  %v9541_v61 = vpack.c.bf16 %v19243_v39, %v19242_v51  ;;  %v19244_v25 = vld [vmem:[#allocation710_spill] sm:$0xff]  ;;  %v19245_v48 = vld [vmem:[#allocation711_spill] sm:$0xff]  ;;  %v19250_v27 = vld [vmem:[#allocation680_spill] sm:$0xff] }
 0x701   :  { %7059 = vmatprep.mubr.f32.mxu0 %v5396_v55  ;;  %v9573_v55 = vpack.c.bf16 %v19245_v48, %v19244_v25  ;;  %v19270_v31 = vld [vmem:[#allocation716_spill] sm:$0xff]  ;;  %v19274_v39 = vld [vmem:[#allocation734_spill] sm:$0xff] }
 0x702   :  { %9524 = vmatpush3.bf16.msra.mxu1 %v9523_v11  ;;  %v19272_v54 = vld [vmem:[#allocation748_spill] sm:$0xff]  ;;  %v19276_v48 = vld [vmem:[#allocation766_spill] sm:$0xff] }
 0x703   :  { %9556 = vmatpush3.bf16.msra.mxu0 %v9555_v34  ;;  %9526 = vmatprep.subr.bf16.mxu1 %v9525_v14  ;;  %v19247_v34 = vld [vmem:[#allocation663_spill] sm:$0xff] }
 0x704   :  { %9558 = vmatprep.subr.bf16.mxu0 %v9557_v29  ;;  %v9543_v21 = vpack.c.bf16 %v19247_v34, %v19246_v30  ;;  %v19249_v29 = vld [vmem:[#allocation695_spill] sm:$0xff]  ;;  %v19282_v34 = vld [vmem:[#allocation736_spill] sm:$0xff] }
 0x705   :  { %v9575_v6 = vpack.c.bf16 %v19249_v29, %v19248_v47  ;;  %v19286_v29 = vld [vmem:[#allocation720_spill] sm:$0xff] }
 0x706   :  { %9528 = vmatpush3.bf16.msra.mxu1 %v9527_v0  ;;  %v19251_v0 = vld [vmem:[#allocation681_spill] sm:$0xff] }
 0x707   :  { %9560 = vmatpush3.bf16.msra.mxu0 %v9559_v53  ;;  %9530 = vmatprep.subr.bf16.mxu1 %v9529_v32  ;;  %v9545_v18 = vpack.c.bf16 %v19251_v0, %v19250_v27  ;;  %v19253_v53 = vld [vmem:[#allocation713_spill] sm:$0xff]  ;;  %v5397_v32 = vcombine.high %v4224_v49, %v4224_v49  ;;  %v19288_v0 = vld [vmem:[#allocation752_spill] sm:$0xff] }
 0x708   :  { %9562 = vmatprep.subr.bf16.mxu0 %v9561_v3  ;;  %v9577_v62 = vpack.c.bf16 %v19253_v53, %v19252_v44  ;;  %v19255_v3 = vld [vmem:[#allocation665_spill] sm:$0xff]  ;;  %v19290_v53 = vld [vmem:[#allocation738_spill] sm:$0xff] }
 0x709   :  { %v9547_v50 = vpack.c.bf16 %v19255_v3, %v19254_v57  ;;  %v17184_v63 = vrot.slane %v5397_v32, %v16364_v2  ;;  %v19292_v32 = vld [vmem:[#allocation770_spill] sm:$0xff]  ;;  %v19293_v57 = vld [vmem:[#allocation771_spill] sm:$0xff] }
 0x70a   :  { %9532 = vmatpush3.bf16.msra.mxu1 %v9531_v12  ;;  %v19257_v12 = vld [vmem:[#allocation697_spill] sm:$0xff]  ;;  %v9629_v3 = vpack.c.bf16 %v19293_v57, %v19292_v32 }
 0x70b   :  { %9564 = vmatpush3.bf16.msra.mxu0 %v9563_v9  ;;  %9534 = vmatprep.subr.bf16.mxu1 %v9533_v7  ;;  %v9579_v41 = vpack.c.bf16 %v19257_v12, %v19256_v16  ;;  %v19259_v9 = vld [vmem:[#allocation731_spill] sm:$0xff]  ;;  %v5413_v35 = vcombine.high %v17184_v63, %v17184_v63 }
 0x70c   :  { %9566 = vmatprep.subr.bf16.mxu0 %v9565_v13  ;;  %v9581_v38 = vpack.c.bf16 %v19259_v9, %v19258_v37  ;;  %v19261_v7 = vld [vmem:[#allocation763_spill] sm:$0xff]  ;;  %v19262_v13 = vld [vmem:[#allocation714_spill] sm:$0xff] }
 0x70d   :  { %v9613_v10 = vpack.c.bf16 %v19261_v7, %v19260_v4  ;;  %v9583_v19 = vpack.c.bf16 %v19263_v43, %v19262_v13  ;;  %v19295_v16 = vld [vmem:[#allocation723_spill] sm:$0xff]  ;;  %v19299_v4 = vld [vmem:[#allocation741_spill] sm:$0xff] }
 0x70e   :  { %9536 = vmatpush3.bf16.msra.mxu1 %v9535_v60  ;;  %v19264_v60 = vld [vmem:[#allocation746_spill] sm:$0xff]  ;;  %v19297_v37 = vld [vmem:[#allocation755_spill] sm:$0xff]  ;;  %v19301_v13 = vld [vmem:[#allocation773_spill] sm:$0xff] }
 0x70f   :  { %9568 = vmatpush3.bf16.msra.mxu0 %v9567_v59  ;;  %9538 = vmatprep.subr.bf16.mxu1 %v9537_v58  ;;  %v9615_v17 = vpack.c.bf16 %v19265_v1, %v19264_v60  ;;  %v19266_v59 = vld [vmem:[#allocation732_spill] sm:$0xff]  ;;  %v19303_v60 = vld [vmem:[#allocation725_spill] sm:$0xff] }
 0x710   :  { %9570 = vmatprep.subr.bf16.mxu0 %v9569_v52  ;;  %v7922_v46 = vpop.f32.mrb[24].mxu1  ;;  %v9585_v33 = vpack.c.bf16 %v19267_v22, %v19266_v59  ;;  %v19268_v58 = vld [vmem:[#allocation764_spill] sm:$0xff]  ;;  %v19305_v59 = vld [vmem:[#allocation757_spill] sm:$0xff] }
 0x711   :  { %v7957_v42 = vpop.f32.mrb[22].mxu0  ;;  %v7923_v11 = vpop.f32.mrb[25].mxu1  ;;  %v9617_v23 = vpack.c.bf16 %v19269_v24, %v19268_v58  ;;  %v19307_v58 = vld [vmem:[#allocation743_spill] sm:$0xff] }
 0x712   :  { %v7958_v40 = vpop.f32.mrb[23].mxu0  ;;  %v7924_v14 = vadd.f32 %v7923_v11, %v7922_v46  ;;  %9540 = vmatpush3.bf16.msra.mxu1 %v9539_v8  ;;  %v19271_v8 = vld [vmem:[#allocation717_spill] sm:$0xff]  ;;  %v19280_v11 = vld [vmem:[#allocation750_spill] sm:$0xff] }
 0x713   :  { %v7959_v15 = vadd.f32 %v7958_v40, %v7957_v42  ;;  %9572 = vmatpush3.bf16.msra.mxu0 %v9571_v5  ;;  %9542 = vmatprep.subr.bf16.mxu1 %v9541_v61  ;;  %v9587_v26 = vpack.c.bf16 %v19271_v8, %v19270_v31  ;;  %v19273_v5 = vld [vmem:[#allocation749_spill] sm:$0xff]  ;;  %v19275_v61 = vld [vmem:[#allocation735_spill] sm:$0xff] }
 0x714   :  { %9574 = vmatprep.subr.bf16.mxu0 %v9573_v55  ;;  %v6012_v20 = vadd.f32 %v7924_v14, %v17091_v45  ;;  %v17181_v45 = vrot.slane %v4224_v49, %v16364_v2  ;;  %v9619_v51 = vpack.c.bf16 %v19273_v5, %v19272_v54  ;;  %v9589_v25 = vpack.c.bf16 %v19275_v61, %v19274_v39  ;;  %v19277_v55 = vld [vmem:[#allocation767_spill] sm:$0xff]  ;;  %v19284_v14 = vld [vmem:[#allocation768_spill] sm:$0xff]  ;;  %v19310_v5 = vld [vmem:[#allocation726_spill] sm:$0xff] }
 0x715   :  { %v9621_v46 = vpack.c.bf16 %v19277_v55, %v19276_v48  ;;  %v19281_v40 = vld [vmem:[#allocation751_spill] sm:$0xff]  ;;  %v19312_v55 = vld [vmem:[#allocation758_spill] sm:$0xff] }
 0x716   :  { %v17170_v36 = vadd.f32 %v7959_v15, %v6012_v20  ;;  %9544 = vmatpush3.bf16.msra.mxu1 %v9543_v21  ;;  %v5412_v52 = vcombine.high %v17181_v45, %v17181_v45  ;;  %v9623_v30 = vpack.c.bf16 %v19281_v40, %v19280_v11  ;;  %v19283_v21 = vld [vmem:[#allocation737_spill] sm:$0xff]  ;;  %v4225_v61 = vld [vmem:[#allocation4 + $0x60] sm:$0xff]  ;;  %v19316_v40 = vld [vmem:[#allocation776_spill] sm:$0xff] }
 0x717   :  { %9576 = vmatpush3.bf16.msra.mxu0 %v9575_v6  ;;  %9546 = vmatprep.subr.bf16.mxu1 %v9545_v18  ;;  %v9593_v49 = vpack.c.bf16 %v19283_v21, %v19282_v34  ;;  %v19285_v15 = vld [vmem:[#allocation769_spill] sm:$0xff] }
 0x718   :  { %9578 = vmatprep.subr.bf16.mxu0 %v9577_v62  ;;  %v9625_v47 = vpack.c.bf16 %v19285_v15, %v19284_v14  ;;  %v19287_v6 = vld [vmem:[#allocation721_spill] sm:$0xff]  ;;  %v19291_v62 = vld [vmem:[#allocation739_spill] sm:$0xff]  ;;  %v19318_v15 = vld [vmem:[#allocation728_spill] sm:$0xff] }
 0x719   :  { %v9595_v27 = vpack.c.bf16 %v19287_v6, %v19286_v29  ;;  %v19289_v18 = vld [vmem:[#allocation753_spill] sm:$0xff]  ;;  %v9597_v20 = vpack.c.bf16 %v19291_v62, %v19290_v53  ;;  %v19320_v6 = vld [vmem:[#allocation760_spill] sm:$0xff]  ;;  %v19324_v62 = vld [vmem:[#allocation826_spill] sm:$0xff] }
 0x71a   :  { %9548 = vmatpush3.bf16.msra.mxu1 %v9547_v50  ;;  %v9627_v44 = vpack.c.bf16 %v19289_v18, %v19288_v0  ;;  %v19294_v50 = vld [vmem:[#allocation722_spill] sm:$0xff] }
 0x71b   :  { %9580 = vmatpush3.bf16.msra.mxu0 %v9579_v41  ;;  %9582 = vmatprep.subr.bf16.mxu1 %v9581_v38  ;;  %v9599_v12 = vpack.c.bf16 %v19295_v16, %v19294_v50  ;;  %v19296_v41 = vld [vmem:[#allocation754_spill] sm:$0xff]  ;;  %v19298_v38 = vld [vmem:[#allocation740_spill] sm:$0xff]  ;;  %v19327_v50 = vld [vmem:[#allocation779_spill] sm:$0xff] }
 0x71c   :  { %9614 = vmatprep.subr.bf16.mxu0 %v9613_v10  ;;  %v9631_v9 = vpack.c.bf16 %v19297_v37, %v19296_v41  ;;  %v9601_v7 = vpack.c.bf16 %v19299_v4, %v19298_v38  ;;  %v19300_v10 = vld [vmem:[#allocation772_spill] sm:$0xff]  ;;  %v19322_v18 = vld [vmem:[#allocation794_spill] sm:$0xff]  ;;  %v19329_v41 = vld [vmem:[#allocation811_spill] sm:$0xff] }
 0x71d   :  { %6990 = vmatmul.mubr.f32.vlgmr.msra.gmra.mrb[38].mxu1 %v17102_v28  ;;  %v19278_v28 = vld [vmem:[#allocation718_spill] sm:$0xff]  ;;  %v9633_v43 = vpack.c.bf16 %v19301_v13, %v19300_v10  ;;  %v19331_v38 = vld [vmem:[#allocation797_spill] sm:$0xff] }
 0x71e   :  { %7060 = vmatmul.mubr.f32.vlgmr.msra.gmra.mrb[36].mxu0 %v17105_v56  ;;  %9584 = vmatpush3.bf16.msra.mxu1 %v9583_v19  ;;  %v19279_v56 = vld [vmem:[#allocation719_spill] sm:$0xff]  ;;  %v19302_v19 = vld [vmem:[#allocation724_spill] sm:$0xff]  ;;  %v19333_v10 = vld [vmem:[#allocation829_spill] sm:$0xff] }
 0x71f   :  { %9616 = vmatpush3.bf16.msra.mxu0 %v9615_v17  ;;  %9586 = vmatprep.subr.bf16.mxu1 %v9585_v33  ;;  %v9591_v42 = vpack.c.bf16 %v19279_v56, %v19278_v28  ;;  %v9603_v1 = vpack.c.bf16 %v19303_v60, %v19302_v19  ;;  %v19304_v17 = vld [vmem:[#allocation756_spill] sm:$0xff]  ;;  %v19306_v33 = vld [vmem:[#allocation742_spill] sm:$0xff] }
 0x720   :  { %9618 = vmatprep.subr.bf16.mxu0 %v9617_v23  ;;  %7129 = vmatprep.mubr.f32.mxu1 %v5412_v52  ;;  %v9635_v22 = vpack.c.bf16 %v19305_v59, %v19304_v17  ;;  %v9605_v24 = vpack.c.bf16 %v19307_v58, %v19306_v33  ;;  %v19308_v23 = vld [vmem:[#allocation774_spill] sm:$0xff]  ;;  %v19309_v52 = vld [vmem:[#allocation775_spill] sm:$0xff]  ;;  %v19314_v56 = vld [vmem:[#allocation744_spill] sm:$0xff] }
 0x721   :  { %7199 = vmatprep.mubr.f32.mxu0 %v5413_v35  ;;  %v9637_v35 = vpack.c.bf16 %v19309_v52, %v19308_v23  ;;  %v19334_v60 = vld [vmem:[#allocation780_spill] sm:$0xff]  ;;  %v19338_v58 = vld [vmem:[#allocation798_spill] sm:$0xff] }
 0x722   :  { %9588 = vmatpush3.bf16.msra.mxu1 %v9587_v26  ;;  %v19336_v59 = vld [vmem:[#allocation812_spill] sm:$0xff]  ;;  %v19340_v52 = vld [vmem:[#allocation830_spill] sm:$0xff] }
 0x723   :  { %9620 = vmatpush3.bf16.msra.mxu0 %v9619_v51  ;;  %9590 = vmatprep.subr.bf16.mxu1 %v9589_v25  ;;  %v19311_v51 = vld [vmem:[#allocation727_spill] sm:$0xff] }
 0x724   :  { %9622 = vmatprep.subr.bf16.mxu0 %v9621_v46  ;;  %v9607_v39 = vpack.c.bf16 %v19311_v51, %v19310_v5  ;;  %v19313_v46 = vld [vmem:[#allocation759_spill] sm:$0xff]  ;;  %v19346_v51 = vld [vmem:[#allocation800_spill] sm:$0xff] }
 0x725   :  { %v9639_v28 = vpack.c.bf16 %v19313_v46, %v19312_v55  ;;  %v19350_v46 = vld [vmem:[#allocation784_spill] sm:$0xff] }
 0x726   :  { %9592 = vmatpush3.bf16.msra.mxu1 %v9591_v42  ;;  %v19315_v42 = vld [vmem:[#allocation745_spill] sm:$0xff] }
 0x727   :  { %9624 = vmatpush3.bf16.msra.mxu0 %v9623_v30  ;;  %9594 = vmatprep.subr.bf16.mxu1 %v9593_v49  ;;  %v9609_v11 = vpack.c.bf16 %v19315_v42, %v19314_v56  ;;  %v19317_v30 = vld [vmem:[#allocation777_spill] sm:$0xff]  ;;  %v5414_v49 = vcombine.high %v4225_v61, %v4225_v61  ;;  %v19352_v42 = vld [vmem:[#allocation816_spill] sm:$0xff] }
 0x728   :  { %9626 = vmatprep.subr.bf16.mxu0 %v9625_v47  ;;  %v9641_v34 = vpack.c.bf16 %v19317_v30, %v19316_v40  ;;  %v19319_v47 = vld [vmem:[#allocation729_spill] sm:$0xff]  ;;  %v19354_v30 = vld [vmem:[#allocation802_spill] sm:$0xff] }
 0x729   :  { %v9611_v29 = vpack.c.bf16 %v19319_v47, %v19318_v15  ;;  %v17263_v57 = vrot.slane %v5414_v49, %v16364_v2  ;;  %v19356_v49 = vld [vmem:[#allocation834_spill] sm:$0xff]  ;;  %v19357_v15 = vld [vmem:[#allocation835_spill] sm:$0xff] }
 0x72a   :  { %9596 = vmatpush3.bf16.msra.mxu1 %v9595_v27  ;;  %v19321_v27 = vld [vmem:[#allocation761_spill] sm:$0xff]  ;;  %v9693_v47 = vpack.c.bf16 %v19357_v15, %v19356_v49 }
 0x72b   :  { %9628 = vmatpush3.bf16.msra.mxu0 %v9627_v44  ;;  %9598 = vmatprep.subr.bf16.mxu1 %v9597_v20  ;;  %v9643_v0 = vpack.c.bf16 %v19321_v27, %v19320_v6  ;;  %v19323_v44 = vld [vmem:[#allocation795_spill] sm:$0xff]  ;;  %v5430_v19 = vcombine.high %v17263_v57, %v17263_v57 }
 0x72c   :  { %9630 = vmatprep.subr.bf16.mxu0 %v9629_v3  ;;  %v9645_v53 = vpack.c.bf16 %v19323_v44, %v19322_v18  ;;  %v19325_v20 = vld [vmem:[#allocation827_spill] sm:$0xff]  ;;  %v19326_v3 = vld [vmem:[#allocation778_spill] sm:$0xff] }
 0x72d   :  { %v9677_v32 = vpack.c.bf16 %v19325_v20, %v19324_v62  ;;  %v9647_v16 = vpack.c.bf16 %v19327_v50, %v19326_v3  ;;  %v19359_v6 = vld [vmem:[#allocation787_spill] sm:$0xff]  ;;  %v19363_v62 = vld [vmem:[#allocation805_spill] sm:$0xff] }
 0x72e   :  { %9600 = vmatpush3.bf16.msra.mxu1 %v9599_v12  ;;  %v19328_v12 = vld [vmem:[#allocation810_spill] sm:$0xff]  ;;  %v19361_v18 = vld [vmem:[#allocation819_spill] sm:$0xff]  ;;  %v19365_v3 = vld [vmem:[#allocation837_spill] sm:$0xff] }
 0x72f   :  { %9632 = vmatpush3.bf16.msra.mxu0 %v9631_v9  ;;  %9602 = vmatprep.subr.bf16.mxu1 %v9601_v7  ;;  %v9679_v37 = vpack.c.bf16 %v19329_v41, %v19328_v12  ;;  %v19330_v9 = vld [vmem:[#allocation796_spill] sm:$0xff]  ;;  %v19367_v12 = vld [vmem:[#allocation789_spill] sm:$0xff] }
 0x730   :  { %9634 = vmatprep.subr.bf16.mxu0 %v9633_v43  ;;  %v7992_v31 = vpop.f32.mrb[26].mxu1  ;;  %v9649_v4 = vpack.c.bf16 %v19331_v38, %v19330_v9  ;;  %v19332_v7 = vld [vmem:[#allocation828_spill] sm:$0xff]  ;;  %v19369_v9 = vld [vmem:[#allocation821_spill] sm:$0xff] }
 0x731   :  { %v8027_v8 = vpop.f32.mrb[24].mxu0  ;;  %v7993_v26 = vpop.f32.mrb[27].mxu1  ;;  %v9681_v13 = vpack.c.bf16 %v19333_v10, %v19332_v7  ;;  %v19371_v7 = vld [vmem:[#allocation807_spill] sm:$0xff] }
 0x732   :  { %v8028_v54 = vpop.f32.mrb[25].mxu0  ;;  %v7994_v25 = vadd.f32 %v7993_v26, %v7992_v31  ;;  %9604 = vmatpush3.bf16.msra.mxu1 %v9603_v1  ;;  %v19335_v1 = vld [vmem:[#allocation781_spill] sm:$0xff]  ;;  %v19344_v26 = vld [vmem:[#allocation814_spill] sm:$0xff] }
 0x733   :  { %v8029_v48 = vadd.f32 %v8028_v54, %v8027_v8  ;;  %9636 = vmatpush3.bf16.msra.mxu0 %v9635_v22  ;;  %9606 = vmatprep.subr.bf16.mxu1 %v9605_v24  ;;  %v9651_v17 = vpack.c.bf16 %v19335_v1, %v19334_v60  ;;  %v19337_v22 = vld [vmem:[#allocation813_spill] sm:$0xff]  ;;  %v19339_v24 = vld [vmem:[#allocation799_spill] sm:$0xff] }
 0x734   :  { %9638 = vmatprep.subr.bf16.mxu0 %v9637_v35  ;;  %v6152_v21 = vadd.f32 %v7994_v25, %v17170_v36  ;;  %v17260_v36 = vrot.slane %v4225_v61, %v16364_v2  ;;  %v9683_v33 = vpack.c.bf16 %v19337_v22, %v19336_v59  ;;  %v9653_v23 = vpack.c.bf16 %v19339_v24, %v19338_v58  ;;  %v19341_v35 = vld [vmem:[#allocation831_spill] sm:$0xff]  ;;  %v19348_v25 = vld [vmem:[#allocation832_spill] sm:$0xff]  ;;  %v19374_v22 = vld [vmem:[#allocation790_spill] sm:$0xff] }
 0x735   :  { %v9685_v31 = vpack.c.bf16 %v19341_v35, %v19340_v52  ;;  %v19345_v54 = vld [vmem:[#allocation815_spill] sm:$0xff]  ;;  %v19376_v35 = vld [vmem:[#allocation822_spill] sm:$0xff] }
 0x736   :  { %v17249_v14 = vadd.f32 %v8029_v48, %v6152_v21  ;;  %9608 = vmatpush3.bf16.msra.mxu1 %v9607_v39  ;;  %v5429_v43 = vcombine.high %v17260_v36, %v17260_v36  ;;  %v9687_v5 = vpack.c.bf16 %v19345_v54, %v19344_v26  ;;  %v19347_v39 = vld [vmem:[#allocation801_spill] sm:$0xff]  ;;  %v4226_v24 = vld [vmem:[#allocation4 + $0x68] sm:$0xff] }
 0x737   :  { %9640 = vmatpush3.bf16.msra.mxu0 %v9639_v28  ;;  %9610 = vmatprep.subr.bf16.mxu1 %v9609_v11  ;;  %v9657_v61 = vpack.c.bf16 %v19347_v39, %v19346_v51  ;;  %v19349_v48 = vld [vmem:[#allocation833_spill] sm:$0xff]  ;;  %v19380_v54 = vld [vmem:[#allocation840_spill] sm:$0xff] }
 0x738   :  { %9642 = vmatprep.subr.bf16.mxu0 %v9641_v34  ;;  %v9689_v55 = vpack.c.bf16 %v19349_v48, %v19348_v25  ;;  %v19351_v28 = vld [vmem:[#allocation785_spill] sm:$0xff]  ;;  %v19355_v34 = vld [vmem:[#allocation803_spill] sm:$0xff]  ;;  %v19382_v48 = vld [vmem:[#allocation792_spill] sm:$0xff] }
 0x739   :  { %v9659_v56 = vpack.c.bf16 %v19351_v28, %v19350_v46  ;;  %v19353_v11 = vld [vmem:[#allocation817_spill] sm:$0xff]  ;;  %v9661_v21 = vpack.c.bf16 %v19355_v34, %v19354_v30  ;;  %v19384_v28 = vld [vmem:[#allocation824_spill] sm:$0xff]  ;;  %v19388_v34 = vld [vmem:[#allocation890_spill] sm:$0xff] }
 0x73a   :  { %9612 = vmatpush3.bf16.msra.mxu1 %v9611_v29  ;;  %v9691_v40 = vpack.c.bf16 %v19353_v11, %v19352_v42  ;;  %v19358_v29 = vld [vmem:[#allocation786_spill] sm:$0xff] }
 0x73b   :  { %9644 = vmatpush3.bf16.msra.mxu0 %v9643_v0  ;;  %9646 = vmatprep.subr.bf16.mxu1 %v9645_v53  ;;  %v9663_v27 = vpack.c.bf16 %v19359_v6, %v19358_v29  ;;  %v19360_v0 = vld [vmem:[#allocation818_spill] sm:$0xff]  ;;  %v19362_v53 = vld [vmem:[#allocation804_spill] sm:$0xff]  ;;  %v19391_v29 = vld [vmem:[#allocation843_spill] sm:$0xff] }
 0x73c   :  { %9678 = vmatprep.subr.bf16.mxu0 %v9677_v32  ;;  %v9695_v44 = vpack.c.bf16 %v19361_v18, %v19360_v0  ;;  %v9665_v20 = vpack.c.bf16 %v19363_v62, %v19362_v53  ;;  %v19364_v32 = vld [vmem:[#allocation836_spill] sm:$0xff]  ;;  %v19386_v11 = vld [vmem:[#allocation858_spill] sm:$0xff]  ;;  %v19393_v0 = vld [vmem:[#allocation875_spill] sm:$0xff] }
 0x73d   :  { %7130 = vmatmul.mubr.f32.vlgmr.msra.gmra.mrb[40].mxu1 %v17181_v45  ;;  %v19342_v45 = vld [vmem:[#allocation782_spill] sm:$0xff]  ;;  %v9697_v50 = vpack.c.bf16 %v19365_v3, %v19364_v32  ;;  %v19395_v53 = vld [vmem:[#allocation861_spill] sm:$0xff] }
 0x73e   :  { %7200 = vmatmul.mubr.f32.vlgmr.msra.gmra.mrb[38].mxu0 %v17184_v63  ;;  %9648 = vmatpush3.bf16.msra.mxu1 %v9647_v16  ;;  %v19343_v63 = vld [vmem:[#allocation783_spill] sm:$0xff]  ;;  %v19366_v16 = vld [vmem:[#allocation788_spill] sm:$0xff]  ;;  %v19397_v32 = vld [vmem:[#allocation893_spill] sm:$0xff] }
 0x73f   :  { %9680 = vmatpush3.bf16.msra.mxu0 %v9679_v37  ;;  %9650 = vmatprep.subr.bf16.mxu1 %v9649_v4  ;;  %v9655_v8 = vpack.c.bf16 %v19343_v63, %v19342_v45  ;;  %v9667_v41 = vpack.c.bf16 %v19367_v12, %v19366_v16  ;;  %v19368_v37 = vld [vmem:[#allocation820_spill] sm:$0xff]  ;;  %v19370_v4 = vld [vmem:[#allocation806_spill] sm:$0xff] }
 0x740   :  { %9682 = vmatprep.subr.bf16.mxu0 %v9681_v13  ;;  %7269 = vmatprep.mubr.f32.mxu1 %v5429_v43  ;;  %v9699_v38 = vpack.c.bf16 %v19369_v9, %v19368_v37  ;;  %v9669_v10 = vpack.c.bf16 %v19371_v7, %v19370_v4  ;;  %v19372_v13 = vld [vmem:[#allocation838_spill] sm:$0xff]  ;;  %v19373_v43 = vld [vmem:[#allocation839_spill] sm:$0xff]  ;;  %v19378_v63 = vld [vmem:[#allocation808_spill] sm:$0xff] }
 0x741   :  { %7339 = vmatprep.mubr.f32.mxu0 %v5430_v19  ;;  %v9701_v19 = vpack.c.bf16 %v19373_v43, %v19372_v13  ;;  %v19398_v12 = vld [vmem:[#allocation844_spill] sm:$0xff]  ;;  %v19402_v7 = vld [vmem:[#allocation862_spill] sm:$0xff] }
 0x742   :  { %9652 = vmatpush3.bf16.msra.mxu1 %v9651_v17  ;;  %v19400_v9 = vld [vmem:[#allocation876_spill] sm:$0xff]  ;;  %v19404_v43 = vld [vmem:[#allocation894_spill] sm:$0xff] }
 0x743   :  { %9684 = vmatpush3.bf16.msra.mxu0 %v9683_v33  ;;  %9654 = vmatprep.subr.bf16.mxu1 %v9653_v23  ;;  %v19375_v33 = vld [vmem:[#allocation791_spill] sm:$0xff] }
 0x744   :  { %9686 = vmatprep.subr.bf16.mxu0 %v9685_v31  ;;  %v9671_v58 = vpack.c.bf16 %v19375_v33, %v19374_v22  ;;  %v19377_v31 = vld [vmem:[#allocation823_spill] sm:$0xff]  ;;  %v19410_v33 = vld [vmem:[#allocation864_spill] sm:$0xff] }
 0x745   :  { %v9703_v45 = vpack.c.bf16 %v19377_v31, %v19376_v35  ;;  %v19414_v31 = vld [vmem:[#allocation848_spill] sm:$0xff] }
 0x746   :  { %9656 = vmatpush3.bf16.msra.mxu1 %v9655_v8  ;;  %v19379_v8 = vld [vmem:[#allocation809_spill] sm:$0xff] }
 0x747   :  { %9688 = vmatpush3.bf16.msra.mxu0 %v9687_v5  ;;  %9658 = vmatprep.subr.bf16.mxu1 %v9657_v61  ;;  %v9673_v26 = vpack.c.bf16 %v19379_v8, %v19378_v63  ;;  %v19381_v5 = vld [vmem:[#allocation841_spill] sm:$0xff]  ;;  %v5431_v61 = vcombine.high %v4226_v24, %v4226_v24  ;;  %v19416_v8 = vld [vmem:[#allocation880_spill] sm:$0xff] }
 0x748   :  { %9690 = vmatprep.subr.bf16.mxu0 %v9689_v55  ;;  %v9705_v51 = vpack.c.bf16 %v19381_v5, %v19380_v54  ;;  %v19383_v55 = vld [vmem:[#allocation793_spill] sm:$0xff]  ;;  %v19418_v5 = vld [vmem:[#allocation866_spill] sm:$0xff] }
 0x749   :  { %v9675_v46 = vpack.c.bf16 %v19383_v55, %v19382_v48  ;;  %v17342_v15 = vrot.slane %v5431_v61, %v16364_v2  ;;  %v19420_v61 = vld [vmem:[#allocation898_spill] sm:$0xff]  ;;  %v19421_v48 = vld [vmem:[#allocation899_spill] sm:$0xff] }
 0x74a   :  { %9660 = vmatpush3.bf16.msra.mxu1 %v9659_v56  ;;  %v19385_v56 = vld [vmem:[#allocation825_spill] sm:$0xff]  ;;  %v9757_v55 = vpack.c.bf16 %v19421_v48, %v19420_v61 }
 0x74b   :  { %9692 = vmatpush3.bf16.msra.mxu0 %v9691_v40  ;;  %9662 = vmatprep.subr.bf16.mxu1 %v9661_v21  ;;  %v9707_v42 = vpack.c.bf16 %v19385_v56, %v19384_v28  ;;  %v19387_v40 = vld [vmem:[#allocation859_spill] sm:$0xff]  ;;  %v5447_v16 = vcombine.high %v17342_v15, %v17342_v15 }
 0x74c   :  { %9694 = vmatprep.subr.bf16.mxu0 %v9693_v47  ;;  %v9709_v30 = vpack.c.bf16 %v19387_v40, %v19386_v11  ;;  %v19389_v21 = vld [vmem:[#allocation891_spill] sm:$0xff]  ;;  %v19390_v47 = vld [vmem:[#allocation842_spill] sm:$0xff] }
 0x74d   :  { %v9741_v49 = vpack.c.bf16 %v19389_v21, %v19388_v34  ;;  %v9711_v6 = vpack.c.bf16 %v19391_v29, %v19390_v47  ;;  %v19423_v28 = vld [vmem:[#allocation851_spill] sm:$0xff]  ;;  %v19427_v34 = vld [vmem:[#allocation869_spill] sm:$0xff] }
 0x74e   :  { %9664 = vmatpush3.bf16.msra.mxu1 %v9663_v27  ;;  %v19392_v27 = vld [vmem:[#allocation874_spill] sm:$0xff]  ;;  %v19425_v11 = vld [vmem:[#allocation883_spill] sm:$0xff]  ;;  %v19429_v47 = vld [vmem:[#allocation901_spill] sm:$0xff] }
 0x74f   :  { %9696 = vmatpush3.bf16.msra.mxu0 %v9695_v44  ;;  %9666 = vmatprep.subr.bf16.mxu1 %v9665_v20  ;;  %v9743_v18 = vpack.c.bf16 %v19393_v0, %v19392_v27  ;;  %v19394_v44 = vld [vmem:[#allocation860_spill] sm:$0xff]  ;;  %v19431_v27 = vld [vmem:[#allocation853_spill] sm:$0xff] }
 0x750   :  { %9698 = vmatprep.subr.bf16.mxu0 %v9697_v50  ;;  %v8062_v60 = vpop.f32.mrb[28].mxu1  ;;  %v9713_v62 = vpack.c.bf16 %v19395_v53, %v19394_v44  ;;  %v19396_v20 = vld [vmem:[#allocation892_spill] sm:$0xff]  ;;  %v19433_v44 = vld [vmem:[#allocation885_spill] sm:$0xff] }
 0x751   :  { %v8097_v1 = vpop.f32.mrb[26].mxu0  ;;  %v8063_v17 = vpop.f32.mrb[29].mxu1  ;;  %v9745_v3 = vpack.c.bf16 %v19397_v32, %v19396_v20  ;;  %v19435_v20 = vld [vmem:[#allocation871_spill] sm:$0xff] }
 0x752   :  { %v8098_v59 = vpop.f32.mrb[27].mxu0  ;;  %v8064_v23 = vadd.f32 %v8063_v17, %v8062_v60  ;;  %9668 = vmatpush3.bf16.msra.mxu1 %v9667_v41  ;;  %v19399_v41 = vld [vmem:[#allocation845_spill] sm:$0xff]  ;;  %v19408_v17 = vld [vmem:[#allocation878_spill] sm:$0xff] }
 0x753   :  { %v8099_v52 = vadd.f32 %v8098_v59, %v8097_v1  ;;  %9700 = vmatpush3.bf16.msra.mxu0 %v9699_v38  ;;  %9670 = vmatprep.subr.bf16.mxu1 %v9669_v10  ;;  %v9715_v37 = vpack.c.bf16 %v19399_v41, %v19398_v12  ;;  %v19401_v38 = vld [vmem:[#allocation877_spill] sm:$0xff]  ;;  %v19403_v10 = vld [vmem:[#allocation863_spill] sm:$0xff] }
 0x754   :  { %9702 = vmatprep.subr.bf16.mxu0 %v9701_v19  ;;  %v6292_v39 = vadd.f32 %v8064_v23, %v17249_v14  ;;  %v17339_v14 = vrot.slane %v4226_v24, %v16364_v2  ;;  %v9747_v4 = vpack.c.bf16 %v19401_v38, %v19400_v9  ;;  %v9717_v13 = vpack.c.bf16 %v19403_v10, %v19402_v7  ;;  %v19405_v19 = vld [vmem:[#allocation895_spill] sm:$0xff]  ;;  %v19412_v23 = vld [vmem:[#allocation896_spill] sm:$0xff]  ;;  %v19438_v38 = vld [vmem:[#allocation854_spill] sm:$0xff] }
 0x755   :  { %v9749_v60 = vpack.c.bf16 %v19405_v19, %v19404_v43  ;;  %v19409_v59 = vld [vmem:[#allocation879_spill] sm:$0xff]  ;;  %v4227_v10 = vld [vmem:[#allocation4 + $0x70] sm:$0xff]  ;;  %v19440_v19 = vld [vmem:[#allocation886_spill] sm:$0xff] }
 0x756   :  { %v17328_v25 = vadd.f32 %v8099_v52, %v6292_v39  ;;  %9672 = vmatpush3.bf16.msra.mxu1 %v9671_v58  ;;  %v5446_v50 = vcombine.high %v17339_v14, %v17339_v14  ;;  %v9751_v22 = vpack.c.bf16 %v19409_v59, %v19408_v17  ;;  %v19411_v58 = vld [vmem:[#allocation865_spill] sm:$0xff]  ;;  %v19444_v59 = vld [vmem:[#allocation904_spill] sm:$0xff] }
 0x757   :  { %9704 = vmatpush3.bf16.msra.mxu0 %v9703_v45  ;;  %9674 = vmatprep.subr.bf16.mxu1 %v9673_v26  ;;  %v9721_v24 = vpack.c.bf16 %v19411_v58, %v19410_v33  ;;  %v19413_v52 = vld [vmem:[#allocation897_spill] sm:$0xff] }
 0x758   :  { %9706 = vmatprep.subr.bf16.mxu0 %v9705_v51  ;;  %v9753_v35 = vpack.c.bf16 %v19413_v52, %v19412_v23  ;;  %v19415_v45 = vld [vmem:[#allocation849_spill] sm:$0xff]  ;;  %v19419_v51 = vld [vmem:[#allocation867_spill] sm:$0xff]  ;;  %v19446_v52 = vld [vmem:[#allocation856_spill] sm:$0xff] }
 0x759   :  { %v9723_v63 = vpack.c.bf16 %v19415_v45, %v19414_v31  ;;  %v19417_v26 = vld [vmem:[#allocation881_spill] sm:$0xff]  ;;  %v9725_v39 = vpack.c.bf16 %v19419_v51, %v19418_v5  ;;  %v19448_v45 = vld [vmem:[#allocation888_spill] sm:$0xff]  ;;  %v19452_v51 = vld [vmem:[#allocation954_spill] sm:$0xff] }
 0x75a   :  { %9676 = vmatpush3.bf16.msra.mxu1 %v9675_v46  ;;  %v9755_v54 = vpack.c.bf16 %v19417_v26, %v19416_v8  ;;  %v19422_v46 = vld [vmem:[#allocation850_spill] sm:$0xff] }
 0x75b   :  { %9708 = vmatpush3.bf16.msra.mxu0 %v9707_v42  ;;  %9710 = vmatprep.subr.bf16.mxu1 %v9709_v30  ;;  %v9727_v56 = vpack.c.bf16 %v19423_v28, %v19422_v46  ;;  %v19424_v42 = vld [vmem:[#allocation882_spill] sm:$0xff]  ;;  %v19426_v30 = vld [vmem:[#allocation868_spill] sm:$0xff]  ;;  %v19455_v46 = vld [vmem:[#allocation907_spill] sm:$0xff] }
 0x75c   :  { %9742 = vmatprep.subr.bf16.mxu0 %v9741_v49  ;;  %v9759_v40 = vpack.c.bf16 %v19425_v11, %v19424_v42  ;;  %v9729_v21 = vpack.c.bf16 %v19427_v34, %v19426_v30  ;;  %v19428_v49 = vld [vmem:[#allocation900_spill] sm:$0xff]  ;;  %v19450_v26 = vld [vmem:[#allocation922_spill] sm:$0xff]  ;;  %v19457_v42 = vld [vmem:[#allocation939_spill] sm:$0xff] }
 0x75d   :  { %7270 = vmatmul.mubr.f32.vlgmr.msra.gmra.mrb[42].mxu1 %v17260_v36  ;;  %v19406_v36 = vld [vmem:[#allocation846_spill] sm:$0xff]  ;;  %v9761_v29 = vpack.c.bf16 %v19429_v47, %v19428_v49  ;;  %v19459_v30 = vld [vmem:[#allocation925_spill] sm:$0xff] }
 0x75e   :  { %7340 = vmatmul.mubr.f32.vlgmr.msra.gmra.mrb[40].mxu0 %v17263_v57  ;;  %9712 = vmatpush3.bf16.msra.mxu1 %v9711_v6  ;;  %v19407_v57 = vld [vmem:[#allocation847_spill] sm:$0xff]  ;;  %v19430_v6 = vld [vmem:[#allocation852_spill] sm:$0xff]  ;;  %v19461_v49 = vld [vmem:[#allocation957_spill] sm:$0xff] }
 0x75f   :  { %9744 = vmatpush3.bf16.msra.mxu0 %v9743_v18  ;;  %9714 = vmatprep.subr.bf16.mxu1 %v9713_v62  ;;  %v9719_v1 = vpack.c.bf16 %v19407_v57, %v19406_v36  ;;  %v9731_v0 = vpack.c.bf16 %v19431_v27, %v19430_v6  ;;  %v19432_v18 = vld [vmem:[#allocation884_spill] sm:$0xff]  ;;  %v19434_v62 = vld [vmem:[#allocation870_spill] sm:$0xff]  ;;  %v19463_v27 = vld [vmem:[#allocation909_spill] sm:$0xff] }
 0x760   :  { %9746 = vmatprep.subr.bf16.mxu0 %v9745_v3  ;;  %7409 = vmatprep.mubr.f32.mxu1 %v5446_v50  ;;  %v9763_v53 = vpack.c.bf16 %v19433_v44, %v19432_v18  ;;  %v9733_v32 = vpack.c.bf16 %v19435_v20, %v19434_v62  ;;  %v19436_v3 = vld [vmem:[#allocation902_spill] sm:$0xff]  ;;  %v19437_v50 = vld [vmem:[#allocation903_spill] sm:$0xff]  ;;  %v19442_v57 = vld [vmem:[#allocation872_spill] sm:$0xff] }
 0x761   :  { %7479 = vmatprep.mubr.f32.mxu0 %v5447_v16  ;;  %v9765_v16 = vpack.c.bf16 %v19437_v50, %v19436_v3  ;;  %v19462_v6 = vld [vmem:[#allocation908_spill] sm:$0xff]  ;;  %v19465_v44 = vld [vmem:[#allocation941_spill] sm:$0xff]  ;;  %v19466_v62 = vld [vmem:[#allocation926_spill] sm:$0xff] }
 0x762   :  { %9716 = vmatpush3.bf16.msra.mxu1 %v9715_v37  ;;  %v19464_v18 = vld [vmem:[#allocation940_spill] sm:$0xff]  ;;  %v19467_v20 = vld [vmem:[#allocation927_spill] sm:$0xff]  ;;  %v19468_v3 = vld [vmem:[#allocation958_spill] sm:$0xff] }
 0x763   :  { %9748 = vmatpush3.bf16.msra.mxu0 %v9747_v4  ;;  %9718 = vmatprep.subr.bf16.mxu1 %v9717_v13  ;;  %v19439_v4 = vld [vmem:[#allocation855_spill] sm:$0xff] }
 0x764   :  { %9750 = vmatprep.subr.bf16.mxu0 %v9749_v60  ;;  %v9735_v7 = vpack.c.bf16 %v19439_v4, %v19438_v38  ;;  %v19441_v60 = vld [vmem:[#allocation887_spill] sm:$0xff]  ;;  %v19474_v38 = vld [vmem:[#allocation928_spill] sm:$0xff]  ;;  %v19475_v4 = vld [vmem:[#allocation929_spill] sm:$0xff] }
 0x765   :  { %v9767_v36 = vpack.c.bf16 %v19441_v60, %v19440_v19  ;;  %v19469_v50 = vld [vmem:[#allocation959_spill] sm:$0xff]  ;;  %v19478_v19 = vld [vmem:[#allocation912_spill] sm:$0xff]  ;;  %v19479_v60 = vld [vmem:[#allocation913_spill] sm:$0xff] }
 0x766   :  { %9720 = vmatpush3.bf16.msra.mxu1 %v9719_v1  ;;  %v19443_v1 = vld [vmem:[#allocation873_spill] sm:$0xff] }
 0x767   :  { %9752 = vmatpush3.bf16.msra.mxu0 %v9751_v22  ;;  %9722 = vmatprep.subr.bf16.mxu1 %v9721_v24  ;;  %v9737_v17 = vpack.c.bf16 %v19443_v1, %v19442_v57  ;;  %v19445_v22 = vld [vmem:[#allocation905_spill] sm:$0xff]  ;;  %v5448_v24 = vcombine.high %v4227_v10, %v4227_v10  ;;  %v19480_v57 = vld [vmem:[#allocation944_spill] sm:$0xff] }
 0x768   :  { %9754 = vmatprep.subr.bf16.mxu0 %v9753_v35  ;;  %v9769_v33 = vpack.c.bf16 %v19445_v22, %v19444_v59  ;;  %v19447_v35 = vld [vmem:[#allocation857_spill] sm:$0xff]  ;;  %v19482_v59 = vld [vmem:[#allocation930_spill] sm:$0xff]  ;;  %v19483_v22 = vld [vmem:[#allocation931_spill] sm:$0xff] }
 0x769   :  { %v9739_v31 = vpack.c.bf16 %v19447_v35, %v19446_v52  ;;  %v17421_v48 = vrot.slane %v5448_v24, %v16364_v2  ;;  %v19481_v1 = vld [vmem:[#allocation945_spill] sm:$0xff]  ;;  %v19485_v24 = vld [vmem:[#allocation963_spill] sm:$0xff]  ;;  %v19486_v35 = vld [vmem:[#allocation914_spill] sm:$0xff] }
 0x76a   :  { %9724 = vmatpush3.bf16.msra.mxu1 %v9723_v63  ;;  %v19449_v63 = vld [vmem:[#allocation889_spill] sm:$0xff] }
 0x76b   :  { %9756 = vmatpush3.bf16.msra.mxu0 %v9755_v54  ;;  %9726 = vmatprep.subr.bf16.mxu1 %v9725_v39  ;;  %v9771_v8 = vpack.c.bf16 %v19449_v63, %v19448_v45  ;;  %v19451_v54 = vld [vmem:[#allocation923_spill] sm:$0xff]  ;;  %v19488_v63 = vld [vmem:[#allocation946_spill] sm:$0xff] }
 0x76c   :  { %9758 = vmatprep.subr.bf16.mxu0 %v9757_v55  ;;  %v9773_v5 = vpack.c.bf16 %v19451_v54, %v19450_v26  ;;  %v19453_v39 = vld [vmem:[#allocation955_spill] sm:$0xff]  ;;  %v19454_v55 = vld [vmem:[#allocation906_spill] sm:$0xff]  ;;  %v19490_v54 = vld [vmem:[#allocation932_spill] sm:$0xff] }
 0x76d   :  { %v9805_v61 = vpack.c.bf16 %v19453_v39, %v19452_v51  ;;  %v9775_v28 = vpack.c.bf16 %v19455_v46, %v19454_v55  ;;  %v19492_v39 = vld [vmem:[#allocation964_spill] sm:$0xff] }
 0x76e   :  { %9728 = vmatpush3.bf16.msra.mxu1 %v9727_v56  ;;  %v19456_v56 = vld [vmem:[#allocation938_spill] sm:$0xff]  ;;  %v19494_v46 = vld [vmem:[#allocation916_spill] sm:$0xff] }
 0x76f   :  { %9760 = vmatpush3.bf16.msra.mxu0 %v9759_v40  ;;  %9730 = vmatprep.subr.bf16.mxu1 %v9729_v21  ;;  %v9807_v11 = vpack.c.bf16 %v19457_v42, %v19456_v56  ;;  %v19458_v40 = vld [vmem:[#allocation924_spill] sm:$0xff] }
 0x770   :  { %9762 = vmatprep.subr.bf16.mxu0 %v9761_v29  ;;  %v8132_v12 = vpop.f32.mrb[30].mxu1  ;;  %v9777_v34 = vpack.c.bf16 %v19459_v30, %v19458_v40  ;;  %v19460_v21 = vld [vmem:[#allocation956_spill] sm:$0xff]  ;;  %v5464_v29 = vcombine.high %v17421_v48, %v17421_v48  ;;  %v19498_v30 = vld [vmem:[#allocation934_spill] sm:$0xff] }
 0x771   :  { %v8167_v41 = vpop.f32.mrb[28].mxu0  ;;  %v8133_v37 = vpop.f32.mrb[31].mxu1  ;;  %v9809_v47 = vpack.c.bf16 %v19461_v49, %v19460_v21  ;;  %v19496_v42 = vld [vmem:[#allocation948_spill] sm:$0xff]  ;;  %v19500_v49 = vld [vmem:[#allocation966_spill] sm:$0xff] }
 0x772   :  { %v8168_v9 = vpop.f32.mrb[29].mxu0  ;;  %v8134_v13 = vadd.f32 %v8133_v37, %v8132_v12  ;;  %9732 = vmatpush3.bf16.msra.mxu1 %v9731_v0  ;;  %v9779_v0 = vpack.c.bf16 %v19463_v27, %v19462_v6  ;;  %v19473_v37 = vld [vmem:[#allocation943_spill] sm:$0xff] }
 0x773   :  { %v8169_v43 = vadd.f32 %v8168_v9, %v8167_v41  ;;  %9764 = vmatpush3.bf16.msra.mxu0 %v9763_v53  ;;  %9734 = vmatprep.subr.bf16.mxu1 %v9733_v32  ;;  %v9811_v53 = vpack.c.bf16 %v19465_v44, %v19464_v18  ;;  %v9781_v32 = vpack.c.bf16 %v19467_v20, %v19466_v62  ;;  %v19472_v41 = vld [vmem:[#allocation942_spill] sm:$0xff]  ;;  %v19503_v44 = vld [vmem:[#allocation919_spill] sm:$0xff] }
 0x774   :  { %9766 = vmatprep.subr.bf16.mxu0 %v9765_v16  ;;  %v6432_v58 = vadd.f32 %v8134_v13, %v17328_v25  ;;  %v17418_v25 = vrot.slane %v4227_v10, %v16364_v2  ;;  %v9813_v16 = vpack.c.bf16 %v19469_v50, %v19468_v3  ;;  %v9815_v9 = vpack.c.bf16 %v19473_v37, %v19472_v41  ;;  %v19476_v10 = vld [vmem:[#allocation960_spill] sm:$0xff]  ;;  %v19477_v13 = vld [vmem:[#allocation961_spill] sm:$0xff]  ;;  %v19502_v18 = vld [vmem:[#allocation918_spill] sm:$0xff] }
 0x775   :  { %v19505_v3 = vld [vmem:[#allocation951_spill] sm:$0xff]  ;;  %v19509_v41 = vld [vmem:[#allocation969_spill] sm:$0xff] }
 0x776   :  { %v17407_v23 = vadd.f32 %v8169_v43, %v6432_v58  ;;  %9736 = vmatpush3.bf16.msra.mxu1 %v9735_v7  ;;  %v5463_v2 = vcombine.high %v17418_v25, %v17418_v25  ;;  %v9785_v7 = vpack.c.bf16 %v19475_v4, %v19474_v38  ;;  %v9817_v43 = vpack.c.bf16 %v19477_v13, %v19476_v10  ;;  %v19484_v58 = vld [vmem:[#allocation962_spill] sm:$0xff]  ;;  %v19510_v4 = vld [vmem:[#allocation920_spill] sm:$0xff] }
 0x777   :  { %9768 = vmatpush3.bf16.msra.mxu0 %v9767_v36  ;;  %9738 = vmatprep.subr.bf16.mxu1 %v9737_v17  ;;  %v9787_v36 = vpack.c.bf16 %v19479_v60, %v19478_v19  ;;  %v9819_v17 = vpack.c.bf16 %v19481_v1, %v19480_v57  ;;  %v9821_v52 = vpack.c.bf16 %v19485_v24, %v19484_v58  ;;  %v19512_v13 = vld [vmem:[#allocation952_spill] sm:$0xff] }
 0x778   :  { %9770 = vmatprep.subr.bf16.mxu0 %v9769_v33  ;;  %v9789_v33 = vpack.c.bf16 %v19483_v22, %v19482_v59 }
 0x77a   :  { %9740 = vmatpush3.bf16.msra.mxu1 %v9739_v31  ;;  %v19487_v31 = vld [vmem:[#allocation915_spill] sm:$0xff] }
 0x77b   :  { %9772 = vmatpush3.bf16.msra.mxu0 %v9771_v8  ;;  %9774 = vmatprep.subr.bf16.mxu1 %v9773_v5  ;;  %v9791_v45 = vpack.c.bf16 %v19487_v31, %v19486_v35  ;;  %v19489_v8 = vld [vmem:[#allocation947_spill] sm:$0xff]  ;;  %v19491_v5 = vld [vmem:[#allocation933_spill] sm:$0xff] }
 0x77c   :  { %9806 = vmatprep.subr.bf16.mxu0 %v9805_v61  ;;  %v9823_v26 = vpack.c.bf16 %v19489_v8, %v19488_v63  ;;  %v9793_v51 = vpack.c.bf16 %v19491_v5, %v19490_v54  ;;  %v19493_v61 = vld [vmem:[#allocation965_spill] sm:$0xff] }
 0x77d   :  { %7410 = vmatmul.mubr.f32.vlgmr.msra.gmra.mrb[44].mxu1 %v17339_v14  ;;  %v19470_v14 = vld [vmem:[#allocation910_spill] sm:$0xff]  ;;  %v9825_v55 = vpack.c.bf16 %v19493_v61, %v19492_v39 }
 0x77e   :  { %7480 = vmatmul.mubr.f32.vlgmr.msra.gmra.mrb[42].mxu0 %v17342_v15  ;;  %9776 = vmatpush3.bf16.msra.mxu1 %v9775_v28  ;;  %v19471_v15 = vld [vmem:[#allocation911_spill] sm:$0xff]  ;;  %v19495_v28 = vld [vmem:[#allocation917_spill] sm:$0xff] }
 0x77f   :  { %9808 = vmatpush3.bf16.msra.mxu0 %v9807_v11  ;;  %9778 = vmatprep.subr.bf16.mxu1 %v9777_v34  ;;  %v9783_v12 = vpack.c.bf16 %v19471_v15, %v19470_v14  ;;  %v9795_v56 = vpack.c.bf16 %v19495_v28, %v19494_v46  ;;  %v19497_v11 = vld [vmem:[#allocation949_spill] sm:$0xff]  ;;  %v19499_v34 = vld [vmem:[#allocation935_spill] sm:$0xff] }
 0x780   :  { %9810 = vmatprep.subr.bf16.mxu0 %v9809_v47  ;;  %7549 = vmatprep.mubr.f32.mxu1 %v5463_v2  ;;  %v9827_v40 = vpack.c.bf16 %v19497_v11, %v19496_v42  ;;  %v9797_v21 = vpack.c.bf16 %v19499_v34, %v19498_v30  ;;  %v19501_v47 = vld [vmem:[#allocation967_spill] sm:$0xff]  ;;  %v19507_v14 = vld [vmem:[#allocation937_spill] sm:$0xff] }
 0x781   :  { %7619 = vmatprep.mubr.f32.mxu0 %v5464_v29  ;;  %v9829_v2 = vpack.c.bf16 %v19501_v47, %v19500_v49 }
 0x782   :  { %9780 = vmatpush3.bf16.msra.mxu1 %v9779_v0 }
 0x783   :  { %9812 = vmatpush3.bf16.msra.mxu0 %v9811_v53  ;;  %9782 = vmatprep.subr.bf16.mxu1 %v9781_v32  ;;  %v9799_v53 = vpack.c.bf16 %v19503_v44, %v19502_v18  ;;  %v19504_v32 = vld [vmem:[#allocation950_spill] sm:$0xff] }
 0x784   :  { %9814 = vmatprep.subr.bf16.mxu0 %v9813_v16  ;;  %v9831_v50 = vpack.c.bf16 %v19505_v3, %v19504_v32  ;;  %v19506_v16 = vld [vmem:[#allocation936_spill] sm:$0xff] }
 0x785   :  { %v9801_v15 = vpack.c.bf16 %v19507_v14, %v19506_v16 }
 0x786   :  { %9784 = vmatpush3.bf16.msra.mxu1 %v9783_v12  ;;  %v19508_v12 = vld [vmem:[#allocation968_spill] sm:$0xff] }
 0x787   :  { %9816 = vmatpush3.bf16.msra.mxu0 %v9815_v9  ;;  %9786 = vmatprep.subr.bf16.mxu1 %v9785_v7  ;;  %v9833_v37 = vpack.c.bf16 %v19509_v41, %v19508_v12  ;;  %v19511_v7 = vld [vmem:[#allocation921_spill] sm:$0xff] }
 0x788   :  { %9818 = vmatprep.subr.bf16.mxu0 %v9817_v43  ;;  %v9803_v10 = vpack.c.bf16 %v19511_v7, %v19510_v4  ;;  %v19513_v43 = vld [vmem:[#allocation953_spill] sm:$0xff] }
 0x789   :  { %v9835_v19 = vpack.c.bf16 %v19513_v43, %v19512_v13 }
 0x78a   :  { %9788 = vmatpush3.bf16.msra.mxu1 %v9787_v36 }
 0x78b   :  { %9820 = vmatpush3.bf16.msra.mxu0 %v9819_v17  ;;  %9790 = vmatprep.subr.bf16.mxu1 %v9789_v33 }
 0x78c   :  { %9822 = vmatprep.subr.bf16.mxu0 %v9821_v52 }
 0x78e   :  { %9792 = vmatpush3.bf16.msra.mxu1 %v9791_v45 }
 0x78f   :  { %9824 = vmatpush3.bf16.msra.mxu0 %v9823_v26  ;;  %9794 = vmatprep.subr.bf16.mxu1 %v9793_v51 }
 0x790   :  { %9826 = vmatprep.subr.bf16.mxu0 %v9825_v55  ;;  %v8202_v29 = vpop.f32.mrb[32].mxu1 }
 0x791   :  { %v8237_v6 = vpop.f32.mrb[30].mxu0  ;;  %v8203_v27 = vpop.f32.mrb[33].mxu1 }
 0x792   :  { %v8238_v0 = vpop.f32.mrb[31].mxu0  ;;  %v8204_v62 = vadd.f32 %v8203_v27, %v8202_v29  ;;  %9796 = vmatpush3.bf16.msra.mxu1 %v9795_v56 }
 0x793   :  { %v8239_v20 = vadd.f32 %v8238_v0, %v8237_v6  ;;  %9828 = vmatpush3.bf16.msra.mxu0 %v9827_v40  ;;  %9798 = vmatprep.subr.bf16.mxu1 %v9797_v21 }
 0x794   :  { %9830 = vmatprep.subr.bf16.mxu0 %v9829_v2  ;;  %v6572_v9 = vadd.f32 %v8204_v62, %v17407_v23 }
 0x796   :  { %v6642_v38 = vadd.f32 %v8239_v20, %v6572_v9  ;;  %9800 = vmatpush3.bf16.msra.mxu1 %v9799_v53  ;;  %v7673_v9 = vld [vmem:[%s17505_s7] ss:$0 sm:$0xff] }
 0x797   :  { %9832 = vmatpush3.bf16.msra.mxu0 %v9831_v50  ;;  %9802 = vmatprep.subr.bf16.mxu1 %v9801_v15 }
 0x798   :  { %9834 = vmatprep.subr.bf16.mxu0 %v9833_v37 }
 0x79a   :  { %9804 = vmatpush3.bf16.msra.mxu1 %v9803_v10  ;;  %v7674_v10 = vld [vmem:[#allocation7] ss:$0 sm:$0xff] }
 0x79b   :  { %9836 = vmatpush3.bf16.msra.mxu0 %v9835_v19 }
 0x79d   :  { %7550 = vmatmul.mubr.f32.vlgmr.msra.gmra.mrb[46].mxu1 %v17418_v25 }
 0x79e   :  { %7620 = vmatmul.mubr.f32.vlgmr.msra.gmra.mrb[44].mxu0 %v17421_v48 }
 0x7b0   :  { %v8272_v60 = vpop.f32.mrb[34].mxu1 }
 0x7b1   :  { %v8307_v36 = vpop.f32.mrb[32].mxu0  ;;  %v8273_v23 = vpop.f32.mrb[35].mxu1 }
 0x7b2   :  { %v8308_v57 = vpop.f32.mrb[33].mxu0  ;;  %v8274_v1 = vadd.f32 %v8273_v23, %v8272_v60 }
 0x7b3   :  { %v8309_v17 = vadd.f32 %v8308_v57, %v8307_v36 }
 0x7b4   :  { %v6712_v59 = vadd.f32 %v8274_v1, %v6642_v38 }
 0x7b6   :  { %v6782_v22 = vadd.f32 %v8309_v17, %v6712_v59 }
 0x7d0   :  { %v8342_v33 = vpop.f32.mrb[36].mxu1 }
 0x7d1   :  { %v8377_v58 = vpop.f32.mrb[34].mxu0  ;;  %v8343_v24 = vpop.f32.mrb[37].mxu1 }
 0x7d2   :  { %v8378_v52 = vpop.f32.mrb[35].mxu0  ;;  %v8344_v35 = vadd.f32 %v8343_v24, %v8342_v33 }
 0x7d3   :  { %v8379_v31 = vadd.f32 %v8378_v52, %v8377_v58 }
 0x7d4   :  { %v6852_v45 = vadd.f32 %v8344_v35, %v6782_v22 }
 0x7d6   :  { %v6922_v63 = vadd.f32 %v8379_v31, %v6852_v45 }
 0x7f0   :  { %v8412_v8 = vpop.f32.mrb[38].mxu1 }
 0x7f1   :  { %v8447_v25 = vpop.f32.mrb[36].mxu0  ;;  %v8413_v26 = vpop.f32.mrb[39].mxu1 }
 0x7f2   :  { %v8448_v48 = vpop.f32.mrb[37].mxu0  ;;  %v8414_v54 = vadd.f32 %v8413_v26, %v8412_v8 }
 0x7f3   :  { %v8449_v5 = vadd.f32 %v8448_v48, %v8447_v25 }
 0x7f4   :  { %v6992_v51 = vadd.f32 %v8414_v54, %v6922_v63 }
 0x7f6   :  { %v7062_v39 = vadd.f32 %v8449_v5, %v6992_v51 }
 0x810   :  { %v8482_v61 = vpop.f32.mrb[40].mxu1 }
 0x811   :  { %v8517_v55 = vpop.f32.mrb[38].mxu0  ;;  %v8483_v46 = vpop.f32.mrb[41].mxu1 }
 0x812   :  { %v8518_v28 = vpop.f32.mrb[39].mxu0  ;;  %v8484_v56 = vadd.f32 %v8483_v46, %v8482_v61 }
 0x813   :  { %v8519_v42 = vadd.f32 %v8518_v28, %v8517_v55 }
 0x814   :  { %v7132_v11 = vadd.f32 %v8484_v56, %v7062_v39 }
 0x816   :  { %v7202_v40 = vadd.f32 %v8519_v42, %v7132_v11 }
 0x830   :  { %v8552_v30 = vpop.f32.mrb[42].mxu1 }
 0x831   :  { %v8587_v34 = vpop.f32.mrb[40].mxu0  ;;  %v8553_v21 = vpop.f32.mrb[43].mxu1 }
 0x832   :  { %v8588_v49 = vpop.f32.mrb[41].mxu0  ;;  %v8554_v47 = vadd.f32 %v8553_v21, %v8552_v30 }
 0x833   :  { %v8589_v2 = vadd.f32 %v8588_v49, %v8587_v34 }
 0x834   :  { %v7272_v29 = vadd.f32 %v8554_v47, %v7202_v40 }
 0x836   :  { %v7342_v6 = vadd.f32 %v8589_v2, %v7272_v29 }
 0x850   :  { %v8622_v27 = vpop.f32.mrb[44].mxu1 }
 0x851   :  { %v8657_v0 = vpop.f32.mrb[42].mxu0  ;;  %v8623_v18 = vpop.f32.mrb[45].mxu1 }
 0x852   :  { %v8658_v44 = vpop.f32.mrb[43].mxu0  ;;  %v8624_v53 = vadd.f32 %v8623_v18, %v8622_v27 }
 0x853   :  { %v8659_v62 = vadd.f32 %v8658_v44, %v8657_v0 }
 0x854   :  { %v7412_v20 = vadd.f32 %v8624_v53, %v7342_v6 }
 0x856   :  { %v7482_v32 = vadd.f32 %v8659_v62, %v7412_v20 }
 0x870   :  { %v8692_v3 = vpop.f32.mrb[46].mxu1 }
 0x871   :  { %v8727_v50 = vpop.f32.mrb[44].mxu0  ;;  %v8693_v16 = vpop.f32.mrb[47].mxu1 }
 0x872   :  { %v8728_v14 = vpop.f32.mrb[45].mxu0  ;;  %v8694_v15 = vadd.f32 %v8693_v16, %v8692_v3 }
 0x873   :  { %v8729_v12 = vadd.f32 %v8728_v14, %v8727_v50 }
 0x874   :  { %v7552_v41 = vadd.f32 %v8694_v15, %v7482_v32 }
 0x876   :  { %v7622_v37 = vadd.f32 %v8729_v12, %v7552_v41 }
 0x878   :  { %v7625_v38 = vmax.f32 %v7622_v37, 0.0 }
 0x87a   :  { %v7633_v4 = vmul.f32 %v7673_v9, %v7625_v38 }
 0x87c   :  { %v7635_v7 = vsel %vm7634_vm9, %v7633_v4, 0.0 }
 0x87d   :  { %7636 = vadd.xlane.f32.xlu0 %v7635_v7 }
 0x90a   :  { %v7637_v13 = vpop.xlane.xlu0 %7636 }
 0x90b   :  { %v7645_v43 = vadd.f32 %v7674_v10, %v7637_v13 }
 0x90d   :  { %7647 = vst.msk [vmem:[%s17507_s9] sm:$0x3] %vm7646_vm13, %v7645_v43 }
 0x90e   :  { %7652 = vsyncmov [#allocation6] }
 0x911   :  { %s7653_s21 = vpop.sfrf %7652 }
 0x912   :  { %p7675_p0 = scmp.ne.s32.totalorder %s7653_s21, 0 }
 0x914   :  { %7657 = shalt.err (%p7675_p0)  }

</bundles_post_ra>
